<compile_context>
chip_gen: v6e
topology: v6e:2x2x1
jax: 0.10.0
libtpu: 0.0.40
codegen_flags: <defaults>
</compile_context>

<pallas_src>
import jax
import jax.numpy as jnp
from jax.experimental import pallas as pl
from jax.experimental.pallas import tpu as pltpu


# ---------------------------------------------------------------------------
# Layout constants
# ---------------------------------------------------------------------------
IMG = 28                   # input spatial size
XPAD = 800                 # padded flat input lanes (784 pixels + ones lane + pad)
ONE_LANE = IMG * IMG       # constant-1.0 lane (carries the conv1 bias)
C1 = 24                    # conv1 output spatial size (28 - 5 + 1)
L1C = 640                  # per-channel conv1 block width (dense 24-stride, 128-aligned)
NCOL1 = 4 * L1C            # conv1 Toeplitz matmul output width
L2D = 552                  # dilated pooled length per channel (valid 48*ph+2*pw <= 550)
LC = 144                   # compact pooled length per channel (12*12, dense)
NF = 1600                  # conv2 output features in PyTorch flatten order (16*10*10)
HID = 128                  # fc1 width
OUTW = 128                 # lane-dense padded fc2 / output width (first 10 are real)
BT_MAX = 128               # default batch tile (multiple of 8)


# ---------------------------------------------------------------------------
# Fused forward kernel (one grid step = one batch tile)
# ---------------------------------------------------------------------------
def _net_kernel(x_ref, t1_ref, p_ref, t2_ref, b2_ref, w3_ref, b3_ref,
                w4_ref, b4_ref, out_ref):
    # ---- Conv2d(1->4, k=5) + bias + ReLU as one Toeplitz matmul (MXU) -------
    # Output layout: 4 channel blocks of width L1C, dense 24-stride rows
    # (flat position 24*r + c).  The constant-1 input lane carries the bias.
    xb = x_ref[...].astype(jnp.bfloat16)                        # (bt, XPAD)
    h1 = jnp.dot(xb, t1_ref[...], preferred_element_type=jnp.float32)
    h1 = jnp.maximum(h1, 0.0)                                   # (bt, 4*L1C)

    # ---- MaxPool2d(2) (VPU) + lane compaction (MXU) + Conv2d(4->16, k=3) ----
    # conv2 is a Toeplitz matmul per input channel, accumulated in f32.
    h2 = None
    for ci in range(4):
        a = h1[:, ci * L1C:(ci + 1) * L1C]
        # pooled value at dilated position 48*ph + 2*pw = max of 4 shifted views
        pd = jnp.maximum(
            jnp.maximum(a[:, 0:L2D], a[:, 1:1 + L2D]),
            jnp.maximum(a[:, C1:C1 + L2D], a[:, C1 + 1:C1 + 1 + L2D]))
        # 0/1 permutation matmul: dilated (stride 48/2) -> dense 12x12 layout
        pc = jnp.dot(pd.astype(jnp.bfloat16), p_ref[...],
                     preferred_element_type=jnp.float32)        # (bt, LC)
        # conv2 Toeplitz matmul, columns already in PyTorch flatten order
        d = jnp.dot(pc.astype(jnp.bfloat16), t2_ref[ci],
                    preferred_element_type=jnp.float32)         # (bt, NF)
        h2 = d if h2 is None else h2 + d
    h2 = jnp.maximum(h2 + b2_ref[...], 0.0)                     # (bt, NF)

    # ---- Linear(1600->128) + ReLU (MXU) -------------------------------------
    h3 = jnp.dot(h2.astype(jnp.bfloat16), w3_ref[...],
                 preferred_element_type=jnp.float32) + b3_ref[...]
    h3 = jnp.maximum(h3, 0.0)                                   # (bt, HID)

    # ---- Linear(128->10) padded to 128 lanes + LogSoftmax -------------------
    logits = jnp.dot(h3.astype(jnp.bfloat16), w4_ref[...],
                     preferred_element_type=jnp.float32) + b4_ref[...]
    m = jnp.max(logits, axis=-1, keepdims=True)
    z = logits - m
    lse = jnp.log(jnp.sum(jnp.exp(z), axis=-1, keepdims=True))
    out_ref[...] = z - lse                                      # (bt, OUTW)


# ---------------------------------------------------------------------------
# Wrapper-side parameter re-layout (pure XLA, weights only)
# ---------------------------------------------------------------------------
def _build_tables(params):
    f32, bf16 = jnp.float32, jnp.bfloat16

    # conv1 -> Toeplitz matrix T1: (XPAD, 4*L1C)
    w1 = params["w1"].astype(f32)[:, 0]                         # (4, 5, 5)
    b1 = params["b1"].astype(f32)                               # (4,)
    oc = jnp.arange(4).reshape(4, 1, 1, 1, 1)
    rr = jnp.arange(C1).reshape(1, C1, 1, 1, 1)
    cc = jnp.arange(C1).reshape(1, 1, C1, 1, 1)
    ki = jnp.arange(5).reshape(1, 1, 1, 5, 1)
    kj = jnp.arange(5).reshape(1, 1, 1, 1, 5)
    s5 = (4, C1, C1, 5, 5)
    rows = jnp.broadcast_to(IMG * (rr + ki) + (cc + kj), s5).reshape(-1)
    cols = jnp.broadcast_to(oc * L1C + C1 * rr + cc, s5).reshape(-1)
    vals = jnp.broadcast_to(w1[oc, ki, kj], s5).reshape(-1)
    t1 = jnp.zeros((XPAD, NCOL1), f32).at[rows, cols].add(vals)
    # conv1 bias rides on the constant-1 input lane
    bias_cols = (jnp.arange(4)[:, None] * L1C
                 + jnp.arange(C1 * C1)[None, :]).reshape(-1)
    t1 = t1.at[jnp.full_like(bias_cols, ONE_LANE), bias_cols].add(
        jnp.repeat(b1, C1 * C1))
    t1 = t1.astype(bf16)

    # pooled-lane compaction: 0/1 permutation matrix (L2D, LC)
    ph = jnp.arange(12).reshape(12, 1)
    pw = jnp.arange(12).reshape(1, 12)
    prow = (2 * C1 * ph + 2 * pw).reshape(-1)
    pcol = (12 * ph + pw).reshape(-1)
    pmat = jnp.zeros((L2D, LC), f32).at[prow, pcol].set(1.0).astype(bf16)

    # conv2 -> per-input-channel Toeplitz matrices T2: (4, LC, NF)
    w2 = params["w2"].astype(f32)                               # (16, 4, 3, 3)
    co = jnp.arange(16).reshape(16, 1, 1, 1, 1, 1)
    ci = jnp.arange(4).reshape(1, 4, 1, 1, 1, 1)
    oh = jnp.arange(10).reshape(1, 1, 10, 1, 1, 1)
    ow = jnp.arange(10).reshape(1, 1, 1, 10, 1, 1)
    ki3 = jnp.arange(3).reshape(1, 1, 1, 1, 3, 1)
    kj3 = jnp.arange(3).reshape(1, 1, 1, 1, 1, 3)
    s6 = (16, 4, 10, 10, 3, 3)
    rows2 = jnp.broadcast_to(12 * (oh + ki3) + (ow + kj3), s6).reshape(-1)
    cols2 = jnp.broadcast_to(co * 100 + 10 * oh + ow, s6).reshape(-1)
    chans = jnp.broadcast_to(ci, s6).reshape(-1)
    vals2 = jnp.broadcast_to(w2[co, ci, ki3, kj3], s6).reshape(-1)
    t2 = jnp.zeros((4, LC, NF), f32).at[chans, rows2, cols2].add(vals2)
    t2 = t2.astype(bf16)

    b2row = jnp.repeat(params["b2"].astype(f32), 100).reshape(1, NF)

    w3t = params["w3"].T.astype(bf16)                           # (1600, 128)
    b3row = params["b3"].reshape(1, HID).astype(f32)

    # lane-dense fc2: pad to 128 columns; padded columns get a -1e30 bias so
    # they vanish in the 128-wide log-softmax
    w4p = jnp.zeros((HID, OUTW), f32).at[:, :10].set(
        params["w4"].T.astype(f32)).astype(bf16)
    b4p = jnp.full((1, OUTW), -1e30, f32).at[0, :10].set(
        params["b4"].astype(f32))

    return t1, pmat, t2, b2row, w3t, b3row, w4p, b4p


def net_forward(x, params, *, block_batch=BT_MAX):
    n = x.shape[0]
    bt = max(8, (min(block_batch, ((n + 7) // 8) * 8) // 8) * 8)
    padn = ((n + bt - 1) // bt) * bt

    # flat input: 784 pixels, lane 784 = 1.0 (conv1 bias), zero-padded
    xf = x.reshape(n, IMG * IMG).astype(jnp.float32)
    xf = jnp.pad(xf, ((0, padn - n), (0, XPAD - IMG * IMG)))
    xf = xf.at[:, ONE_LANE].set(1.0)

    t1, pmat, t2, b2row, w3t, b3row, w4p, b4p = _build_tables(params)

    vmem = pl.BlockSpec(memory_space=pltpu.MemorySpace.VMEM)
    out = pl.pallas_call(
        _net_kernel,
        out_shape=jax.ShapeDtypeStruct((padn, OUTW), jnp.float32),
        grid=(padn // bt,),
        in_specs=[
            pl.BlockSpec((bt, XPAD), lambda b: (b, 0)),         # pipelined input tiles
            vmem, vmem, vmem, vmem, vmem, vmem, vmem, vmem,     # resident weights
        ],
        out_specs=pl.BlockSpec((bt, OUTW), lambda b: (b, 0)),
        compiler_params=pltpu.CompilerParams(
            dimension_semantics=("parallel",),                  # megacore on v7x
            vmem_limit_bytes=48 * 1024 * 1024),
    )(xf, t1, pmat, t2, b2row, w3t, b3row, w4p, b4p)
    return out[:n, :10]


# ---------------------------------------------------------------------------
# Pure-JAX reference (for correctness check only)
# ---------------------------------------------------------------------------
def _reference_forward(x, params):
    y = jax.lax.conv_general_dilated(
        x, params["w1"], window_strides=(1, 1), padding="VALID",
        dimension_numbers=("NCHW", "OIHW", "NCHW"))
    y = jnp.maximum(y + params["b1"][None, :, None, None], 0.0)
    nb = y.shape[0]
    y = y.reshape(nb, 4, 12, 2, 12, 2).max(axis=(3, 5))        # MaxPool2d(2)
    y = jax.lax.conv_general_dilated(
        y, params["w2"], window_strides=(1, 1), padding="VALID",
        dimension_numbers=("NCHW", "OIHW", "NCHW"))
    y = jnp.maximum(y + params["b2"][None, :, None, None], 0.0)
    flat = y.reshape(nb, -1)
    h = jnp.maximum(flat @ params["w3"].T + params["b3"], 0.0)
    logits = h @ params["w4"].T + params["b4"]
    return jax.nn.log_softmax(logits, axis=-1)


# ---------------------------------------------------------------------------
# Deterministic synthetic parameters (shapes from the nn.Module)
# ---------------------------------------------------------------------------
def init_params(key):
    ks = jax.random.split(key, 8)

    def wn(k, shape, scale):
        return scale * jax.random.normal(k, shape, jnp.float32)

    return {
        "w1": wn(ks[0], (4, 1, 5, 5), 0.2),
        "b1": wn(ks[1], (4,), 0.1),
        "w2": wn(ks[2], (16, 4, 3, 3), 0.1),
        "b2": wn(ks[3], (16,), 0.1),
        "w3": wn(ks[4], (128, 1600), 0.02),
        "b3": wn(ks[5], (128,), 0.02),
        "w4": wn(ks[6], (10, 128), 0.05),
        "b4": wn(ks[7], (10,), 0.05),
    }


if __name__ == "__main__":
    # Input must be 28x28: Linear(in_features=10*10*16) pins the spatial size.
    kx, kp = jax.random.split(jax.random.PRNGKey(0))
    x = jax.random.normal(kx, (2, 1, 28, 28), jnp.float32)      # NCHW
    params = init_params(kp)

    out = jax.jit(net_forward)(x, params)
    out = jax.block_until_ready(out)

    assert out.shape == (2, 10), out.shape
    assert out.dtype == jnp.float32
    assert bool(jnp.all(jnp.isfinite(out)))
    # log-softmax rows must exponentiate to ~1
    row_sums = jnp.exp(out).sum(axis=1)
    assert bool(jnp.all(jnp.abs(row_sums - 1.0) < 1e-3)), row_sums
    # match the pure-JAX reference (bf16 MXU operands -> loose tolerance)
    ref = _reference_forward(x, params)
    err = float(jnp.max(jnp.abs(out - ref)))
    assert err < 3e-2, f"max |out - ref| = {err}"

    print("KERNEL_OK")
</pallas_src>

<mosaic_0001>
module attributes {stable_mosaic.version = 11 : i64} {
  func.func private @main(%arg0: i32) attributes {dimension_semantics = [#tpu.dimension_semantics<core_parallel>], iteration_bounds = array<i64: 2>, tpu.core_type = #tpu.core_type<sc_scalar_subcore>, window_params = []} {
    return
  }
}

module attributes {stable_mosaic.version = 11 : i64} {
  func.func private @main(%arg0: i32) attributes {dimension_semantics = [#tpu.dimension_semantics<core_parallel>], iteration_bounds = array<i64: 2>, tpu.core_type = #tpu.core_type<sc_scalar_subcore>, window_params = []} {
    return
  }
}

module attributes {stable_mosaic.version = 11 : i64} {
  func.func @_net_kernel(%arg0: i32, %arg1: memref<8x800xf32, #tpu.memory_space<vmem>>, %arg2: memref<800x2560xbf16, #tpu.memory_space<vmem>>, %arg3: memref<552x144xbf16, #tpu.memory_space<vmem>>, %arg4: memref<4x144x1600xbf16, #tpu.memory_space<vmem>>, %arg5: memref<1x1600xf32, #tpu.memory_space<vmem>>, %arg6: memref<1600x128xbf16, #tpu.memory_space<vmem>>, %arg7: memref<1x128xf32, #tpu.memory_space<vmem>>, %arg8: memref<128x128xbf16, #tpu.memory_space<vmem>>, %arg9: memref<1x128xf32, #tpu.memory_space<vmem>>, %arg10: memref<8x128xf32, #tpu.memory_space<vmem>>) attributes {dimension_semantics = [#tpu.dimension_semantics<parallel>], iteration_bounds = array<i64: 1>, scalar_prefetch = 0 : i64, scratch_operands = 0 : i64, tpu.core_type = #tpu.core_type<tc>, window_params = [{transform_indices = @transform_0, window_bounds = array<i64: 8, 800>}, {pipeline_mode = #tpu.pipeline_mode<synchronous>, transform_indices = @transform_1, window_bounds = array<i64: 800, 2560>}, {pipeline_mode = #tpu.pipeline_mode<synchronous>, transform_indices = @transform_2, window_bounds = array<i64: 552, 144>}, {pipeline_mode = #tpu.pipeline_mode<synchronous>, transform_indices = @transform_3, window_bounds = array<i64: 4, 144, 1600>}, {pipeline_mode = #tpu.pipeline_mode<synchronous>, transform_indices = @transform_4, window_bounds = array<i64: 1, 1600>}, {pipeline_mode = #tpu.pipeline_mode<synchronous>, transform_indices = @transform_5, window_bounds = array<i64: 1600, 128>}, {pipeline_mode = #tpu.pipeline_mode<synchronous>, transform_indices = @transform_6, window_bounds = array<i64: 1, 128>}, {pipeline_mode = #tpu.pipeline_mode<synchronous>, transform_indices = @transform_7, window_bounds = array<i64: 128, 128>}, {pipeline_mode = #tpu.pipeline_mode<synchronous>, transform_indices = @transform_8, window_bounds = array<i64: 1, 128>}, {transform_indices = @transform_9, window_bounds = array<i64: 8, 128>}]} {
    %c0 = arith.constant 0 : index
    %c0_0 = arith.constant 0 : index
    %0 = vector.load %arg1[%c0, %c0_0] : memref<8x800xf32, #tpu.memory_space<vmem>>, vector<8x800xf32>
    %1 = arith.truncf %0 : vector<8x800xf32> to vector<8x800xbf16>
    %c0_1 = arith.constant 0 : index
    %c0_2 = arith.constant 0 : index
    %2 = vector.load %arg2[%c0_1, %c0_2] : memref<800x2560xbf16, #tpu.memory_space<vmem>>, vector<800x2560xbf16>
    %cst = arith.constant dense<0.000000e+00> : vector<8x2560xf32>
    %3 = tpu.matmul %1, %2, %cst {dimension_numbers = #tpu.dot_dimension_numbers<[1], [0], [0], [1], [0, 0, 1, 1], [], []>} : vector<8x800xbf16>, vector<800x2560xbf16>, vector<8x2560xf32> -> vector<8x2560xf32>
    %cst_3 = arith.constant 0.000000e+00 : f32
    %4 = vector.broadcast %cst_3 : f32 to vector<8x2560xf32>
    %5 = arith.maximumf %3, %4 : vector<8x2560xf32>
    %6 = vector.extract_strided_slice %5 {offsets = [0, 0], sizes = [8, 640], strides = [1, 1]} : vector<8x2560xf32> to vector<8x640xf32>
    %7 = vector.extract_strided_slice %6 {offsets = [0, 0], sizes = [8, 552], strides = [1, 1]} : vector<8x640xf32> to vector<8x552xf32>
    %8 = vector.extract_strided_slice %6 {offsets = [0, 1], sizes = [8, 552], strides = [1, 1]} : vector<8x640xf32> to vector<8x552xf32>
    %9 = arith.maximumf %7, %8 : vector<8x552xf32>
    %10 = vector.extract_strided_slice %6 {offsets = [0, 24], sizes = [8, 552], strides = [1, 1]} : vector<8x640xf32> to vector<8x552xf32>
    %11 = vector.extract_strided_slice %6 {offsets = [0, 25], sizes = [8, 552], strides = [1, 1]} : vector<8x640xf32> to vector<8x552xf32>
    %12 = arith.maximumf %10, %11 : vector<8x552xf32>
    %13 = arith.maximumf %9, %12 : vector<8x552xf32>
    %14 = arith.truncf %13 : vector<8x552xf32> to vector<8x552xbf16>
    %c0_4 = arith.constant 0 : index
    %c0_5 = arith.constant 0 : index
    %15 = vector.load %arg3[%c0_4, %c0_5] : memref<552x144xbf16, #tpu.memory_space<vmem>>, vector<552x144xbf16>
    %cst_6 = arith.constant dense<0.000000e+00> : vector<8x144xf32>
    %16 = tpu.matmul %14, %15, %cst_6 {dimension_numbers = #tpu.dot_dimension_numbers<[1], [0], [0], [1], [0, 0, 1, 1], [], []>} : vector<8x552xbf16>, vector<552x144xbf16>, vector<8x144xf32> -> vector<8x144xf32>
    %17 = arith.truncf %16 : vector<8x144xf32> to vector<8x144xbf16>
    %c0_7 = arith.constant 0 : index
    %c0_8 = arith.constant 0 : index
    %c0_9 = arith.constant 0 : index
    %18 = vector.load %arg4[%c0_7, %c0_8, %c0_9] : memref<4x144x1600xbf16, #tpu.memory_space<vmem>>, vector<1x144x1600xbf16>
    %19 = vector.shape_cast %18 : vector<1x144x1600xbf16> to vector<144x1600xbf16>
    %cst_10 = arith.constant dense<0.000000e+00> : vector<8x1600xf32>
    %20 = tpu.matmul %17, %19, %cst_10 {dimension_numbers = #tpu.dot_dimension_numbers<[1], [0], [0], [1], [0, 0, 1, 1], [], []>} : vector<8x144xbf16>, vector<144x1600xbf16>, vector<8x1600xf32> -> vector<8x1600xf32>
    %21 = vector.extract_strided_slice %5 {offsets = [0, 640], sizes = [8, 640], strides = [1, 1]} : vector<8x2560xf32> to vector<8x640xf32>
    %22 = vector.extract_strided_slice %21 {offsets = [0, 0], sizes = [8, 552], strides = [1, 1]} : vector<8x640xf32> to vector<8x552xf32>
    %23 = vector.extract_strided_slice %21 {offsets = [0, 1], sizes = [8, 552], strides = [1, 1]} : vector<8x640xf32> to vector<8x552xf32>
    %24 = arith.maximumf %22, %23 : vector<8x552xf32>
    %25 = vector.extract_strided_slice %21 {offsets = [0, 24], sizes = [8, 552], strides = [1, 1]} : vector<8x640xf32> to vector<8x552xf32>
    %26 = vector.extract_strided_slice %21 {offsets = [0, 25], sizes = [8, 552], strides = [1, 1]} : vector<8x640xf32> to vector<8x552xf32>
    %27 = arith.maximumf %25, %26 : vector<8x552xf32>
    %28 = arith.maximumf %24, %27 : vector<8x552xf32>
    %29 = arith.truncf %28 : vector<8x552xf32> to vector<8x552xbf16>
    %c0_11 = arith.constant 0 : index
    %c0_12 = arith.constant 0 : index
    %30 = vector.load %arg3[%c0_11, %c0_12] : memref<552x144xbf16, #tpu.memory_space<vmem>>, vector<552x144xbf16>
    %cst_13 = arith.constant dense<0.000000e+00> : vector<8x144xf32>
    %31 = tpu.matmul %29, %30, %cst_13 {dimension_numbers = #tpu.dot_dimension_numbers<[1], [0], [0], [1], [0, 0, 1, 1], [], []>} : vector<8x552xbf16>, vector<552x144xbf16>, vector<8x144xf32> -> vector<8x144xf32>
    %32 = arith.truncf %31 : vector<8x144xf32> to vector<8x144xbf16>
    %c1 = arith.constant 1 : index
    %c0_14 = arith.constant 0 : index
    %c0_15 = arith.constant 0 : index
    %33 = vector.load %arg4[%c1, %c0_14, %c0_15] : memref<4x144x1600xbf16, #tpu.memory_space<vmem>>, vector<1x144x1600xbf16>
    %34 = vector.shape_cast %33 : vector<1x144x1600xbf16> to vector<144x1600xbf16>
    %cst_16 = arith.constant dense<0.000000e+00> : vector<8x1600xf32>
    %35 = tpu.matmul %32, %34, %cst_16 {dimension_numbers = #tpu.dot_dimension_numbers<[1], [0], [0], [1], [0, 0, 1, 1], [], []>} : vector<8x144xbf16>, vector<144x1600xbf16>, vector<8x1600xf32> -> vector<8x1600xf32>
    %36 = arith.addf %20, %35 : vector<8x1600xf32>
    %37 = vector.extract_strided_slice %5 {offsets = [0, 1280], sizes = [8, 640], strides = [1, 1]} : vector<8x2560xf32> to vector<8x640xf32>
    %38 = vector.extract_strided_slice %37 {offsets = [0, 0], sizes = [8, 552], strides = [1, 1]} : vector<8x640xf32> to vector<8x552xf32>
    %39 = vector.extract_strided_slice %37 {offsets = [0, 1], sizes = [8, 552], strides = [1, 1]} : vector<8x640xf32> to vector<8x552xf32>
    %40 = arith.maximumf %38, %39 : vector<8x552xf32>
    %41 = vector.extract_strided_slice %37 {offsets = [0, 24], sizes = [8, 552], strides = [1, 1]} : vector<8x640xf32> to vector<8x552xf32>
    %42 = vector.extract_strided_slice %37 {offsets = [0, 25], sizes = [8, 552], strides = [1, 1]} : vector<8x640xf32> to vector<8x552xf32>
    %43 = arith.maximumf %41, %42 : vector<8x552xf32>
    %44 = arith.maximumf %40, %43 : vector<8x552xf32>
    %45 = arith.truncf %44 : vector<8x552xf32> to vector<8x552xbf16>
    %c0_17 = arith.constant 0 : index
    %c0_18 = arith.constant 0 : index
    %46 = vector.load %arg3[%c0_17, %c0_18] : memref<552x144xbf16, #tpu.memory_space<vmem>>, vector<552x144xbf16>
    %cst_19 = arith.constant dense<0.000000e+00> : vector<8x144xf32>
    %47 = tpu.matmul %45, %46, %cst_19 {dimension_numbers = #tpu.dot_dimension_numbers<[1], [0], [0], [1], [0, 0, 1, 1], [], []>} : vector<8x552xbf16>, vector<552x144xbf16>, vector<8x144xf32> -> vector<8x144xf32>
    %48 = arith.truncf %47 : vector<8x144xf32> to vector<8x144xbf16>
    %c2 = arith.constant 2 : index
    %c0_20 = arith.constant 0 : index
    %c0_21 = arith.constant 0 : index
    %49 = vector.load %arg4[%c2, %c0_20, %c0_21] : memref<4x144x1600xbf16, #tpu.memory_space<vmem>>, vector<1x144x1600xbf16>
    %50 = vector.shape_cast %49 : vector<1x144x1600xbf16> to vector<144x1600xbf16>
    %cst_22 = arith.constant dense<0.000000e+00> : vector<8x1600xf32>
    %51 = tpu.matmul %48, %50, %cst_22 {dimension_numbers = #tpu.dot_dimension_numbers<[1], [0], [0], [1], [0, 0, 1, 1], [], []>} : vector<8x144xbf16>, vector<144x1600xbf16>, vector<8x1600xf32> -> vector<8x1600xf32>
    %52 = arith.addf %36, %51 : vector<8x1600xf32>
    %53 = vector.extract_strided_slice %5 {offsets = [0, 1920], sizes = [8, 640], strides = [1, 1]} : vector<8x2560xf32> to vector<8x640xf32>
    %54 = vector.extract_strided_slice %53 {offsets = [0, 0], sizes = [8, 552], strides = [1, 1]} : vector<8x640xf32> to vector<8x552xf32>
    %55 = vector.extract_strided_slice %53 {offsets = [0, 1], sizes = [8, 552], strides = [1, 1]} : vector<8x640xf32> to vector<8x552xf32>
    %56 = arith.maximumf %54, %55 : vector<8x552xf32>
    %57 = vector.extract_strided_slice %53 {offsets = [0, 24], sizes = [8, 552], strides = [1, 1]} : vector<8x640xf32> to vector<8x552xf32>
    %58 = vector.extract_strided_slice %53 {offsets = [0, 25], sizes = [8, 552], strides = [1, 1]} : vector<8x640xf32> to vector<8x552xf32>
    %59 = arith.maximumf %57, %58 : vector<8x552xf32>
    %60 = arith.maximumf %56, %59 : vector<8x552xf32>
    %61 = arith.truncf %60 : vector<8x552xf32> to vector<8x552xbf16>
    %c0_23 = arith.constant 0 : index
    %c0_24 = arith.constant 0 : index
    %62 = vector.load %arg3[%c0_23, %c0_24] : memref<552x144xbf16, #tpu.memory_space<vmem>>, vector<552x144xbf16>
    %cst_25 = arith.constant dense<0.000000e+00> : vector<8x144xf32>
    %63 = tpu.matmul %61, %62, %cst_25 {dimension_numbers = #tpu.dot_dimension_numbers<[1], [0], [0], [1], [0, 0, 1, 1], [], []>} : vector<8x552xbf16>, vector<552x144xbf16>, vector<8x144xf32> -> vector<8x144xf32>
    %64 = arith.truncf %63 : vector<8x144xf32> to vector<8x144xbf16>
    %c3 = arith.constant 3 : index
    %c0_26 = arith.constant 0 : index
    %c0_27 = arith.constant 0 : index
    %65 = vector.load %arg4[%c3, %c0_26, %c0_27] : memref<4x144x1600xbf16, #tpu.memory_space<vmem>>, vector<1x144x1600xbf16>
    %66 = vector.shape_cast %65 : vector<1x144x1600xbf16> to vector<144x1600xbf16>
    %cst_28 = arith.constant dense<0.000000e+00> : vector<8x1600xf32>
    %67 = tpu.matmul %64, %66, %cst_28 {dimension_numbers = #tpu.dot_dimension_numbers<[1], [0], [0], [1], [0, 0, 1, 1], [], []>} : vector<8x144xbf16>, vector<144x1600xbf16>, vector<8x1600xf32> -> vector<8x1600xf32>
    %68 = arith.addf %52, %67 : vector<8x1600xf32>
    %c0_29 = arith.constant 0 : index
    %c0_30 = arith.constant 0 : index
    %69 = vector.load %arg5[%c0_29, %c0_30] : memref<1x1600xf32, #tpu.memory_space<vmem>>, vector<1x1600xf32>
    %70 = vector.broadcast %69 : vector<1x1600xf32> to vector<8x1600xf32>
    %71 = arith.addf %68, %70 : vector<8x1600xf32>
    %cst_31 = arith.constant 0.000000e+00 : f32
    %72 = vector.broadcast %cst_31 : f32 to vector<8x1600xf32>
    %73 = arith.maximumf %71, %72 : vector<8x1600xf32>
    %74 = arith.truncf %73 : vector<8x1600xf32> to vector<8x1600xbf16>
    %c0_32 = arith.constant 0 : index
    %c0_33 = arith.constant 0 : index
    %75 = vector.load %arg6[%c0_32, %c0_33] : memref<1600x128xbf16, #tpu.memory_space<vmem>>, vector<1600x128xbf16>
    %cst_34 = arith.constant dense<0.000000e+00> : vector<8x128xf32>
    %76 = tpu.matmul %74, %75, %cst_34 {dimension_numbers = #tpu.dot_dimension_numbers<[1], [0], [0], [1], [0, 0, 1, 1], [], []>} : vector<8x1600xbf16>, vector<1600x128xbf16>, vector<8x128xf32> -> vector<8x128xf32>
    %c0_35 = arith.constant 0 : index
    %c0_36 = arith.constant 0 : index
    %77 = vector.load %arg7[%c0_35, %c0_36] : memref<1x128xf32, #tpu.memory_space<vmem>>, vector<1x128xf32>
    %78 = vector.broadcast %77 : vector<1x128xf32> to vector<8x128xf32>
    %79 = arith.addf %76, %78 : vector<8x128xf32>
    %cst_37 = arith.constant 0.000000e+00 : f32
    %80 = vector.broadcast %cst_37 : f32 to vector<8x128xf32>
    %81 = arith.maximumf %79, %80 : vector<8x128xf32>
    %82 = arith.truncf %81 : vector<8x128xf32> to vector<8x128xbf16>
    %c0_38 = arith.constant 0 : index
    %c0_39 = arith.constant 0 : index
    %83 = vector.load %arg8[%c0_38, %c0_39] : memref<128x128xbf16, #tpu.memory_space<vmem>>, vector<128x128xbf16>
    %cst_40 = arith.constant dense<0.000000e+00> : vector<8x128xf32>
    %84 = tpu.matmul %82, %83, %cst_40 {dimension_numbers = #tpu.dot_dimension_numbers<[1], [0], [0], [1], [0, 0, 1, 1], [], []>} : vector<8x128xbf16>, vector<128x128xbf16>, vector<8x128xf32> -> vector<8x128xf32>
    %c0_41 = arith.constant 0 : index
    %c0_42 = arith.constant 0 : index
    %85 = vector.load %arg9[%c0_41, %c0_42] : memref<1x128xf32, #tpu.memory_space<vmem>>, vector<1x128xf32>
    %86 = vector.broadcast %85 : vector<1x128xf32> to vector<8x128xf32>
    %87 = arith.addf %84, %86 : vector<8x128xf32>
    %cst_43 = arith.constant dense<0xFF800000> : vector<8xf32>
    %88 = vector.multi_reduction <maximumf>, %87, %cst_43 [1] : vector<8x128xf32> to vector<8xf32>
    %89 = vector.shape_cast %88 : vector<8xf32> to vector<8x1xf32>
    %90 = vector.broadcast %89 : vector<8x1xf32> to vector<8x128xf32>
    %91 = arith.subf %87, %90 : vector<8x128xf32>
    %92 = math.exp %91 : vector<8x128xf32>
    %cst_44 = arith.constant dense<0.000000e+00> : vector<8xf32>
    %93 = vector.multi_reduction <add>, %92, %cst_44 [1] : vector<8x128xf32> to vector<8xf32>
    %94 = vector.shape_cast %93 : vector<8xf32> to vector<8x1xf32>
    %95 = math.log %94 : vector<8x1xf32>
    %96 = vector.broadcast %95 : vector<8x1xf32> to vector<8x128xf32>
    %97 = arith.subf %91, %96 : vector<8x128xf32>
    %c0_45 = arith.constant 0 : index
    %c0_46 = arith.constant 0 : index
    %98 = vector.load %arg10[%c0_45, %c0_46] : memref<8x128xf32, #tpu.memory_space<vmem>>, vector<8x128xf32>
    tpu.vector_store %arg10[%c0_45, %c0_46], %97 {strides = array<i32>} : memref<8x128xf32, #tpu.memory_space<vmem>>, vector<8x128xf32>,
    return
  }
  func.func @transform_0(%arg0: i32) -> (i32, i32) {
    %c0_i32 = arith.constant 0 : i32
    %c0_i32_0 = arith.constant 0 : i32
    return %arg0, %c0_i32 : i32, i32
  }
  func.func @transform_1(%arg0: i32) -> (i32, i32) {
    %c0_i32 = arith.constant 0 : i32
    %c0_i32_0 = arith.constant 0 : i32
    %c0_i32_1 = arith.constant 0 : i32
    return %c0_i32, %c0_i32_0 : i32, i32
  }
  func.func @transform_2(%arg0: i32) -> (i32, i32) {
    %c0_i32 = arith.constant 0 : i32
    %c0_i32_0 = arith.constant 0 : i32
    %c0_i32_1 = arith.constant 0 : i32
    return %c0_i32, %c0_i32_0 : i32, i32
  }
  func.func @transform_3(%arg0: i32) -> (i32, i32, i32) {
    %c0_i32 = arith.constant 0 : i32
    %c0_i32_0 = arith.constant 0 : i32
    %c0_i32_1 = arith.constant 0 : i32
    %c0_i32_2 = arith.constant 0 : i32
    return %c0_i32, %c0_i32_0, %c0_i32_1 : i32, i32, i32
  }
  func.func @transform_4(%arg0: i32) -> (i32, i32) {
    %c0_i32 = arith.constant 0 : i32
    %c0_i32_0 = arith.constant 0 : i32
    %c0_i32_1 = arith.constant 0 : i32
    return %c0_i32, %c0_i32_0 : i32, i32
  }
  func.func @transform_5(%arg0: i32) -> (i32, i32) {
    %c0_i32 = arith.constant 0 : i32
    %c0_i32_0 = arith.constant 0 : i32
    %c0_i32_1 = arith.constant 0 : i32
    return %c0_i32, %c0_i32_0 : i32, i32
  }
  func.func @transform_6(%arg0: i32) -> (i32, i32) {
    %c0_i32 = arith.constant 0 : i32
    %c0_i32_0 = arith.constant 0 : i32
    %c0_i32_1 = arith.constant 0 : i32
    return %c0_i32, %c0_i32_0 : i32, i32
  }
  func.func @transform_7(%arg0: i32) -> (i32, i32) {
    %c0_i32 = arith.constant 0 : i32
    %c0_i32_0 = arith.constant 0 : i32
    %c0_i32_1 = arith.constant 0 : i32
    return %c0_i32, %c0_i32_0 : i32, i32
  }
  func.func @transform_8(%arg0: i32) -> (i32, i32) {
    %c0_i32 = arith.constant 0 : i32
    %c0_i32_0 = arith.constant 0 : i32
    %c0_i32_1 = arith.constant 0 : i32
    return %c0_i32, %c0_i32_0 : i32, i32
  }
  func.func @transform_9(%arg0: i32) -> (i32, i32) {
    %c0_i32 = arith.constant 0 : i32
    %c0_i32_0 = arith.constant 0 : i32
    return %arg0, %c0_i32 : i32, i32
  }
}

</mosaic_0001>

<bundles_post_ra>
// kernel: net_forward.1
= control target key start
LH: loop header
LB: loop body
LE: loop exit
PB: predicated region body
PF: predicated region fallthrough
CT: control target
= control target key end

     0   :  { %vm6047_vm0 = vcmask 261120   ;;  %s19092_s17 = smov 127   ;;  %vm7726_vm1 = vcmask 1039360   ;;  %s19093_s15 = smov 104   ;;  %vm7756_vm2 = vcmask 850944   ;;  %vm8194_vm3 = vcmask 1043456   ;;  %s25815_s1 = inlined_call_operand.vmem [shape: bf16[800,2560], index: 1, kind: input, shape index: {}]   ;;  %s25816_s0 = inlined_call_operand.vmem [shape: f32[8,800], index: 0, kind: input, shape index: {}]   ;;  %s25817_s2 = inlined_call_operand.vmem [shape: bf16[552,144], index: 2, kind: input, shape index: {}]   ;;  %s25818_s3 = inlined_call_operand.vmem [shape: bf16[4,144,1600], index: 3, kind: input, shape index: {}]   ;;  %s25819_s5 = inlined_call_operand.vmem [shape: bf16[1600,128], index: 5, kind: input, shape index: {}]   ;;  %s25820_s4 = inlined_call_operand.vmem [shape: f32[1,1600], index: 4, kind: input, shape index: {}]   ;;  %s25821_s7 = inlined_call_operand.vmem [shape: bf16[128,128], index: 7, kind: input, shape index: {}]   ;;  %s25822_s6 = inlined_call_operand.vmem [shape: f32[1,128], index: 6, kind: input, shape index: {}]   ;;  %s25823_s8 = inlined_call_operand.vmem [shape: f32[1,128], index: 8, kind: input, shape index: {}]   ;;  %s25824_s9 = inlined_call_operand.vmem [shape: f32[8,128], index: 9, kind: output, shape index: {}]  }
   0x1   :  { %v16623_v0 = vld [vmem:[%s25815_s1 + $0x464] ss:$80 sps:$4 sm:$0xff]   ;;  %v16627_v2 = vld [vmem:[%s25815_s1 + $0x460] ss:$80 sps:$4 sm:$0xff]   ;;  %v34_v46 = vld [vmem:[%s25816_s0 + $0x8] sm:$0xff]  ;;  %vm8190_vm4 = vcmask 326656  }
   0x2   :  { %v16625_v1 = vld [vmem:[%s25815_s1 + $0xe64] ss:$80 sps:$4 sm:$0xff]   ;;  %6051 = vmatprep.subr.bf16.mxu0 %v16623_v0  ;;  %v16628_v3 = vld [vmem:[%s25815_s1 + $0xe60] ss:$80 sps:$4 sm:$0xff]   ;;  %v19293_v49 = vpack.c.bf16 %v34_v46, %v34_v46  ;;  %v36_v50 = vld [vmem:[%s25816_s0 + $0x18] sm:$0xff]  ;;  %vm9364_vm5 = vcmask 130048  }
   0x3   :  { %6092 = vmatprep.subr.bf16.mxu1 %v16625_v1  ;;  %v16629_v4 = vld [vmem:[%s25815_s1 + $0x3c4] ss:$80 sps:$4 sm:$0xff]   ;;  %6052 = vmatpush1.bf16.msra.mxu0 %v16627_v2  ;;  %v16633_v6 = vld [vmem:[%s25815_s1 + $0x3c0] ss:$80 sps:$4 sm:$0xff]   ;;  %v19301_v52 = vpack.c.bf16 %v36_v50, %v36_v50  ;;  %v16772_v46 = vld [vmem:[%s25815_s1 + $0xac] ss:$80 sps:$4 sm:$0xff]  }
   0x4   :  { %6093 = vmatpush1.bf16.msra.mxu1 %v16628_v3  ;;  %v16631_v5 = vld [vmem:[%s25815_s1 + $0xdc4] ss:$80 sps:$4 sm:$0xff]   ;;  %6053 = vmatprep.subr.bf16.mxu0 %v16629_v4  ;;  %v16634_v7 = vld [vmem:[%s25815_s1 + $0xdc0] ss:$80 sps:$4 sm:$0xff]   ;;  %vm19095_vm6 = vmmov 0   ;;  %vm13880_vm7 = vcmask 523264  }
   0x5   :  { %6094 = vmatprep.subr.bf16.mxu1 %v16631_v5  ;;  %v16635_v8 = vld [vmem:[%s25815_s1 + $0x324] ss:$80 sps:$4 sm:$0xff]   ;;  %v16639_v10 = vld [vmem:[%s25815_s1 + $0x320] ss:$80 sps:$4 sm:$0xff]   ;;  %6083 = vmatprep.mubr.bf16.mxu0 %v19293_v49 }
   0x6   :  { %v16637_v9 = vld [vmem:[%s25815_s1 + $0xd24] ss:$80 sps:$4 sm:$0xff]   ;;  %v16640_v11 = vld [vmem:[%s25815_s1 + $0xd20] ss:$80 sps:$4 sm:$0xff]   ;;  %6124 = vmatprep.mubr.bf16.mxu1 %v19301_v52 }
   0x7   :  { %6054 = vmatpush1.bf16.msra.mxu0 %v16633_v6  ;;  %v16641_v12 = vld [vmem:[%s25815_s1 + $0x284] ss:$80 sps:$4 sm:$0xff]   ;;  %v16645_v14 = vld [vmem:[%s25815_s1 + $0x280] ss:$80 sps:$4 sm:$0xff]  }
   0x8   :  { %6095 = vmatpush1.bf16.msra.mxu1 %v16634_v7  ;;  %6055 = vmatprep.subr.bf16.mxu0 %v16635_v8  ;;  %v16643_v13 = vld [vmem:[%s25815_s1 + $0xc84] ss:$80 sps:$4 sm:$0xff]   ;;  %v16646_v15 = vld [vmem:[%s25815_s1 + $0xc80] ss:$80 sps:$4 sm:$0xff]  }
   0x9   :  { %6096 = vmatprep.subr.bf16.mxu1 %v16637_v9  ;;  %v16647_v16 = vld [vmem:[%s25815_s1 + $0x1e4] ss:$80 sps:$4 sm:$0xff]   ;;  %v16651_v18 = vld [vmem:[%s25815_s1 + $0x1e0] ss:$80 sps:$4 sm:$0xff]  }
   0xa   :  { %v16649_v17 = vld [vmem:[%s25815_s1 + $0xbe4] ss:$80 sps:$4 sm:$0xff]   ;;  %v16652_v19 = vld [vmem:[%s25815_s1 + $0xbe0] ss:$80 sps:$4 sm:$0xff]  }
   0xb   :  { %6056 = vmatpush1.bf16.msra.mxu0 %v16639_v10  ;;  %v16653_v20 = vld [vmem:[%s25815_s1 + $0x144] ss:$80 sps:$4 sm:$0xff]   ;;  %v16657_v22 = vld [vmem:[%s25815_s1 + $0x140] ss:$80 sps:$4 sm:$0xff]  }
   0xc   :  { %6097 = vmatpush1.bf16.msra.mxu1 %v16640_v11  ;;  %6057 = vmatprep.subr.bf16.mxu0 %v16641_v12  ;;  %v16655_v21 = vld [vmem:[%s25815_s1 + $0xb44] ss:$80 sps:$4 sm:$0xff]   ;;  %v16658_v23 = vld [vmem:[%s25815_s1 + $0xb40] ss:$80 sps:$4 sm:$0xff]  }
   0xd   :  { %6098 = vmatprep.subr.bf16.mxu1 %v16643_v13  ;;  %v16659_v24 = vld [vmem:[%s25815_s1 + $0xa4] ss:$80 sps:$4 sm:$0xff]   ;;  %v16663_v26 = vld [vmem:[%s25815_s1 + $0xa0] ss:$80 sps:$4 sm:$0xff]  }
   0xe   :  { %v16661_v25 = vld [vmem:[%s25815_s1 + $0xaa4] ss:$80 sps:$4 sm:$0xff]   ;;  %v16664_v27 = vld [vmem:[%s25815_s1 + $0xaa0] ss:$80 sps:$4 sm:$0xff]  }
   0xf   :  { %6058 = vmatpush1.bf16.msra.mxu0 %v16645_v14  ;;  %v16665_v28 = vld [vmem:[%s25815_s1 + $0x4] ss:$80 sps:$4 sm:$0xff]   ;;  %v16669_v30 = vld [vmem:[%s25815_s1] ss:$80 sps:$4 sm:$0xff]  }
  0x10   :  { %6099 = vmatpush1.bf16.msra.mxu1 %v16646_v15  ;;  %6059 = vmatprep.subr.bf16.mxu0 %v16647_v16  ;;  %v16667_v29 = vld [vmem:[%s25815_s1 + $0xa04] ss:$80 sps:$4 sm:$0xff]   ;;  %v16670_v31 = vld [vmem:[%s25815_s1 + $0xa00] ss:$80 sps:$4 sm:$0xff]  }
  0x11   :  { %6100 = vmatprep.subr.bf16.mxu1 %v16649_v17  ;;  %v16671_v32 = vld [vmem:[%s25815_s1 + $0x964] ss:$80 sps:$4 sm:$0xff]   ;;  %v16675_v34 = vld [vmem:[%s25815_s1 + $0x960] ss:$80 sps:$4 sm:$0xff]  }
  0x12   :  { %v16673_v33 = vld [vmem:[%s25815_s1 + $0x1364] ss:$80 sps:$4 sm:$0xff]   ;;  %v16676_v35 = vld [vmem:[%s25815_s1 + $0x1360] ss:$80 sps:$4 sm:$0xff]  }
  0x13   :  { %6060 = vmatpush1.bf16.msra.mxu0 %v16651_v18  ;;  %v16677_v36 = vld [vmem:[%s25815_s1 + $0x8c4] ss:$80 sps:$4 sm:$0xff]   ;;  %v16681_v38 = vld [vmem:[%s25815_s1 + $0x8c0] ss:$80 sps:$4 sm:$0xff]   ;;  %v16736_v18 = vld [vmem:[%s25815_s1 + $0x46c] ss:$80 sps:$4 sm:$0xff]  }
  0x14   :  { %6101 = vmatpush1.bf16.msra.mxu1 %v16652_v19  ;;  %6061 = vmatprep.subr.bf16.mxu0 %v16653_v20  ;;  %v16679_v37 = vld [vmem:[%s25815_s1 + $0x12c4] ss:$80 sps:$4 sm:$0xff]   ;;  %v16682_v39 = vld [vmem:[%s25815_s1 + $0x12c0] ss:$80 sps:$4 sm:$0xff]   ;;  %v25827_v19 = vmov 0  }
  0x15   :  { %6102 = vmatprep.subr.bf16.mxu1 %v16655_v21  ;;  %v16683_v40 = vld [vmem:[%s25815_s1 + $0x824] ss:$80 sps:$4 sm:$0xff]   ;;  %v16687_v42 = vld [vmem:[%s25815_s1 + $0x820] ss:$80 sps:$4 sm:$0xff]  }
  0x16   :  { %v16685_v41 = vld [vmem:[%s25815_s1 + $0x1224] ss:$80 sps:$4 sm:$0xff]   ;;  %v16688_v43 = vld [vmem:[%s25815_s1 + $0x1220] ss:$80 sps:$4 sm:$0xff]  }
  0x17   :  { %6062 = vmatpush1.bf16.msra.mxu0 %v16657_v22  ;;  %v16689_v44 = vld [vmem:[%s25815_s1 + $0x784] ss:$80 sps:$4 sm:$0xff]   ;;  %v16693_v47 = vld [vmem:[%s25815_s1 + $0x780] ss:$80 sps:$4 sm:$0xff]   ;;  %v16734_v22 = vld [vmem:[%s25815_s1 + $0x468] ss:$80 sps:$4 sm:$0xff]  }
  0x18   :  { %6103 = vmatpush1.bf16.msra.mxu1 %v16658_v23  ;;  %6063 = vmatprep.subr.bf16.mxu0 %v16659_v24  ;;  %v16691_v45 = vld [vmem:[%s25815_s1 + $0x1184] ss:$80 sps:$4 sm:$0xff]   ;;  %v16694_v48 = vld [vmem:[%s25815_s1 + $0x1180] ss:$80 sps:$4 sm:$0xff]   ;;  %v16742_v24 = vld [vmem:[%s25815_s1 + $0x3cc] ss:$80 sps:$4 sm:$0xff]  }
  0x19   :  { %6104 = vmatprep.subr.bf16.mxu1 %v16661_v25  ;;  %v16695_v51 = vld [vmem:[%s25815_s1 + $0x6e4] ss:$80 sps:$4 sm:$0xff]   ;;  %v16699_v54 = vld [vmem:[%s25815_s1 + $0x6e0] ss:$80 sps:$4 sm:$0xff]  }
  0x1a   :  { %v16697_v53 = vld [vmem:[%s25815_s1 + $0x10e4] ss:$80 sps:$4 sm:$0xff]   ;;  %v16700_v55 = vld [vmem:[%s25815_s1 + $0x10e0] ss:$80 sps:$4 sm:$0xff]  }
  0x1b   :  { %6064 = vmatpush1.bf16.msra.mxu0 %v16663_v26  ;;  %v16701_v56 = vld [vmem:[%s25815_s1 + $0x644] ss:$80 sps:$4 sm:$0xff]   ;;  %v16705_v58 = vld [vmem:[%s25815_s1 + $0x640] ss:$80 sps:$4 sm:$0xff]   ;;  %v16740_v26 = vld [vmem:[%s25815_s1 + $0x3c8] ss:$80 sps:$4 sm:$0xff]  }
  0x1c   :  { %6105 = vmatpush1.bf16.msra.mxu1 %v16664_v27  ;;  %6065 = vmatprep.subr.bf16.mxu0 %v16665_v28  ;;  %v16703_v57 = vld [vmem:[%s25815_s1 + $0x1044] ss:$80 sps:$4 sm:$0xff]   ;;  %v16706_v59 = vld [vmem:[%s25815_s1 + $0x1040] ss:$80 sps:$4 sm:$0xff]   ;;  %v16748_v28 = vld [vmem:[%s25815_s1 + $0x32c] ss:$80 sps:$4 sm:$0xff]  }
  0x1d   :  { %6106 = vmatprep.subr.bf16.mxu1 %v16667_v29  ;;  %v16707_v60 = vld [vmem:[%s25815_s1 + $0x5a4] ss:$80 sps:$4 sm:$0xff]   ;;  %v16711_v62 = vld [vmem:[%s25815_s1 + $0x5a0] ss:$80 sps:$4 sm:$0xff]  }
  0x1e   :  { %v16709_v61 = vld [vmem:[%s25815_s1 + $0xfa4] ss:$80 sps:$4 sm:$0xff]   ;;  %v16712_v63 = vld [vmem:[%s25815_s1 + $0xfa0] ss:$80 sps:$4 sm:$0xff]  }
  0x1f   :  { %6066 = vmatpush1.bf16.msra.mxu0 %v16669_v30  ;;  %v16713_v0 = vld [vmem:[%s25815_s1 + $0x504] ss:$80 sps:$4 sm:$0xff]   ;;  %v16717_v2 = vld [vmem:[%s25815_s1 + $0x500] ss:$80 sps:$4 sm:$0xff]   ;;  %v16746_v30 = vld [vmem:[%s25815_s1 + $0x328] ss:$80 sps:$4 sm:$0xff]  }
  0x20   :  { %6107 = vmatpush1.bf16.msra.mxu1 %v16670_v31  ;;  %6067 = vmatprep.subr.bf16.mxu0 %v16671_v32  ;;  %v16715_v1 = vld [vmem:[%s25815_s1 + $0xf04] ss:$80 sps:$4 sm:$0xff]   ;;  %v16718_v3 = vld [vmem:[%s25815_s1 + $0xf00] ss:$80 sps:$4 sm:$0xff]   ;;  %v16754_v32 = vld [vmem:[%s25815_s1 + $0x28c] ss:$80 sps:$4 sm:$0xff]  }
  0x21   :  { %6108 = vmatprep.subr.bf16.mxu1 %v16673_v33  ;;  %v33_v4 = vld [vmem:[%s25816_s0] sm:$0xff]  ;;  %v35_v5 = vld [vmem:[%s25816_s0 + $0x10] sm:$0xff] }
  0x22   :  { %v16721_v6 = vld [vmem:[%s25815_s1 + $0x1864] ss:$80 sps:$4 sm:$0xff]   ;;  %v19362_v8 = vpack.c.bf16 %v33_v4, %v33_v4  ;;  %v19364_v9 = vpack.c.bf16 %v35_v5, %v35_v5  ;;  %v16719_v10 = vld [vmem:[%s25815_s1 + $0x1860] ss:$80 sps:$4 sm:$0xff]   ;;  %v16802_v4 = vld [vmem:[%s25815_s1 + $0x78c] ss:$80 sps:$4 sm:$0xff]  }
  0x23   :  { %6068 = vmatpush2.bf16.msra.mxu0 %v16675_v34  ;;  %v16724_v7 = vld [vmem:[%s25815_s1 + $0x1ea4] ss:$80 sps:$4 sm:$0xff]   ;;  %v16722_v11 = vld [vmem:[%s25815_s1 + $0x1ea0] ss:$80 sps:$4 sm:$0xff]   ;;  %v16752_v34 = vld [vmem:[%s25815_s1 + $0x288] ss:$80 sps:$4 sm:$0xff]  }
  0x24   :  { %6109 = vmatpush2.bf16.msra.mxu1 %v16676_v35  ;;  %6069 = vmatprep.subr.bf16.mxu0 %v16677_v36  ;;  %v16727_v12 = vld [vmem:[%s25815_s1 + $0x17c4] ss:$80 sps:$4 sm:$0xff]   ;;  %v16725_v14 = vld [vmem:[%s25815_s1 + $0x17c0] ss:$80 sps:$4 sm:$0xff]   ;;  %v16760_v36 = vld [vmem:[%s25815_s1 + $0x1ec] ss:$80 sps:$4 sm:$0xff]  }
  0x25   :  { %6110 = vmatprep.subr.bf16.mxu1 %v16679_v37  ;;  %v16730_v13 = vld [vmem:[%s25815_s1 + $0x1e04] ss:$80 sps:$4 sm:$0xff]   ;;  %v16728_v15 = vld [vmem:[%s25815_s1 + $0x1e00] ss:$80 sps:$4 sm:$0xff]  }
  0x26   :  { %v39_v16 = vld [vmem:[%s25816_s0 + $0x30] sm:$0xff] }
  0x27   :  { %6070 = vmatpush2.bf16.msra.mxu0 %v16681_v38  ;;  %v16733_v17 = vld [vmem:[%s25815_s1 + $0x1724] ss:$80 sps:$4 sm:$0xff]   ;;  %v16731_v20 = vld [vmem:[%s25815_s1 + $0x1720] ss:$80 sps:$4 sm:$0xff]   ;;  %v19399_v21 = vpack.c.bf16 %v39_v16, %v39_v16  ;;  %v38_v38 = vld [vmem:[%s25816_s0 + $0x28] sm:$0xff] }
  0x28   :  { %6111 = vmatpush2.bf16.msra.mxu1 %v16682_v39  ;;  %6071 = vmatprep.subr.bf16.mxu0 %v16683_v40  ;;  %v16739_v23 = vld [vmem:[%s25815_s1 + $0x1684] ss:$80 sps:$4 sm:$0xff]   ;;  %v16737_v25 = vld [vmem:[%s25815_s1 + $0x1680] ss:$80 sps:$4 sm:$0xff]   ;;  %v16758_v39 = vld [vmem:[%s25815_s1 + $0x1e8] ss:$80 sps:$4 sm:$0xff]  }
  0x29   :  { %6112 = vmatprep.subr.bf16.mxu1 %v16685_v41  ;;  %v16745_v27 = vld [vmem:[%s25815_s1 + $0x15e4] ss:$80 sps:$4 sm:$0xff]   ;;  %v16743_v29 = vld [vmem:[%s25815_s1 + $0x15e0] ss:$80 sps:$4 sm:$0xff]   ;;  %v19461_v41 = vpack.c.bf16 %v38_v38, %v38_v38  ;;  %v16812_v16 = vld [vmem:[%s25815_s1 + $0x648] ss:$80 sps:$4 sm:$0xff]  }
  0x2a   :  { %v16751_v31 = vld [vmem:[%s25815_s1 + $0x1544] ss:$80 sps:$4 sm:$0xff]   ;;  %v16749_v33 = vld [vmem:[%s25815_s1 + $0x1540] ss:$80 sps:$4 sm:$0xff]   ;;  %v16844_v38 = vld [vmem:[%s25815_s1 + $0x172c] ss:$80 sps:$4 sm:$0xff]  }
  0x2b   :  { %6072 = vmatpush2.bf16.msra.mxu0 %v16687_v42  ;;  %v16757_v35 = vld [vmem:[%s25815_s1 + $0x14a4] ss:$80 sps:$4 sm:$0xff]   ;;  %v16755_v37 = vld [vmem:[%s25815_s1 + $0x14a0] ss:$80 sps:$4 sm:$0xff]   ;;  %v16766_v42 = vld [vmem:[%s25815_s1 + $0x14c] ss:$80 sps:$4 sm:$0xff]  }
  0x2c   :  { %6113 = vmatpush2.bf16.msra.mxu1 %v16688_v43  ;;  %6073 = vmatprep.subr.bf16.mxu0 %v16689_v44  ;;  %v16763_v40 = vld [vmem:[%s25815_s1 + $0x1404] ss:$80 sps:$4 sm:$0xff]   ;;  %v16761_v43 = vld [vmem:[%s25815_s1 + $0x1400] ss:$80 sps:$4 sm:$0xff]   ;;  %v16764_v44 = vld [vmem:[%s25815_s1 + $0x148] ss:$80 sps:$4 sm:$0xff]  }
  0x2d   :  { %6114 = vmatprep.subr.bf16.mxu1 %v16691_v45  ;;  %v16769_v45 = vld [vmem:[%s25815_s1 + $0x1d64] ss:$80 sps:$4 sm:$0xff]   ;;  %v16797_v5 = vld [vmem:[%s25815_s1 + $0x1a40] ss:$80 sps:$4 sm:$0xff]  }
  0x2e   :  { %v16775_v50 = vld [vmem:[%s25815_s1 + $0x1cc4] ss:$80 sps:$4 sm:$0xff]  }
  0x2f   :  { %6074 = vmatpush2.bf16.msra.mxu0 %v16693_v47  ;;  %v16767_v47 = vld [vmem:[%s25815_s1 + $0x1d60] ss:$80 sps:$4 sm:$0xff]  }
  0x30   :  { %6115 = vmatpush2.bf16.msra.mxu1 %v16694_v48  ;;  %6075 = vmatprep.subr.bf16.mxu0 %v16695_v51  ;;  %v16770_v48 = vld [vmem:[%s25815_s1 + $0xa8] ss:$80 sps:$4 sm:$0xff]   ;;  %v16778_v51 = vld [vmem:[%s25815_s1 + $0xc] ss:$80 sps:$4 sm:$0xff]  }
  0x31   :  { %6116 = vmatprep.subr.bf16.mxu1 %v16697_v53  ;;  %v16773_v53 = vld [vmem:[%s25815_s1 + $0x1cc0] ss:$80 sps:$4 sm:$0xff]  }
  0x33   :  { %6076 = vmatpush2.bf16.msra.mxu0 %v16699_v54  ;;  %v16776_v54 = vld [vmem:[%s25815_s1 + $0x8] ss:$80 sps:$4 sm:$0xff]  }
  0x34   :  { %6117 = vmatpush2.bf16.msra.mxu1 %v16700_v55  ;;  %6077 = vmatprep.subr.bf16.mxu0 %v16701_v56  ;;  %v16781_v55 = vld [vmem:[%s25815_s1 + $0x1c24] ss:$80 sps:$4 sm:$0xff]   ;;  %v16784_v56 = vld [vmem:[%s25815_s1 + $0x96c] ss:$80 sps:$4 sm:$0xff]  }
  0x35   :  { %6118 = vmatprep.subr.bf16.mxu1 %v16703_v57  ;;  %v16779_v57 = vld [vmem:[%s25815_s1 + $0x1c20] ss:$80 sps:$4 sm:$0xff]  }
  0x37   :  { %6078 = vmatpush2.bf16.msra.mxu0 %v16705_v58  ;;  %v16782_v58 = vld [vmem:[%s25815_s1 + $0x968] ss:$80 sps:$4 sm:$0xff]  }
  0x38   :  { %6119 = vmatpush2.bf16.msra.mxu1 %v16706_v59  ;;  %6079 = vmatprep.subr.bf16.mxu0 %v16707_v60  ;;  %v16787_v59 = vld [vmem:[%s25815_s1 + $0x1b84] ss:$80 sps:$4 sm:$0xff]   ;;  %v16790_v60 = vld [vmem:[%s25815_s1 + $0x8cc] ss:$80 sps:$4 sm:$0xff]  }
  0x39   :  { %6120 = vmatprep.subr.bf16.mxu1 %v16709_v61  ;;  %v16785_v61 = vld [vmem:[%s25815_s1 + $0x1b80] ss:$80 sps:$4 sm:$0xff]  }
  0x3b   :  { %6080 = vmatpush2.bf16.msra.mxu0 %v16711_v62  ;;  %v16788_v62 = vld [vmem:[%s25815_s1 + $0x8c8] ss:$80 sps:$4 sm:$0xff]  }
  0x3c   :  { %6121 = vmatpush2.bf16.msra.mxu1 %v16712_v63  ;;  %6081 = vmatprep.subr.bf16.mxu0 %v16713_v0  ;;  %v16793_v63 = vld [vmem:[%s25815_s1 + $0x1ae4] ss:$80 sps:$4 sm:$0xff]   ;;  %v16796_v0 = vld [vmem:[%s25815_s1 + $0x82c] ss:$80 sps:$4 sm:$0xff]  }
  0x3d   :  { %6122 = vmatprep.subr.bf16.mxu1 %v16715_v1  ;;  %v16791_v1 = vld [vmem:[%s25815_s1 + $0x1ae0] ss:$80 sps:$4 sm:$0xff]  }
  0x3f   :  { %6082 = vmatpush2.bf16.msra.mxu0 %v16717_v2  ;;  %v16794_v2 = vld [vmem:[%s25815_s1 + $0x828] ss:$80 sps:$4 sm:$0xff]  }
  0x40   :  { %6123 = vmatpush2.bf16.msra.mxu1 %v16718_v3  ;;  %6133 = vmatprep.subr.bf16.mxu0 %v16721_v6  ;;  %v16799_v3 = vld [vmem:[%s25815_s1 + $0x1a44] ss:$80 sps:$4 sm:$0xff]   ;;  %v16800_v6 = vld [vmem:[%s25815_s1 + $0x788] ss:$80 sps:$4 sm:$0xff]  }
  0x41   :  { %6186 = vmatprep.subr.bf16.mxu1 %v16724_v7  ;;  %v16805_v7 = vld [vmem:[%s25815_s1 + $0x19a4] ss:$80 sps:$4 sm:$0xff]  }
  0x42   :  { %6084 = vmatmul.mubr.bf16.vlgmr.msra.gmra.mxu0 %v19362_v8 }
  0x43   :  { %6125 = vmatmul.mubr.bf16.vlgmr.msra.gmra.mxu1 %v19364_v9  ;;  %6134 = vmatpush1.bf16.msra.mxu0 %v16719_v10  ;;  %v16808_v10 = vld [vmem:[%s25815_s1 + $0x6ec] ss:$80 sps:$4 sm:$0xff]  }
  0x44   :  { %6187 = vmatpush1.bf16.msra.mxu1 %v16722_v11  ;;  %6135 = vmatprep.subr.bf16.mxu0 %v16727_v12  ;;  %v16803_v11 = vld [vmem:[%s25815_s1 + $0x19a0] ss:$80 sps:$4 sm:$0xff]   ;;  %v16806_v12 = vld [vmem:[%s25815_s1 + $0x6e8] ss:$80 sps:$4 sm:$0xff]  }
  0x45   :  { %6188 = vmatprep.subr.bf16.mxu1 %v16730_v13  ;;  %6206 = vmatprep.mubr.bf16.mxu1 %v25827_v19  ;;  %v16811_v13 = vld [vmem:[%s25815_s1 + $0x1904] ss:$80 sps:$4 sm:$0xff]  }
  0x46   :  { %6165 = vmatprep.mubr.bf16.mxu0 %v19461_v41 }
  0x47   :  { %6136 = vmatpush1.bf16.msra.mxu0 %v16725_v14  ;;  %v16814_v14 = vld [vmem:[%s25815_s1 + $0x64c] ss:$80 sps:$4 sm:$0xff]  }
  0x48   :  { %6189 = vmatpush1.bf16.msra.mxu1 %v16728_v15  ;;  %6137 = vmatprep.subr.bf16.mxu0 %v16733_v17  ;;  %v16809_v15 = vld [vmem:[%s25815_s1 + $0x1900] ss:$80 sps:$4 sm:$0xff]  }
  0x49   :  { %6215 = vmatprep.subr.bf16.mxu1 %v16736_v18  ;;  %v37_v17 = vld [vmem:[%s25816_s0 + $0x20] sm:$0xff]  ;;  %v16817_v18 = vld [vmem:[%s25815_s1 + $0x5ac] ss:$80 sps:$4 sm:$0xff]  }
  0x4b   :  { %15292 = vmatmul.mubr.msk.bf16.vlgmr.msra.gmra.mxu1 %vm6047_vm0, %v19399_v21  ;;  %6138 = vmatpush1.bf16.msra.mxu0 %v16731_v20  ;;  %v16820_v20 = vld [vmem:[%s25815_s1 + $0xe6c] ss:$80 sps:$4 sm:$0xff]  }
  0x4c   :  { %6216 = vmatpush1.bf16.msra.mxu1 %v16734_v22  ;;  %6139 = vmatprep.subr.bf16.mxu0 %v16739_v23  ;;  %v19578_v22 = vpack.c.bf16 %v37_v17, %v37_v17  ;;  %v16815_v23 = vld [vmem:[%s25815_s1 + $0x5a8] ss:$80 sps:$4 sm:$0xff]  }
  0x4d   :  { %6217 = vmatprep.subr.bf16.mxu1 %v16742_v24  ;;  %6247 = vmatprep.mubr.bf16.mxu1 %v19293_v49  ;;  %v16818_v24 = vld [vmem:[%s25815_s1 + $0xe68] ss:$80 sps:$4 sm:$0xff]  }
  0x4e   :  { %v16896_v17 = vld [vmem:[%s25815_s1 + $0x1b88] ss:$80 sps:$4 sm:$0xff]  }
  0x4f   :  { %6140 = vmatpush1.bf16.msra.mxu0 %v16737_v25  ;;  %v16823_v25 = vld [vmem:[%s25815_s1 + $0x50c] ss:$80 sps:$4 sm:$0xff]  }
  0x50   :  { %6218 = vmatpush1.bf16.msra.mxu1 %v16740_v26  ;;  %6141 = vmatprep.subr.bf16.mxu0 %v16745_v27  ;;  %v16826_v26 = vld [vmem:[%s25815_s1 + $0xdcc] ss:$80 sps:$4 sm:$0xff]   ;;  %v16821_v27 = vld [vmem:[%s25815_s1 + $0x508] ss:$80 sps:$4 sm:$0xff]  }
  0x51   :  { %6219 = vmatprep.subr.bf16.mxu1 %v16748_v28  ;;  %v16824_v28 = vld [vmem:[%s25815_s1 + $0xdc8] ss:$80 sps:$4 sm:$0xff]  }
  0x53   :  { %6142 = vmatpush1.bf16.msra.mxu0 %v16743_v29  ;;  %v16829_v29 = vld [vmem:[%s25815_s1 + $0xd2c] ss:$80 sps:$4 sm:$0xff]  }
  0x54   :  { %6220 = vmatpush1.bf16.msra.mxu1 %v16746_v30  ;;  %6143 = vmatprep.subr.bf16.mxu0 %v16751_v31  ;;  %v16832_v30 = vld [vmem:[%s25815_s1 + $0x186c] ss:$80 sps:$4 sm:$0xff]   ;;  %v16827_v31 = vld [vmem:[%s25815_s1 + $0xd28] ss:$80 sps:$4 sm:$0xff]  }
  0x55   :  { %6221 = vmatprep.subr.bf16.mxu1 %v16754_v32  ;;  %v16830_v32 = vld [vmem:[%s25815_s1 + $0x1868] ss:$80 sps:$4 sm:$0xff]  }
  0x57   :  { %6144 = vmatpush1.bf16.msra.mxu0 %v16749_v33  ;;  %v16835_v33 = vld [vmem:[%s25815_s1 + $0xc8c] ss:$80 sps:$4 sm:$0xff]  }
  0x58   :  { %6222 = vmatpush1.bf16.msra.mxu1 %v16752_v34  ;;  %6145 = vmatprep.subr.bf16.mxu0 %v16757_v35  ;;  %v16838_v34 = vld [vmem:[%s25815_s1 + $0x17cc] ss:$80 sps:$4 sm:$0xff]   ;;  %v16833_v35 = vld [vmem:[%s25815_s1 + $0xc88] ss:$80 sps:$4 sm:$0xff]  }
  0x59   :  { %6223 = vmatprep.subr.bf16.mxu1 %v16760_v36  ;;  %v16836_v36 = vld [vmem:[%s25815_s1 + $0x17c8] ss:$80 sps:$4 sm:$0xff]  }
  0x5b   :  { %6146 = vmatpush1.bf16.msra.mxu0 %v16755_v37  ;;  %v16841_v37 = vld [vmem:[%s25815_s1 + $0xbec] ss:$80 sps:$4 sm:$0xff]  }
  0x5c   :  { %6224 = vmatpush1.bf16.msra.mxu1 %v16758_v39  ;;  %6147 = vmatprep.subr.bf16.mxu0 %v16763_v40  ;;  %v16839_v39 = vld [vmem:[%s25815_s1 + $0xbe8] ss:$80 sps:$4 sm:$0xff]  }
  0x5d   :  { %6225 = vmatprep.subr.bf16.mxu1 %v16766_v42  ;;  %v16842_v40 = vld [vmem:[%s25815_s1 + $0x1728] ss:$80 sps:$4 sm:$0xff]   ;;  %v16847_v42 = vld [vmem:[%s25815_s1 + $0xb4c] ss:$80 sps:$4 sm:$0xff]  }
  0x5f   :  { %6148 = vmatpush1.bf16.msra.mxu0 %v16761_v43  ;;  %v16850_v43 = vld [vmem:[%s25815_s1 + $0x168c] ss:$80 sps:$4 sm:$0xff]  }
  0x60   :  { %6226 = vmatpush1.bf16.msra.mxu1 %v16764_v44  ;;  %6149 = vmatprep.subr.bf16.mxu0 %v16769_v45  ;;  %v16845_v44 = vld [vmem:[%s25815_s1 + $0xb48] ss:$80 sps:$4 sm:$0xff]  }
  0x61   :  { %6227 = vmatprep.subr.bf16.mxu1 %v16772_v46  ;;  %v16848_v45 = vld [vmem:[%s25815_s1 + $0x1688] ss:$80 sps:$4 sm:$0xff]   ;;  %v16853_v46 = vld [vmem:[%s25815_s1 + $0xaac] ss:$80 sps:$4 sm:$0xff]  }
  0x63   :  { %6150 = vmatpush2.bf16.msra.mxu0 %v16767_v47  ;;  %v16856_v47 = vld [vmem:[%s25815_s1 + $0x15ec] ss:$80 sps:$4 sm:$0xff]  }
  0x64   :  { %6228 = vmatpush1.bf16.msra.mxu1 %v16770_v48  ;;  %6151 = vmatprep.subr.bf16.mxu0 %v16775_v50  ;;  %v16851_v48 = vld [vmem:[%s25815_s1 + $0xaa8] ss:$80 sps:$4 sm:$0xff]  }
  0x65   :  { %6229 = vmatprep.subr.bf16.mxu1 %v16778_v51  ;;  %v16854_v50 = vld [vmem:[%s25815_s1 + $0x15e8] ss:$80 sps:$4 sm:$0xff]   ;;  %v16859_v51 = vld [vmem:[%s25815_s1 + $0xa0c] ss:$80 sps:$4 sm:$0xff]  }
  0x67   :  { %6152 = vmatpush2.bf16.msra.mxu0 %v16773_v53  ;;  %v16862_v53 = vld [vmem:[%s25815_s1 + $0x154c] ss:$80 sps:$4 sm:$0xff]  }
  0x68   :  { %6230 = vmatpush1.bf16.msra.mxu1 %v16776_v54  ;;  %6153 = vmatprep.subr.bf16.mxu0 %v16781_v55  ;;  %v16857_v54 = vld [vmem:[%s25815_s1 + $0xa08] ss:$80 sps:$4 sm:$0xff]  }
  0x69   :  { %6231 = vmatprep.subr.bf16.mxu1 %v16784_v56  ;;  %v16860_v55 = vld [vmem:[%s25815_s1 + $0x1548] ss:$80 sps:$4 sm:$0xff]   ;;  %v16865_v56 = vld [vmem:[%s25815_s1 + $0x136c] ss:$80 sps:$4 sm:$0xff]  }
  0x6b   :  { %6154 = vmatpush2.bf16.msra.mxu0 %v16779_v57  ;;  %v16868_v57 = vld [vmem:[%s25815_s1 + $0x14ac] ss:$80 sps:$4 sm:$0xff]  }
  0x6c   :  { %6232 = vmatpush2.bf16.msra.mxu1 %v16782_v58  ;;  %6155 = vmatprep.subr.bf16.mxu0 %v16787_v59  ;;  %v16863_v58 = vld [vmem:[%s25815_s1 + $0x1368] ss:$80 sps:$4 sm:$0xff]  }
  0x6d   :  { %6233 = vmatprep.subr.bf16.mxu1 %v16790_v60  ;;  %v16866_v59 = vld [vmem:[%s25815_s1 + $0x14a8] ss:$80 sps:$4 sm:$0xff]   ;;  %v16871_v60 = vld [vmem:[%s25815_s1 + $0x12cc] ss:$80 sps:$4 sm:$0xff]  }
  0x6f   :  { %6156 = vmatpush2.bf16.msra.mxu0 %v16785_v61  ;;  %v16874_v61 = vld [vmem:[%s25815_s1 + $0x140c] ss:$80 sps:$4 sm:$0xff]  }
  0x70   :  { %6234 = vmatpush2.bf16.msra.mxu1 %v16788_v62  ;;  %6157 = vmatprep.subr.bf16.mxu0 %v16793_v63  ;;  %v16869_v62 = vld [vmem:[%s25815_s1 + $0x12c8] ss:$80 sps:$4 sm:$0xff]  }
  0x71   :  { %6235 = vmatprep.subr.bf16.mxu1 %v16796_v0  ;;  %v16872_v63 = vld [vmem:[%s25815_s1 + $0x1408] ss:$80 sps:$4 sm:$0xff]   ;;  %v16877_v0 = vld [vmem:[%s25815_s1 + $0x122c] ss:$80 sps:$4 sm:$0xff]  }
  0x73   :  { %6158 = vmatpush2.bf16.msra.mxu0 %v16791_v1  ;;  %v16880_v1 = vld [vmem:[%s25815_s1 + $0x1d6c] ss:$80 sps:$4 sm:$0xff]  }
  0x74   :  { %6236 = vmatpush2.bf16.msra.mxu1 %v16794_v2  ;;  %6159 = vmatprep.subr.bf16.mxu0 %v16799_v3  ;;  %v16875_v2 = vld [vmem:[%s25815_s1 + $0x1228] ss:$80 sps:$4 sm:$0xff]  }
  0x75   :  { %6237 = vmatprep.subr.bf16.mxu1 %v16802_v4  ;;  %v16878_v3 = vld [vmem:[%s25815_s1 + $0x1d68] ss:$80 sps:$4 sm:$0xff]   ;;  %v16883_v4 = vld [vmem:[%s25815_s1 + $0x118c] ss:$80 sps:$4 sm:$0xff]  }
  0x77   :  { %6160 = vmatpush2.bf16.msra.mxu0 %v16797_v5  ;;  %v16886_v5 = vld [vmem:[%s25815_s1 + $0x1ccc] ss:$80 sps:$4 sm:$0xff]  }
  0x78   :  { %6238 = vmatpush2.bf16.msra.mxu1 %v16800_v6  ;;  %6161 = vmatprep.subr.bf16.mxu0 %v16805_v7  ;;  %v16881_v6 = vld [vmem:[%s25815_s1 + $0x1188] ss:$80 sps:$4 sm:$0xff]  }
  0x79   :  { %6239 = vmatprep.subr.bf16.mxu1 %v16808_v10  ;;  %v16884_v7 = vld [vmem:[%s25815_s1 + $0x1cc8] ss:$80 sps:$4 sm:$0xff]   ;;  %v16889_v10 = vld [vmem:[%s25815_s1 + $0x10ec] ss:$80 sps:$4 sm:$0xff]  }
  0x7b   :  { %6162 = vmatpush2.bf16.msra.mxu0 %v16803_v11  ;;  %v16892_v11 = vld [vmem:[%s25815_s1 + $0x1c2c] ss:$80 sps:$4 sm:$0xff]  }
  0x7c   :  { %6240 = vmatpush2.bf16.msra.mxu1 %v16806_v12  ;;  %6163 = vmatprep.subr.bf16.mxu0 %v16811_v13  ;;  %v16887_v12 = vld [vmem:[%s25815_s1 + $0x10e8] ss:$80 sps:$4 sm:$0xff]  }
  0x7d   :  { %6241 = vmatprep.subr.bf16.mxu1 %v16814_v14  ;;  %v16890_v13 = vld [vmem:[%s25815_s1 + $0x1c28] ss:$80 sps:$4 sm:$0xff]   ;;  %v16895_v14 = vld [vmem:[%s25815_s1 + $0x104c] ss:$80 sps:$4 sm:$0xff]  }
  0x7f   :  { %6164 = vmatpush2.bf16.msra.mxu0 %v16809_v15  ;;  %v16898_v15 = vld [vmem:[%s25815_s1 + $0x1b8c] ss:$80 sps:$4 sm:$0xff]  }
  0x80   :  { %6242 = vmatpush2.bf16.msra.mxu1 %v16812_v16  ;;  %6256 = vmatprep.subr.bf16.mxu0 %v16820_v20  ;;  %v16893_v16 = vld [vmem:[%s25815_s1 + $0x1048] ss:$80 sps:$4 sm:$0xff]   ;;  %v16904_v20 = vld [vmem:[%s25815_s1 + $0x1aec] ss:$80 sps:$4 sm:$0xff]  }
  0x81   :  { %6243 = vmatprep.subr.bf16.mxu1 %v16817_v18  ;;  %v16901_v18 = vld [vmem:[%s25815_s1 + $0xfac] ss:$80 sps:$4 sm:$0xff]  }
  0x82   :  { %6166 = vmatmul.mubr.bf16.vlgmr.msra.gmra.mxu0 %v19578_v22 }
  0x83   :  { %6257 = vmatpush1.bf16.msra.mxu0 %v16818_v24  ;;  %6288 = vmatprep.mubr.bf16.mxu0 %v19301_v52  ;;  %v16902_v24 = vld [vmem:[%s25815_s1 + $0x1ae8] ss:$80 sps:$4 sm:$0xff]  }
  0x84   :  { %6244 = vmatpush2.bf16.msra.mxu1 %v16815_v23  ;;  %6258 = vmatprep.subr.bf16.mxu0 %v16826_v26  ;;  %v16899_v23 = vld [vmem:[%s25815_s1 + $0xfa8] ss:$80 sps:$4 sm:$0xff]   ;;  %v16910_v26 = vld [vmem:[%s25815_s1 + $0x1a4c] ss:$80 sps:$4 sm:$0xff]  }
  0x85   :  { %6245 = vmatprep.subr.bf16.mxu1 %v16823_v25  ;;  %v16907_v25 = vld [vmem:[%s25815_s1 + $0xf0c] ss:$80 sps:$4 sm:$0xff]  }
  0x87   :  { %6259 = vmatpush1.bf16.msra.mxu0 %v16824_v28  ;;  %v16908_v28 = vld [vmem:[%s25815_s1 + $0x1a48] ss:$80 sps:$4 sm:$0xff]  }
  0x88   :  { %6246 = vmatpush2.bf16.msra.mxu1 %v16821_v27  ;;  %6260 = vmatprep.subr.bf16.mxu0 %v16829_v29  ;;  %v16905_v27 = vld [vmem:[%s25815_s1 + $0xf08] ss:$80 sps:$4 sm:$0xff]   ;;  %v16913_v29 = vld [vmem:[%s25815_s1 + $0x19ac] ss:$80 sps:$4 sm:$0xff]  }
  0x89   :  { %6297 = vmatprep.subr.bf16.mxu1 %v16832_v30  ;;  %v16916_v30 = vld [vmem:[%s25815_s1 + $0x1eac] ss:$80 sps:$4 sm:$0xff]  }
  0x8b   :  { %6248 = vmatmul.mubr.bf16.vlgmr.msra.gmra.mxu1 %v19362_v8  ;;  %6261 = vmatpush1.bf16.msra.mxu0 %v16827_v31  ;;  %v16911_v31 = vld [vmem:[%s25815_s1 + $0x19a8] ss:$80 sps:$4 sm:$0xff]  }
  0x8c   :  { %6298 = vmatpush1.bf16.msra.mxu1 %v16830_v32  ;;  %6262 = vmatprep.subr.bf16.mxu0 %v16835_v33  ;;  %v16914_v32 = vld [vmem:[%s25815_s1 + $0x1ea8] ss:$80 sps:$4 sm:$0xff]   ;;  %v16919_v33 = vld [vmem:[%s25815_s1 + $0x190c] ss:$80 sps:$4 sm:$0xff]  }
  0x8d   :  { %6299 = vmatprep.subr.bf16.mxu1 %v16838_v34  ;;  %6329 = vmatprep.mubr.bf16.mxu1 %v19461_v41  ;;  %v16922_v34 = vld [vmem:[%s25815_s1 + $0x1e0c] ss:$80 sps:$4 sm:$0xff]  }
  0x8f   :  { %6263 = vmatpush1.bf16.msra.mxu0 %v16833_v35  ;;  %v16917_v35 = vld [vmem:[%s25815_s1 + $0x1908] ss:$80 sps:$4 sm:$0xff]  }
  0x90   :  { %6300 = vmatpush1.bf16.msra.mxu1 %v16836_v36  ;;  %6264 = vmatprep.subr.bf16.mxu0 %v16841_v37  ;;  %v16920_v36 = vld [vmem:[%s25815_s1 + $0x1e08] ss:$80 sps:$4 sm:$0xff]   ;;  %v16925_v37 = vld [vmem:[%s25815_s1 + $0x474] ss:$80 sps:$4 sm:$0xff]  }
  0x91   :  { %6301 = vmatprep.subr.bf16.mxu1 %v16844_v38  ;;  %v16928_v38 = vld [vmem:[%s25815_s1 + $0xe74] ss:$80 sps:$4 sm:$0xff]  }
  0x93   :  { %6265 = vmatpush1.bf16.msra.mxu0 %v16839_v39  ;;  %v16923_v39 = vld [vmem:[%s25815_s1 + $0x470] ss:$80 sps:$4 sm:$0xff]  }
  0x94   :  { %6302 = vmatpush1.bf16.msra.mxu1 %v16842_v40  ;;  %6266 = vmatprep.subr.bf16.mxu0 %v16847_v42  ;;  %v16926_v40 = vld [vmem:[%s25815_s1 + $0xe70] ss:$80 sps:$4 sm:$0xff]   ;;  %v16931_v42 = vld [vmem:[%s25815_s1 + $0x3d4] ss:$80 sps:$4 sm:$0xff]  }
  0x95   :  { %6303 = vmatprep.subr.bf16.mxu1 %v16850_v43  ;;  %v16934_v43 = vld [vmem:[%s25815_s1 + $0xdd4] ss:$80 sps:$4 sm:$0xff]  }
  0x97   :  { %6267 = vmatpush1.bf16.msra.mxu0 %v16845_v44  ;;  %v16929_v44 = vld [vmem:[%s25815_s1 + $0x3d0] ss:$80 sps:$4 sm:$0xff]  }
  0x98   :  { %6304 = vmatpush1.bf16.msra.mxu1 %v16848_v45  ;;  %6268 = vmatprep.subr.bf16.mxu0 %v16853_v46  ;;  %v16932_v45 = vld [vmem:[%s25815_s1 + $0xdd0] ss:$80 sps:$4 sm:$0xff]   ;;  %v16937_v46 = vld [vmem:[%s25815_s1 + $0x334] ss:$80 sps:$4 sm:$0xff]  }
  0x99   :  { %6305 = vmatprep.subr.bf16.mxu1 %v16856_v47  ;;  %v16940_v47 = vld [vmem:[%s25815_s1 + $0xd34] ss:$80 sps:$4 sm:$0xff]  }
  0x9b   :  { %6269 = vmatpush1.bf16.msra.mxu0 %v16851_v48  ;;  %v16935_v48 = vld [vmem:[%s25815_s1 + $0x330] ss:$80 sps:$4 sm:$0xff]  }
  0x9c   :  { %6306 = vmatpush1.bf16.msra.mxu1 %v16854_v50  ;;  %6270 = vmatprep.subr.bf16.mxu0 %v16859_v51  ;;  %v16938_v50 = vld [vmem:[%s25815_s1 + $0xd30] ss:$80 sps:$4 sm:$0xff]   ;;  %v16943_v51 = vld [vmem:[%s25815_s1 + $0x294] ss:$80 sps:$4 sm:$0xff]  }
  0x9d   :  { %6307 = vmatprep.subr.bf16.mxu1 %v16862_v53  ;;  %v16946_v53 = vld [vmem:[%s25815_s1 + $0xc94] ss:$80 sps:$4 sm:$0xff]  }
  0x9f   :  { %6271 = vmatpush1.bf16.msra.mxu0 %v16857_v54  ;;  %v16941_v54 = vld [vmem:[%s25815_s1 + $0x290] ss:$80 sps:$4 sm:$0xff]  }
  0xa0   :  { %6308 = vmatpush1.bf16.msra.mxu1 %v16860_v55  ;;  %6272 = vmatprep.subr.bf16.mxu0 %v16865_v56  ;;  %v16944_v55 = vld [vmem:[%s25815_s1 + $0xc90] ss:$80 sps:$4 sm:$0xff]   ;;  %v16949_v56 = vld [vmem:[%s25815_s1 + $0x1f4] ss:$80 sps:$4 sm:$0xff]  }
  0xa1   :  { %6309 = vmatprep.subr.bf16.mxu1 %v16868_v57  ;;  %v16952_v57 = vld [vmem:[%s25815_s1 + $0xbf4] ss:$80 sps:$4 sm:$0xff]  }
  0xa3   :  { %6273 = vmatpush2.bf16.msra.mxu0 %v16863_v58  ;;  %v16947_v58 = vld [vmem:[%s25815_s1 + $0x1f0] ss:$80 sps:$4 sm:$0xff]  }
  0xa4   :  { %6310 = vmatpush1.bf16.msra.mxu1 %v16866_v59  ;;  %6274 = vmatprep.subr.bf16.mxu0 %v16871_v60  ;;  %v16950_v59 = vld [vmem:[%s25815_s1 + $0xbf0] ss:$80 sps:$4 sm:$0xff]   ;;  %v16955_v60 = vld [vmem:[%s25815_s1 + $0x154] ss:$80 sps:$4 sm:$0xff]  }
  0xa5   :  { %6311 = vmatprep.subr.bf16.mxu1 %v16874_v61  ;;  %v16958_v61 = vld [vmem:[%s25815_s1 + $0xb54] ss:$80 sps:$4 sm:$0xff]  }
  0xa7   :  { %6275 = vmatpush2.bf16.msra.mxu0 %v16869_v62  ;;  %v16953_v62 = vld [vmem:[%s25815_s1 + $0x150] ss:$80 sps:$4 sm:$0xff]  }
  0xa8   :  { %6312 = vmatpush1.bf16.msra.mxu1 %v16872_v63  ;;  %6276 = vmatprep.subr.bf16.mxu0 %v16877_v0  ;;  %v16956_v63 = vld [vmem:[%s25815_s1 + $0xb50] ss:$80 sps:$4 sm:$0xff]   ;;  %v16961_v0 = vld [vmem:[%s25815_s1 + $0xb4] ss:$80 sps:$4 sm:$0xff]  }
  0xa9   :  { %6313 = vmatprep.subr.bf16.mxu1 %v16880_v1  ;;  %v16964_v1 = vld [vmem:[%s25815_s1 + $0xab4] ss:$80 sps:$4 sm:$0xff]  }
  0xab   :  { %6277 = vmatpush2.bf16.msra.mxu0 %v16875_v2  ;;  %v16959_v2 = vld [vmem:[%s25815_s1 + $0xb0] ss:$80 sps:$4 sm:$0xff]  }
  0xac   :  { %6314 = vmatpush2.bf16.msra.mxu1 %v16878_v3  ;;  %6278 = vmatprep.subr.bf16.mxu0 %v16883_v4  ;;  %v16962_v3 = vld [vmem:[%s25815_s1 + $0xab0] ss:$80 sps:$4 sm:$0xff]   ;;  %v16967_v4 = vld [vmem:[%s25815_s1 + $0x14] ss:$80 sps:$4 sm:$0xff]  }
  0xad   :  { %6315 = vmatprep.subr.bf16.mxu1 %v16886_v5  ;;  %v16970_v5 = vld [vmem:[%s25815_s1 + $0xa14] ss:$80 sps:$4 sm:$0xff]  }
  0xaf   :  { %6279 = vmatpush2.bf16.msra.mxu0 %v16881_v6  ;;  %v16965_v6 = vld [vmem:[%s25815_s1 + $0x10] ss:$80 sps:$4 sm:$0xff]  }
  0xb0   :  { %6316 = vmatpush2.bf16.msra.mxu1 %v16884_v7  ;;  %6280 = vmatprep.subr.bf16.mxu0 %v16889_v10  ;;  %v16968_v7 = vld [vmem:[%s25815_s1 + $0xa10] ss:$80 sps:$4 sm:$0xff]   ;;  %v16973_v10 = vld [vmem:[%s25815_s1 + $0x974] ss:$80 sps:$4 sm:$0xff]  }
  0xb1   :  { %6317 = vmatprep.subr.bf16.mxu1 %v16892_v11  ;;  %v16976_v11 = vld [vmem:[%s25815_s1 + $0x1374] ss:$80 sps:$4 sm:$0xff]  }
  0xb3   :  { %6281 = vmatpush2.bf16.msra.mxu0 %v16887_v12  ;;  %v16971_v12 = vld [vmem:[%s25815_s1 + $0x970] ss:$80 sps:$4 sm:$0xff]  }
  0xb4   :  { %6318 = vmatpush2.bf16.msra.mxu1 %v16890_v13  ;;  %6282 = vmatprep.subr.bf16.mxu0 %v16895_v14  ;;  %v16974_v13 = vld [vmem:[%s25815_s1 + $0x1370] ss:$80 sps:$4 sm:$0xff]   ;;  %v16979_v14 = vld [vmem:[%s25815_s1 + $0x8d4] ss:$80 sps:$4 sm:$0xff]  }
  0xb5   :  { %6319 = vmatprep.subr.bf16.mxu1 %v16898_v15  ;;  %v16982_v15 = vld [vmem:[%s25815_s1 + $0x12d4] ss:$80 sps:$4 sm:$0xff]  }
  0xb7   :  { %6283 = vmatpush2.bf16.msra.mxu0 %v16893_v16  ;;  %v16977_v16 = vld [vmem:[%s25815_s1 + $0x8d0] ss:$80 sps:$4 sm:$0xff]  }
  0xb8   :  { %6320 = vmatpush2.bf16.msra.mxu1 %v16896_v17  ;;  %6284 = vmatprep.subr.bf16.mxu0 %v16901_v18  ;;  %v16980_v17 = vld [vmem:[%s25815_s1 + $0x12d0] ss:$80 sps:$4 sm:$0xff]   ;;  %v16985_v18 = vld [vmem:[%s25815_s1 + $0x834] ss:$80 sps:$4 sm:$0xff]  }
  0xb9   :  { %6321 = vmatprep.subr.bf16.mxu1 %v16904_v20  ;;  %v16988_v20 = vld [vmem:[%s25815_s1 + $0x1234] ss:$80 sps:$4 sm:$0xff]  }
  0xbb   :  { %6285 = vmatpush2.bf16.msra.mxu0 %v16899_v23  ;;  %v16983_v23 = vld [vmem:[%s25815_s1 + $0x830] ss:$80 sps:$4 sm:$0xff]  }
  0xbc   :  { %6322 = vmatpush2.bf16.msra.mxu1 %v16902_v24  ;;  %6286 = vmatprep.subr.bf16.mxu0 %v16907_v25  ;;  %v16986_v24 = vld [vmem:[%s25815_s1 + $0x1230] ss:$80 sps:$4 sm:$0xff]   ;;  %v16991_v25 = vld [vmem:[%s25815_s1 + $0x794] ss:$80 sps:$4 sm:$0xff]  }
  0xbd   :  { %6323 = vmatprep.subr.bf16.mxu1 %v16910_v26  ;;  %v16994_v26 = vld [vmem:[%s25815_s1 + $0x1194] ss:$80 sps:$4 sm:$0xff]  }
  0xbf   :  { %6287 = vmatpush2.bf16.msra.mxu0 %v16905_v27  ;;  %v16989_v27 = vld [vmem:[%s25815_s1 + $0x790] ss:$80 sps:$4 sm:$0xff]  }
  0xc0   :  { %6324 = vmatpush2.bf16.msra.mxu1 %v16908_v28  ;;  %6350 = vmatprep.subr.bf16.mxu0 %v16916_v30  ;;  %v16992_v28 = vld [vmem:[%s25815_s1 + $0x1190] ss:$80 sps:$4 sm:$0xff]   ;;  %v17000_v30 = vld [vmem:[%s25815_s1 + $0x10f4] ss:$80 sps:$4 sm:$0xff]  }
  0xc1   :  { %6325 = vmatprep.subr.bf16.mxu1 %v16913_v29  ;;  %v16997_v29 = vld [vmem:[%s25815_s1 + $0x6f4] ss:$80 sps:$4 sm:$0xff]  }
  0xc2   :  { %6289 = vmatmul.mubr.bf16.vlgmr.msra.gmra.mxu0 %v19364_v9 }
  0xc3   :  { %6351 = vmatpush1.bf16.msra.mxu0 %v16914_v32  ;;  %6370 = vmatprep.mubr.bf16.mxu0 %v25827_v19  ;;  %v16998_v32 = vld [vmem:[%s25815_s1 + $0x10f0] ss:$80 sps:$4 sm:$0xff]  }
  0xc4   :  { %6326 = vmatpush2.bf16.msra.mxu1 %v16911_v31  ;;  %6352 = vmatprep.subr.bf16.mxu0 %v16922_v34  ;;  %v16995_v31 = vld [vmem:[%s25815_s1 + $0x6f0] ss:$80 sps:$4 sm:$0xff]   ;;  %v17006_v34 = vld [vmem:[%s25815_s1 + $0x1054] ss:$80 sps:$4 sm:$0xff]  }
  0xc5   :  { %6327 = vmatprep.subr.bf16.mxu1 %v16919_v33  ;;  %v17003_v33 = vld [vmem:[%s25815_s1 + $0x654] ss:$80 sps:$4 sm:$0xff]  }
  0xc7   :  { %6353 = vmatpush1.bf16.msra.mxu0 %v16920_v36  ;;  %v17004_v36 = vld [vmem:[%s25815_s1 + $0x1050] ss:$80 sps:$4 sm:$0xff]  }
  0xc8   :  { %6328 = vmatpush2.bf16.msra.mxu1 %v16917_v35  ;;  %6379 = vmatprep.subr.bf16.mxu0 %v16925_v37  ;;  %v17001_v35 = vld [vmem:[%s25815_s1 + $0x650] ss:$80 sps:$4 sm:$0xff]   ;;  %v17009_v37 = vld [vmem:[%s25815_s1 + $0x5b4] ss:$80 sps:$4 sm:$0xff]  }
  0xc9   :  { %6420 = vmatprep.subr.bf16.mxu1 %v16928_v38  ;;  %v17012_v38 = vld [vmem:[%s25815_s1 + $0xfb4] ss:$80 sps:$4 sm:$0xff]  }
  0xca   :  { %15293 = vmatmul.mubr.msk.bf16.vlgmr.msra.gmra.mxu0 %vm6047_vm0, %v19399_v21 }
  0xcb   :  { %6330 = vmatmul.mubr.bf16.vlgmr.msra.gmra.mxu1 %v19578_v22  ;;  %6380 = vmatpush1.bf16.msra.mxu0 %v16923_v39  ;;  %v17007_v39 = vld [vmem:[%s25815_s1 + $0x5b0] ss:$80 sps:$4 sm:$0xff]  }
  0xcc   :  { %6421 = vmatpush1.bf16.msra.mxu1 %v16926_v40  ;;  %6381 = vmatprep.subr.bf16.mxu0 %v16931_v42  ;;  %v17010_v40 = vld [vmem:[%s25815_s1 + $0xfb0] ss:$80 sps:$4 sm:$0xff]   ;;  %v17015_v42 = vld [vmem:[%s25815_s1 + $0x514] ss:$80 sps:$4 sm:$0xff]  }
  0xcd   :  { %6422 = vmatprep.subr.bf16.mxu1 %v16934_v43  ;;  %6411 = vmatprep.mubr.bf16.mxu0 %v19293_v49  ;;  %v17018_v43 = vld [vmem:[%s25815_s1 + $0xf14] ss:$80 sps:$4 sm:$0xff]  }
  0xce   :  { %6452 = vmatprep.mubr.bf16.mxu1 %v19301_v52 }
  0xcf   :  { %6382 = vmatpush1.bf16.msra.mxu0 %v16929_v44 }
  0xd0   :  { %6423 = vmatpush1.bf16.msra.mxu1 %v16932_v45  ;;  %6383 = vmatprep.subr.bf16.mxu0 %v16937_v46  ;;  %v17013_v46 = vld [vmem:[%s25815_s1 + $0x510] ss:$80 sps:$4 sm:$0xff]  }
  0xd1   :  { %6424 = vmatprep.subr.bf16.mxu1 %v16940_v47 }
  0xd3   :  { %6384 = vmatpush1.bf16.msra.mxu0 %v16935_v48  ;;  %v17016_v48 = vld [vmem:[%s25815_s1 + $0xf10] ss:$80 sps:$4 sm:$0xff]  }
  0xd4   :  { %6425 = vmatpush1.bf16.msra.mxu1 %v16938_v50  ;;  %6385 = vmatprep.subr.bf16.mxu0 %v16943_v51  ;;  %v17021_v50 = vld [vmem:[%s25815_s1 + $0x1874] ss:$80 sps:$4 sm:$0xff]  }
  0xd5   :  { %6426 = vmatprep.subr.bf16.mxu1 %v16946_v53 }
  0xd7   :  { %6386 = vmatpush1.bf16.msra.mxu0 %v16941_v54  ;;  %v17024_v54 = vld [vmem:[%s25815_s1 + $0x1eb4] ss:$80 sps:$4 sm:$0xff]  }
  0xd8   :  { %6427 = vmatpush1.bf16.msra.mxu1 %v16944_v55  ;;  %6387 = vmatprep.subr.bf16.mxu0 %v16949_v56 }
  0xd9   :  { %6428 = vmatprep.subr.bf16.mxu1 %v16952_v57  ;;  %v17019_v57 = vld [vmem:[%s25815_s1 + $0x1870] ss:$80 sps:$4 sm:$0xff]  }
  0xdb   :  { %6388 = vmatpush1.bf16.msra.mxu0 %v16947_v58  ;;  %v17022_v58 = vld [vmem:[%s25815_s1 + $0x1eb0] ss:$80 sps:$4 sm:$0xff]  }
  0xdc   :  { %6429 = vmatpush1.bf16.msra.mxu1 %v16950_v59  ;;  %6389 = vmatprep.subr.bf16.mxu0 %v16955_v60 }
  0xdd   :  { %6430 = vmatprep.subr.bf16.mxu1 %v16958_v61  ;;  %v17027_v61 = vld [vmem:[%s25815_s1 + $0x17d4] ss:$80 sps:$4 sm:$0xff]  }
  0xdf   :  { %6390 = vmatpush1.bf16.msra.mxu0 %v16953_v62  ;;  %v17030_v62 = vld [vmem:[%s25815_s1 + $0x1e14] ss:$80 sps:$4 sm:$0xff]  }
  0xe0   :  { %6431 = vmatpush1.bf16.msra.mxu1 %v16956_v63  ;;  %6391 = vmatprep.subr.bf16.mxu0 %v16961_v0  ;;  %v17025_v0 = vld [vmem:[%s25815_s1 + $0x17d0] ss:$80 sps:$4 sm:$0xff]  }
  0xe1   :  { %6432 = vmatprep.subr.bf16.mxu1 %v16964_v1  ;;  %v17028_v1 = vld [vmem:[%s25815_s1 + $0x1e10] ss:$80 sps:$4 sm:$0xff]  }
  0xe3   :  { %6392 = vmatpush1.bf16.msra.mxu0 %v16959_v2 }
  0xe4   :  { %6433 = vmatpush1.bf16.msra.mxu1 %v16962_v3  ;;  %6393 = vmatprep.subr.bf16.mxu0 %v16967_v4  ;;  %v17033_v3 = vld [vmem:[%s25815_s1 + $0x1734] ss:$80 sps:$4 sm:$0xff]   ;;  %v17036_v4 = vld [vmem:[%s25815_s1 + $0x47c] ss:$80 sps:$4 sm:$0xff]  }
  0xe5   :  { %6434 = vmatprep.subr.bf16.mxu1 %v16970_v5 }
  0xe7   :  { %6394 = vmatpush1.bf16.msra.mxu0 %v16965_v6  ;;  %v17031_v6 = vld [vmem:[%s25815_s1 + $0x1730] ss:$80 sps:$4 sm:$0xff]  }
  0xe8   :  { %6435 = vmatpush1.bf16.msra.mxu1 %v16968_v7  ;;  %6395 = vmatprep.subr.bf16.mxu0 %v16973_v10  ;;  %v17034_v7 = vld [vmem:[%s25815_s1 + $0x478] ss:$80 sps:$4 sm:$0xff]  }
  0xe9   :  { %6436 = vmatprep.subr.bf16.mxu1 %v16976_v11  ;;  %v17039_v11 = vld [vmem:[%s25815_s1 + $0x1694] ss:$80 sps:$4 sm:$0xff]  }
  0xeb   :  { %6396 = vmatpush2.bf16.msra.mxu0 %v16971_v12  ;;  %v17042_v12 = vld [vmem:[%s25815_s1 + $0x3dc] ss:$80 sps:$4 sm:$0xff]  }
  0xec   :  { %6437 = vmatpush2.bf16.msra.mxu1 %v16974_v13  ;;  %6397 = vmatprep.subr.bf16.mxu0 %v16979_v14  ;;  %v17037_v14 = vld [vmem:[%s25815_s1 + $0x1690] ss:$80 sps:$4 sm:$0xff]  }
  0xed   :  { %6438 = vmatprep.subr.bf16.mxu1 %v16982_v15  ;;  %v17040_v15 = vld [vmem:[%s25815_s1 + $0x3d8] ss:$80 sps:$4 sm:$0xff]  }
  0xef   :  { %6398 = vmatpush2.bf16.msra.mxu0 %v16977_v16  ;;  %v17045_v16 = vld [vmem:[%s25815_s1 + $0x15f4] ss:$80 sps:$4 sm:$0xff]  }
  0xf0   :  { %6439 = vmatpush2.bf16.msra.mxu1 %v16980_v17  ;;  %6399 = vmatprep.subr.bf16.mxu0 %v16985_v18  ;;  %v17048_v17 = vld [vmem:[%s25815_s1 + $0x33c] ss:$80 sps:$4 sm:$0xff]   ;;  %v17043_v18 = vld [vmem:[%s25815_s1 + $0x15f0] ss:$80 sps:$4 sm:$0xff]  }
  0xf1   :  { %6440 = vmatprep.subr.bf16.mxu1 %v16988_v20  ;;  %v17046_v20 = vld [vmem:[%s25815_s1 + $0x338] ss:$80 sps:$4 sm:$0xff]  }
  0xf3   :  { %6400 = vmatpush2.bf16.msra.mxu0 %v16983_v23  ;;  %v17051_v23 = vld [vmem:[%s25815_s1 + $0x1554] ss:$80 sps:$4 sm:$0xff]  }
  0xf4   :  { %6441 = vmatpush2.bf16.msra.mxu1 %v16986_v24  ;;  %6401 = vmatprep.subr.bf16.mxu0 %v16991_v25  ;;  %v17054_v24 = vld [vmem:[%s25815_s1 + $0x29c] ss:$80 sps:$4 sm:$0xff]   ;;  %v17049_v25 = vld [vmem:[%s25815_s1 + $0x1550] ss:$80 sps:$4 sm:$0xff]  }
  0xf5   :  { %6442 = vmatprep.subr.bf16.mxu1 %v16994_v26  ;;  %v17052_v26 = vld [vmem:[%s25815_s1 + $0x298] ss:$80 sps:$4 sm:$0xff]  }
  0xf7   :  { %6402 = vmatpush2.bf16.msra.mxu0 %v16989_v27  ;;  %v17057_v27 = vld [vmem:[%s25815_s1 + $0x14b4] ss:$80 sps:$4 sm:$0xff]  }
  0xf8   :  { %6443 = vmatpush2.bf16.msra.mxu1 %v16992_v28  ;;  %6403 = vmatprep.subr.bf16.mxu0 %v16997_v29  ;;  %v17060_v28 = vld [vmem:[%s25815_s1 + $0x1fc] ss:$80 sps:$4 sm:$0xff]   ;;  %v17055_v29 = vld [vmem:[%s25815_s1 + $0x14b0] ss:$80 sps:$4 sm:$0xff]  }
  0xf9   :  { %6444 = vmatprep.subr.bf16.mxu1 %v17000_v30  ;;  %v17058_v30 = vld [vmem:[%s25815_s1 + $0x1f8] ss:$80 sps:$4 sm:$0xff]  }
  0xfb   :  { %6404 = vmatpush2.bf16.msra.mxu0 %v16995_v31  ;;  %v17063_v31 = vld [vmem:[%s25815_s1 + $0x1414] ss:$80 sps:$4 sm:$0xff]  }
  0xfc   :  { %6445 = vmatpush2.bf16.msra.mxu1 %v16998_v32  ;;  %6405 = vmatprep.subr.bf16.mxu0 %v17003_v33  ;;  %v17066_v32 = vld [vmem:[%s25815_s1 + $0x15c] ss:$80 sps:$4 sm:$0xff]   ;;  %v17061_v33 = vld [vmem:[%s25815_s1 + $0x1410] ss:$80 sps:$4 sm:$0xff]  }
  0xfd   :  { %6446 = vmatprep.subr.bf16.mxu1 %v17006_v34  ;;  %v17064_v34 = vld [vmem:[%s25815_s1 + $0x158] ss:$80 sps:$4 sm:$0xff]  }
  0xff   :  { %6406 = vmatpush2.bf16.msra.mxu0 %v17001_v35  ;;  %v17069_v35 = vld [vmem:[%s25815_s1 + $0x1d74] ss:$80 sps:$4 sm:$0xff]  }
 0x100   :  { %6447 = vmatpush2.bf16.msra.mxu1 %v17004_v36  ;;  %6407 = vmatprep.subr.bf16.mxu0 %v17009_v37  ;;  %v17072_v36 = vld [vmem:[%s25815_s1 + $0xbc] ss:$80 sps:$4 sm:$0xff]   ;;  %v17067_v37 = vld [vmem:[%s25815_s1 + $0x1d70] ss:$80 sps:$4 sm:$0xff]  }
 0x101   :  { %6448 = vmatprep.subr.bf16.mxu1 %v17012_v38  ;;  %v17070_v38 = vld [vmem:[%s25815_s1 + $0xb8] ss:$80 sps:$4 sm:$0xff]  }
 0x102   :  { %v6085_v44 = vpop.f32.mrf.mxu0 }
 0x103   :  { %v6126_v45 = vpop.f32.mrf.mxu1  ;;  %6408 = vmatpush2.bf16.msra.mxu0 %v17007_v39  ;;  %v17075_v39 = vld [vmem:[%s25815_s1 + $0x1cd4] ss:$80 sps:$4 sm:$0xff]  }
 0x104   :  { %v19990_v47 = vadd.f32 %v6126_v45, %v6085_v44  ;;  %6449 = vmatpush2.bf16.msra.mxu1 %v17010_v40  ;;  %v6087_v51 = vpop.f32.mrf.mxu0  ;;  %6409 = vmatprep.subr.bf16.mxu0 %v17015_v42  ;;  %v17078_v40 = vld [vmem:[%s25815_s1 + $0x1c] ss:$80 sps:$4 sm:$0xff]   ;;  %v17073_v42 = vld [vmem:[%s25815_s1 + $0x1cd0] ss:$80 sps:$4 sm:$0xff]   ;;  %v17081_v44 = vld [vmem:[%s25815_s1 + $0x1c34] ss:$80 sps:$4 sm:$0xff]  }
 0x105   :  { %v6128_v53 = vpop.f32.mrf.mxu1  ;;  %6450 = vmatprep.subr.bf16.mxu1 %v17018_v43  ;;  %v17076_v43 = vld [vmem:[%s25815_s1 + $0x18] ss:$80 sps:$4 sm:$0xff]   ;;  %v17084_v45 = vld [vmem:[%s25815_s1 + $0x97c] ss:$80 sps:$4 sm:$0xff]  }
 0x106   :  { %v20001_v55 = vadd.f32 %v6128_v53, %v6087_v51  ;;  %v6089_v56 = vpop.f32.mrf.mxu0  ;;  %v17090_v51 = vld [vmem:[%s25815_s1 + $0x8dc] ss:$80 sps:$4 sm:$0xff]   ;;  %v17085_v53 = vld [vmem:[%s25815_s1 + $0x1b90] ss:$80 sps:$4 sm:$0xff]  }
 0x107   :  { %v6130_v59 = vpop.f32.mrf.mxu1  ;;  %6410 = vmatpush2.bf16.msra.mxu0 %v17013_v46  ;;  %v17079_v46 = vld [vmem:[%s25815_s1 + $0x1c30] ss:$80 sps:$4 sm:$0xff]   ;;  %v17093_v56 = vld [vmem:[%s25815_s1 + $0x1af4] ss:$80 sps:$4 sm:$0xff]  }
 0x108   :  { %6451 = vmatpush2.bf16.msra.mxu1 %v17016_v48  ;;  %v6090_v60 = vpop.f32.mrf.mxu0  ;;  %6461 = vmatprep.subr.bf16.mxu0 %v17021_v50  ;;  %v17082_v48 = vld [vmem:[%s25815_s1 + $0x978] ss:$80 sps:$4 sm:$0xff]   ;;  %v17087_v50 = vld [vmem:[%s25815_s1 + $0x1b94] ss:$80 sps:$4 sm:$0xff]  }
 0x109   :  { %6514 = vmatprep.subr.bf16.mxu1 %v17024_v54  ;;  %v6131_v63 = vpop.f32.mrf.mxu1  ;;  %v17088_v54 = vld [vmem:[%s25815_s1 + $0x8d8] ss:$80 sps:$4 sm:$0xff]   ;;  %v17099_v60 = vld [vmem:[%s25815_s1 + $0x1a54] ss:$80 sps:$4 sm:$0xff]  }
 0x10a   :  { %6412 = vmatmul.mubr.bf16.vlgmr.msra.gmra.mxu0 %v19362_v8  ;;  %v17094_v59 = vld [vmem:[%s25815_s1 + $0x838] ss:$80 sps:$4 sm:$0xff]  }
 0x10b   :  { %6453 = vmatmul.mubr.bf16.vlgmr.msra.gmra.mxu1 %v19364_v9  ;;  %v20023_v2 = vpop.f32.mrf.mxu1  ;;  %6462 = vmatpush1.bf16.msra.mxu0 %v17019_v57  ;;  %v17096_v57 = vld [vmem:[%s25815_s1 + $0x83c] ss:$80 sps:$4 sm:$0xff]   ;;  %v17100_v63 = vld [vmem:[%s25815_s1 + $0x798] ss:$80 sps:$4 sm:$0xff]  }
 0x10c   :  { %6515 = vmatpush1.bf16.msra.mxu1 %v17022_v58  ;;  %6463 = vmatprep.subr.bf16.mxu0 %v17027_v61  ;;  %v17091_v58 = vld [vmem:[%s25815_s1 + $0x1af0] ss:$80 sps:$4 sm:$0xff]   ;;  %v17102_v61 = vld [vmem:[%s25815_s1 + $0x79c] ss:$80 sps:$4 sm:$0xff]  }
 0x10d   :  { %6516 = vmatprep.subr.bf16.mxu1 %v17030_v62  ;;  %v20031_v5 = vpop.f32.mrf.mxu1  ;;  %6534 = vmatprep.mubr.bf16.mxu1 %v25827_v19  ;;  %v17097_v62 = vld [vmem:[%s25815_s1 + $0x1a50] ss:$80 sps:$4 sm:$0xff]  }
 0x10e   :  { %6493 = vmatprep.mubr.bf16.mxu0 %v19461_v41 }
 0x10f   :  { %v6212_v10 = vpop.f32.mrf.mxu1  ;;  %6464 = vmatpush1.bf16.msra.mxu0 %v17025_v0  ;;  %v17105_v0 = vld [vmem:[%s25815_s1 + $0x19b4] ss:$80 sps:$4 sm:$0xff]  }
 0x110   :  { %6517 = vmatpush1.bf16.msra.mxu1 %v17028_v1  ;;  %6465 = vmatprep.subr.bf16.mxu0 %v17033_v3  ;;  %v17108_v1 = vld [vmem:[%s25815_s1 + $0x6fc] ss:$80 sps:$4 sm:$0xff]   ;;  %v17103_v3 = vld [vmem:[%s25815_s1 + $0x19b0] ss:$80 sps:$4 sm:$0xff]  }
 0x111   :  { %6543 = vmatprep.subr.bf16.mxu1 %v17036_v4  ;;  %v6213_v13 = vpop.f32.mrf.mxu1  ;;  %v17106_v4 = vld [vmem:[%s25815_s1 + $0x6f8] ss:$80 sps:$4 sm:$0xff]  }
 0x112   :  { %v17112_v13 = vld [vmem:[%s25815_s1 + $0x658] ss:$80 sps:$4 sm:$0xff]  }
 0x113   :  { %15294 = vmatmul.mubr.msk.bf16.vlgmr.msra.gmra.mxu1 %vm6047_vm0, %v19399_v21  ;;  %6466 = vmatpush1.bf16.msra.mxu0 %v17031_v6  ;;  %v17111_v6 = vld [vmem:[%s25815_s1 + $0x1914] ss:$80 sps:$4 sm:$0xff]  }
 0x114   :  { %6544 = vmatpush1.bf16.msra.mxu1 %v17034_v7  ;;  %6467 = vmatprep.subr.bf16.mxu0 %v17039_v11  ;;  %v17114_v7 = vld [vmem:[%s25815_s1 + $0x65c] ss:$80 sps:$4 sm:$0xff]  }
 0x115   :  { %6545 = vmatprep.subr.bf16.mxu1 %v17042_v12  ;;  %6575 = vmatprep.mubr.bf16.mxu1 %v19293_v49  ;;  %v17109_v12 = vld [vmem:[%s25815_s1 + $0x1910] ss:$80 sps:$4 sm:$0xff]  }
 0x117   :  { %6468 = vmatpush1.bf16.msra.mxu0 %v17037_v14 }
 0x118   :  { %6546 = vmatpush1.bf16.msra.mxu1 %v17040_v15  ;;  %6469 = vmatprep.subr.bf16.mxu0 %v17045_v16  ;;  %v17117_v15 = vld [vmem:[%s25815_s1 + $0x5bc] ss:$80 sps:$4 sm:$0xff]  }
 0x119   :  { %6547 = vmatprep.subr.bf16.mxu1 %v17048_v17 }
 0x11b   :  { %6470 = vmatpush1.bf16.msra.mxu0 %v17043_v18  ;;  %v17115_v18 = vld [vmem:[%s25815_s1 + $0x5b8] ss:$80 sps:$4 sm:$0xff]  }
 0x11c   :  { %6548 = vmatpush1.bf16.msra.mxu1 %v17046_v20  ;;  %6471 = vmatprep.subr.bf16.mxu0 %v17051_v23  ;;  %v17118_v20 = vld [vmem:[%s25815_s1 + $0xe78] ss:$80 sps:$4 sm:$0xff]  }
 0x11d   :  { %6549 = vmatprep.subr.bf16.mxu1 %v17054_v24  ;;  %v17123_v24 = vld [vmem:[%s25815_s1 + $0x51c] ss:$80 sps:$4 sm:$0xff]  }
 0x11f   :  { %6472 = vmatpush1.bf16.msra.mxu0 %v17049_v25 }
 0x120   :  { %6550 = vmatpush1.bf16.msra.mxu1 %v17052_v26  ;;  %6473 = vmatprep.subr.bf16.mxu0 %v17057_v27  ;;  %v17121_v26 = vld [vmem:[%s25815_s1 + $0x518] ss:$80 sps:$4 sm:$0xff]  }
 0x121   :  { %6551 = vmatprep.subr.bf16.mxu1 %v17060_v28  ;;  %v17124_v27 = vld [vmem:[%s25815_s1 + $0xdd8] ss:$80 sps:$4 sm:$0xff]   ;;  %v17132_v28 = vld [vmem:[%s25815_s1 + $0x187c] ss:$80 sps:$4 sm:$0xff]  }
 0x123   :  { %6474 = vmatpush1.bf16.msra.mxu0 %v17055_v29 }
 0x124   :  { %6552 = vmatpush1.bf16.msra.mxu1 %v17058_v30  ;;  %6475 = vmatprep.subr.bf16.mxu0 %v17063_v31  ;;  %v17127_v31 = vld [vmem:[%s25815_s1 + $0xd38] ss:$80 sps:$4 sm:$0xff]  }
 0x125   :  { %6553 = vmatprep.subr.bf16.mxu1 %v17066_v32  ;;  %v17130_v32 = vld [vmem:[%s25815_s1 + $0x1878] ss:$80 sps:$4 sm:$0xff]  }
 0x127   :  { %6476 = vmatpush1.bf16.msra.mxu0 %v17061_v33  ;;  %v17135_v33 = vld [vmem:[%s25815_s1 + $0xc9c] ss:$80 sps:$4 sm:$0xff]  }
 0x128   :  { %6554 = vmatpush1.bf16.msra.mxu1 %v17064_v34  ;;  %6477 = vmatprep.subr.bf16.mxu0 %v17069_v35  ;;  %v17138_v34 = vld [vmem:[%s25815_s1 + $0x17dc] ss:$80 sps:$4 sm:$0xff]  }
 0x129   :  { %6555 = vmatprep.subr.bf16.mxu1 %v17072_v36 }
 0x12b   :  { %6478 = vmatpush2.bf16.msra.mxu0 %v17067_v37  ;;  %v17133_v37 = vld [vmem:[%s25815_s1 + $0xc98] ss:$80 sps:$4 sm:$0xff]  }
 0x12c   :  { %6556 = vmatpush1.bf16.msra.mxu1 %v17070_v38  ;;  %6479 = vmatprep.subr.bf16.mxu0 %v17075_v39  ;;  %v17136_v38 = vld [vmem:[%s25815_s1 + $0x17d8] ss:$80 sps:$4 sm:$0xff]   ;;  %v17141_v39 = vld [vmem:[%s25815_s1 + $0xbfc] ss:$80 sps:$4 sm:$0xff]  }
 0x12d   :  { %6557 = vmatprep.subr.bf16.mxu1 %v17078_v40  ;;  %v17144_v40 = vld [vmem:[%s25815_s1 + $0x173c] ss:$80 sps:$4 sm:$0xff]  }
 0x12f   :  { %6480 = vmatpush2.bf16.msra.mxu0 %v17073_v42  ;;  %v17139_v42 = vld [vmem:[%s25815_s1 + $0xbf8] ss:$80 sps:$4 sm:$0xff]  }
 0x130   :  { %6558 = vmatpush1.bf16.msra.mxu1 %v17076_v43  ;;  %6481 = vmatprep.subr.bf16.mxu0 %v17081_v44  ;;  %v17142_v43 = vld [vmem:[%s25815_s1 + $0x1738] ss:$80 sps:$4 sm:$0xff]   ;;  %v17147_v44 = vld [vmem:[%s25815_s1 + $0xb5c] ss:$80 sps:$4 sm:$0xff]  }
 0x131   :  { %6559 = vmatprep.subr.bf16.mxu1 %v17084_v45  ;;  %v17150_v45 = vld [vmem:[%s25815_s1 + $0x169c] ss:$80 sps:$4 sm:$0xff]  }
 0x133   :  { %6482 = vmatpush2.bf16.msra.mxu0 %v17079_v46  ;;  %v17145_v46 = vld [vmem:[%s25815_s1 + $0xb58] ss:$80 sps:$4 sm:$0xff]  }
 0x134   :  { %6560 = vmatpush2.bf16.msra.mxu1 %v17082_v48  ;;  %6483 = vmatprep.subr.bf16.mxu0 %v17087_v50  ;;  %v17148_v48 = vld [vmem:[%s25815_s1 + $0x1698] ss:$80 sps:$4 sm:$0xff]   ;;  %v17153_v50 = vld [vmem:[%s25815_s1 + $0xabc] ss:$80 sps:$4 sm:$0xff]  }
 0x135   :  { %6561 = vmatprep.subr.bf16.mxu1 %v17090_v51  ;;  %v17156_v51 = vld [vmem:[%s25815_s1 + $0x15fc] ss:$80 sps:$4 sm:$0xff]  }
 0x137   :  { %6484 = vmatpush2.bf16.msra.mxu0 %v17085_v53  ;;  %v17151_v53 = vld [vmem:[%s25815_s1 + $0xab8] ss:$80 sps:$4 sm:$0xff]  }
 0x138   :  { %6562 = vmatpush2.bf16.msra.mxu1 %v17088_v54  ;;  %6485 = vmatprep.subr.bf16.mxu0 %v17093_v56  ;;  %v17154_v54 = vld [vmem:[%s25815_s1 + $0x15f8] ss:$80 sps:$4 sm:$0xff]   ;;  %v17159_v56 = vld [vmem:[%s25815_s1 + $0xa1c] ss:$80 sps:$4 sm:$0xff]  }
 0x139   :  { %6563 = vmatprep.subr.bf16.mxu1 %v17096_v57  ;;  %v17162_v57 = vld [vmem:[%s25815_s1 + $0x155c] ss:$80 sps:$4 sm:$0xff]  }
 0x13b   :  { %6486 = vmatpush2.bf16.msra.mxu0 %v17091_v58  ;;  %v17157_v58 = vld [vmem:[%s25815_s1 + $0xa18] ss:$80 sps:$4 sm:$0xff]  }
 0x13c   :  { %6564 = vmatpush2.bf16.msra.mxu1 %v17094_v59  ;;  %6487 = vmatprep.subr.bf16.mxu0 %v17099_v60  ;;  %v17160_v59 = vld [vmem:[%s25815_s1 + $0x1558] ss:$80 sps:$4 sm:$0xff]   ;;  %v17165_v60 = vld [vmem:[%s25815_s1 + $0x137c] ss:$80 sps:$4 sm:$0xff]  }
 0x13d   :  { %6565 = vmatprep.subr.bf16.mxu1 %v17102_v61  ;;  %v17168_v61 = vld [vmem:[%s25815_s1 + $0x14bc] ss:$80 sps:$4 sm:$0xff]  }
 0x13f   :  { %6488 = vmatpush2.bf16.msra.mxu0 %v17097_v62  ;;  %v17163_v62 = vld [vmem:[%s25815_s1 + $0x1378] ss:$80 sps:$4 sm:$0xff]  }
 0x140   :  { %6566 = vmatpush2.bf16.msra.mxu1 %v17100_v63  ;;  %6489 = vmatprep.subr.bf16.mxu0 %v17105_v0  ;;  %v17166_v63 = vld [vmem:[%s25815_s1 + $0x14b8] ss:$80 sps:$4 sm:$0xff]   ;;  %v17171_v0 = vld [vmem:[%s25815_s1 + $0x12dc] ss:$80 sps:$4 sm:$0xff]  }
 0x141   :  { %6567 = vmatprep.subr.bf16.mxu1 %v17108_v1  ;;  %v17174_v1 = vld [vmem:[%s25815_s1 + $0x141c] ss:$80 sps:$4 sm:$0xff]  }
 0x142   :  { %v6167_v10 = vpop.f32.mrf.mxu0 }
 0x143   :  { %v6168_v11 = vadd.f32 %v6167_v10, %v19990_v47  ;;  %6490 = vmatpush2.bf16.msra.mxu0 %v17103_v3  ;;  %v17120_v47 = vld [vmem:[%s25815_s1 + $0xe7c] ss:$80 sps:$4 sm:$0xff]   ;;  %v17169_v3 = vld [vmem:[%s25815_s1 + $0x12d8] ss:$80 sps:$4 sm:$0xff]  }
 0x144   :  { %6568 = vmatpush2.bf16.msra.mxu1 %v17106_v4  ;;  %v6169_v14 = vpop.f32.mrf.mxu0  ;;  %6491 = vmatprep.subr.bf16.mxu0 %v17111_v6  ;;  %v17172_v4 = vld [vmem:[%s25815_s1 + $0x1418] ss:$80 sps:$4 sm:$0xff]   ;;  %v17177_v6 = vld [vmem:[%s25815_s1 + $0x123c] ss:$80 sps:$4 sm:$0xff]  }
 0x145   :  { %6569 = vmatprep.subr.bf16.mxu1 %v17114_v7  ;;  %v20208_v16 = vadd.f32 %v20023_v2, %v6168_v11  ;;  %v6170_v17 = vadd.f32 %v6169_v14, %v20001_v55  ;;  %v17126_v2 = vld [vmem:[%s25815_s1 + $0xddc] ss:$80 sps:$4 sm:$0xff]   ;;  %v17175_v10 = vld [vmem:[%s25815_s1 + $0x1238] ss:$80 sps:$4 sm:$0xff]  }
 0x146   :  { %v6171_v23 = vpop.f32.mrf.mxu0  ;;  %v17180_v7 = vld [vmem:[%s25815_s1 + $0x1d7c] ss:$80 sps:$4 sm:$0xff]   ;;  %v17178_v11 = vld [vmem:[%s25815_s1 + $0x1d78] ss:$80 sps:$4 sm:$0xff]  }
 0x147   :  { %v20224_v25 = vadd.f32 %v20031_v5, %v6170_v17  ;;  %6492 = vmatpush2.bf16.msra.mxu0 %v17109_v12  ;;  %v17129_v5 = vld [vmem:[%s25815_s1 + $0xd3c] ss:$80 sps:$4 sm:$0xff]   ;;  %v17181_v14 = vld [vmem:[%s25815_s1 + $0x1198] ss:$80 sps:$4 sm:$0xff]  }
 0x148   :  { %6570 = vmatpush2.bf16.msra.mxu1 %v17112_v13  ;;  %v6172_v55 = vpop.f32.mrf.mxu0  ;;  %6584 = vmatprep.subr.bf16.mxu0 %v17120_v47  ;;  %v17183_v12 = vld [vmem:[%s25815_s1 + $0x119c] ss:$80 sps:$4 sm:$0xff]  }
 0x149   :  { %6571 = vmatprep.subr.bf16.mxu1 %v17117_v15  ;;  %v17186_v13 = vld [vmem:[%s25815_s1 + $0x1cdc] ss:$80 sps:$4 sm:$0xff]   ;;  %v17184_v15 = vld [vmem:[%s25815_s1 + $0x1cd8] ss:$80 sps:$4 sm:$0xff]  }
 0x14a   :  { %6494 = vmatmul.mubr.bf16.vlgmr.msra.gmra.mxu0 %v19578_v22  ;;  %v17189_v47 = vld [vmem:[%s25815_s1 + $0x10fc] ss:$80 sps:$4 sm:$0xff]   ;;  %v17196_v55 = vld [vmem:[%s25815_s1 + $0x1b98] ss:$80 sps:$4 sm:$0xff]  }
 0x14b   :  { %v20239_v29 = vpop.f32.mrf.mxu1  ;;  %6585 = vmatpush1.bf16.msra.mxu0 %v17118_v20  ;;  %6616 = vmatprep.mubr.bf16.mxu0 %v19301_v52  ;;  %v17192_v17 = vld [vmem:[%s25815_s1 + $0x1c3c] ss:$80 sps:$4 sm:$0xff]   ;;  %v17190_v20 = vld [vmem:[%s25815_s1 + $0x1c38] ss:$80 sps:$4 sm:$0xff]  }
 0x14c   :  { %6572 = vmatpush2.bf16.msra.mxu1 %v17115_v18  ;;  %6586 = vmatprep.subr.bf16.mxu0 %v17126_v2  ;;  %v17187_v18 = vld [vmem:[%s25815_s1 + $0x10f8] ss:$80 sps:$4 sm:$0xff]   ;;  %v17195_v23 = vld [vmem:[%s25815_s1 + $0x105c] ss:$80 sps:$4 sm:$0xff]  }
 0x14d   :  { %6573 = vmatprep.subr.bf16.mxu1 %v17123_v24  ;;  %v20241_v30 = vpop.f32.mrf.mxu1  ;;  %v17198_v24 = vld [vmem:[%s25815_s1 + $0x1b9c] ss:$80 sps:$4 sm:$0xff]   ;;  %v17193_v2 = vld [vmem:[%s25815_s1 + $0x1058] ss:$80 sps:$4 sm:$0xff]  }
 0x14f   :  { %v6253_v35 = vpop.f32.mrf.mxu1  ;;  %6587 = vmatpush1.bf16.msra.mxu0 %v17124_v27  ;;  %v17204_v27 = vld [vmem:[%s25815_s1 + $0x1afc] ss:$80 sps:$4 sm:$0xff]  }
 0x150   :  { %6574 = vmatpush2.bf16.msra.mxu1 %v17121_v26  ;;  %6588 = vmatprep.subr.bf16.mxu0 %v17129_v5  ;;  %v17201_v26 = vld [vmem:[%s25815_s1 + $0xfbc] ss:$80 sps:$4 sm:$0xff]   ;;  %v17199_v5 = vld [vmem:[%s25815_s1 + $0xfb8] ss:$80 sps:$4 sm:$0xff]  }
 0x151   :  { %6625 = vmatprep.subr.bf16.mxu1 %v17132_v28  ;;  %v6254_v36 = vpop.f32.mrf.mxu1  ;;  %v17202_v28 = vld [vmem:[%s25815_s1 + $0x1af8] ss:$80 sps:$4 sm:$0xff]  }
 0x152   :  { %v17213_v36 = vld [vmem:[%s25815_s1 + $0x19bc] ss:$80 sps:$4 sm:$0xff]  }
 0x153   :  { %6576 = vmatmul.mubr.bf16.vlgmr.msra.gmra.mxu1 %v19362_v8  ;;  %6589 = vmatpush1.bf16.msra.mxu0 %v17127_v31  ;;  %v17207_v31 = vld [vmem:[%s25815_s1 + $0xf1c] ss:$80 sps:$4 sm:$0xff]  }
 0x154   :  { %6626 = vmatpush1.bf16.msra.mxu1 %v17130_v32  ;;  %6590 = vmatprep.subr.bf16.mxu0 %v17135_v33  ;;  %v17210_v32 = vld [vmem:[%s25815_s1 + $0x1a5c] ss:$80 sps:$4 sm:$0xff]   ;;  %v17205_v33 = vld [vmem:[%s25815_s1 + $0xf18] ss:$80 sps:$4 sm:$0xff]  }
 0x155   :  { %6627 = vmatprep.subr.bf16.mxu1 %v17138_v34  ;;  %6657 = vmatprep.mubr.bf16.mxu1 %v19461_v41  ;;  %v17208_v34 = vld [vmem:[%s25815_s1 + $0x1a58] ss:$80 sps:$4 sm:$0xff]  }
 0x157   :  { %6591 = vmatpush1.bf16.msra.mxu0 %v17133_v37  ;;  %v17216_v37 = vld [vmem:[%s25815_s1 + $0x1ebc] ss:$80 sps:$4 sm:$0xff]  }
 0x158   :  { %6628 = vmatpush1.bf16.msra.mxu1 %v17136_v38  ;;  %6592 = vmatprep.subr.bf16.mxu0 %v17141_v39  ;;  %v17211_v39 = vld [vmem:[%s25815_s1 + $0x19b8] ss:$80 sps:$4 sm:$0xff]  }
 0x159   :  { %6629 = vmatprep.subr.bf16.mxu1 %v17144_v40  ;;  %v17214_v40 = vld [vmem:[%s25815_s1 + $0x1eb8] ss:$80 sps:$4 sm:$0xff]  }
 0x15b   :  { %6593 = vmatpush1.bf16.msra.mxu0 %v17139_v42 }
 0x15c   :  { %6630 = vmatpush1.bf16.msra.mxu1 %v17142_v43  ;;  %6594 = vmatprep.subr.bf16.mxu0 %v17147_v44  ;;  %v17219_v43 = vld [vmem:[%s25815_s1 + $0x191c] ss:$80 sps:$4 sm:$0xff]  }
 0x15d   :  { %6631 = vmatprep.subr.bf16.mxu1 %v17150_v45  ;;  %v17222_v44 = vld [vmem:[%s25815_s1 + $0x1e1c] ss:$80 sps:$4 sm:$0xff]  }
 0x15f   :  { %6595 = vmatpush1.bf16.msra.mxu0 %v17145_v46 }
 0x160   :  { %6632 = vmatpush1.bf16.msra.mxu1 %v17148_v48  ;;  %6596 = vmatprep.subr.bf16.mxu0 %v17153_v50  ;;  %v17217_v48 = vld [vmem:[%s25815_s1 + $0x1918] ss:$80 sps:$4 sm:$0xff]  }
 0x161   :  { %6633 = vmatprep.subr.bf16.mxu1 %v17156_v51  ;;  %v17220_v50 = vld [vmem:[%s25815_s1 + $0x1e18] ss:$80 sps:$4 sm:$0xff]  }
 0x163   :  { %6597 = vmatpush1.bf16.msra.mxu0 %v17151_v53 }
 0x164   :  { %6634 = vmatpush1.bf16.msra.mxu1 %v17154_v54  ;;  %6598 = vmatprep.subr.bf16.mxu0 %v17159_v56  ;;  %v17225_v54 = vld [vmem:[%s25815_s1 + $0x484] ss:$80 sps:$4 sm:$0xff]  }
 0x165   :  { %6635 = vmatprep.subr.bf16.mxu1 %v17162_v57 }
 0x167   :  { %6599 = vmatpush1.bf16.msra.mxu0 %v17157_v58 }
 0x168   :  { %6636 = vmatpush1.bf16.msra.mxu1 %v17160_v59  ;;  %6600 = vmatprep.subr.bf16.mxu0 %v17165_v60 }
 0x169   :  { %6637 = vmatprep.subr.bf16.mxu1 %v17168_v61 }
 0x16b   :  { %6601 = vmatpush2.bf16.msra.mxu0 %v17163_v62  ;;  %v17223_v62 = vld [vmem:[%s25815_s1 + $0x480] ss:$80 sps:$4 sm:$0xff]  }
 0x16c   :  { %6638 = vmatpush1.bf16.msra.mxu1 %v17166_v63  ;;  %6602 = vmatprep.subr.bf16.mxu0 %v17171_v0  ;;  %v17231_v0 = vld [vmem:[%s25815_s1 + $0x3e4] ss:$80 sps:$4 sm:$0xff]  }
 0x16d   :  { %6639 = vmatprep.subr.bf16.mxu1 %v17174_v1 }
 0x16f   :  { %6603 = vmatpush2.bf16.msra.mxu0 %v17169_v3  ;;  %v7692_v3 = vmax.f32 %v20224_v25, 0.0  ;;  %v17432_v25 = vld [vmem:[%s25815_s1 + $0x188c] ss:$80 sps:$4 sm:$0xff]  }
 0x170   :  { %6640 = vmatpush1.bf16.msra.mxu1 %v17172_v4  ;;  %6604 = vmatprep.subr.bf16.mxu0 %v17177_v6 }
 0x171   :  { %6641 = vmatprep.subr.bf16.mxu1 %v17180_v7 }
 0x173   :  { %6605 = vmatpush2.bf16.msra.mxu0 %v17175_v10 }
 0x174   :  { %6642 = vmatpush2.bf16.msra.mxu1 %v17178_v11  ;;  %6606 = vmatprep.subr.bf16.mxu0 %v17183_v12  ;;  %v17229_v12 = vld [vmem:[%s25815_s1 + $0x3e0] ss:$80 sps:$4 sm:$0xff]  }
 0x175   :  { %6643 = vmatprep.subr.bf16.mxu1 %v17186_v13  ;;  %v17234_v13 = vld [vmem:[%s25815_s1 + $0xde4] ss:$80 sps:$4 sm:$0xff]  }
 0x177   :  { %6607 = vmatpush2.bf16.msra.mxu0 %v17181_v14 }
 0x178   :  { %6644 = vmatpush2.bf16.msra.mxu1 %v17184_v15  ;;  %6608 = vmatprep.subr.bf16.mxu0 %v17189_v47  ;;  %v17232_v15 = vld [vmem:[%s25815_s1 + $0xde0] ss:$80 sps:$4 sm:$0xff]   ;;  %v17237_v47 = vld [vmem:[%s25815_s1 + $0x344] ss:$80 sps:$4 sm:$0xff]  }
 0x179   :  { %6645 = vmatprep.subr.bf16.mxu1 %v17192_v17  ;;  %v7691_v17 = vmax.f32 %v20208_v16, 0.0 }
 0x17b   :  { %6609 = vmatpush2.bf16.msra.mxu0 %v17187_v18  ;;  %v17240_v18 = vld [vmem:[%s25815_s1 + $0xd44] ss:$80 sps:$4 sm:$0xff]  }
 0x17c   :  { %6646 = vmatpush2.bf16.msra.mxu1 %v17190_v20  ;;  %6610 = vmatprep.subr.bf16.mxu0 %v17195_v23  ;;  %v17235_v23 = vld [vmem:[%s25815_s1 + $0x340] ss:$80 sps:$4 sm:$0xff]  }
 0x17d   :  { %6647 = vmatprep.subr.bf16.mxu1 %v17198_v24  ;;  %v17238_v24 = vld [vmem:[%s25815_s1 + $0xd40] ss:$80 sps:$4 sm:$0xff]  }
 0x17f   :  { %6611 = vmatpush2.bf16.msra.mxu0 %v17193_v2  ;;  %v17243_v2 = vld [vmem:[%s25815_s1 + $0x2a4] ss:$80 sps:$4 sm:$0xff]  }
 0x180   :  { %6648 = vmatpush2.bf16.msra.mxu1 %v17196_v55  ;;  %6612 = vmatprep.subr.bf16.mxu0 %v17201_v26  ;;  %v17246_v55 = vld [vmem:[%s25815_s1 + $0xca4] ss:$80 sps:$4 sm:$0xff]   ;;  %v17241_v26 = vld [vmem:[%s25815_s1 + $0x2a0] ss:$80 sps:$4 sm:$0xff]  }
 0x181   :  { %6649 = vmatprep.subr.bf16.mxu1 %v17204_v27  ;;  %v17244_v27 = vld [vmem:[%s25815_s1 + $0xca0] ss:$80 sps:$4 sm:$0xff]  }
 0x182   :  { %v6290_v35 = vpop.f32.mrf.mxu0 }
 0x183   :  { %6613 = vmatpush2.bf16.msra.mxu0 %v17199_v5  ;;  %v6291_v46 = vadd.f32 %v6290_v35, %v20239_v29  ;;  %v17228_v29 = vld [vmem:[%s25815_s1 + $0xe84] ss:$80 sps:$4 sm:$0xff]   ;;  %v17253_v35 = vld [vmem:[%s25815_s1 + $0x160] ss:$80 sps:$4 sm:$0xff]  }
 0x184   :  { %6650 = vmatpush2.bf16.msra.mxu1 %v17202_v28  ;;  %v6292_v38 = vpop.f32.mrf.mxu0  ;;  %6614 = vmatprep.subr.bf16.mxu0 %v17207_v31  ;;  %v17249_v5 = vld [vmem:[%s25815_s1 + $0x204] ss:$80 sps:$4 sm:$0xff]   ;;  %v17247_v31 = vld [vmem:[%s25815_s1 + $0x200] ss:$80 sps:$4 sm:$0xff]  }
 0x185   :  { %6651 = vmatprep.subr.bf16.mxu1 %v17210_v32  ;;  %v6293_v56 = vadd.f32 %v6292_v38, %v20241_v30  ;;  %v17226_v30 = vld [vmem:[%s25815_s1 + $0xe80] ss:$80 sps:$4 sm:$0xff]   ;;  %v17252_v28 = vld [vmem:[%s25815_s1 + $0xc04] ss:$80 sps:$4 sm:$0xff]  }
 0x186   :  { %v6294_v42 = vpop.f32.mrf.mxu0  ;;  %v17250_v32 = vld [vmem:[%s25815_s1 + $0xc00] ss:$80 sps:$4 sm:$0xff]   ;;  %v17264_v38 = vld [vmem:[%s25815_s1 + $0xac4] ss:$80 sps:$4 sm:$0xff]  }
 0x187   :  { %6615 = vmatpush2.bf16.msra.mxu0 %v17205_v33  ;;  %v17255_v33 = vld [vmem:[%s25815_s1 + $0x164] ss:$80 sps:$4 sm:$0xff]  }
 0x188   :  { %6652 = vmatpush2.bf16.msra.mxu1 %v17208_v34  ;;  %v6295_v45 = vpop.f32.mrf.mxu0  ;;  %6678 = vmatprep.subr.bf16.mxu0 %v17216_v37  ;;  %v17258_v34 = vld [vmem:[%s25815_s1 + $0xb64] ss:$80 sps:$4 sm:$0xff]  }
 0x189   :  { %6653 = vmatprep.subr.bf16.mxu1 %v17213_v36  ;;  %v17256_v36 = vld [vmem:[%s25815_s1 + $0xb60] ss:$80 sps:$4 sm:$0xff]   ;;  %v17261_v37 = vld [vmem:[%s25815_s1 + $0xc4] ss:$80 sps:$4 sm:$0xff]  }
 0x18a   :  { %v6372_v53 = vpop.f32.mrf.mxu0  ;;  %6617 = vmatmul.mubr.bf16.vlgmr.msra.gmra.mxu0 %v19364_v9  ;;  %v17267_v42 = vld [vmem:[%s25815_s1 + $0x24] ss:$80 sps:$4 sm:$0xff]   ;;  %v17268_v45 = vld [vmem:[%s25815_s1 + $0xa20] ss:$80 sps:$4 sm:$0xff]  }
 0x18b   :  { %v6331_v51 = vpop.f32.mrf.mxu1  ;;  %6679 = vmatpush1.bf16.msra.mxu0 %v17214_v40  ;;  %6698 = vmatprep.mubr.bf16.mxu0 %v25827_v19  ;;  %v17262_v40 = vld [vmem:[%s25815_s1 + $0xac0] ss:$80 sps:$4 sm:$0xff]  }
 0x18c   :  { %v6332_v57 = vadd.f32 %v6331_v51, %v6291_v46  ;;  %6654 = vmatpush2.bf16.msra.mxu1 %v17211_v39  ;;  %v6374_v59 = vpop.f32.mrf.mxu0  ;;  %6680 = vmatprep.subr.bf16.mxu0 %v17222_v44  ;;  %v17259_v39 = vld [vmem:[%s25815_s1 + $0xc0] ss:$80 sps:$4 sm:$0xff]   ;;  %v17273_v46 = vld [vmem:[%s25815_s1 + $0x984] ss:$80 sps:$4 sm:$0xff]  }
 0x18d   :  { %v6333_v58 = vpop.f32.mrf.mxu1  ;;  %6655 = vmatprep.subr.bf16.mxu1 %v17219_v43  ;;  %v17270_v43 = vld [vmem:[%s25815_s1 + $0xa24] ss:$80 sps:$4 sm:$0xff]   ;;  %v17265_v44 = vld [vmem:[%s25815_s1 + $0x20] ss:$80 sps:$4 sm:$0xff]  }
 0x18e   :  { %v20441_v60 = vadd.f32 %v6372_v53, %v6332_v57  ;;  %v6334_v61 = vadd.f32 %v6333_v58, %v6293_v56  ;;  %v6376_v63 = vpop.f32.mrf.mxu0  ;;  %v17274_v51 = vld [vmem:[%s25815_s1 + $0x1380] ss:$80 sps:$4 sm:$0xff]   ;;  %v17279_v53 = vld [vmem:[%s25815_s1 + $0x8e4] ss:$80 sps:$4 sm:$0xff]  }
 0x18f   :  { %v6335_v1 = vpop.f32.mrf.mxu1  ;;  %6681 = vmatpush1.bf16.msra.mxu0 %v17220_v50  ;;  %v17271_v50 = vld [vmem:[%s25815_s1 + $0x980] ss:$80 sps:$4 sm:$0xff]   ;;  %v17285_v57 = vld [vmem:[%s25815_s1 + $0x844] ss:$80 sps:$4 sm:$0xff]  }
 0x190   :  { %v7693_v4 = vmax.f32 %v20441_v60, 0.0  ;;  %v20455_v6 = vadd.f32 %v6374_v59, %v6334_v61  ;;  %6656 = vmatpush2.bf16.msra.mxu1 %v17217_v48  ;;  %v6377_v7 = vpop.f32.mrf.mxu0  ;;  %6707 = vmatprep.subr.bf16.mxu0 %v17225_v54  ;;  %v17276_v48 = vld [vmem:[%s25815_s1 + $0x1384] ss:$80 sps:$4 sm:$0xff]   ;;  %v17280_v56 = vld [vmem:[%s25815_s1 + $0x12e0] ss:$80 sps:$4 sm:$0xff]  }
 0x191   :  { %6748 = vmatprep.subr.bf16.mxu1 %v17228_v29  ;;  %v6336_v10 = vpop.f32.mrf.mxu1  ;;  %v17282_v54 = vld [vmem:[%s25815_s1 + $0x12e4] ss:$80 sps:$4 sm:$0xff]   ;;  %v17277_v29 = vld [vmem:[%s25815_s1 + $0x8e0] ss:$80 sps:$4 sm:$0xff]   ;;  %v17421_v60 = vld [vmem:[%s25815_s1 + $0x528] ss:$80 sps:$4 sm:$0xff]  }
 0x192   :  { %v16548_v11 = vpack.i.bf16 %v7693_v4, %v7692_v3  ;;  %v7694_v14 = vmax.f32 %v20455_v6, 0.0  ;;  %15295 = vmatmul.mubr.msk.bf16.vlgmr.msra.gmra.mxu0 %vm6047_vm0, %v19399_v21  ;;  %v17288_v58 = vld [vmem:[%s25815_s1 + $0x1244] ss:$80 sps:$4 sm:$0xff]   ;;  %v17283_v59 = vld [vmem:[%s25815_s1 + $0x840] ss:$80 sps:$4 sm:$0xff]  }
 0x193   :  { %6658 = vmatmul.mubr.bf16.vlgmr.msra.gmra.mxu1 %v19578_v22  ;;  %6708 = vmatpush1.bf16.msra.mxu0 %v17223_v62  ;;  %v17286_v61 = vld [vmem:[%s25815_s1 + $0x1240] ss:$80 sps:$4 sm:$0xff]   ;;  %v17291_v62 = vld [vmem:[%s25815_s1 + $0x7a4] ss:$80 sps:$4 sm:$0xff]   ;;  %v17738_v6 = vld [vmem:[%s25815_s1 + $0x17fc] ss:$80 sps:$4 sm:$0xff]  }
 0x194   :  { %6749 = vmatpush1.bf16.msra.mxu1 %v17226_v30  ;;  %16549 = vrot.lane.b32.xlu0 %v16548_v11, %s19092_s17  ;;  %v16553_v20 = vpack.i.bf16 %v7691_v17, %v7694_v14  ;;  %v17294_v63 = vld [vmem:[%s25815_s1 + $0x11a4] ss:$80 sps:$4 sm:$0xff]   ;;  %v17289_v30 = vld [vmem:[%s25815_s1 + $0x7a0] ss:$80 sps:$4 sm:$0xff]  }
 0x195   :  { %6709 = vmatprep.subr.bf16.mxu0 %v17231_v0  ;;  %6750 = vmatprep.subr.bf16.mxu1 %v17234_v13  ;;  %v17292_v0 = vld [vmem:[%s25815_s1 + $0x11a0] ss:$80 sps:$4 sm:$0xff]   ;;  %v17297_v1 = vld [vmem:[%s25815_s1 + $0x704] ss:$80 sps:$4 sm:$0xff]  }
 0x196   :  { %6739 = vmatprep.mubr.bf16.mxu0 %v19293_v49  ;;  %6780 = vmatprep.mubr.bf16.mxu1 %v19301_v52  ;;  %v17300_v7 = vld [vmem:[%s25815_s1 + $0x1104] ss:$80 sps:$4 sm:$0xff]   ;;  %v17295_v10 = vld [vmem:[%s25815_s1 + $0x700] ss:$80 sps:$4 sm:$0xff]  }
 0x197   :  { %6710 = vmatpush1.bf16.msra.mxu0 %v17229_v12  ;;  %v17298_v11 = vld [vmem:[%s25815_s1 + $0x1100] ss:$80 sps:$4 sm:$0xff]   ;;  %v17303_v12 = vld [vmem:[%s25815_s1 + $0x664] ss:$80 sps:$4 sm:$0xff]  }
 0x198   :  { %6751 = vmatpush1.bf16.msra.mxu1 %v17232_v15  ;;  %16554 = vrot.lane.b32.xlu0 %v16553_v20, %s19092_s17  ;;  %v17306_v13 = vld [vmem:[%s25815_s1 + $0x1064] ss:$80 sps:$4 sm:$0xff]   ;;  %v17301_v15 = vld [vmem:[%s25815_s1 + $0x660] ss:$80 sps:$4 sm:$0xff]  }
 0x199   :  { %6711 = vmatprep.subr.bf16.mxu0 %v17237_v47  ;;  %6752 = vmatprep.subr.bf16.mxu1 %v17240_v18  ;;  %v17304_v47 = vld [vmem:[%s25815_s1 + $0x1060] ss:$80 sps:$4 sm:$0xff]   ;;  %v17309_v18 = vld [vmem:[%s25815_s1 + $0x5c4] ss:$80 sps:$4 sm:$0xff]  }
 0x19a   :  { %v17312_v20 = vld [vmem:[%s25815_s1 + $0xfc4] ss:$80 sps:$4 sm:$0xff]  }
 0x19b   :  { %6712 = vmatpush1.bf16.msra.mxu0 %v17235_v23  ;;  %v17307_v23 = vld [vmem:[%s25815_s1 + $0x5c0] ss:$80 sps:$4 sm:$0xff]  }
 0x19c   :  { %6753 = vmatpush1.bf16.msra.mxu1 %v17238_v24  ;;  %6713 = vmatprep.subr.bf16.mxu0 %v17243_v2  ;;  %v17310_v24 = vld [vmem:[%s25815_s1 + $0xfc0] ss:$80 sps:$4 sm:$0xff]   ;;  %v17315_v2 = vld [vmem:[%s25815_s1 + $0x524] ss:$80 sps:$4 sm:$0xff]  }
 0x19d   :  { %6754 = vmatprep.subr.bf16.mxu1 %v17246_v55  ;;  %v17318_v55 = vld [vmem:[%s25815_s1 + $0xf24] ss:$80 sps:$4 sm:$0xff]  }
 0x19f   :  { %6714 = vmatpush1.bf16.msra.mxu0 %v17241_v26  ;;  %v17313_v26 = vld [vmem:[%s25815_s1 + $0x520] ss:$80 sps:$4 sm:$0xff]  }
 0x1a0   :  { %6755 = vmatpush1.bf16.msra.mxu1 %v17244_v27  ;;  %6715 = vmatprep.subr.bf16.mxu0 %v17249_v5  ;;  %v17316_v27 = vld [vmem:[%s25815_s1 + $0xf20] ss:$80 sps:$4 sm:$0xff]  }
 0x1a1   :  { %6756 = vmatprep.subr.bf16.mxu1 %v17252_v28 }
 0x1a3   :  { %6716 = vmatpush1.bf16.msra.mxu0 %v17247_v31  ;;  %v17321_v31 = vld [vmem:[%s25815_s1 + $0x1884] ss:$80 sps:$4 sm:$0xff]  }
 0x1a4   :  { %6757 = vmatpush1.bf16.msra.mxu1 %v17250_v32  ;;  %6717 = vmatprep.subr.bf16.mxu0 %v17255_v33  ;;  %v17324_v32 = vld [vmem:[%s25815_s1 + $0x1ec4] ss:$80 sps:$4 sm:$0xff]  }
 0x1a5   :  { %6758 = vmatprep.subr.bf16.mxu1 %v17258_v34 }
 0x1a7   :  { %6718 = vmatpush1.bf16.msra.mxu0 %v17253_v35 }
 0x1a8   :  { %6759 = vmatpush1.bf16.msra.mxu1 %v17256_v36  ;;  %6719 = vmatprep.subr.bf16.mxu0 %v17261_v37  ;;  %v17319_v36 = vld [vmem:[%s25815_s1 + $0x1880] ss:$80 sps:$4 sm:$0xff]  }
 0x1a9   :  { %6760 = vmatprep.subr.bf16.mxu1 %v17264_v38  ;;  %v17322_v37 = vld [vmem:[%s25815_s1 + $0x1ec0] ss:$80 sps:$4 sm:$0xff]  }
 0x1ab   :  { %6720 = vmatpush1.bf16.msra.mxu0 %v17259_v39  ;;  %v17327_v39 = vld [vmem:[%s25815_s1 + $0x17e4] ss:$80 sps:$4 sm:$0xff]  }
 0x1ac   :  { %6761 = vmatpush1.bf16.msra.mxu1 %v17262_v40  ;;  %6721 = vmatprep.subr.bf16.mxu0 %v17267_v42  ;;  %v17330_v40 = vld [vmem:[%s25815_s1 + $0x1e24] ss:$80 sps:$4 sm:$0xff]  }
 0x1ad   :  { %6762 = vmatprep.subr.bf16.mxu1 %v17270_v43 }
 0x1af   :  { %6722 = vmatpush1.bf16.msra.mxu0 %v17265_v44 }
 0x1b0   :  { %6763 = vmatpush1.bf16.msra.mxu1 %v17268_v45  ;;  %6723 = vmatprep.subr.bf16.mxu0 %v17273_v46  ;;  %v17325_v45 = vld [vmem:[%s25815_s1 + $0x17e0] ss:$80 sps:$4 sm:$0xff]  }
 0x1b1   :  { %6764 = vmatprep.subr.bf16.mxu1 %v17276_v48  ;;  %v17328_v46 = vld [vmem:[%s25815_s1 + $0x1e20] ss:$80 sps:$4 sm:$0xff]   ;;  %v17333_v48 = vld [vmem:[%s25815_s1 + $0x1744] ss:$80 sps:$4 sm:$0xff]  }
 0x1b3   :  { %6724 = vmatpush2.bf16.msra.mxu0 %v17271_v50  ;;  %v17336_v50 = vld [vmem:[%s25815_s1 + $0x48c] ss:$80 sps:$4 sm:$0xff]  }
 0x1b4   :  { %6765 = vmatpush2.bf16.msra.mxu1 %v17274_v51  ;;  %6725 = vmatprep.subr.bf16.mxu0 %v17279_v53 }
 0x1b5   :  { %6766 = vmatprep.subr.bf16.mxu1 %v17282_v54  ;;  %v17331_v54 = vld [vmem:[%s25815_s1 + $0x1740] ss:$80 sps:$4 sm:$0xff]  }
 0x1b7   :  { %6726 = vmatpush2.bf16.msra.mxu0 %v17277_v29  ;;  %v17334_v29 = vld [vmem:[%s25815_s1 + $0x488] ss:$80 sps:$4 sm:$0xff]  }
 0x1b8   :  { %6767 = vmatpush2.bf16.msra.mxu1 %v17280_v56  ;;  %6727 = vmatprep.subr.bf16.mxu0 %v17285_v57  ;;  %v17339_v56 = vld [vmem:[%s25815_s1 + $0x16a4] ss:$80 sps:$4 sm:$0xff]   ;;  %v17342_v57 = vld [vmem:[%s25815_s1 + $0x3ec] ss:$80 sps:$4 sm:$0xff]  }
 0x1b9   :  { %6768 = vmatprep.subr.bf16.mxu1 %v17288_v58 }
 0x1bb   :  { %6728 = vmatpush2.bf16.msra.mxu0 %v17283_v59 }
 0x1bc   :  { %6769 = vmatpush2.bf16.msra.mxu1 %v17286_v61  ;;  %6729 = vmatprep.subr.bf16.mxu0 %v17291_v62  ;;  %v17337_v61 = vld [vmem:[%s25815_s1 + $0x16a0] ss:$80 sps:$4 sm:$0xff]   ;;  %v17340_v62 = vld [vmem:[%s25815_s1 + $0x3e8] ss:$80 sps:$4 sm:$0xff]  }
 0x1bd   :  { %6770 = vmatprep.subr.bf16.mxu1 %v17294_v63  ;;  %v17345_v63 = vld [vmem:[%s25815_s1 + $0x1604] ss:$80 sps:$4 sm:$0xff]  }
 0x1bf   :  { %6730 = vmatpush2.bf16.msra.mxu0 %v17289_v30  ;;  %v17348_v30 = vld [vmem:[%s25815_s1 + $0x34c] ss:$80 sps:$4 sm:$0xff]  }
 0x1c0   :  { %6771 = vmatpush2.bf16.msra.mxu1 %v17292_v0  ;;  %6731 = vmatprep.subr.bf16.mxu0 %v17297_v1  ;;  %v17343_v0 = vld [vmem:[%s25815_s1 + $0x1600] ss:$80 sps:$4 sm:$0xff]   ;;  %v17346_v1 = vld [vmem:[%s25815_s1 + $0x348] ss:$80 sps:$4 sm:$0xff]  }
 0x1c1   :  { %6772 = vmatprep.subr.bf16.mxu1 %v17300_v7  ;;  %v17351_v7 = vld [vmem:[%s25815_s1 + $0x1564] ss:$80 sps:$4 sm:$0xff]  }
 0x1c3   :  { %6732 = vmatpush2.bf16.msra.mxu0 %v17295_v10  ;;  %v17354_v10 = vld [vmem:[%s25815_s1 + $0x2ac] ss:$80 sps:$4 sm:$0xff]  }
 0x1c4   :  { %6773 = vmatpush2.bf16.msra.mxu1 %v17298_v11  ;;  %6733 = vmatprep.subr.bf16.mxu0 %v17303_v12  ;;  %v17349_v11 = vld [vmem:[%s25815_s1 + $0x1560] ss:$80 sps:$4 sm:$0xff]   ;;  %v17352_v12 = vld [vmem:[%s25815_s1 + $0x2a8] ss:$80 sps:$4 sm:$0xff]  }
 0x1c5   :  { %6774 = vmatprep.subr.bf16.mxu1 %v17306_v13  ;;  %v17357_v13 = vld [vmem:[%s25815_s1 + $0x14c4] ss:$80 sps:$4 sm:$0xff]  }
 0x1c7   :  { %6734 = vmatpush2.bf16.msra.mxu0 %v17301_v15  ;;  %v17360_v15 = vld [vmem:[%s25815_s1 + $0x20c] ss:$80 sps:$4 sm:$0xff]  }
 0x1c8   :  { %6775 = vmatpush2.bf16.msra.mxu1 %v17304_v47  ;;  %6735 = vmatprep.subr.bf16.mxu0 %v17309_v18  ;;  %v17355_v47 = vld [vmem:[%s25815_s1 + $0x14c0] ss:$80 sps:$4 sm:$0xff]   ;;  %v17358_v18 = vld [vmem:[%s25815_s1 + $0x208] ss:$80 sps:$4 sm:$0xff]  }
 0x1c9   :  { %6776 = vmatprep.subr.bf16.mxu1 %v17312_v20  ;;  %v17363_v20 = vld [vmem:[%s25815_s1 + $0x1424] ss:$80 sps:$4 sm:$0xff]  }
 0x1ca   :  { %v20651_v5 = vpop.f32.mrf.mxu0 }
 0x1cb   :  { %v20653_v28 = vpop.f32.mrf.mxu1  ;;  %6736 = vmatpush2.bf16.msra.mxu0 %v17307_v23  ;;  %v17366_v23 = vld [vmem:[%s25815_s1 + $0x16c] ss:$80 sps:$4 sm:$0xff]  }
 0x1cc   :  { %6777 = vmatpush2.bf16.msra.mxu1 %v17310_v24  ;;  %v6415_v33 = vpop.f32.mrf.mxu0  ;;  %6737 = vmatprep.subr.bf16.mxu0 %v17315_v2  ;;  %v17361_v24 = vld [vmem:[%s25815_s1 + $0x1420] ss:$80 sps:$4 sm:$0xff]   ;;  %v17364_v2 = vld [vmem:[%s25815_s1 + $0x168] ss:$80 sps:$4 sm:$0xff]  }
 0x1cd   :  { %v6456_v34 = vpop.f32.mrf.mxu1  ;;  %6778 = vmatprep.subr.bf16.mxu1 %v17318_v55  ;;  %v17369_v55 = vld [vmem:[%s25815_s1 + $0x1d84] ss:$80 sps:$4 sm:$0xff]  }
 0x1ce   :  { %v20661_v35 = vadd.f32 %v6456_v34, %v6415_v33  ;;  %v6417_v38 = vpop.f32.mrf.mxu0  ;;  %v17378_v33 = vld [vmem:[%s25815_s1 + $0x2c] ss:$80 sps:$4 sm:$0xff]   ;;  %v17373_v34 = vld [vmem:[%s25815_s1 + $0x1ce0] ss:$80 sps:$4 sm:$0xff]  }
 0x1cf   :  { %v6458_v42 = vpop.f32.mrf.mxu1  ;;  %6738 = vmatpush2.bf16.msra.mxu0 %v17313_v26  ;;  %v17372_v26 = vld [vmem:[%s25815_s1 + $0xcc] ss:$80 sps:$4 sm:$0xff]  }
 0x1d0   :  { %6779 = vmatpush2.bf16.msra.mxu1 %v17316_v27  ;;  %v6418_v43 = vpop.f32.mrf.mxu0  ;;  %6789 = vmatprep.subr.bf16.mxu0 %v17321_v31  ;;  %v17367_v27 = vld [vmem:[%s25815_s1 + $0x1d80] ss:$80 sps:$4 sm:$0xff]   ;;  %v17370_v31 = vld [vmem:[%s25815_s1 + $0xc8] ss:$80 sps:$4 sm:$0xff]   ;;  %v17384_v38 = vld [vmem:[%s25815_s1 + $0x98c] ss:$80 sps:$4 sm:$0xff]  }
 0x1d1   :  { %6842 = vmatprep.subr.bf16.mxu1 %v17324_v32  ;;  %v6459_v44 = vpop.f32.mrf.mxu1  ;;  %v17375_v32 = vld [vmem:[%s25815_s1 + $0x1ce4] ss:$80 sps:$4 sm:$0xff]   ;;  %v17390_v43 = vld [vmem:[%s25815_s1 + $0x8ec] ss:$80 sps:$4 sm:$0xff]  }
 0x1d2   :  { %6740 = vmatmul.mubr.bf16.vlgmr.msra.gmra.mxu0 %v19362_v8  ;;  %v17387_v42 = vld [vmem:[%s25815_s1 + $0x1ba4] ss:$80 sps:$4 sm:$0xff]   ;;  %v17385_v44 = vld [vmem:[%s25815_s1 + $0x1ba0] ss:$80 sps:$4 sm:$0xff]  }
 0x1d3   :  { %6781 = vmatmul.mubr.bf16.vlgmr.msra.gmra.mxu1 %v19364_v9  ;;  %v20689_v51 = vpop.f32.mrf.mxu1  ;;  %6790 = vmatpush1.bf16.msra.mxu0 %v17319_v36  ;;  %v17376_v36 = vld [vmem:[%s25815_s1 + $0x28] ss:$80 sps:$4 sm:$0xff]  }
 0x1d4   :  { %6843 = vmatpush1.bf16.msra.mxu1 %v17322_v37  ;;  %6791 = vmatprep.subr.bf16.mxu0 %v17327_v39  ;;  %v17381_v37 = vld [vmem:[%s25815_s1 + $0x1c44] ss:$80 sps:$4 sm:$0xff]   ;;  %v17379_v39 = vld [vmem:[%s25815_s1 + $0x1c40] ss:$80 sps:$4 sm:$0xff]  }
 0x1d5   :  { %6844 = vmatprep.subr.bf16.mxu1 %v17330_v40  ;;  %v20691_v53 = vpop.f32.mrf.mxu1  ;;  %6862 = vmatprep.mubr.bf16.mxu1 %v25827_v19  ;;  %v17382_v40 = vld [vmem:[%s25815_s1 + $0x988] ss:$80 sps:$4 sm:$0xff]  }
 0x1d6   :  { %6821 = vmatprep.mubr.bf16.mxu0 %v19461_v41 }
 0x1d7   :  { %v6540_v58 = vpop.f32.mrf.mxu1  ;;  %6792 = vmatpush1.bf16.msra.mxu0 %v17325_v45  ;;  %v17388_v45 = vld [vmem:[%s25815_s1 + $0x8e8] ss:$80 sps:$4 sm:$0xff]  }
 0x1d8   :  { %6845 = vmatpush1.bf16.msra.mxu1 %v17328_v46  ;;  %6793 = vmatprep.subr.bf16.mxu0 %v17333_v48  ;;  %v17393_v46 = vld [vmem:[%s25815_s1 + $0x1b04] ss:$80 sps:$4 sm:$0xff]   ;;  %v17396_v48 = vld [vmem:[%s25815_s1 + $0x84c] ss:$80 sps:$4 sm:$0xff]   ;;  %v17400_v58 = vld [vmem:[%s25815_s1 + $0x7a8] ss:$80 sps:$4 sm:$0xff]  }
 0x1d9   :  { %6871 = vmatprep.subr.bf16.mxu1 %v17336_v50  ;;  %v6541_v59 = vpop.f32.mrf.mxu1  ;;  %v17391_v50 = vld [vmem:[%s25815_s1 + $0x1b00] ss:$80 sps:$4 sm:$0xff]  }
 0x1da   :  { %v17405_v59 = vld [vmem:[%s25815_s1 + $0x19c4] ss:$80 sps:$4 sm:$0xff]  }
 0x1db   :  { %15296 = vmatmul.mubr.msk.bf16.vlgmr.msra.gmra.mxu1 %vm6047_vm0, %v19399_v21  ;;  %6794 = vmatpush1.bf16.msra.mxu0 %v17331_v54  ;;  %v17394_v54 = vld [vmem:[%s25815_s1 + $0x848] ss:$80 sps:$4 sm:$0xff]  }
 0x1dc   :  { %6872 = vmatpush1.bf16.msra.mxu1 %v17334_v29  ;;  %6795 = vmatprep.subr.bf16.mxu0 %v17339_v56  ;;  %v17399_v29 = vld [vmem:[%s25815_s1 + $0x1a64] ss:$80 sps:$4 sm:$0xff]   ;;  %v17402_v56 = vld [vmem:[%s25815_s1 + $0x7ac] ss:$80 sps:$4 sm:$0xff]  }
 0x1dd   :  { %6873 = vmatprep.subr.bf16.mxu1 %v17342_v57  ;;  %6903 = vmatprep.mubr.bf16.mxu1 %v19293_v49  ;;  %v17397_v57 = vld [vmem:[%s25815_s1 + $0x1a60] ss:$80 sps:$4 sm:$0xff]  }
 0x1df   :  { %6796 = vmatpush1.bf16.msra.mxu0 %v17337_v61  ;;  %v17408_v61 = vld [vmem:[%s25815_s1 + $0x70c] ss:$80 sps:$4 sm:$0xff]  }
 0x1e0   :  { %6874 = vmatpush1.bf16.msra.mxu1 %v17340_v62  ;;  %6797 = vmatprep.subr.bf16.mxu0 %v17345_v63  ;;  %v17403_v62 = vld [vmem:[%s25815_s1 + $0x19c0] ss:$80 sps:$4 sm:$0xff]   ;;  %v17406_v63 = vld [vmem:[%s25815_s1 + $0x708] ss:$80 sps:$4 sm:$0xff]  }
 0x1e1   :  { %6875 = vmatprep.subr.bf16.mxu1 %v17348_v30 }
 0x1e3   :  { %6798 = vmatpush1.bf16.msra.mxu0 %v17343_v0  ;;  %v17411_v0 = vld [vmem:[%s25815_s1 + $0x1924] ss:$80 sps:$4 sm:$0xff]  }
 0x1e4   :  { %6876 = vmatpush1.bf16.msra.mxu1 %v17346_v1  ;;  %6799 = vmatprep.subr.bf16.mxu0 %v17351_v7  ;;  %v17414_v1 = vld [vmem:[%s25815_s1 + $0x66c] ss:$80 sps:$4 sm:$0xff]   ;;  %v6455_v7 = vadd.f32 %v20653_v28, %v20651_v5  ;;  %v17412_v5 = vld [vmem:[%s25815_s1 + $0x668] ss:$80 sps:$4 sm:$0xff]  }
 0x1e5   :  { %6877 = vmatprep.subr.bf16.mxu1 %v17354_v10 }
 0x1e7   :  { %6800 = vmatpush1.bf16.msra.mxu0 %v17349_v11 }
 0x1e8   :  { %6878 = vmatpush1.bf16.msra.mxu1 %v17352_v12  ;;  %6801 = vmatprep.subr.bf16.mxu0 %v17357_v13 }
 0x1e9   :  { %6879 = vmatprep.subr.bf16.mxu1 %v17360_v15 }
 0x1eb   :  { %6802 = vmatpush1.bf16.msra.mxu0 %v17355_v47 }
 0x1ec   :  { %6880 = vmatpush1.bf16.msra.mxu1 %v17358_v18  ;;  %6803 = vmatprep.subr.bf16.mxu0 %v17363_v20  ;;  %v17409_v20 = vld [vmem:[%s25815_s1 + $0x1920] ss:$80 sps:$4 sm:$0xff]  }
 0x1ed   :  { %6881 = vmatprep.subr.bf16.mxu1 %v17366_v23  ;;  %v17417_v23 = vld [vmem:[%s25815_s1 + $0x5cc] ss:$80 sps:$4 sm:$0xff]  }
 0x1ef   :  { %6804 = vmatpush1.bf16.msra.mxu0 %v17361_v24  ;;  %v17420_v24 = vld [vmem:[%s25815_s1 + $0xe8c] ss:$80 sps:$4 sm:$0xff]  }
 0x1f0   :  { %6882 = vmatpush1.bf16.msra.mxu1 %v17364_v2  ;;  %6805 = vmatprep.subr.bf16.mxu0 %v17369_v55 }
 0x1f1   :  { %6883 = vmatprep.subr.bf16.mxu1 %v17372_v26 }
 0x1f3   :  { %6806 = vmatpush2.bf16.msra.mxu0 %v17367_v27 }
 0x1f4   :  { %6884 = vmatpush1.bf16.msra.mxu1 %v17370_v31  ;;  %6807 = vmatprep.subr.bf16.mxu0 %v17375_v32  ;;  %v17415_v31 = vld [vmem:[%s25815_s1 + $0x5c8] ss:$80 sps:$4 sm:$0xff]  }
 0x1f5   :  { %6885 = vmatprep.subr.bf16.mxu1 %v17378_v33  ;;  %v17418_v32 = vld [vmem:[%s25815_s1 + $0xe88] ss:$80 sps:$4 sm:$0xff]  }
 0x1f7   :  { %6808 = vmatpush2.bf16.msra.mxu0 %v17373_v34 }
 0x1f8   :  { %6886 = vmatpush1.bf16.msra.mxu1 %v17376_v36  ;;  %6809 = vmatprep.subr.bf16.mxu0 %v17381_v37 }
 0x1f9   :  { %6887 = vmatprep.subr.bf16.mxu1 %v17384_v38 }
 0x1fb   :  { %6810 = vmatpush2.bf16.msra.mxu0 %v17379_v39  ;;  %v17429_v39 = vld [vmem:[%s25815_s1 + $0xd4c] ss:$80 sps:$4 sm:$0xff]  }
 0x1fc   :  { %6888 = vmatpush2.bf16.msra.mxu1 %v17382_v40  ;;  %6811 = vmatprep.subr.bf16.mxu0 %v17387_v42 }
 0x1fd   :  { %6889 = vmatprep.subr.bf16.mxu1 %v17390_v43  ;;  %v17427_v43 = vld [vmem:[%s25815_s1 + $0xd48] ss:$80 sps:$4 sm:$0xff]  }
 0x1ff   :  { %6812 = vmatpush2.bf16.msra.mxu0 %v17385_v44  ;;  %v17430_v44 = vld [vmem:[%s25815_s1 + $0x1888] ss:$80 sps:$4 sm:$0xff]  }
 0x200   :  { %6890 = vmatpush2.bf16.msra.mxu1 %v17388_v45  ;;  %6813 = vmatprep.subr.bf16.mxu0 %v17393_v46  ;;  %v17435_v45 = vld [vmem:[%s25815_s1 + $0xcac] ss:$80 sps:$4 sm:$0xff]  }
 0x201   :  { %6891 = vmatprep.subr.bf16.mxu1 %v17396_v48  ;;  %v17438_v46 = vld [vmem:[%s25815_s1 + $0x17ec] ss:$80 sps:$4 sm:$0xff]  }
 0x203   :  { %6814 = vmatpush2.bf16.msra.mxu0 %v17391_v50 }
 0x204   :  { %6892 = vmatpush2.bf16.msra.mxu1 %v17394_v54  ;;  %6815 = vmatprep.subr.bf16.mxu0 %v17399_v29  ;;  %v17433_v54 = vld [vmem:[%s25815_s1 + $0xca8] ss:$80 sps:$4 sm:$0xff]  }
 0x205   :  { %6893 = vmatprep.subr.bf16.mxu1 %v17402_v56  ;;  %v17436_v29 = vld [vmem:[%s25815_s1 + $0x17e8] ss:$80 sps:$4 sm:$0xff]   ;;  %v17441_v56 = vld [vmem:[%s25815_s1 + $0xc0c] ss:$80 sps:$4 sm:$0xff]  }
 0x206   :  { %v16550_v30 = vpop.permute.xlu0 %16549 }
 0x207   :  { %6816 = vmatpush2.bf16.msra.mxu0 %v17397_v57  ;;  %v16552_v10 = vunpack.i.h.bf16 %v16550_v30  ;;  %v16551_v11 = vunpack.i.l.bf16 %v16550_v30  ;;  %v17444_v57 = vld [vmem:[%s25815_s1 + $0x174c] ss:$80 sps:$4 sm:$0xff]   ;;  %v17448_v30 = vld [vmem:[%s25815_s1 + $0x16a8] ss:$80 sps:$4 sm:$0xff]  }
 0x208   :  { %6894 = vmatpush2.bf16.msra.mxu1 %v17400_v58  ;;  %6817 = vmatprep.subr.bf16.mxu0 %v17405_v59  ;;  %v17439_v58 = vld [vmem:[%s25815_s1 + $0xc08] ss:$80 sps:$4 sm:$0xff]  }
 0x209   :  { %6895 = vmatprep.subr.bf16.mxu1 %v17408_v61  ;;  %v7728_v33 = vsel %vm7726_vm1, %v16551_v11, %v16552_v10  ;;  %v17442_v59 = vld [vmem:[%s25815_s1 + $0x1748] ss:$80 sps:$4 sm:$0xff]   ;;  %v17447_v61 = vld [vmem:[%s25815_s1 + $0xb6c] ss:$80 sps:$4 sm:$0xff]  }
 0x20a   :  { %v20856_v12 = vpop.permute.xlu0 %16554  ;;  %v6495_v13 = vpop.f32.mrf.mxu0 }
 0x20b   :  { %v16557_v15 = vunpack.i.h.bf16 %v20856_v12  ;;  %v16556_v47 = vunpack.i.l.bf16 %v20856_v12  ;;  %v6496_v18 = vadd.f32 %v6495_v13, %v6455_v7  ;;  %6818 = vmatpush2.bf16.msra.mxu0 %v17403_v62  ;;  %v17450_v62 = vld [vmem:[%s25815_s1 + $0x16ac] ss:$80 sps:$4 sm:$0xff]   ;;  %v17451_v7 = vld [vmem:[%s25815_s1 + $0xac8] ss:$80 sps:$4 sm:$0xff]  }
 0x20c   :  { %6896 = vmatpush2.bf16.msra.mxu1 %v17406_v63  ;;  %v6497_v28 = vpop.f32.mrf.mxu0  ;;  %6819 = vmatprep.subr.bf16.mxu0 %v17411_v0  ;;  %v17445_v63 = vld [vmem:[%s25815_s1 + $0xb68] ss:$80 sps:$4 sm:$0xff]   ;;  %v17453_v0 = vld [vmem:[%s25815_s1 + $0xacc] ss:$80 sps:$4 sm:$0xff]  }
 0x20d   :  { %6897 = vmatprep.subr.bf16.mxu1 %v17414_v1  ;;  %v7729_v2 = vsel %vm7726_vm1, %v16552_v10, %v16556_v47  ;;  %v6498_v55 = vadd.f32 %v6497_v28, %v20661_v35  ;;  %v7727_v26 = vsel %vm7726_vm1, %v16557_v15, %v16551_v11  ;;  %v20878_v27 = vadd.f32 %v20689_v51, %v6496_v18  ;;  %v17423_v35 = vld [vmem:[%s25815_s1 + $0x52c] ss:$80 sps:$4 sm:$0xff]   ;;  %v17454_v10 = vld [vmem:[%s25815_s1 + $0x1608] ss:$80 sps:$4 sm:$0xff]  }
 0x20e   :  { %v6499_v34 = vpop.f32.mrf.mxu0  ;;  %v20889_v36 = vmax.f32 %v7691_v17, %v7727_v26  ;;  %v17426_v51 = vld [vmem:[%s25815_s1 + $0xdec] ss:$80 sps:$4 sm:$0xff]   ;;  %v20903_v16 = vmax.f32 %v7693_v4, %v7729_v2  ;;  %v17424_v4 = vld [vmem:[%s25815_s1 + $0xde8] ss:$80 sps:$4 sm:$0xff]  }
 0x20f   :  { %v20898_v37 = vadd.f32 %v20691_v53, %v6498_v55  ;;  %6820 = vmatpush2.bf16.msra.mxu0 %v17409_v20  ;;  %v7695_v38 = vmax.f32 %v20878_v27, 0.0  ;;  %v20912_v53 = vmax.f32 %v7692_v3, %v7728_v33  ;;  %v17456_v1 = vld [vmem:[%s25815_s1 + $0x160c] ss:$80 sps:$4 sm:$0xff]   ;;  %v17457_v15 = vld [vmem:[%s25815_s1 + $0xa28] ss:$80 sps:$4 sm:$0xff]  }
 0x210   :  { %6898 = vmatpush2.bf16.msra.mxu1 %v17412_v5  ;;  %7746 = vrot.lane.b32.xlu0 %v20889_v36, %s19093_s15  ;;  %v6500_v17 = vpop.f32.mrf.mxu0  ;;  %v17459_v11 = vld [vmem:[%s25815_s1 + $0xa2c] ss:$80 sps:$4 sm:$0xff]   ;;  %v17460_v18 = vld [vmem:[%s25815_s1 + $0x1568] ss:$80 sps:$4 sm:$0xff]   ;;  %v17595_v27 = vld [vmem:[%s25815_s1 + $0x710] ss:$80 sps:$4 sm:$0xff]  }
 0x211   :  { %6899 = vmatprep.subr.bf16.mxu1 %v17417_v23  ;;  %7724 = vrot.lane.b32.xlu1 %v7695_v38, %s19092_s17  ;;  %v16558_v40 = vpack.i.bf16 %v20903_v16, %v20912_v53  ;;  %v17462_v13 = vld [vmem:[%s25815_s1 + $0x156c] ss:$80 sps:$4 sm:$0xff]   ;;  %v17463_v28 = vld [vmem:[%s25815_s1 + $0x1388] ss:$80 sps:$4 sm:$0xff]  }
 0x212   :  { %6912 = vmatprep.subr.bf16.mxu0 %v17420_v24  ;;  %6822 = vmatmul.mubr.bf16.vlgmr.msra.gmra.mxu0 %v19578_v22  ;;  %v17465_v20 = vld [vmem:[%s25815_s1 + $0x138c] ss:$80 sps:$4 sm:$0xff]   ;;  %v17466_v23 = vld [vmem:[%s25815_s1 + $0x14c8] ss:$80 sps:$4 sm:$0xff]  }
 0x213   :  { %v20927_v3 = vpop.f32.mrf.mxu1  ;;  %6913 = vmatpush1.bf16.msra.mxu0 %v17418_v32  ;;  %6944 = vmatprep.mubr.bf16.mxu0 %v19301_v52  ;;  %v17468_v5 = vld [vmem:[%s25815_s1 + $0x14cc] ss:$80 sps:$4 sm:$0xff]   ;;  %v17469_v55 = vld [vmem:[%s25815_s1 + $0x12e8] ss:$80 sps:$4 sm:$0xff]  }
 0x214   :  { %6900 = vmatpush2.bf16.msra.mxu1 %v17415_v31  ;;  %6914 = vmatprep.subr.bf16.mxu0 %v17426_v51  ;;  %v17471_v24 = vld [vmem:[%s25815_s1 + $0x12ec] ss:$80 sps:$4 sm:$0xff]   ;;  %v17472_v26 = vld [vmem:[%s25815_s1 + $0x1428] ss:$80 sps:$4 sm:$0xff]  }
 0x215   :  { %6901 = vmatprep.subr.bf16.mxu1 %v17423_v35  ;;  %v20931_v42 = vpop.f32.mrf.mxu1  ;;  %16559 = vrot.lane.b32.xlu1 %v16558_v40, %s19093_s15  ;;  %v17474_v2 = vld [vmem:[%s25815_s1 + $0x142c] ss:$80 sps:$4 sm:$0xff]   ;;  %v17475_v33 = vld [vmem:[%s25815_s1 + $0x1248] ss:$80 sps:$4 sm:$0xff]  }
 0x216   :  { %v17477_v31 = vld [vmem:[%s25815_s1 + $0x124c] ss:$80 sps:$4 sm:$0xff]   ;;  %v17478_v34 = vld [vmem:[%s25815_s1 + $0x1d88] ss:$80 sps:$4 sm:$0xff]  }
 0x217   :  { %v6581_v48 = vpop.f32.mrf.mxu1  ;;  %6915 = vmatpush1.bf16.msra.mxu0 %v17424_v4  ;;  %v17480_v32 = vld [vmem:[%s25815_s1 + $0x1d8c] ss:$80 sps:$4 sm:$0xff]   ;;  %v17481_v17 = vld [vmem:[%s25815_s1 + $0x11a8] ss:$80 sps:$4 sm:$0xff]  }
 0x218   :  { %6902 = vmatpush2.bf16.msra.mxu1 %v17421_v60  ;;  %6916 = vmatprep.subr.bf16.mxu0 %v17429_v39  ;;  %v17483_v35 = vld [vmem:[%s25815_s1 + $0x11ac] ss:$80 sps:$4 sm:$0xff]   ;;  %v17484_v60 = vld [vmem:[%s25815_s1 + $0x1ce8] ss:$80 sps:$4 sm:$0xff]  }
 0x219   :  { %6953 = vmatprep.subr.bf16.mxu1 %v17432_v25  ;;  %v6582_v50 = vpop.f32.mrf.mxu1  ;;  %v17486_v51 = vld [vmem:[%s25815_s1 + $0x1cec] ss:$80 sps:$4 sm:$0xff]   ;;  %v17487_v25 = vld [vmem:[%s25815_s1 + $0x1108] ss:$80 sps:$4 sm:$0xff]  }
 0x21a   :  { %v17489_v4 = vld [vmem:[%s25815_s1 + $0x110c] ss:$80 sps:$4 sm:$0xff]   ;;  %v17490_v40 = vld [vmem:[%s25815_s1 + $0x1c48] ss:$80 sps:$4 sm:$0xff]  }
 0x21b   :  { %6904 = vmatmul.mubr.bf16.vlgmr.msra.gmra.mxu1 %v19362_v8  ;;  %6917 = vmatpush1.bf16.msra.mxu0 %v17427_v43  ;;  %v17492_v39 = vld [vmem:[%s25815_s1 + $0x1c4c] ss:$80 sps:$4 sm:$0xff]  }
 0x21c   :  { %6954 = vmatpush1.bf16.msra.mxu1 %v17430_v44  ;;  %6918 = vmatprep.subr.bf16.mxu0 %v17435_v45  ;;  %v17495_v43 = vld [vmem:[%s25815_s1 + $0x106c] ss:$80 sps:$4 sm:$0xff]   ;;  %v17493_v45 = vld [vmem:[%s25815_s1 + $0x1068] ss:$80 sps:$4 sm:$0xff]  }
 0x21d   :  { %6955 = vmatprep.subr.bf16.mxu1 %v17438_v46  ;;  %6985 = vmatprep.mubr.bf16.mxu1 %v19461_v41  ;;  %v17498_v44 = vld [vmem:[%s25815_s1 + $0x1bac] ss:$80 sps:$4 sm:$0xff]   ;;  %v17496_v46 = vld [vmem:[%s25815_s1 + $0x1ba8] ss:$80 sps:$4 sm:$0xff]  }
 0x21e   :  { %v17501_v48 = vld [vmem:[%s25815_s1 + $0xfcc] ss:$80 sps:$4 sm:$0xff]  }
 0x21f   :  { %6919 = vmatpush1.bf16.msra.mxu0 %v17433_v54  ;;  %v17504_v50 = vld [vmem:[%s25815_s1 + $0x1b0c] ss:$80 sps:$4 sm:$0xff]   ;;  %v17499_v54 = vld [vmem:[%s25815_s1 + $0xfc8] ss:$80 sps:$4 sm:$0xff]  }
 0x220   :  { %6956 = vmatpush1.bf16.msra.mxu1 %v17436_v29  ;;  %6920 = vmatprep.subr.bf16.mxu0 %v17441_v56  ;;  %v17502_v29 = vld [vmem:[%s25815_s1 + $0x1b08] ss:$80 sps:$4 sm:$0xff]   ;;  %v17507_v56 = vld [vmem:[%s25815_s1 + $0xf2c] ss:$80 sps:$4 sm:$0xff]  }
 0x221   :  { %6957 = vmatprep.subr.bf16.mxu1 %v17444_v57  ;;  %v17510_v57 = vld [vmem:[%s25815_s1 + $0x1a6c] ss:$80 sps:$4 sm:$0xff]  }
 0x223   :  { %6921 = vmatpush1.bf16.msra.mxu0 %v17439_v58 }
 0x224   :  { %6958 = vmatpush1.bf16.msra.mxu1 %v17442_v59  ;;  %6922 = vmatprep.subr.bf16.mxu0 %v17447_v61  ;;  %v17505_v59 = vld [vmem:[%s25815_s1 + $0xf28] ss:$80 sps:$4 sm:$0xff]  }
 0x225   :  { %6959 = vmatprep.subr.bf16.mxu1 %v17450_v62  ;;  %v17508_v61 = vld [vmem:[%s25815_s1 + $0x1a68] ss:$80 sps:$4 sm:$0xff]  }
 0x227   :  { %6923 = vmatpush1.bf16.msra.mxu0 %v17445_v63  ;;  %v17513_v63 = vld [vmem:[%s25815_s1 + $0x19cc] ss:$80 sps:$4 sm:$0xff]  }
 0x228   :  { %6960 = vmatpush1.bf16.msra.mxu1 %v17448_v30  ;;  %6924 = vmatprep.subr.bf16.mxu0 %v17453_v0  ;;  %v17516_v30 = vld [vmem:[%s25815_s1 + $0x1ecc] ss:$80 sps:$4 sm:$0xff]  }
 0x229   :  { %6961 = vmatprep.subr.bf16.mxu1 %v17456_v1  ;;  %v17511_v1 = vld [vmem:[%s25815_s1 + $0x19c8] ss:$80 sps:$4 sm:$0xff]  }
 0x22b   :  { %6925 = vmatpush1.bf16.msra.mxu0 %v17451_v7  ;;  %v17514_v7 = vld [vmem:[%s25815_s1 + $0x1ec8] ss:$80 sps:$4 sm:$0xff]  }
 0x22c   :  { %6962 = vmatpush1.bf16.msra.mxu1 %v17454_v10  ;;  %6926 = vmatprep.subr.bf16.mxu0 %v17459_v11  ;;  %v17519_v11 = vld [vmem:[%s25815_s1 + $0x192c] ss:$80 sps:$4 sm:$0xff]  }
 0x22d   :  { %6963 = vmatprep.subr.bf16.mxu1 %v17462_v13  ;;  %v17522_v13 = vld [vmem:[%s25815_s1 + $0x1e2c] ss:$80 sps:$4 sm:$0xff]  }
 0x22f   :  { %6927 = vmatpush1.bf16.msra.mxu0 %v17457_v15 }
 0x230   :  { %6964 = vmatpush1.bf16.msra.mxu1 %v17460_v18  ;;  %6928 = vmatprep.subr.bf16.mxu0 %v17465_v20  ;;  %v17517_v20 = vld [vmem:[%s25815_s1 + $0x1928] ss:$80 sps:$4 sm:$0xff]  }
 0x231   :  { %6965 = vmatprep.subr.bf16.mxu1 %v17468_v5  ;;  %v17520_v5 = vld [vmem:[%s25815_s1 + $0x1e28] ss:$80 sps:$4 sm:$0xff]  }
 0x233   :  { %6929 = vmatpush2.bf16.msra.mxu0 %v17463_v28 }
 0x234   :  { %6966 = vmatpush1.bf16.msra.mxu1 %v17466_v23  ;;  %6930 = vmatprep.subr.bf16.mxu0 %v17471_v24  ;;  %v17525_v24 = vld [vmem:[%s25815_s1 + $0x494] ss:$80 sps:$4 sm:$0xff]  }
 0x235   :  { %6967 = vmatprep.subr.bf16.mxu1 %v17474_v2  ;;  %v17528_v2 = vld [vmem:[%s25815_s1 + $0xe94] ss:$80 sps:$4 sm:$0xff]  }
 0x237   :  { %6931 = vmatpush2.bf16.msra.mxu0 %v17469_v55 }
 0x238   :  { %6968 = vmatpush1.bf16.msra.mxu1 %v17472_v26  ;;  %6932 = vmatprep.subr.bf16.mxu0 %v17477_v31  ;;  %v17523_v31 = vld [vmem:[%s25815_s1 + $0x490] ss:$80 sps:$4 sm:$0xff]  }
 0x239   :  { %6969 = vmatprep.subr.bf16.mxu1 %v17480_v32  ;;  %v17526_v32 = vld [vmem:[%s25815_s1 + $0xe90] ss:$80 sps:$4 sm:$0xff]  }
 0x23b   :  { %6933 = vmatpush2.bf16.msra.mxu0 %v17475_v33 }
 0x23c   :  { %6970 = vmatpush2.bf16.msra.mxu1 %v17478_v34  ;;  %6934 = vmatprep.subr.bf16.mxu0 %v17483_v35  ;;  %v17531_v34 = vld [vmem:[%s25815_s1 + $0x3f4] ss:$80 sps:$4 sm:$0xff]  }
 0x23d   :  { %6971 = vmatprep.subr.bf16.mxu1 %v17486_v51  ;;  %v17534_v35 = vld [vmem:[%s25815_s1 + $0xdf4] ss:$80 sps:$4 sm:$0xff]  }
 0x23f   :  { %6935 = vmatpush2.bf16.msra.mxu0 %v17481_v17  ;;  %v17529_v17 = vld [vmem:[%s25815_s1 + $0x3f0] ss:$80 sps:$4 sm:$0xff]  }
 0x240   :  { %6972 = vmatpush2.bf16.msra.mxu1 %v17484_v60  ;;  %6936 = vmatprep.subr.bf16.mxu0 %v17489_v4  ;;  %v17532_v60 = vld [vmem:[%s25815_s1 + $0xdf0] ss:$80 sps:$4 sm:$0xff]   ;;  %v17537_v4 = vld [vmem:[%s25815_s1 + $0x354] ss:$80 sps:$4 sm:$0xff]  }
 0x241   :  { %6973 = vmatprep.subr.bf16.mxu1 %v17492_v39  ;;  %v17540_v39 = vld [vmem:[%s25815_s1 + $0xd54] ss:$80 sps:$4 sm:$0xff]  }
 0x243   :  { %6937 = vmatpush2.bf16.msra.mxu0 %v17487_v25  ;;  %v17535_v25 = vld [vmem:[%s25815_s1 + $0x350] ss:$80 sps:$4 sm:$0xff]  }
 0x244   :  { %6974 = vmatpush2.bf16.msra.mxu1 %v17490_v40  ;;  %6938 = vmatprep.subr.bf16.mxu0 %v17495_v43  ;;  %v17538_v40 = vld [vmem:[%s25815_s1 + $0xd50] ss:$80 sps:$4 sm:$0xff]   ;;  %v17543_v43 = vld [vmem:[%s25815_s1 + $0x2b4] ss:$80 sps:$4 sm:$0xff]  }
 0x245   :  { %6975 = vmatprep.subr.bf16.mxu1 %v17498_v44  ;;  %v17546_v44 = vld [vmem:[%s25815_s1 + $0xcb4] ss:$80 sps:$4 sm:$0xff]  }
 0x247   :  { %6939 = vmatpush2.bf16.msra.mxu0 %v17493_v45  ;;  %v17541_v45 = vld [vmem:[%s25815_s1 + $0x2b0] ss:$80 sps:$4 sm:$0xff]  }
 0x248   :  { %6976 = vmatpush2.bf16.msra.mxu1 %v17496_v46  ;;  %6940 = vmatprep.subr.bf16.mxu0 %v17501_v48  ;;  %v17544_v46 = vld [vmem:[%s25815_s1 + $0xcb0] ss:$80 sps:$4 sm:$0xff]   ;;  %v17549_v48 = vld [vmem:[%s25815_s1 + $0x214] ss:$80 sps:$4 sm:$0xff]  }
 0x249   :  { %6977 = vmatprep.subr.bf16.mxu1 %v17504_v50  ;;  %v17552_v50 = vld [vmem:[%s25815_s1 + $0xc14] ss:$80 sps:$4 sm:$0xff]  }
 0x24a   :  { %v21093_v58 = vpop.f32.mrf.mxu0 }
 0x24b   :  { %6941 = vmatpush2.bf16.msra.mxu0 %v17499_v54  ;;  %v17547_v54 = vld [vmem:[%s25815_s1 + $0x210] ss:$80 sps:$4 sm:$0xff]  }
 0x24c   :  { %6978 = vmatpush2.bf16.msra.mxu1 %v17502_v29  ;;  %v21101_v62 = vpop.f32.mrf.mxu0  ;;  %6942 = vmatprep.subr.bf16.mxu0 %v17507_v56  ;;  %v17550_v29 = vld [vmem:[%s25815_s1 + $0xc10] ss:$80 sps:$4 sm:$0xff]   ;;  %v17555_v56 = vld [vmem:[%s25815_s1 + $0x174] ss:$80 sps:$4 sm:$0xff]  }
 0x24d   :  { %6979 = vmatprep.subr.bf16.mxu1 %v17510_v57  ;;  %v17558_v57 = vld [vmem:[%s25815_s1 + $0xb74] ss:$80 sps:$4 sm:$0xff]  }
 0x24e   :  { %v6622_v0 = vpop.f32.mrf.mxu0 }
 0x24f   :  { %6943 = vmatpush2.bf16.msra.mxu0 %v17505_v59  ;;  %v17553_v59 = vld [vmem:[%s25815_s1 + $0x170] ss:$80 sps:$4 sm:$0xff]  }
 0x250   :  { %6980 = vmatpush2.bf16.msra.mxu1 %v17508_v61  ;;  %v6623_v10 = vpop.f32.mrf.mxu0  ;;  %7006 = vmatprep.subr.bf16.mxu0 %v17516_v30  ;;  %v17556_v61 = vld [vmem:[%s25815_s1 + $0xb70] ss:$80 sps:$4 sm:$0xff]   ;;  %v17564_v30 = vld [vmem:[%s25815_s1 + $0xad4] ss:$80 sps:$4 sm:$0xff]  }
 0x251   :  { %6981 = vmatprep.subr.bf16.mxu1 %v17513_v63  ;;  %v17561_v63 = vld [vmem:[%s25815_s1 + $0xd4] ss:$80 sps:$4 sm:$0xff]   ;;  %v17559_v0 = vld [vmem:[%s25815_s1 + $0xd0] ss:$80 sps:$4 sm:$0xff]  }
 0x252   :  { %v21123_v18 = vpop.f32.mrf.mxu0  ;;  %6945 = vmatmul.mubr.bf16.vlgmr.msra.gmra.mxu0 %v19364_v9  ;;  %v17570_v10 = vld [vmem:[%s25815_s1 + $0xa34] ss:$80 sps:$4 sm:$0xff]  }
 0x253   :  { %v21121_v15 = vpop.f32.mrf.mxu1  ;;  %7007 = vmatpush1.bf16.msra.mxu0 %v17514_v7  ;;  %7026 = vmatprep.mubr.bf16.mxu0 %v25827_v19  ;;  %v17567_v7 = vld [vmem:[%s25815_s1 + $0x34] ss:$80 sps:$4 sm:$0xff]  }
 0x254   :  { %6982 = vmatpush2.bf16.msra.mxu1 %v17511_v1  ;;  %v21134_v23 = vpop.f32.mrf.mxu0  ;;  %7008 = vmatprep.subr.bf16.mxu0 %v17522_v13  ;;  %v17562_v1 = vld [vmem:[%s25815_s1 + $0xad0] ss:$80 sps:$4 sm:$0xff]  }
 0x255   :  { %v21132_v28 = vpop.f32.mrf.mxu1  ;;  %6983 = vmatprep.subr.bf16.mxu1 %v17519_v11  ;;  %v17565_v11 = vld [vmem:[%s25815_s1 + $0x30] ss:$80 sps:$4 sm:$0xff]  }
 0x256   :  { %v6704_v55 = vpop.f32.mrf.mxu0  ;;  %v17568_v13 = vld [vmem:[%s25815_s1 + $0xa30] ss:$80 sps:$4 sm:$0xff]  }
 0x257   :  { %v6663_v26 = vpop.f32.mrf.mxu1  ;;  %7009 = vmatpush1.bf16.msra.mxu0 %v17520_v5  ;;  %v17576_v5 = vld [vmem:[%s25815_s1 + $0x1394] ss:$80 sps:$4 sm:$0xff]  }
 0x258   :  { %6984 = vmatpush2.bf16.msra.mxu1 %v17517_v20  ;;  %v6705_v33 = vpop.f32.mrf.mxu0  ;;  %7035 = vmatprep.subr.bf16.mxu0 %v17525_v24  ;;  %v17573_v20 = vld [vmem:[%s25815_s1 + $0x994] ss:$80 sps:$4 sm:$0xff]   ;;  %v17571_v24 = vld [vmem:[%s25815_s1 + $0x990] ss:$80 sps:$4 sm:$0xff]  }
 0x259   :  { %7076 = vmatprep.subr.bf16.mxu1 %v17528_v2  ;;  %v6664_v51 = vpop.f32.mrf.mxu1  ;;  %v17574_v2 = vld [vmem:[%s25815_s1 + $0x1390] ss:$80 sps:$4 sm:$0xff]   ;;  %v17579_v55 = vld [vmem:[%s25815_s1 + $0x8f4] ss:$80 sps:$4 sm:$0xff]  }
 0x25a   :  { %15297 = vmatmul.mubr.msk.bf16.vlgmr.msra.gmra.mxu0 %vm6047_vm0, %v19399_v21  ;;  %v17582_v26 = vld [vmem:[%s25815_s1 + $0x12f4] ss:$80 sps:$4 sm:$0xff]   ;;  %v6621_v51 = vadd.f32 %v21101_v62, %v20931_v42  ;;  %v17589_v62 = vld [vmem:[%s25815_s1 + $0x7b0] ss:$80 sps:$4 sm:$0xff]  }
 0x25b   :  { %6986 = vmatmul.mubr.bf16.vlgmr.msra.gmra.mxu1 %v19578_v22  ;;  %7036 = vmatpush1.bf16.msra.mxu0 %v17523_v31  ;;  %v17577_v31 = vld [vmem:[%s25815_s1 + $0x8f0] ss:$80 sps:$4 sm:$0xff]   ;;  %v17585_v33 = vld [vmem:[%s25815_s1 + $0x854] ss:$80 sps:$4 sm:$0xff]  }
 0x25c   :  { %7077 = vmatpush1.bf16.msra.mxu1 %v17526_v32  ;;  %7037 = vmatprep.subr.bf16.mxu0 %v17531_v34  ;;  %v17580_v32 = vld [vmem:[%s25815_s1 + $0x12f0] ss:$80 sps:$4 sm:$0xff]   ;;  %v17588_v34 = vld [vmem:[%s25815_s1 + $0x1254] ss:$80 sps:$4 sm:$0xff]  }
 0x25d   :  { %7078 = vmatprep.subr.bf16.mxu1 %v17534_v35  ;;  %7067 = vmatprep.mubr.bf16.mxu0 %v19293_v49  ;;  %v6619_v35 = vadd.f32 %v21093_v58, %v20927_v3  ;;  %v17591_v3 = vld [vmem:[%s25815_s1 + $0x7b4] ss:$80 sps:$4 sm:$0xff]  }
 0x25e   :  { %7108 = vmatprep.mubr.bf16.mxu1 %v19301_v52  ;;  %v17594_v42 = vld [vmem:[%s25815_s1 + $0x11b4] ss:$80 sps:$4 sm:$0xff]  }
 0x25f   :  { %7038 = vmatpush1.bf16.msra.mxu0 %v17529_v17  ;;  %v17583_v17 = vld [vmem:[%s25815_s1 + $0x850] ss:$80 sps:$4 sm:$0xff]  }
 0x260   :  { %7079 = vmatpush1.bf16.msra.mxu1 %v17532_v60  ;;  %7039 = vmatprep.subr.bf16.mxu0 %v17537_v4  ;;  %v17586_v60 = vld [vmem:[%s25815_s1 + $0x1250] ss:$80 sps:$4 sm:$0xff]   ;;  %v6660_v4 = vadd.f32 %v21121_v15, %v6619_v35 }
 0x261   :  { %7080 = vmatprep.subr.bf16.mxu1 %v17540_v39  ;;  %v6662_v39 = vadd.f32 %v21132_v28, %v6621_v51  ;;  %v17592_v15 = vld [vmem:[%s25815_s1 + $0x11b0] ss:$80 sps:$4 sm:$0xff]  }
 0x262   :  { %v21295_v28 = vadd.f32 %v21123_v18, %v6660_v4  ;;  %v17633_v4 = vld [vmem:[%s25815_s1 + $0x1754] ss:$80 sps:$4 sm:$0xff]  }
 0x263   :  { %7040 = vmatpush1.bf16.msra.mxu0 %v17535_v25  ;;  %v21298_v25 = vadd.f32 %v21134_v23, %v6662_v39  ;;  %v17636_v39 = vld [vmem:[%s25815_s1 + $0x49c] ss:$80 sps:$4 sm:$0xff]  }
 0x264   :  { %7081 = vmatpush1.bf16.msra.mxu1 %v17538_v40  ;;  %7041 = vmatprep.subr.bf16.mxu0 %v17543_v43  ;;  %v17597_v43 = vld [vmem:[%s25815_s1 + $0x714] ss:$80 sps:$4 sm:$0xff]   ;;  %v7697_v18 = vmax.f32 %v21295_v28, 0.0 }
 0x265   :  { %7082 = vmatprep.subr.bf16.mxu1 %v17546_v44  ;;  %v17600_v44 = vld [vmem:[%s25815_s1 + $0x1114] ss:$80 sps:$4 sm:$0xff]   ;;  %v7698_v23 = vmax.f32 %v21298_v25, 0.0 }
 0x266   :  { %v17909_v25 = vld [vmem:[%s25815_s1 + $0x5e4] ss:$80 sps:$4 sm:$0xff]  }
 0x267   :  { %7042 = vmatpush1.bf16.msra.mxu0 %v17541_v45  ;;  %v17603_v45 = vld [vmem:[%s25815_s1 + $0x674] ss:$80 sps:$4 sm:$0xff]  }
 0x268   :  { %7083 = vmatpush1.bf16.msra.mxu1 %v17544_v46  ;;  %7043 = vmatprep.subr.bf16.mxu0 %v17549_v48  ;;  %v17606_v46 = vld [vmem:[%s25815_s1 + $0x1074] ss:$80 sps:$4 sm:$0xff]   ;;  %v7696_v48 = vmax.f32 %v20898_v37, 0.0 }
 0x269   :  { %7084 = vmatprep.subr.bf16.mxu1 %v17552_v50  ;;  %v17601_v50 = vld [vmem:[%s25815_s1 + $0x670] ss:$80 sps:$4 sm:$0xff]   ;;  %v17915_v37 = vld [vmem:[%s25815_s1 + $0x544] ss:$80 sps:$4 sm:$0xff]  }
 0x26a   :  { %v17918_v28 = vld [vmem:[%s25815_s1 + $0xf44] ss:$80 sps:$4 sm:$0xff]  }
 0x26b   :  { %7044 = vmatpush1.bf16.msra.mxu0 %v17547_v54  ;;  %v17604_v54 = vld [vmem:[%s25815_s1 + $0x1070] ss:$80 sps:$4 sm:$0xff]  }
 0x26c   :  { %7085 = vmatpush1.bf16.msra.mxu1 %v17550_v29  ;;  %7045 = vmatprep.subr.bf16.mxu0 %v17555_v56  ;;  %v16568_v29 = vpack.i.bf16 %v7696_v48, %v7697_v18  ;;  %v17609_v56 = vld [vmem:[%s25815_s1 + $0x5d4] ss:$80 sps:$4 sm:$0xff]  }
 0x26d   :  { %7086 = vmatprep.subr.bf16.mxu1 %v17558_v57  ;;  %v17612_v57 = vld [vmem:[%s25815_s1 + $0xfd4] ss:$80 sps:$4 sm:$0xff]  }
 0x26f   :  { %7046 = vmatpush1.bf16.msra.mxu0 %v17553_v59  ;;  %v17607_v59 = vld [vmem:[%s25815_s1 + $0x5d0] ss:$80 sps:$4 sm:$0xff]  }
 0x270   :  { %7087 = vmatpush1.bf16.msra.mxu1 %v17556_v61  ;;  %7047 = vmatprep.subr.bf16.mxu0 %v17561_v63  ;;  %v17610_v61 = vld [vmem:[%s25815_s1 + $0xfd0] ss:$80 sps:$4 sm:$0xff]   ;;  %v17615_v63 = vld [vmem:[%s25815_s1 + $0x534] ss:$80 sps:$4 sm:$0xff]  }
 0x271   :  { %7088 = vmatprep.subr.bf16.mxu1 %v17564_v30  ;;  %v17618_v30 = vld [vmem:[%s25815_s1 + $0xf34] ss:$80 sps:$4 sm:$0xff]  }
 0x273   :  { %7048 = vmatpush1.bf16.msra.mxu0 %v17559_v0 }
 0x274   :  { %7089 = vmatpush1.bf16.msra.mxu1 %v17562_v1  ;;  %7049 = vmatprep.subr.bf16.mxu0 %v17567_v7 }
 0x275   :  { %7090 = vmatprep.subr.bf16.mxu1 %v17570_v10  ;;  %v17613_v10 = vld [vmem:[%s25815_s1 + $0x530] ss:$80 sps:$4 sm:$0xff]  }
 0x277   :  { %7050 = vmatpush1.bf16.msra.mxu0 %v17565_v11  ;;  %v17616_v11 = vld [vmem:[%s25815_s1 + $0xf30] ss:$80 sps:$4 sm:$0xff]  }
 0x278   :  { %7091 = vmatpush1.bf16.msra.mxu1 %v17568_v13  ;;  %7051 = vmatprep.subr.bf16.mxu0 %v17573_v20 }
 0x279   :  { %7092 = vmatprep.subr.bf16.mxu1 %v17576_v5  ;;  %v17621_v5 = vld [vmem:[%s25815_s1 + $0x1894] ss:$80 sps:$4 sm:$0xff]  }
 0x27b   :  { %7052 = vmatpush2.bf16.msra.mxu0 %v17571_v24  ;;  %v17624_v24 = vld [vmem:[%s25815_s1 + $0x1ed4] ss:$80 sps:$4 sm:$0xff]  }
 0x27c   :  { %7093 = vmatpush2.bf16.msra.mxu1 %v17574_v2  ;;  %7053 = vmatprep.subr.bf16.mxu0 %v17579_v55 }
 0x27d   :  { %7094 = vmatprep.subr.bf16.mxu1 %v17582_v26  ;;  %v17619_v26 = vld [vmem:[%s25815_s1 + $0x1890] ss:$80 sps:$4 sm:$0xff]  }
 0x27f   :  { %7054 = vmatpush2.bf16.msra.mxu0 %v17577_v31  ;;  %v17622_v31 = vld [vmem:[%s25815_s1 + $0x1ed0] ss:$80 sps:$4 sm:$0xff]  }
 0x280   :  { %7095 = vmatpush2.bf16.msra.mxu1 %v17580_v32  ;;  %7055 = vmatprep.subr.bf16.mxu0 %v17585_v33  ;;  %v17627_v33 = vld [vmem:[%s25815_s1 + $0x17f4] ss:$80 sps:$4 sm:$0xff]  }
 0x281   :  { %7096 = vmatprep.subr.bf16.mxu1 %v17588_v34  ;;  %v17630_v34 = vld [vmem:[%s25815_s1 + $0x1e34] ss:$80 sps:$4 sm:$0xff]  }
 0x283   :  { %7056 = vmatpush2.bf16.msra.mxu0 %v17583_v17  ;;  %v21286_v58 = vpop.permute.xlu1 %7724  ;;  %v17625_v17 = vld [vmem:[%s25815_s1 + $0x17f0] ss:$80 sps:$4 sm:$0xff]  }
 0x284   :  { %7097 = vmatpush2.bf16.msra.mxu1 %v17586_v60  ;;  %v21303_v40 = vmax.f32 %v7695_v38, %v21286_v58  ;;  %7057 = vmatprep.subr.bf16.mxu0 %v17591_v3  ;;  %v17598_v38 = vld [vmem:[%s25815_s1 + $0x1110] ss:$80 sps:$4 sm:$0xff]  }
 0x285   :  { %7098 = vmatprep.subr.bf16.mxu1 %v17594_v42  ;;  %v17628_v60 = vld [vmem:[%s25815_s1 + $0x1e30] ss:$80 sps:$4 sm:$0xff]  }
 0x286   :  { %7754 = vrot.lane.b32.xlu1 %v21303_v40, %s19093_s15 }
 0x287   :  { %7058 = vmatpush2.bf16.msra.mxu0 %v17589_v62  ;;  %v17631_v62 = vld [vmem:[%s25815_s1 + $0x1750] ss:$80 sps:$4 sm:$0xff]  }
 0x288   :  { %7099 = vmatpush2.bf16.msra.mxu1 %v17592_v15  ;;  %7059 = vmatprep.subr.bf16.mxu0 %v17597_v43  ;;  %v17634_v15 = vld [vmem:[%s25815_s1 + $0x498] ss:$80 sps:$4 sm:$0xff]   ;;  %v17639_v43 = vld [vmem:[%s25815_s1 + $0x16b4] ss:$80 sps:$4 sm:$0xff]  }
 0x289   :  { %7100 = vmatprep.subr.bf16.mxu1 %v17600_v44  ;;  %v17642_v44 = vld [vmem:[%s25815_s1 + $0x3fc] ss:$80 sps:$4 sm:$0xff]  }
 0x28a   :  { %8461 = vrot.lane.b32.xlu1 %v7698_v23, %s19092_s17 }
 0x28b   :  { %7060 = vmatpush2.bf16.msra.mxu0 %v17595_v27 }
 0x28c   :  { %7101 = vmatpush2.bf16.msra.mxu1 %v17598_v38  ;;  %7061 = vmatprep.subr.bf16.mxu0 %v17603_v45  ;;  %v17637_v38 = vld [vmem:[%s25815_s1 + $0x16b0] ss:$80 sps:$4 sm:$0xff]   ;;  %v17640_v45 = vld [vmem:[%s25815_s1 + $0x3f8] ss:$80 sps:$4 sm:$0xff]  }
 0x28d   :  { %7102 = vmatprep.subr.bf16.mxu1 %v17606_v46  ;;  %v17645_v46 = vld [vmem:[%s25815_s1 + $0x1614] ss:$80 sps:$4 sm:$0xff]  }
 0x28e   :  { %16569 = vrot.lane.b32.xlu1 %v16568_v29, %s19092_s17  ;;  %v17646_v29 = vld [vmem:[%s25815_s1 + $0x358] ss:$80 sps:$4 sm:$0xff]  }
 0x28f   :  { %7062 = vmatpush2.bf16.msra.mxu0 %v17601_v50  ;;  %v17648_v50 = vld [vmem:[%s25815_s1 + $0x35c] ss:$80 sps:$4 sm:$0xff]  }
 0x290   :  { %7103 = vmatpush2.bf16.msra.mxu1 %v17604_v54  ;;  %7063 = vmatprep.subr.bf16.mxu0 %v17609_v56  ;;  %v17643_v54 = vld [vmem:[%s25815_s1 + $0x1610] ss:$80 sps:$4 sm:$0xff]   ;;  %v17651_v56 = vld [vmem:[%s25815_s1 + $0x1574] ss:$80 sps:$4 sm:$0xff]  }
 0x291   :  { %7104 = vmatprep.subr.bf16.mxu1 %v17612_v57  ;;  %v17654_v57 = vld [vmem:[%s25815_s1 + $0x2bc] ss:$80 sps:$4 sm:$0xff]  }
 0x292   :  { %v6741_v0 = vpop.f32.mrf.mxu0 }
 0x293   :  { %v6782_v1 = vpop.f32.mrf.mxu1  ;;  %7064 = vmatpush2.bf16.msra.mxu0 %v17607_v59  ;;  %v17649_v59 = vld [vmem:[%s25815_s1 + $0x1570] ss:$80 sps:$4 sm:$0xff]  }
 0x294   :  { %v21360_v7 = vadd.f32 %v6782_v1, %v6741_v0  ;;  %7105 = vmatpush2.bf16.msra.mxu1 %v17610_v61  ;;  %v21368_v13 = vpop.f32.mrf.mxu0  ;;  %7065 = vmatprep.subr.bf16.mxu0 %v17615_v63  ;;  %v17652_v61 = vld [vmem:[%s25815_s1 + $0x2b8] ss:$80 sps:$4 sm:$0xff]   ;;  %v17657_v63 = vld [vmem:[%s25815_s1 + $0x14d4] ss:$80 sps:$4 sm:$0xff]   ;;  %v17655_v0 = vld [vmem:[%s25815_s1 + $0x14d0] ss:$80 sps:$4 sm:$0xff]  }
 0x295   :  { %v21370_v20 = vpop.f32.mrf.mxu1  ;;  %7106 = vmatprep.subr.bf16.mxu1 %v17618_v30  ;;  %v17660_v30 = vld [vmem:[%s25815_s1 + $0x21c] ss:$80 sps:$4 sm:$0xff]   ;;  %v17658_v1 = vld [vmem:[%s25815_s1 + $0x218] ss:$80 sps:$4 sm:$0xff]  }
 0x296   :  { %v6745_v2 = vpop.f32.mrf.mxu0 }
 0x297   :  { %v6786_v55 = vpop.f32.mrf.mxu1  ;;  %7066 = vmatpush2.bf16.msra.mxu0 %v17613_v10  ;;  %v17663_v10 = vld [vmem:[%s25815_s1 + $0x1434] ss:$80 sps:$4 sm:$0xff]  }
 0x298   :  { %7107 = vmatpush2.bf16.msra.mxu1 %v17616_v11  ;;  %v6746_v32 = vpop.f32.mrf.mxu0  ;;  %7117 = vmatprep.subr.bf16.mxu0 %v17621_v5  ;;  %v17666_v11 = vld [vmem:[%s25815_s1 + $0x17c] ss:$80 sps:$4 sm:$0xff]   ;;  %v17661_v5 = vld [vmem:[%s25815_s1 + $0x1430] ss:$80 sps:$4 sm:$0xff]   ;;  %v17669_v2 = vld [vmem:[%s25815_s1 + $0x1d94] ss:$80 sps:$4 sm:$0xff]  }
 0x299   :  { %7170 = vmatprep.subr.bf16.mxu1 %v17624_v24  ;;  %v6787_v35 = vpop.f32.mrf.mxu1  ;;  %v17664_v24 = vld [vmem:[%s25815_s1 + $0x178] ss:$80 sps:$4 sm:$0xff]   ;;  %v17672_v55 = vld [vmem:[%s25815_s1 + $0xdc] ss:$80 sps:$4 sm:$0xff]   ;;  %v17675_v32 = vld [vmem:[%s25815_s1 + $0x1cf4] ss:$80 sps:$4 sm:$0xff]  }
 0x29a   :  { %7068 = vmatmul.mubr.bf16.vlgmr.msra.gmra.mxu0 %v19362_v8  ;;  %v17676_v35 = vld [vmem:[%s25815_s1 + $0x38] ss:$80 sps:$4 sm:$0xff]  }
 0x29b   :  { %7109 = vmatmul.mubr.bf16.vlgmr.msra.gmra.mxu1 %v19364_v9  ;;  %v21392_v51 = vpop.f32.mrf.mxu1  ;;  %7118 = vmatpush1.bf16.msra.mxu0 %v17619_v26  ;;  %v17667_v26 = vld [vmem:[%s25815_s1 + $0x1d90] ss:$80 sps:$4 sm:$0xff]  }
 0x29c   :  { %7171 = vmatpush1.bf16.msra.mxu1 %v17622_v31  ;;  %7119 = vmatprep.subr.bf16.mxu0 %v17627_v33  ;;  %v17670_v31 = vld [vmem:[%s25815_s1 + $0xd8] ss:$80 sps:$4 sm:$0xff]   ;;  %v17678_v33 = vld [vmem:[%s25815_s1 + $0x3c] ss:$80 sps:$4 sm:$0xff]  }
 0x29d   :  { %7172 = vmatprep.subr.bf16.mxu1 %v17630_v34  ;;  %v21406_v3 = vpop.f32.mrf.mxu1  ;;  %7190 = vmatprep.mubr.bf16.mxu1 %v25827_v19  ;;  %v17673_v34 = vld [vmem:[%s25815_s1 + $0x1cf0] ss:$80 sps:$4 sm:$0xff]  }
 0x29e   :  { %7149 = vmatprep.mubr.bf16.mxu0 %v19461_v41 }
 0x29f   :  { %v6868_v42 = vpop.f32.mrf.mxu1  ;;  %7120 = vmatpush1.bf16.msra.mxu0 %v17625_v17  ;;  %v17681_v17 = vld [vmem:[%s25815_s1 + $0x1c54] ss:$80 sps:$4 sm:$0xff]  }
 0x2a0   :  { %7173 = vmatpush1.bf16.msra.mxu1 %v17628_v60  ;;  %7121 = vmatprep.subr.bf16.mxu0 %v17633_v4  ;;  %v17684_v60 = vld [vmem:[%s25815_s1 + $0x99c] ss:$80 sps:$4 sm:$0xff]   ;;  %v17679_v4 = vld [vmem:[%s25815_s1 + $0x1c50] ss:$80 sps:$4 sm:$0xff]   ;;  %v17687_v42 = vld [vmem:[%s25815_s1 + $0x1bb4] ss:$80 sps:$4 sm:$0xff]  }
 0x2a1   :  { %7199 = vmatprep.subr.bf16.mxu1 %v17636_v39  ;;  %v6869_v27 = vpop.f32.mrf.mxu1  ;;  %v17682_v39 = vld [vmem:[%s25815_s1 + $0x998] ss:$80 sps:$4 sm:$0xff]  }
 0x2a2   :  { %v17696_v27 = vld [vmem:[%s25815_s1 + $0x85c] ss:$80 sps:$4 sm:$0xff]  }
 0x2a3   :  { %15298 = vmatmul.mubr.msk.bf16.vlgmr.msra.gmra.mxu1 %vm6047_vm0, %v19399_v21  ;;  %7122 = vmatpush1.bf16.msra.mxu0 %v17631_v62  ;;  %v17690_v62 = vld [vmem:[%s25815_s1 + $0x8fc] ss:$80 sps:$4 sm:$0xff]  }
 0x2a4   :  { %7200 = vmatpush1.bf16.msra.mxu1 %v17634_v15  ;;  %7123 = vmatprep.subr.bf16.mxu0 %v17639_v43  ;;  %v17685_v15 = vld [vmem:[%s25815_s1 + $0x1bb0] ss:$80 sps:$4 sm:$0xff]   ;;  %v17688_v43 = vld [vmem:[%s25815_s1 + $0x8f8] ss:$80 sps:$4 sm:$0xff]  }
 0x2a5   :  { %7201 = vmatprep.subr.bf16.mxu1 %v17642_v44  ;;  %7231 = vmatprep.mubr.bf16.mxu1 %v19293_v49  ;;  %v17693_v44 = vld [vmem:[%s25815_s1 + $0x1b14] ss:$80 sps:$4 sm:$0xff]  }
 0x2a7   :  { %7124 = vmatpush1.bf16.msra.mxu0 %v17637_v38  ;;  %v17691_v38 = vld [vmem:[%s25815_s1 + $0x1b10] ss:$80 sps:$4 sm:$0xff]  }
 0x2a8   :  { %7202 = vmatpush1.bf16.msra.mxu1 %v17640_v45  ;;  %7125 = vmatprep.subr.bf16.mxu0 %v17645_v46  ;;  %v17694_v45 = vld [vmem:[%s25815_s1 + $0x858] ss:$80 sps:$4 sm:$0xff]   ;;  %v17699_v46 = vld [vmem:[%s25815_s1 + $0x1a74] ss:$80 sps:$4 sm:$0xff]  }
 0x2a9   :  { %7203 = vmatprep.subr.bf16.mxu1 %v17648_v50  ;;  %v17702_v50 = vld [vmem:[%s25815_s1 + $0x7bc] ss:$80 sps:$4 sm:$0xff]  }
 0x2ab   :  { %7126 = vmatpush1.bf16.msra.mxu0 %v17643_v54  ;;  %v17697_v54 = vld [vmem:[%s25815_s1 + $0x1a70] ss:$80 sps:$4 sm:$0xff]  }
 0x2ac   :  { %7204 = vmatpush1.bf16.msra.mxu1 %v17646_v29  ;;  %7127 = vmatprep.subr.bf16.mxu0 %v17651_v56  ;;  %v17700_v29 = vld [vmem:[%s25815_s1 + $0x7b8] ss:$80 sps:$4 sm:$0xff]   ;;  %v17705_v56 = vld [vmem:[%s25815_s1 + $0x19d4] ss:$80 sps:$4 sm:$0xff]  }
 0x2ad   :  { %7205 = vmatprep.subr.bf16.mxu1 %v17654_v57  ;;  %v17708_v57 = vld [vmem:[%s25815_s1 + $0x71c] ss:$80 sps:$4 sm:$0xff]  }
 0x2af   :  { %7128 = vmatpush1.bf16.msra.mxu0 %v17649_v59  ;;  %v17703_v59 = vld [vmem:[%s25815_s1 + $0x19d0] ss:$80 sps:$4 sm:$0xff]  }
 0x2b0   :  { %7206 = vmatpush1.bf16.msra.mxu1 %v17652_v61  ;;  %7129 = vmatprep.subr.bf16.mxu0 %v17657_v63  ;;  %v17706_v61 = vld [vmem:[%s25815_s1 + $0x718] ss:$80 sps:$4 sm:$0xff]   ;;  %v17711_v63 = vld [vmem:[%s25815_s1 + $0x1934] ss:$80 sps:$4 sm:$0xff]  }
 0x2b1   :  { %7207 = vmatprep.subr.bf16.mxu1 %v17660_v30  ;;  %v17714_v30 = vld [vmem:[%s25815_s1 + $0x67c] ss:$80 sps:$4 sm:$0xff]  }
 0x2b3   :  { %7130 = vmatpush1.bf16.msra.mxu0 %v17655_v0 }
 0x2b4   :  { %7208 = vmatpush1.bf16.msra.mxu1 %v17658_v1  ;;  %7131 = vmatprep.subr.bf16.mxu0 %v17663_v10  ;;  %v6785_v1 = vadd.f32 %v21370_v20, %v21368_v13 }
 0x2b5   :  { %7209 = vmatprep.subr.bf16.mxu1 %v17666_v11  ;;  %v17709_v11 = vld [vmem:[%s25815_s1 + $0x1930] ss:$80 sps:$4 sm:$0xff]  }
 0x2b7   :  { %7132 = vmatpush1.bf16.msra.mxu0 %v17661_v5  ;;  %v17712_v5 = vld [vmem:[%s25815_s1 + $0x678] ss:$80 sps:$4 sm:$0xff]  }
 0x2b8   :  { %7210 = vmatpush1.bf16.msra.mxu1 %v17664_v24  ;;  %7133 = vmatprep.subr.bf16.mxu0 %v17669_v2  ;;  %v17717_v2 = vld [vmem:[%s25815_s1 + $0x5dc] ss:$80 sps:$4 sm:$0xff]  }
 0x2b9   :  { %7211 = vmatprep.subr.bf16.mxu1 %v17672_v55 }
 0x2bb   :  { %7134 = vmatpush2.bf16.msra.mxu0 %v17667_v26 }
 0x2bc   :  { %7212 = vmatpush1.bf16.msra.mxu1 %v17670_v31  ;;  %7135 = vmatprep.subr.bf16.mxu0 %v17675_v32  ;;  %v17715_v31 = vld [vmem:[%s25815_s1 + $0x5d8] ss:$80 sps:$4 sm:$0xff]  }
 0x2bd   :  { %7213 = vmatprep.subr.bf16.mxu1 %v17678_v33  ;;  %v17718_v32 = vld [vmem:[%s25815_s1 + $0xe98] ss:$80 sps:$4 sm:$0xff]  }
 0x2bf   :  { %7136 = vmatpush2.bf16.msra.mxu0 %v17673_v34 }
 0x2c0   :  { %7214 = vmatpush1.bf16.msra.mxu1 %v17676_v35  ;;  %7137 = vmatprep.subr.bf16.mxu0 %v17681_v17 }
 0x2c1   :  { %7215 = vmatprep.subr.bf16.mxu1 %v17684_v60 }
 0x2c3   :  { %7138 = vmatpush2.bf16.msra.mxu0 %v17679_v4  ;;  %v17721_v4 = vld [vmem:[%s25815_s1 + $0x538] ss:$80 sps:$4 sm:$0xff]  }
 0x2c4   :  { %7216 = vmatpush2.bf16.msra.mxu1 %v17682_v39  ;;  %7139 = vmatprep.subr.bf16.mxu0 %v17687_v42  ;;  %v17724_v39 = vld [vmem:[%s25815_s1 + $0xdf8] ss:$80 sps:$4 sm:$0xff]   ;;  %v7730_v42 = vsel %vm7726_vm1, %v16556_v47, %v21286_v58 }
 0x2c5   :  { %7217 = vmatprep.subr.bf16.mxu1 %v17690_v62  ;;  %v17729_v62 = vld [vmem:[%s25815_s1 + $0xd5c] ss:$80 sps:$4 sm:$0xff]   ;;  %v21633_v12 = vmax.f32 %v7694_v14, %v7730_v42  ;;  %v17727_v47 = vld [vmem:[%s25815_s1 + $0xd58] ss:$80 sps:$4 sm:$0xff]  }
 0x2c6   :  { %v17730_v58 = vld [vmem:[%s25815_s1 + $0x1898] ss:$80 sps:$4 sm:$0xff]   ;;  %v17783_v42 = vld [vmem:[%s25815_s1 + $0x11bc] ss:$80 sps:$4 sm:$0xff]  }
 0x2c7   :  { %7140 = vmatpush2.bf16.msra.mxu0 %v17685_v15  ;;  %v17732_v15 = vld [vmem:[%s25815_s1 + $0x189c] ss:$80 sps:$4 sm:$0xff]  }
 0x2c8   :  { %7218 = vmatpush2.bf16.msra.mxu1 %v17688_v43  ;;  %7141 = vmatprep.subr.bf16.mxu0 %v17693_v44 }
 0x2c9   :  { %7219 = vmatprep.subr.bf16.mxu1 %v17696_v27  ;;  %v17735_v27 = vld [vmem:[%s25815_s1 + $0xcbc] ss:$80 sps:$4 sm:$0xff]  }
 0x2cb   :  { %7142 = vmatpush2.bf16.msra.mxu0 %v17691_v38  ;;  %v17733_v38 = vld [vmem:[%s25815_s1 + $0xcb8] ss:$80 sps:$4 sm:$0xff]  }
 0x2cc   :  { %7220 = vmatpush2.bf16.msra.mxu1 %v17694_v45  ;;  %7143 = vmatprep.subr.bf16.mxu0 %v17699_v46  ;;  %v17736_v45 = vld [vmem:[%s25815_s1 + $0x17f8] ss:$80 sps:$4 sm:$0xff]   ;;  %v17741_v46 = vld [vmem:[%s25815_s1 + $0xc1c] ss:$80 sps:$4 sm:$0xff]  }
 0x2cd   :  { %7221 = vmatprep.subr.bf16.mxu1 %v17702_v50  ;;  %v17744_v50 = vld [vmem:[%s25815_s1 + $0x175c] ss:$80 sps:$4 sm:$0xff]  }
 0x2cf   :  { %7144 = vmatpush2.bf16.msra.mxu0 %v17697_v54  ;;  %v17739_v54 = vld [vmem:[%s25815_s1 + $0xc18] ss:$80 sps:$4 sm:$0xff]  }
 0x2d0   :  { %7222 = vmatpush2.bf16.msra.mxu1 %v17700_v29  ;;  %7145 = vmatprep.subr.bf16.mxu0 %v17705_v56  ;;  %v17742_v29 = vld [vmem:[%s25815_s1 + $0x1758] ss:$80 sps:$4 sm:$0xff]   ;;  %v17747_v56 = vld [vmem:[%s25815_s1 + $0xb7c] ss:$80 sps:$4 sm:$0xff]  }
 0x2d1   :  { %7223 = vmatprep.subr.bf16.mxu1 %v17708_v57  ;;  %v17750_v57 = vld [vmem:[%s25815_s1 + $0x16bc] ss:$80 sps:$4 sm:$0xff]  }
 0x2d2   :  { %v6823_v0 = vpop.f32.mrf.mxu0 }
 0x2d3   :  { %v6824_v10 = vadd.f32 %v6823_v0, %v21360_v7  ;;  %7146 = vmatpush2.bf16.msra.mxu0 %v17703_v59  ;;  %v17720_v7 = vld [vmem:[%s25815_s1 + $0xe9c] ss:$80 sps:$4 sm:$0xff]   ;;  %v17745_v59 = vld [vmem:[%s25815_s1 + $0xb78] ss:$80 sps:$4 sm:$0xff]  }
 0x2d4   :  { %7224 = vmatpush2.bf16.msra.mxu1 %v17706_v61  ;;  %v6825_v24 = vpop.f32.mrf.mxu0  ;;  %7147 = vmatprep.subr.bf16.mxu0 %v17711_v63  ;;  %v17748_v61 = vld [vmem:[%s25815_s1 + $0x16b8] ss:$80 sps:$4 sm:$0xff]   ;;  %v17753_v63 = vld [vmem:[%s25815_s1 + $0xadc] ss:$80 sps:$4 sm:$0xff]  }
 0x2d5   :  { %7225 = vmatprep.subr.bf16.mxu1 %v17714_v30  ;;  %v21585_v13 = vadd.f32 %v21392_v51, %v6824_v10  ;;  %v6826_v20 = vadd.f32 %v6825_v24, %v6785_v1  ;;  %v17723_v51 = vld [vmem:[%s25815_s1 + $0x53c] ss:$80 sps:$4 sm:$0xff]   ;;  %v17751_v0 = vld [vmem:[%s25815_s1 + $0xad8] ss:$80 sps:$4 sm:$0xff]  }
 0x2d6   :  { %v6827_v55 = vpop.f32.mrf.mxu0  ;;  %v17756_v30 = vld [vmem:[%s25815_s1 + $0x161c] ss:$80 sps:$4 sm:$0xff]   ;;  %v17754_v1 = vld [vmem:[%s25815_s1 + $0x1618] ss:$80 sps:$4 sm:$0xff]  }
 0x2d7   :  { %v21588_v26 = vadd.f32 %v21406_v3, %v6826_v20  ;;  %7148 = vmatpush2.bf16.msra.mxu0 %v17709_v11  ;;  %v17726_v3 = vld [vmem:[%s25815_s1 + $0xdfc] ss:$80 sps:$4 sm:$0xff]   ;;  %v7699_v34 = vmax.f32 %v21585_v13, 0.0  ;;  %v17760_v24 = vld [vmem:[%s25815_s1 + $0x1578] ss:$80 sps:$4 sm:$0xff]  }
 0x2d8   :  { %7226 = vmatpush2.bf16.msra.mxu1 %v17712_v5  ;;  %v6828_v33 = vpop.f32.mrf.mxu0  ;;  %7240 = vmatprep.subr.bf16.mxu0 %v17720_v7  ;;  %v17759_v10 = vld [vmem:[%s25815_s1 + $0xa3c] ss:$80 sps:$4 sm:$0xff]   ;;  %v17757_v5 = vld [vmem:[%s25815_s1 + $0xa38] ss:$80 sps:$4 sm:$0xff]  }
 0x2d9   :  { %7227 = vmatprep.subr.bf16.mxu1 %v17717_v2  ;;  %v7700_v35 = vmax.f32 %v21588_v26, 0.0  ;;  %v17762_v11 = vld [vmem:[%s25815_s1 + $0x157c] ss:$80 sps:$4 sm:$0xff]   ;;  %v17763_v20 = vld [vmem:[%s25815_s1 + $0x1398] ss:$80 sps:$4 sm:$0xff]  }
 0x2da   :  { %7150 = vmatmul.mubr.bf16.vlgmr.msra.gmra.mxu0 %v19578_v22  ;;  %v17765_v2 = vld [vmem:[%s25815_s1 + $0x139c] ss:$80 sps:$4 sm:$0xff]   ;;  %v17766_v55 = vld [vmem:[%s25815_s1 + $0x14d8] ss:$80 sps:$4 sm:$0xff]   ;;  %v17904_v26 = vld [vmem:[%s25815_s1 + $0x1080] ss:$80 sps:$4 sm:$0xff]  }
 0x2db   :  { %v21605_v17 = vpop.f32.mrf.mxu1  ;;  %7241 = vmatpush1.bf16.msra.mxu0 %v17718_v32  ;;  %v16563_v60 = vpack.i.bf16 %v7700_v35, %v7699_v34  ;;  %7272 = vmatprep.mubr.bf16.mxu0 %v19301_v52  ;;  %v17768_v7 = vld [vmem:[%s25815_s1 + $0x14dc] ss:$80 sps:$4 sm:$0xff]   ;;  %v17769_v33 = vld [vmem:[%s25815_s1 + $0x12f8] ss:$80 sps:$4 sm:$0xff]  }
 0x2dc   :  { %7228 = vmatpush2.bf16.msra.mxu1 %v17715_v31  ;;  %7242 = vmatprep.subr.bf16.mxu0 %v17726_v3  ;;  %v17771_v31 = vld [vmem:[%s25815_s1 + $0x12fc] ss:$80 sps:$4 sm:$0xff]  }
 0x2dd   :  { %7229 = vmatprep.subr.bf16.mxu1 %v17723_v51  ;;  %v21627_v43 = vpop.f32.mrf.mxu1  ;;  %16564 = vrot.lane.b32.xlu0 %v16563_v60, %s19092_s17  ;;  %v17774_v32 = vld [vmem:[%s25815_s1 + $0x143c] ss:$80 sps:$4 sm:$0xff]   ;;  %v17772_v51 = vld [vmem:[%s25815_s1 + $0x1438] ss:$80 sps:$4 sm:$0xff]  }
 0x2de   :  { %v17777_v3 = vld [vmem:[%s25815_s1 + $0x125c] ss:$80 sps:$4 sm:$0xff]  }
 0x2df   :  { %v6909_v44 = vpop.f32.mrf.mxu1  ;;  %7243 = vmatpush1.bf16.msra.mxu0 %v17724_v39  ;;  %v17780_v60 = vld [vmem:[%s25815_s1 + $0x1d9c] ss:$80 sps:$4 sm:$0xff]   ;;  %v17778_v39 = vld [vmem:[%s25815_s1 + $0x1d98] ss:$80 sps:$4 sm:$0xff]  }
 0x2e0   :  { %7230 = vmatpush2.bf16.msra.mxu1 %v17721_v4  ;;  %7244 = vmatprep.subr.bf16.mxu0 %v17729_v62  ;;  %v17775_v4 = vld [vmem:[%s25815_s1 + $0x1258] ss:$80 sps:$4 sm:$0xff]   ;;  %v17786_v62 = vld [vmem:[%s25815_s1 + $0x1cfc] ss:$80 sps:$4 sm:$0xff]  }
 0x2e1   :  { %7281 = vmatprep.subr.bf16.mxu1 %v17732_v15  ;;  %v6910_v14 = vpop.f32.mrf.mxu1  ;;  %7752 = vrot.lane.b32.xlu0 %v21633_v12, %s19093_s15  ;;  %v17781_v15 = vld [vmem:[%s25815_s1 + $0x11b8] ss:$80 sps:$4 sm:$0xff]  }
 0x2e2   :  { %v17784_v44 = vld [vmem:[%s25815_s1 + $0x1cf8] ss:$80 sps:$4 sm:$0xff]   ;;  %v17795_v14 = vld [vmem:[%s25815_s1 + $0x107c] ss:$80 sps:$4 sm:$0xff]  }
 0x2e3   :  { %7232 = vmatmul.mubr.bf16.vlgmr.msra.gmra.mxu1 %v19362_v8  ;;  %7245 = vmatpush1.bf16.msra.mxu0 %v17727_v47  ;;  %v17789_v47 = vld [vmem:[%s25815_s1 + $0x111c] ss:$80 sps:$4 sm:$0xff]  }
 0x2e4   :  { %7282 = vmatpush1.bf16.msra.mxu1 %v17730_v58  ;;  %7246 = vmatprep.subr.bf16.mxu0 %v17735_v27  ;;  %v17792_v58 = vld [vmem:[%s25815_s1 + $0x1c5c] ss:$80 sps:$4 sm:$0xff]   ;;  %v17787_v27 = vld [vmem:[%s25815_s1 + $0x1118] ss:$80 sps:$4 sm:$0xff]  }
 0x2e5   :  { %7283 = vmatprep.subr.bf16.mxu1 %v17738_v6  ;;  %7313 = vmatprep.mubr.bf16.mxu1 %v19461_v41  ;;  %v17790_v6 = vld [vmem:[%s25815_s1 + $0x1c58] ss:$80 sps:$4 sm:$0xff]  }
 0x2e7   :  { %7247 = vmatpush1.bf16.msra.mxu0 %v17733_v38  ;;  %v17798_v38 = vld [vmem:[%s25815_s1 + $0x1bbc] ss:$80 sps:$4 sm:$0xff]  }
 0x2e8   :  { %7284 = vmatpush1.bf16.msra.mxu1 %v17736_v45  ;;  %7248 = vmatprep.subr.bf16.mxu0 %v17741_v46  ;;  %v17793_v45 = vld [vmem:[%s25815_s1 + $0x1078] ss:$80 sps:$4 sm:$0xff]  }
 0x2e9   :  { %7285 = vmatprep.subr.bf16.mxu1 %v17744_v50  ;;  %v17796_v46 = vld [vmem:[%s25815_s1 + $0x1bb8] ss:$80 sps:$4 sm:$0xff]   ;;  %v17801_v50 = vld [vmem:[%s25815_s1 + $0xfdc] ss:$80 sps:$4 sm:$0xff]  }
 0x2eb   :  { %7249 = vmatpush1.bf16.msra.mxu0 %v17739_v54  ;;  %v17804_v54 = vld [vmem:[%s25815_s1 + $0x1b1c] ss:$80 sps:$4 sm:$0xff]  }
 0x2ec   :  { %7286 = vmatpush1.bf16.msra.mxu1 %v17742_v29  ;;  %7250 = vmatprep.subr.bf16.mxu0 %v17747_v56  ;;  %v17799_v29 = vld [vmem:[%s25815_s1 + $0xfd8] ss:$80 sps:$4 sm:$0xff]  }
 0x2ed   :  { %7287 = vmatprep.subr.bf16.mxu1 %v17750_v57  ;;  %v17802_v56 = vld [vmem:[%s25815_s1 + $0x1b18] ss:$80 sps:$4 sm:$0xff]   ;;  %v17807_v57 = vld [vmem:[%s25815_s1 + $0xf3c] ss:$80 sps:$4 sm:$0xff]  }
 0x2ef   :  { %7251 = vmatpush1.bf16.msra.mxu0 %v17745_v59  ;;  %v17810_v59 = vld [vmem:[%s25815_s1 + $0x1a7c] ss:$80 sps:$4 sm:$0xff]  }
 0x2f0   :  { %7288 = vmatpush1.bf16.msra.mxu1 %v17748_v61  ;;  %7252 = vmatprep.subr.bf16.mxu0 %v17753_v63 }
 0x2f1   :  { %7289 = vmatprep.subr.bf16.mxu1 %v17756_v30  ;;  %v17805_v30 = vld [vmem:[%s25815_s1 + $0xf38] ss:$80 sps:$4 sm:$0xff]  }
 0x2f3   :  { %7253 = vmatpush1.bf16.msra.mxu0 %v17751_v0  ;;  %v17808_v0 = vld [vmem:[%s25815_s1 + $0x1a78] ss:$80 sps:$4 sm:$0xff]  }
 0x2f4   :  { %7290 = vmatpush1.bf16.msra.mxu1 %v17754_v1  ;;  %7254 = vmatprep.subr.bf16.mxu0 %v17759_v10  ;;  %v17813_v10 = vld [vmem:[%s25815_s1 + $0x19dc] ss:$80 sps:$4 sm:$0xff]  }
 0x2f5   :  { %7291 = vmatprep.subr.bf16.mxu1 %v17762_v11 }
 0x2f7   :  { %7255 = vmatpush1.bf16.msra.mxu0 %v17757_v5 }
 0x2f8   :  { %7292 = vmatpush1.bf16.msra.mxu1 %v17760_v24  ;;  %7256 = vmatprep.subr.bf16.mxu0 %v17765_v2  ;;  %v17811_v24 = vld [vmem:[%s25815_s1 + $0x19d8] ss:$80 sps:$4 sm:$0xff]  }
 0x2f9   :  { %7293 = vmatprep.subr.bf16.mxu1 %v17768_v7  ;;  %v17814_v2 = vld [vmem:[%s25815_s1 + $0x1ed8] ss:$80 sps:$4 sm:$0xff]  }
 0x2fb   :  { %7257 = vmatpush2.bf16.msra.mxu0 %v17763_v20  ;;  %v17819_v20 = vld [vmem:[%s25815_s1 + $0x193c] ss:$80 sps:$4 sm:$0xff]  }
 0x2fc   :  { %7294 = vmatpush1.bf16.msra.mxu1 %v17766_v55  ;;  %7258 = vmatprep.subr.bf16.mxu0 %v17771_v31 }
 0x2fd   :  { %7295 = vmatprep.subr.bf16.mxu1 %v17774_v32 }
 0x2ff   :  { %7259 = vmatpush2.bf16.msra.mxu0 %v17769_v33  ;;  %v17817_v33 = vld [vmem:[%s25815_s1 + $0x1938] ss:$80 sps:$4 sm:$0xff]  }
 0x300   :  { %7296 = vmatpush1.bf16.msra.mxu1 %v17772_v51  ;;  %7260 = vmatprep.subr.bf16.mxu0 %v17777_v3  ;;  %v17820_v51 = vld [vmem:[%s25815_s1 + $0x1e38] ss:$80 sps:$4 sm:$0xff]  }
 0x301   :  { %7297 = vmatprep.subr.bf16.mxu1 %v17780_v60 }
 0x303   :  { %7261 = vmatpush2.bf16.msra.mxu0 %v17775_v4  ;;  %v17825_v4 = vld [vmem:[%s25815_s1 + $0x4a4] ss:$80 sps:$4 sm:$0xff]  }
 0x304   :  { %7298 = vmatpush2.bf16.msra.mxu1 %v17778_v39  ;;  %7262 = vmatprep.subr.bf16.mxu0 %v17783_v42  ;;  %v17828_v39 = vld [vmem:[%s25815_s1 + $0xea4] ss:$80 sps:$4 sm:$0xff]  }
 0x305   :  { %7299 = vmatprep.subr.bf16.mxu1 %v17786_v62 }
 0x307   :  { %7263 = vmatpush2.bf16.msra.mxu0 %v17781_v15 }
 0x308   :  { %7300 = vmatpush2.bf16.msra.mxu1 %v17784_v44  ;;  %7264 = vmatprep.subr.bf16.mxu0 %v17789_v47 }
 0x309   :  { %7301 = vmatprep.subr.bf16.mxu1 %v17792_v58  ;;  %v17823_v58 = vld [vmem:[%s25815_s1 + $0x4a0] ss:$80 sps:$4 sm:$0xff]  }
 0x30b   :  { %7265 = vmatpush2.bf16.msra.mxu0 %v17787_v27  ;;  %v17826_v27 = vld [vmem:[%s25815_s1 + $0xea0] ss:$80 sps:$4 sm:$0xff]  }
 0x30c   :  { %7302 = vmatpush2.bf16.msra.mxu1 %v17790_v6  ;;  %7266 = vmatprep.subr.bf16.mxu0 %v17795_v14  ;;  %v17831_v14 = vld [vmem:[%s25815_s1 + $0x404] ss:$80 sps:$4 sm:$0xff]  }
 0x30d   :  { %7303 = vmatprep.subr.bf16.mxu1 %v17798_v38  ;;  %v17834_v38 = vld [vmem:[%s25815_s1 + $0xe04] ss:$80 sps:$4 sm:$0xff]  }
 0x30f   :  { %7267 = vmatpush2.bf16.msra.mxu0 %v17793_v45 }
 0x310   :  { %7304 = vmatpush2.bf16.msra.mxu1 %v17796_v46  ;;  %7268 = vmatprep.subr.bf16.mxu0 %v17801_v50  ;;  %v17829_v46 = vld [vmem:[%s25815_s1 + $0x400] ss:$80 sps:$4 sm:$0xff]  }
 0x311   :  { %7305 = vmatprep.subr.bf16.mxu1 %v17804_v54  ;;  %v17832_v50 = vld [vmem:[%s25815_s1 + $0xe00] ss:$80 sps:$4 sm:$0xff]   ;;  %v17837_v54 = vld [vmem:[%s25815_s1 + $0x364] ss:$80 sps:$4 sm:$0xff]  }
 0x312   :  { %v6946_v61 = vpop.f32.mrf.mxu0 }
 0x313   :  { %v6947_v63 = vadd.f32 %v6946_v61, %v21605_v17  ;;  %7269 = vmatpush2.bf16.msra.mxu0 %v17799_v29  ;;  %v17816_v17 = vld [vmem:[%s25815_s1 + $0x1edc] ss:$80 sps:$4 sm:$0xff]   ;;  %v17840_v29 = vld [vmem:[%s25815_s1 + $0xd64] ss:$80 sps:$4 sm:$0xff]  }
 0x314   :  { %7306 = vmatpush2.bf16.msra.mxu1 %v17802_v56  ;;  %v6948_v1 = vpop.f32.mrf.mxu0  ;;  %7270 = vmatprep.subr.bf16.mxu0 %v17807_v57  ;;  %v17835_v56 = vld [vmem:[%s25815_s1 + $0x360] ss:$80 sps:$4 sm:$0xff]   ;;  %v17846_v61 = vld [vmem:[%s25815_s1 + $0xcc4] ss:$80 sps:$4 sm:$0xff]  }
 0x315   :  { %7307 = vmatprep.subr.bf16.mxu1 %v17810_v59  ;;  %v6949_v11 = vadd.f32 %v6948_v1, %v21627_v43  ;;  %v17822_v43 = vld [vmem:[%s25815_s1 + $0x1e3c] ss:$80 sps:$4 sm:$0xff]   ;;  %v17838_v57 = vld [vmem:[%s25815_s1 + $0xd60] ss:$80 sps:$4 sm:$0xff]   ;;  %v17843_v59 = vld [vmem:[%s25815_s1 + $0x2c4] ss:$80 sps:$4 sm:$0xff]  }
 0x316   :  { %v6950_v5 = vpop.f32.mrf.mxu0  ;;  %v17852_v1 = vld [vmem:[%s25815_s1 + $0xc24] ss:$80 sps:$4 sm:$0xff]  }
 0x317   :  { %7271 = vmatpush2.bf16.msra.mxu0 %v17805_v30  ;;  %v17844_v30 = vld [vmem:[%s25815_s1 + $0xcc0] ss:$80 sps:$4 sm:$0xff]   ;;  %v17858_v5 = vld [vmem:[%s25815_s1 + $0xb84] ss:$80 sps:$4 sm:$0xff]  }
 0x318   :  { %7308 = vmatpush2.bf16.msra.mxu1 %v17808_v0  ;;  %v6951_v7 = vpop.f32.mrf.mxu0  ;;  %7334 = vmatprep.subr.bf16.mxu0 %v17816_v17  ;;  %v17849_v0 = vld [vmem:[%s25815_s1 + $0x224] ss:$80 sps:$4 sm:$0xff]   ;;  %v17850_v17 = vld [vmem:[%s25815_s1 + $0xc20] ss:$80 sps:$4 sm:$0xff]  }
 0x319   :  { %7309 = vmatprep.subr.bf16.mxu1 %v17813_v10  ;;  %v17847_v10 = vld [vmem:[%s25815_s1 + $0x220] ss:$80 sps:$4 sm:$0xff]   ;;  %v17861_v7 = vld [vmem:[%s25815_s1 + $0xe4] ss:$80 sps:$4 sm:$0xff]  }
 0x31a   :  { %v7028_v31 = vpop.f32.mrf.mxu0  ;;  %7273 = vmatmul.mubr.bf16.vlgmr.msra.gmra.mxu0 %v19364_v9 }
 0x31b   :  { %v6987_v55 = vpop.f32.mrf.mxu1  ;;  %7335 = vmatpush1.bf16.msra.mxu0 %v17814_v2  ;;  %7354 = vmatprep.mubr.bf16.mxu0 %v25827_v19  ;;  %v17856_v2 = vld [vmem:[%s25815_s1 + $0xb80] ss:$80 sps:$4 sm:$0xff]  }
 0x31c   :  { %v6988_v32 = vadd.f32 %v6987_v55, %v6947_v63  ;;  %7310 = vmatpush2.bf16.msra.mxu1 %v17811_v24  ;;  %v7030_v60 = vpop.f32.mrf.mxu0  ;;  %7336 = vmatprep.subr.bf16.mxu0 %v17822_v43  ;;  %v17841_v63 = vld [vmem:[%s25815_s1 + $0x2c0] ss:$80 sps:$4 sm:$0xff]  }
 0x31d   :  { %v6989_v3 = vpop.f32.mrf.mxu1  ;;  %7311 = vmatprep.subr.bf16.mxu1 %v17819_v20  ;;  %v17853_v24 = vld [vmem:[%s25815_s1 + $0x180] ss:$80 sps:$4 sm:$0xff]   ;;  %v17864_v20 = vld [vmem:[%s25815_s1 + $0xae4] ss:$80 sps:$4 sm:$0xff]  }
 0x31e   :  { %v21834_v42 = vadd.f32 %v7028_v31, %v6988_v32  ;;  %v6990_v62 = vadd.f32 %v6989_v3, %v6949_v11  ;;  %v7032_v15 = vpop.f32.mrf.mxu0  ;;  %v17855_v11 = vld [vmem:[%s25815_s1 + $0x184] ss:$80 sps:$4 sm:$0xff]   ;;  %v17859_v43 = vld [vmem:[%s25815_s1 + $0xe0] ss:$80 sps:$4 sm:$0xff]  }
 0x31f   :  { %v6991_v44 = vpop.f32.mrf.mxu1  ;;  %7337 = vmatpush1.bf16.msra.mxu0 %v17820_v51  ;;  %v17862_v55 = vld [vmem:[%s25815_s1 + $0xae0] ss:$80 sps:$4 sm:$0xff]   ;;  %v17867_v31 = vld [vmem:[%s25815_s1 + $0x44] ss:$80 sps:$4 sm:$0xff]  }
 0x320   :  { %v21837_v47 = vadd.f32 %v7030_v60, %v6990_v62  ;;  %7312 = vmatpush2.bf16.msra.mxu1 %v17817_v33  ;;  %v7033_v6 = vpop.f32.mrf.mxu0  ;;  %7363 = vmatprep.subr.bf16.mxu0 %v17825_v4  ;;  %v17870_v32 = vld [vmem:[%s25815_s1 + $0xa44] ss:$80 sps:$4 sm:$0xff]   ;;  %v21928_v33 = vpop.permute.xlu1 %16559  ;;  %v17865_v51 = vld [vmem:[%s25815_s1 + $0x40] ss:$80 sps:$4 sm:$0xff]  }
 0x321   :  { %7404 = vmatprep.subr.bf16.mxu1 %v17828_v39  ;;  %v6992_v45 = vpop.f32.mrf.mxu1  ;;  %v17868_v3 = vld [vmem:[%s25815_s1 + $0xa40] ss:$80 sps:$4 sm:$0xff]   ;;  %v17873_v60 = vld [vmem:[%s25815_s1 + $0x9a4] ss:$80 sps:$4 sm:$0xff]  }
 0x322   :  { %15299 = vmatmul.mubr.msk.bf16.vlgmr.msra.gmra.mxu0 %vm6047_vm0, %v19399_v21  ;;  %v17876_v4 = vld [vmem:[%s25815_s1 + $0x13a4] ss:$80 sps:$4 sm:$0xff]   ;;  %v17871_v62 = vld [vmem:[%s25815_s1 + $0x9a0] ss:$80 sps:$4 sm:$0xff]  }
 0x323   :  { %7314 = vmatmul.mubr.bf16.vlgmr.msra.gmra.mxu1 %v19578_v22  ;;  %7364 = vmatpush1.bf16.msra.mxu0 %v17823_v58  ;;  %v17874_v15 = vld [vmem:[%s25815_s1 + $0x13a0] ss:$80 sps:$4 sm:$0xff]   ;;  %v17879_v44 = vld [vmem:[%s25815_s1 + $0x904] ss:$80 sps:$4 sm:$0xff]  }
 0x324   :  { %7405 = vmatpush1.bf16.msra.mxu1 %v17826_v27  ;;  %7365 = vmatprep.subr.bf16.mxu0 %v17831_v14  ;;  %v21942_v39 = vpop.permute.xlu1 %7754  ;;  %v17882_v58 = vld [vmem:[%s25815_s1 + $0x1304] ss:$80 sps:$4 sm:$0xff]   ;;  %v17877_v27 = vld [vmem:[%s25815_s1 + $0x900] ss:$80 sps:$4 sm:$0xff]  }
 0x325   :  { %7406 = vmatprep.subr.bf16.mxu1 %v17834_v38  ;;  %7395 = vmatprep.mubr.bf16.mxu0 %v19293_v49  ;;  %v17880_v6 = vld [vmem:[%s25815_s1 + $0x1300] ss:$80 sps:$4 sm:$0xff]   ;;  %v17885_v14 = vld [vmem:[%s25815_s1 + $0x864] ss:$80 sps:$4 sm:$0xff]  }
 0x326   :  { %7436 = vmatprep.mubr.bf16.mxu1 %v19301_v52  ;;  %v17888_v38 = vld [vmem:[%s25815_s1 + $0x1264] ss:$80 sps:$4 sm:$0xff]  }
 0x327   :  { %7366 = vmatpush1.bf16.msra.mxu0 %v17829_v46  ;;  %v17883_v46 = vld [vmem:[%s25815_s1 + $0x860] ss:$80 sps:$4 sm:$0xff]  }
 0x328   :  { %7407 = vmatpush1.bf16.msra.mxu1 %v17832_v50  ;;  %7367 = vmatprep.subr.bf16.mxu0 %v17837_v54  ;;  %v8462_v45 = vpop.permute.xlu1 %8461  ;;  %v17886_v50 = vld [vmem:[%s25815_s1 + $0x1260] ss:$80 sps:$4 sm:$0xff]   ;;  %v17891_v54 = vld [vmem:[%s25815_s1 + $0x7c4] ss:$80 sps:$4 sm:$0xff]  }
 0x329   :  { %7408 = vmatprep.subr.bf16.mxu1 %v17840_v29  ;;  %v17894_v29 = vld [vmem:[%s25815_s1 + $0x11c4] ss:$80 sps:$4 sm:$0xff]  }
 0x32b   :  { %7368 = vmatpush1.bf16.msra.mxu0 %v17835_v56  ;;  %v21980_v56 = vpop.permute.xlu0 %7746 }
 0x32c   :  { %7409 = vmatpush1.bf16.msra.mxu1 %v17838_v57  ;;  %7369 = vmatprep.subr.bf16.mxu0 %v17843_v59  ;;  %v16570_v57 = vpop.permute.xlu1 %16569  ;;  %v17889_v59 = vld [vmem:[%s25815_s1 + $0x7c0] ss:$80 sps:$4 sm:$0xff]  }
 0x32d   :  { %7410 = vmatprep.subr.bf16.mxu1 %v17846_v61  ;;  %v17892_v61 = vld [vmem:[%s25815_s1 + $0x11c0] ss:$80 sps:$4 sm:$0xff]  }
 0x32f   :  { %7370 = vmatpush1.bf16.msra.mxu0 %v17841_v63  ;;  %v17897_v63 = vld [vmem:[%s25815_s1 + $0x724] ss:$80 sps:$4 sm:$0xff]  }
 0x330   :  { %7411 = vmatpush1.bf16.msra.mxu1 %v17844_v30  ;;  %7371 = vmatprep.subr.bf16.mxu0 %v17849_v0  ;;  %v17900_v30 = vld [vmem:[%s25815_s1 + $0x1124] ss:$80 sps:$4 sm:$0xff]   ;;  %v16572_v0 = vunpack.i.h.bf16 %v16570_v57 }
 0x331   :  { %7412 = vmatprep.subr.bf16.mxu1 %v17852_v1  ;;  %v16571_v1 = vunpack.i.l.bf16 %v16570_v57  ;;  %v17927_v57 = vld [vmem:[%s25815_s1 + $0x1804] ss:$80 sps:$4 sm:$0xff]  }
 0x333   :  { %7372 = vmatpush1.bf16.msra.mxu0 %v17847_v10 }
 0x334   :  { %7413 = vmatpush1.bf16.msra.mxu1 %v17850_v17  ;;  %7373 = vmatprep.subr.bf16.mxu0 %v17855_v11  ;;  %v17895_v17 = vld [vmem:[%s25815_s1 + $0x720] ss:$80 sps:$4 sm:$0xff]  }
 0x335   :  { %7414 = vmatprep.subr.bf16.mxu1 %v17858_v5  ;;  %v17898_v11 = vld [vmem:[%s25815_s1 + $0x1120] ss:$80 sps:$4 sm:$0xff]  }
 0x337   :  { %7374 = vmatpush1.bf16.msra.mxu0 %v17853_v24 }
 0x338   :  { %7415 = vmatpush1.bf16.msra.mxu1 %v17856_v2  ;;  %7375 = vmatprep.subr.bf16.mxu0 %v17861_v7  ;;  %v17903_v2 = vld [vmem:[%s25815_s1 + $0x684] ss:$80 sps:$4 sm:$0xff]  }
 0x339   :  { %7416 = vmatprep.subr.bf16.mxu1 %v17864_v20  ;;  %v17906_v7 = vld [vmem:[%s25815_s1 + $0x1084] ss:$80 sps:$4 sm:$0xff]   ;;  %v8467_v20 = vsel %vm7726_vm1, %v16572_v0, %v16571_v1  ;;  %v17928_v0 = vld [vmem:[%s25815_s1 + $0x1e40] ss:$80 sps:$4 sm:$0xff]  }
 0x33a   :  { %v22040_v13 = vmax.f32 %v7696_v48, %v8467_v20 }
 0x33b   :  { %7376 = vmatpush1.bf16.msra.mxu0 %v17859_v43 }
 0x33c   :  { %7417 = vmatpush1.bf16.msra.mxu1 %v17862_v55  ;;  %7377 = vmatprep.subr.bf16.mxu0 %v17867_v31  ;;  %25909 = vst [vmem:[#allocation4_spill] sm:$0xff] %v22040_v13 }
 0x33d   :  { %7418 = vmatprep.subr.bf16.mxu1 %v17870_v32  ;;  %v8468_v32 = vsel %vm7726_vm1, %v16571_v1, %v8462_v45  ;;  %v17933_v1 = vld [vmem:[%s25815_s1 + $0x1764] ss:$80 sps:$4 sm:$0xff]  }
 0x33f   :  { %7378 = vmatpush1.bf16.msra.mxu0 %v17865_v51 }
 0x340   :  { %7419 = vmatpush1.bf16.msra.mxu1 %v17868_v3  ;;  %7379 = vmatprep.subr.bf16.mxu0 %v17873_v60  ;;  %v17901_v3 = vld [vmem:[%s25815_s1 + $0x680] ss:$80 sps:$4 sm:$0xff]   ;;  %v17912_v60 = vld [vmem:[%s25815_s1 + $0xfe4] ss:$80 sps:$4 sm:$0xff]  }
 0x341   :  { %7420 = vmatprep.subr.bf16.mxu1 %v17876_v4  ;;  %v17907_v4 = vld [vmem:[%s25815_s1 + $0x5e0] ss:$80 sps:$4 sm:$0xff]  }
 0x343   :  { %7380 = vmatpush2.bf16.msra.mxu0 %v17871_v62  ;;  %v17910_v62 = vld [vmem:[%s25815_s1 + $0xfe0] ss:$80 sps:$4 sm:$0xff]  }
 0x344   :  { %7421 = vmatpush2.bf16.msra.mxu1 %v17874_v15  ;;  %7381 = vmatprep.subr.bf16.mxu0 %v17879_v44  ;;  %v17913_v44 = vld [vmem:[%s25815_s1 + $0x540] ss:$80 sps:$4 sm:$0xff]  }
 0x345   :  { %7422 = vmatprep.subr.bf16.mxu1 %v17882_v58  ;;  %v17916_v58 = vld [vmem:[%s25815_s1 + $0xf40] ss:$80 sps:$4 sm:$0xff]  }
 0x347   :  { %7382 = vmatpush2.bf16.msra.mxu0 %v17877_v27 }
 0x348   :  { %7423 = vmatpush2.bf16.msra.mxu1 %v17880_v6  ;;  %7383 = vmatprep.subr.bf16.mxu0 %v17885_v14  ;;  %v17921_v14 = vld [vmem:[%s25815_s1 + $0x18a4] ss:$80 sps:$4 sm:$0xff]  }
 0x349   :  { %7424 = vmatprep.subr.bf16.mxu1 %v17888_v38  ;;  %v17924_v38 = vld [vmem:[%s25815_s1 + $0x1ee4] ss:$80 sps:$4 sm:$0xff]  }
 0x34b   :  { %7384 = vmatpush2.bf16.msra.mxu0 %v17883_v46 }
 0x34c   :  { %7425 = vmatpush2.bf16.msra.mxu1 %v17886_v50  ;;  %7385 = vmatprep.subr.bf16.mxu0 %v17891_v54  ;;  %v17919_v50 = vld [vmem:[%s25815_s1 + $0x18a0] ss:$80 sps:$4 sm:$0xff]  }
 0x34d   :  { %7426 = vmatprep.subr.bf16.mxu1 %v17894_v29  ;;  %v17922_v54 = vld [vmem:[%s25815_s1 + $0x1ee0] ss:$80 sps:$4 sm:$0xff]  }
 0x34f   :  { %7386 = vmatpush2.bf16.msra.mxu0 %v17889_v59  ;;  %v16565_v10 = vpop.permute.xlu0 %16564  ;;  %v17930_v59 = vld [vmem:[%s25815_s1 + $0x1e44] ss:$80 sps:$4 sm:$0xff]  }
 0x350   :  { %7427 = vmatpush2.bf16.msra.mxu1 %v17892_v61  ;;  %v16567_v5 = vunpack.i.h.bf16 %v16565_v10  ;;  %v16566_v24 = vunpack.i.l.bf16 %v16565_v10  ;;  %7387 = vmatprep.subr.bf16.mxu0 %v17897_v63  ;;  %v17936_v10 = vld [vmem:[%s25815_s1 + $0x4ac] ss:$80 sps:$4 sm:$0xff]  }
 0x351   :  { %7428 = vmatprep.subr.bf16.mxu1 %v17900_v30  ;;  %v17925_v30 = vld [vmem:[%s25815_s1 + $0x1800] ss:$80 sps:$4 sm:$0xff]  }
 0x352   :  { %v22009_v43 = vmax.f32 %v7700_v35, %v16567_v5  ;;  %v8470_v55 = vsel %vm7726_vm1, %v16566_v24, %v16567_v5  ;;  %v8469_v31 = vsel %vm7726_vm1, %v8462_v45, %v16566_v24  ;;  %v17931_v5 = vld [vmem:[%s25815_s1 + $0x1760] ss:$80 sps:$4 sm:$0xff]   ;;  %v17934_v24 = vld [vmem:[%s25815_s1 + $0x4a8] ss:$80 sps:$4 sm:$0xff]  }
 0x353   :  { %7388 = vmatpush2.bf16.msra.mxu0 %v17895_v17  ;;  %v22016_v51 = vmax.f32 %v7698_v23, %v8469_v31  ;;  %v22026_v35 = vmax.f32 %v7699_v34, %v8470_v55  ;;  %v22044_v34 = vmax.f32 %v7697_v18, %v8468_v32  ;;  %v17937_v55 = vld [vmem:[%s25815_s1 + $0x16c0] ss:$80 sps:$4 sm:$0xff]   ;;  %v17940_v31 = vld [vmem:[%s25815_s1 + $0x408] ss:$80 sps:$4 sm:$0xff]   ;;  %v17945_v32 = vld [vmem:[%s25815_s1 + $0x1624] ss:$80 sps:$4 sm:$0xff]  }
 0x354   :  { %25907 = vst [vmem:[#allocation2_spill] sm:$0xff] %v22009_v43  ;;  %7429 = vmatpush2.bf16.msra.mxu1 %v17898_v11  ;;  %7389 = vmatprep.subr.bf16.mxu0 %v17903_v2  ;;  %v17939_v2 = vld [vmem:[%s25815_s1 + $0x16c4] ss:$80 sps:$4 sm:$0xff]  }
 0x355   :  { %25908 = vst [vmem:[#allocation3_spill] sm:$0xff] %v22016_v51  ;;  %7430 = vmatprep.subr.bf16.mxu1 %v17906_v7  ;;  %8490 = vrot.lane.b32.xlu1 %v22016_v51, %s19093_s15  ;;  %v16573_v23 = vpack.i.bf16 %v22009_v43, %v22026_v35  ;;  %v16578_v15 = vpack.i.bf16 %v22040_v13, %v22044_v34  ;;  %v17942_v7 = vld [vmem:[%s25815_s1 + $0x40c] ss:$80 sps:$4 sm:$0xff]   ;;  %v22838_v13 = vld [vmem:[%s25817_s2 + $0xc0] ss:$8 sps:$4 sm:$0xff]  }
 0x356   :  { %25928 = vst [vmem:[#allocation23_spill] sm:$0xff] %v22838_v13 }
 0x357   :  { %7390 = vmatpush2.bf16.msra.mxu0 %v17901_v3  ;;  %16574 = vrot.lane.b32.xlu0 %v16573_v23, %s19093_s15  ;;  %v17948_v3 = vld [vmem:[%s25815_s1 + $0x36c] ss:$80 sps:$4 sm:$0xff]   ;;  %v17951_v23 = vld [vmem:[%s25815_s1 + $0x1584] ss:$80 sps:$4 sm:$0xff]  }
 0x358   :  { %7431 = vmatpush2.bf16.msra.mxu1 %v17904_v26  ;;  %7391 = vmatprep.subr.bf16.mxu0 %v17909_v25  ;;  %v17943_v26 = vld [vmem:[%s25815_s1 + $0x1620] ss:$80 sps:$4 sm:$0xff]   ;;  %v17946_v25 = vld [vmem:[%s25815_s1 + $0x368] ss:$80 sps:$4 sm:$0xff]  }
 0x359   :  { %7432 = vmatprep.subr.bf16.mxu1 %v17912_v60  ;;  %v17954_v60 = vld [vmem:[%s25815_s1 + $0x2cc] ss:$80 sps:$4 sm:$0xff]  }
 0x35a   :  { %v22059_v18 = vpop.f32.mrf.mxu0 }
 0x35b   :  { %v22061_v48 = vpop.f32.mrf.mxu1  ;;  %7392 = vmatpush2.bf16.msra.mxu0 %v17907_v4  ;;  %16579 = vrot.lane.b32.xlu0 %v16578_v15, %s19093_s15  ;;  %v17952_v4 = vld [vmem:[%s25815_s1 + $0x2c8] ss:$80 sps:$4 sm:$0xff]  }
 0x35c   :  { %7433 = vmatpush2.bf16.msra.mxu1 %v17910_v62  ;;  %v22072_v27 = vpop.f32.mrf.mxu0  ;;  %7393 = vmatprep.subr.bf16.mxu0 %v17915_v37  ;;  %v17957_v62 = vld [vmem:[%s25815_s1 + $0x14e4] ss:$80 sps:$4 sm:$0xff]   ;;  %v17960_v37 = vld [vmem:[%s25815_s1 + $0x22c] ss:$80 sps:$4 sm:$0xff]   ;;  %v17958_v15 = vld [vmem:[%s25815_s1 + $0x228] ss:$80 sps:$4 sm:$0xff]  }
 0x35d   :  { %v22074_v6 = vpop.f32.mrf.mxu1  ;;  %7434 = vmatprep.subr.bf16.mxu1 %v17918_v28  ;;  %v17955_v28 = vld [vmem:[%s25815_s1 + $0x14e0] ss:$80 sps:$4 sm:$0xff]  }
 0x35e   :  { %v7073_v45 = vpop.f32.mrf.mxu0 }
 0x35f   :  { %v7114_v46 = vpop.f32.mrf.mxu1  ;;  %7394 = vmatpush2.bf16.msra.mxu0 %v17913_v44  ;;  %v17963_v44 = vld [vmem:[%s25815_s1 + $0x1444] ss:$80 sps:$4 sm:$0xff]  }
 0x360   :  { %7435 = vmatpush2.bf16.msra.mxu1 %v17916_v58  ;;  %v7074_v29 = vpop.f32.mrf.mxu0  ;;  %7445 = vmatprep.subr.bf16.mxu0 %v17921_v14  ;;  %v17966_v58 = vld [vmem:[%s25815_s1 + $0x18c] ss:$80 sps:$4 sm:$0xff]   ;;  %v17961_v14 = vld [vmem:[%s25815_s1 + $0x1440] ss:$80 sps:$4 sm:$0xff]   ;;  %v17969_v45 = vld [vmem:[%s25815_s1 + $0x1da4] ss:$80 sps:$4 sm:$0xff]  }
 0x361   :  { %7498 = vmatprep.subr.bf16.mxu1 %v17924_v38  ;;  %v7115_v61 = vpop.f32.mrf.mxu1  ;;  %v17964_v38 = vld [vmem:[%s25815_s1 + $0x188] ss:$80 sps:$4 sm:$0xff]   ;;  %v17972_v46 = vld [vmem:[%s25815_s1 + $0xec] ss:$80 sps:$4 sm:$0xff]   ;;  %v17975_v29 = vld [vmem:[%s25815_s1 + $0x1d04] ss:$80 sps:$4 sm:$0xff]  }
 0x362   :  { %7396 = vmatmul.mubr.bf16.vlgmr.msra.gmra.mxu0 %v19362_v8  ;;  %v17976_v61 = vld [vmem:[%s25815_s1 + $0x48] ss:$80 sps:$4 sm:$0xff]  }
 0x363   :  { %7437 = vmatmul.mubr.bf16.vlgmr.msra.gmra.mxu1 %v19364_v9  ;;  %v22096_v63 = vpop.f32.mrf.mxu1  ;;  %7446 = vmatpush1.bf16.msra.mxu0 %v17919_v50  ;;  %v17967_v50 = vld [vmem:[%s25815_s1 + $0x1da0] ss:$80 sps:$4 sm:$0xff]  }
 0x364   :  { %7499 = vmatpush1.bf16.msra.mxu1 %v17922_v54  ;;  %7447 = vmatprep.subr.bf16.mxu0 %v17927_v57  ;;  %v17970_v54 = vld [vmem:[%s25815_s1 + $0xe8] ss:$80 sps:$4 sm:$0xff]   ;;  %v17978_v57 = vld [vmem:[%s25815_s1 + $0x4c] ss:$80 sps:$4 sm:$0xff]  }
 0x365   :  { %7500 = vmatprep.subr.bf16.mxu1 %v17930_v59  ;;  %v22110_v17 = vpop.f32.mrf.mxu1  ;;  %7518 = vmatprep.mubr.bf16.mxu1 %v25827_v19  ;;  %v17973_v59 = vld [vmem:[%s25815_s1 + $0x1d00] ss:$80 sps:$4 sm:$0xff]  }
 0x366   :  { %7477 = vmatprep.mubr.bf16.mxu0 %v19461_v41 }
 0x367   :  { %v7196_v11 = vpop.f32.mrf.mxu1  ;;  %7448 = vmatpush1.bf16.msra.mxu0 %v17925_v30  ;;  %v17981_v30 = vld [vmem:[%s25815_s1 + $0x1c64] ss:$80 sps:$4 sm:$0xff]  }
 0x368   :  { %7501 = vmatpush1.bf16.msra.mxu1 %v17928_v0  ;;  %7449 = vmatprep.subr.bf16.mxu0 %v17933_v1  ;;  %v17984_v0 = vld [vmem:[%s25815_s1 + $0x9ac] ss:$80 sps:$4 sm:$0xff]   ;;  %v17979_v1 = vld [vmem:[%s25815_s1 + $0x1c60] ss:$80 sps:$4 sm:$0xff]   ;;  %v17987_v11 = vld [vmem:[%s25815_s1 + $0x1bc4] ss:$80 sps:$4 sm:$0xff]  }
 0x369   :  { %7527 = vmatprep.subr.bf16.mxu1 %v17936_v10  ;;  %v7197_v20 = vpop.f32.mrf.mxu1  ;;  %v17982_v10 = vld [vmem:[%s25815_s1 + $0x9a8] ss:$80 sps:$4 sm:$0xff]  }
 0x36a   :  { %v17996_v20 = vld [vmem:[%s25815_s1 + $0x86c] ss:$80 sps:$4 sm:$0xff]  }
 0x36b   :  { %15300 = vmatmul.mubr.msk.bf16.vlgmr.msra.gmra.mxu1 %vm6047_vm0, %v19399_v21  ;;  %7450 = vmatpush1.bf16.msra.mxu0 %v17931_v5  ;;  %v17990_v5 = vld [vmem:[%s25815_s1 + $0x90c] ss:$80 sps:$4 sm:$0xff]  }
 0x36c   :  { %7528 = vmatpush1.bf16.msra.mxu1 %v17934_v24  ;;  %7451 = vmatprep.subr.bf16.mxu0 %v17939_v2  ;;  %v17985_v24 = vld [vmem:[%s25815_s1 + $0x1bc0] ss:$80 sps:$4 sm:$0xff]   ;;  %v17988_v2 = vld [vmem:[%s25815_s1 + $0x908] ss:$80 sps:$4 sm:$0xff]  }
 0x36d   :  { %7529 = vmatprep.subr.bf16.mxu1 %v17942_v7  ;;  %7559 = vmatprep.mubr.bf16.mxu1 %v19293_v49  ;;  %v17949_v49 = vld [vmem:[%s25815_s1 + $0x1580] ss:$80 sps:$4 sm:$0xff]   ;;  %v17993_v7 = vld [vmem:[%s25815_s1 + $0x1b24] ss:$80 sps:$4 sm:$0xff]  }
 0x36f   :  { %7452 = vmatpush1.bf16.msra.mxu0 %v17937_v55  ;;  %v17991_v55 = vld [vmem:[%s25815_s1 + $0x1b20] ss:$80 sps:$4 sm:$0xff]  }
 0x370   :  { %7530 = vmatpush1.bf16.msra.mxu1 %v17940_v31  ;;  %7453 = vmatprep.subr.bf16.mxu0 %v17945_v32  ;;  %v17994_v31 = vld [vmem:[%s25815_s1 + $0x868] ss:$80 sps:$4 sm:$0xff]   ;;  %v17999_v32 = vld [vmem:[%s25815_s1 + $0x1a84] ss:$80 sps:$4 sm:$0xff]  }
 0x371   :  { %7531 = vmatprep.subr.bf16.mxu1 %v17948_v3  ;;  %v18002_v3 = vld [vmem:[%s25815_s1 + $0x7cc] ss:$80 sps:$4 sm:$0xff]  }
 0x373   :  { %7454 = vmatpush1.bf16.msra.mxu0 %v17943_v26  ;;  %v17997_v26 = vld [vmem:[%s25815_s1 + $0x1a80] ss:$80 sps:$4 sm:$0xff]  }
 0x374   :  { %7532 = vmatpush1.bf16.msra.mxu1 %v17946_v25  ;;  %7455 = vmatprep.subr.bf16.mxu0 %v17951_v23  ;;  %v18000_v25 = vld [vmem:[%s25815_s1 + $0x7c8] ss:$80 sps:$4 sm:$0xff]   ;;  %v18005_v23 = vld [vmem:[%s25815_s1 + $0x19e4] ss:$80 sps:$4 sm:$0xff]  }
 0x375   :  { %7533 = vmatprep.subr.bf16.mxu1 %v17954_v60  ;;  %v18008_v60 = vld [vmem:[%s25815_s1 + $0x72c] ss:$80 sps:$4 sm:$0xff]  }
 0x377   :  { %7456 = vmatpush1.bf16.msra.mxu0 %v17949_v49  ;;  %v18003_v49 = vld [vmem:[%s25815_s1 + $0x19e0] ss:$80 sps:$4 sm:$0xff]  }
 0x378   :  { %7534 = vmatpush1.bf16.msra.mxu1 %v17952_v4  ;;  %7457 = vmatprep.subr.bf16.mxu0 %v17957_v62  ;;  %v18006_v4 = vld [vmem:[%s25815_s1 + $0x728] ss:$80 sps:$4 sm:$0xff]   ;;  %v18011_v62 = vld [vmem:[%s25815_s1 + $0x1944] ss:$80 sps:$4 sm:$0xff]  }
 0x379   :  { %7535 = vmatprep.subr.bf16.mxu1 %v17960_v37  ;;  %v18014_v37 = vld [vmem:[%s25815_s1 + $0x68c] ss:$80 sps:$4 sm:$0xff]  }
 0x37b   :  { %7458 = vmatpush1.bf16.msra.mxu0 %v17955_v28  ;;  %v7111_v28 = vadd.f32 %v22061_v48, %v22059_v18  ;;  %v18017_v18 = vld [vmem:[%s25815_s1 + $0x5ec] ss:$80 sps:$4 sm:$0xff]  }
 0x37c   :  { %7536 = vmatpush1.bf16.msra.mxu1 %v17958_v15  ;;  %7459 = vmatprep.subr.bf16.mxu0 %v17963_v44  ;;  %v7113_v44 = vadd.f32 %v22074_v6, %v22072_v27  ;;  %v18020_v48 = vld [vmem:[%s25815_s1 + $0xeac] ss:$80 sps:$4 sm:$0xff]  }
 0x37d   :  { %7537 = vmatprep.subr.bf16.mxu1 %v17966_v58 }
 0x37f   :  { %7460 = vmatpush1.bf16.msra.mxu0 %v17961_v14  ;;  %v18009_v14 = vld [vmem:[%s25815_s1 + $0x1940] ss:$80 sps:$4 sm:$0xff]  }
 0x380   :  { %7538 = vmatpush1.bf16.msra.mxu1 %v17964_v38  ;;  %7461 = vmatprep.subr.bf16.mxu0 %v17969_v45  ;;  %v18012_v38 = vld [vmem:[%s25815_s1 + $0x688] ss:$80 sps:$4 sm:$0xff]  }
 0x381   :  { %7539 = vmatprep.subr.bf16.mxu1 %v17972_v46 }
 0x383   :  { %7462 = vmatpush2.bf16.msra.mxu0 %v17967_v50  ;;  %v25832_v50 = vmax.f32 %v21837_v47, 0.0 }
 0x384   :  { %7540 = vmatpush1.bf16.msra.mxu1 %v17970_v54  ;;  %7463 = vmatprep.subr.bf16.mxu0 %v17975_v29 }
 0x385   :  { %7541 = vmatprep.subr.bf16.mxu1 %v17978_v57  ;;  %v18015_v57 = vld [vmem:[%s25815_s1 + $0x5e8] ss:$80 sps:$4 sm:$0xff]  }
 0x387   :  { %7464 = vmatpush2.bf16.msra.mxu0 %v17973_v59 }
 0x388   :  { %7542 = vmatpush1.bf16.msra.mxu1 %v17976_v61  ;;  %7465 = vmatprep.subr.bf16.mxu0 %v17981_v30  ;;  %v18023_v61 = vld [vmem:[%s25815_s1 + $0x54c] ss:$80 sps:$4 sm:$0xff]  }
 0x389   :  { %7543 = vmatprep.subr.bf16.mxu1 %v17984_v0 }
 0x38b   :  { %7466 = vmatpush2.bf16.msra.mxu0 %v17979_v1  ;;  %v18026_v1 = vld [vmem:[%s25815_s1 + $0xe0c] ss:$80 sps:$4 sm:$0xff]  }
 0x38c   :  { %7544 = vmatpush2.bf16.msra.mxu1 %v17982_v10  ;;  %7467 = vmatprep.subr.bf16.mxu0 %v17987_v11 }
 0x38d   :  { %7545 = vmatprep.subr.bf16.mxu1 %v17990_v5  ;;  %v18021_v5 = vld [vmem:[%s25815_s1 + $0x548] ss:$80 sps:$4 sm:$0xff]  }
 0x38f   :  { %7468 = vmatpush2.bf16.msra.mxu0 %v17985_v24  ;;  %v18024_v24 = vld [vmem:[%s25815_s1 + $0xe08] ss:$80 sps:$4 sm:$0xff]  }
 0x390   :  { %7546 = vmatpush2.bf16.msra.mxu1 %v17988_v2  ;;  %7469 = vmatprep.subr.bf16.mxu0 %v17993_v7  ;;  %v18029_v2 = vld [vmem:[%s25815_s1 + $0xd6c] ss:$80 sps:$4 sm:$0xff]  }
 0x391   :  { %7547 = vmatprep.subr.bf16.mxu1 %v17996_v20  ;;  %v18032_v7 = vld [vmem:[%s25815_s1 + $0x18ac] ss:$80 sps:$4 sm:$0xff]  }
 0x393   :  { %7470 = vmatpush2.bf16.msra.mxu0 %v17991_v55 }
 0x394   :  { %7548 = vmatpush2.bf16.msra.mxu1 %v17994_v31  ;;  %7471 = vmatprep.subr.bf16.mxu0 %v17999_v32  ;;  %v18027_v31 = vld [vmem:[%s25815_s1 + $0xd68] ss:$80 sps:$4 sm:$0xff]  }
 0x395   :  { %7549 = vmatprep.subr.bf16.mxu1 %v18002_v3  ;;  %v18030_v32 = vld [vmem:[%s25815_s1 + $0x18a8] ss:$80 sps:$4 sm:$0xff]   ;;  %v18035_v3 = vld [vmem:[%s25815_s1 + $0xccc] ss:$80 sps:$4 sm:$0xff]  }
 0x397   :  { %7472 = vmatpush2.bf16.msra.mxu0 %v17997_v26 }
 0x398   :  { %7550 = vmatpush2.bf16.msra.mxu1 %v18000_v25  ;;  %7473 = vmatprep.subr.bf16.mxu0 %v18005_v23  ;;  %v18033_v25 = vld [vmem:[%s25815_s1 + $0xcc8] ss:$80 sps:$4 sm:$0xff]  }
 0x399   :  { %7551 = vmatprep.subr.bf16.mxu1 %v18008_v60  ;;  %v18036_v23 = vld [vmem:[%s25815_s1 + $0x1808] ss:$80 sps:$4 sm:$0xff]   ;;  %v18041_v60 = vld [vmem:[%s25815_s1 + $0xc2c] ss:$80 sps:$4 sm:$0xff]  }
 0x39a   :  { %v7151_v15 = vpop.f32.mrf.mxu0 }
 0x39b   :  { %v7152_v58 = vadd.f32 %v7151_v15, %v7111_v28  ;;  %7474 = vmatpush2.bf16.msra.mxu0 %v18003_v49  ;;  %v18039_v49 = vld [vmem:[%s25815_s1 + $0xc28] ss:$80 sps:$4 sm:$0xff]   ;;  %v18053_v15 = vld [vmem:[%s25815_s1 + $0xaec] ss:$80 sps:$4 sm:$0xff]  }
 0x39c   :  { %7552 = vmatpush2.bf16.msra.mxu1 %v18006_v4  ;;  %v7153_v45 = vpop.f32.mrf.mxu0  ;;  %7475 = vmatprep.subr.bf16.mxu0 %v18011_v62  ;;  %v18042_v4 = vld [vmem:[%s25815_s1 + $0x1768] ss:$80 sps:$4 sm:$0xff]   ;;  %v18047_v62 = vld [vmem:[%s25815_s1 + $0xb8c] ss:$80 sps:$4 sm:$0xff]  }
 0x39d   :  { %7553 = vmatprep.subr.bf16.mxu1 %v18014_v37  ;;  %v22290_v27 = vadd.f32 %v22096_v63, %v7152_v58  ;;  %v7154_v6 = vadd.f32 %v7153_v45, %v7113_v44  ;;  %v18018_v63 = vld [vmem:[%s25815_s1 + $0xea8] ss:$80 sps:$4 sm:$0xff]   ;;  %v18056_v44 = vld [vmem:[%s25815_s1 + $0x162c] ss:$80 sps:$4 sm:$0xff]  }
 0x39e   :  { %v7155_v46 = vpop.f32.mrf.mxu0  ;;  %v18045_v37 = vld [vmem:[%s25815_s1 + $0xb88] ss:$80 sps:$4 sm:$0xff]   ;;  %v18062_v45 = vld [vmem:[%s25815_s1 + $0x158c] ss:$80 sps:$4 sm:$0xff]  }
 0x39f   :  { %v25831_v54 = vmax.f32 %v22290_v27, 0.0  ;;  %v22295_v29 = vadd.f32 %v22110_v17, %v7154_v6  ;;  %7476 = vmatpush2.bf16.msra.mxu0 %v18009_v14  ;;  %v25833_v17 = vmax.f32 %v21834_v42, 0.0  ;;  %v18048_v28 = vld [vmem:[%s25815_s1 + $0x16c8] ss:$80 sps:$4 sm:$0xff]   ;;  %v18065_v6 = vld [vmem:[%s25815_s1 + $0x13ac] ss:$80 sps:$4 sm:$0xff]  }
 0x3a0   :  { %7554 = vmatpush2.bf16.msra.mxu1 %v18012_v38  ;;  %v7156_v59 = vpop.f32.mrf.mxu0  ;;  %7568 = vmatprep.subr.bf16.mxu0 %v18020_v48  ;;  %v18051_v58 = vld [vmem:[%s25815_s1 + $0xae8] ss:$80 sps:$4 sm:$0xff]   ;;  %v18059_v38 = vld [vmem:[%s25815_s1 + $0xa4c] ss:$80 sps:$4 sm:$0xff]  }
 0x3a1   :  { %25910 = vst [vmem:[#allocation5_spill] sm:$0xff] %v22295_v29  ;;  %7555 = vmatprep.subr.bf16.mxu1 %v18017_v18  ;;  %v25825_v30 = vmax.f32 %v22295_v29, 0.0  ;;  %v16583_v0 = vpack.i.bf16 %v25831_v54, %v25832_v50  ;;  %v18054_v14 = vld [vmem:[%s25815_s1 + $0x1628] ss:$80 sps:$4 sm:$0xff]   ;;  %v18068_v46 = vld [vmem:[%s25815_s1 + $0x14ec] ss:$80 sps:$4 sm:$0xff]  }
 0x3a2   :  { %7478 = vmatmul.mubr.bf16.vlgmr.msra.gmra.mxu0 %v19578_v22  ;;  %v18057_v18 = vld [vmem:[%s25815_s1 + $0xa48] ss:$80 sps:$4 sm:$0xff]   ;;  %v18071_v59 = vld [vmem:[%s25815_s1 + $0x130c] ss:$80 sps:$4 sm:$0xff]  }
 0x3a3   :  { %v22316_v10 = vpop.f32.mrf.mxu1  ;;  %7569 = vmatpush1.bf16.msra.mxu0 %v18018_v63  ;;  %v16588_v11 = vpack.i.bf16 %v25833_v17, %v25825_v30  ;;  %16584 = vrot.lane.b32.xlu1 %v16583_v0, %s19092_s17  ;;  %v18060_v48 = vld [vmem:[%s25815_s1 + $0x1588] ss:$80 sps:$4 sm:$0xff]   ;;  %v22822_v17 = vld [vmem:[%s25817_s2 + $0xc4] ss:$8 sps:$4 sm:$0xff]  }
 0x3a4   :  { %7556 = vmatpush2.bf16.msra.mxu1 %v18015_v57  ;;  %7570 = vmatprep.subr.bf16.mxu0 %v18026_v1  ;;  %v18063_v57 = vld [vmem:[%s25815_s1 + $0x13a8] ss:$80 sps:$4 sm:$0xff]   ;;  %25925 = vst [vmem:[#allocation20_spill] sm:$0xff] %v22822_v17 }
 0x3a5   :  { %7557 = vmatprep.subr.bf16.mxu1 %v18023_v61  ;;  %v22335_v20 = vpop.f32.mrf.mxu1  ;;  %16589 = vrot.lane.b32.xlu0 %v16588_v11, %s19092_s17  ;;  %v18066_v63 = vld [vmem:[%s25815_s1 + $0x14e8] ss:$80 sps:$4 sm:$0xff]   ;;  %v18074_v61 = vld [vmem:[%s25815_s1 + $0x144c] ss:$80 sps:$4 sm:$0xff]  }
 0x3a6   :  { %7600 = vmatprep.mubr.bf16.mxu0 %v19301_v52  ;;  %v18038_v52 = vld [vmem:[%s25815_s1 + $0x180c] ss:$80 sps:$4 sm:$0xff]   ;;  %v18069_v0 = vld [vmem:[%s25815_s1 + $0x1308] ss:$80 sps:$4 sm:$0xff]  }
 0x3a7   :  { %v7237_v55 = vpop.f32.mrf.mxu1  ;;  %7571 = vmatpush1.bf16.msra.mxu0 %v18024_v24  ;;  %v18072_v1 = vld [vmem:[%s25815_s1 + $0x1448] ss:$80 sps:$4 sm:$0xff]   ;;  %v18077_v11 = vld [vmem:[%s25815_s1 + $0x126c] ss:$80 sps:$4 sm:$0xff]  }
 0x3a8   :  { %7558 = vmatpush2.bf16.msra.mxu1 %v18021_v5  ;;  %7572 = vmatprep.subr.bf16.mxu0 %v18029_v2  ;;  %v18080_v5 = vld [vmem:[%s25815_s1 + $0x1dac] ss:$80 sps:$4 sm:$0xff]   ;;  %v18075_v24 = vld [vmem:[%s25815_s1 + $0x1268] ss:$80 sps:$4 sm:$0xff]  }
 0x3a9   :  { %7609 = vmatprep.subr.bf16.mxu1 %v18032_v7  ;;  %v7238_v26 = vpop.f32.mrf.mxu1  ;;  %v18078_v2 = vld [vmem:[%s25815_s1 + $0x1da8] ss:$80 sps:$4 sm:$0xff]   ;;  %v18083_v7 = vld [vmem:[%s25815_s1 + $0x11cc] ss:$80 sps:$4 sm:$0xff]  }
 0x3aa   :  { %v18086_v55 = vld [vmem:[%s25815_s1 + $0x1d0c] ss:$80 sps:$4 sm:$0xff]   ;;  %v18087_v26 = vld [vmem:[%s25815_s1 + $0x1128] ss:$80 sps:$4 sm:$0xff]  }
 0x3ab   :  { %7560 = vmatmul.mubr.bf16.vlgmr.msra.gmra.mxu1 %v19362_v8  ;;  %7573 = vmatpush1.bf16.msra.mxu0 %v18027_v31  ;;  %v18044_v8 = vld [vmem:[%s25815_s1 + $0x176c] ss:$80 sps:$4 sm:$0xff]   ;;  %v18081_v31 = vld [vmem:[%s25815_s1 + $0x11c8] ss:$80 sps:$4 sm:$0xff]  }
 0x3ac   :  { %7610 = vmatpush1.bf16.msra.mxu1 %v18030_v32  ;;  %7574 = vmatprep.subr.bf16.mxu0 %v18035_v3  ;;  %v18084_v32 = vld [vmem:[%s25815_s1 + $0x1d08] ss:$80 sps:$4 sm:$0xff]   ;;  %v18089_v3 = vld [vmem:[%s25815_s1 + $0x112c] ss:$80 sps:$4 sm:$0xff]  }
 0x3ad   :  { %7611 = vmatprep.subr.bf16.mxu1 %v18038_v52  ;;  %7641 = vmatprep.mubr.bf16.mxu1 %v19461_v41  ;;  %v18050_v41 = vld [vmem:[%s25815_s1 + $0x16cc] ss:$80 sps:$4 sm:$0xff]   ;;  %v22784_v30 = vld [vmem:[%s25817_s2 + $0xe0] ss:$8 sps:$4 sm:$0xff]   ;;  %v22810_v54 = vld [vmem:[%s25817_s2 + $0xd0] ss:$8 sps:$4 sm:$0xff]  }
 0x3ae   :  { %v18092_v52 = vld [vmem:[%s25815_s1 + $0x1c6c] ss:$80 sps:$4 sm:$0xff]   ;;  %25919 = vst [vmem:[#allocation14_spill] sm:$0xff] %v22784_v30  ;;  %25923 = vst [vmem:[#allocation18_spill] sm:$0xff] %v22810_v54  ;;  %v22817_v50 = vld [vmem:[%s25817_s2 + $0x1d0] ss:$8 sps:$4 sm:$0xff]  }
 0x3af   :  { %7575 = vmatpush1.bf16.msra.mxu0 %v18033_v25  ;;  %v18090_v25 = vld [vmem:[%s25815_s1 + $0x1c68] ss:$80 sps:$4 sm:$0xff]   ;;  %25924 = vst [vmem:[#allocation19_spill] sm:$0xff] %v22817_v50 }
 0x3b0   :  { %7612 = vmatpush1.bf16.msra.mxu1 %v18036_v23  ;;  %7576 = vmatprep.subr.bf16.mxu0 %v18041_v60  ;;  %v18095_v23 = vld [vmem:[%s25815_s1 + $0x108c] ss:$80 sps:$4 sm:$0xff]   ;;  %v22845_v29 = vld [vmem:[%s25817_s2 + $0x1c0] ss:$8 sps:$4 sm:$0xff]  }
 0x3b1   :  { %7613 = vmatprep.subr.bf16.mxu1 %v18044_v8  ;;  %v18098_v60 = vld [vmem:[%s25815_s1 + $0x1bcc] ss:$80 sps:$4 sm:$0xff]   ;;  %v18093_v8 = vld [vmem:[%s25815_s1 + $0x1088] ss:$80 sps:$4 sm:$0xff]   ;;  %25929 = vst [vmem:[#allocation24_spill] sm:$0xff] %v22845_v29 }
 0x3b3   :  { %7577 = vmatpush1.bf16.msra.mxu0 %v18039_v49  ;;  %v18096_v49 = vld [vmem:[%s25815_s1 + $0x1bc8] ss:$80 sps:$4 sm:$0xff]  }
 0x3b4   :  { %7614 = vmatpush1.bf16.msra.mxu1 %v18042_v4  ;;  %7578 = vmatprep.subr.bf16.mxu0 %v18047_v62  ;;  %v18101_v4 = vld [vmem:[%s25815_s1 + $0xfec] ss:$80 sps:$4 sm:$0xff]  }
 0x3b5   :  { %7615 = vmatprep.subr.bf16.mxu1 %v18050_v41  ;;  %v18104_v62 = vld [vmem:[%s25815_s1 + $0x1b2c] ss:$80 sps:$4 sm:$0xff]   ;;  %v18099_v41 = vld [vmem:[%s25815_s1 + $0xfe8] ss:$80 sps:$4 sm:$0xff]  }
 0x3b7   :  { %7579 = vmatpush1.bf16.msra.mxu0 %v18045_v37  ;;  %v18102_v37 = vld [vmem:[%s25815_s1 + $0x1b28] ss:$80 sps:$4 sm:$0xff]  }
 0x3b8   :  { %7616 = vmatpush1.bf16.msra.mxu1 %v18048_v28  ;;  %7580 = vmatprep.subr.bf16.mxu0 %v18053_v15  ;;  %v18107_v28 = vld [vmem:[%s25815_s1 + $0xf4c] ss:$80 sps:$4 sm:$0xff]  }
 0x3b9   :  { %7617 = vmatprep.subr.bf16.mxu1 %v18056_v44  ;;  %v18110_v15 = vld [vmem:[%s25815_s1 + $0x1a8c] ss:$80 sps:$4 sm:$0xff]  }
 0x3bb   :  { %7581 = vmatpush1.bf16.msra.mxu0 %v18051_v58  ;;  %v18105_v58 = vld [vmem:[%s25815_s1 + $0xf48] ss:$80 sps:$4 sm:$0xff]  }
 0x3bc   :  { %7618 = vmatpush1.bf16.msra.mxu1 %v18054_v14  ;;  %7582 = vmatprep.subr.bf16.mxu0 %v18059_v38  ;;  %v18108_v14 = vld [vmem:[%s25815_s1 + $0x1a88] ss:$80 sps:$4 sm:$0xff]  }
 0x3bd   :  { %7619 = vmatprep.subr.bf16.mxu1 %v18062_v45  ;;  %v18113_v45 = vld [vmem:[%s25815_s1 + $0x19ec] ss:$80 sps:$4 sm:$0xff]  }
 0x3bf   :  { %7583 = vmatpush1.bf16.msra.mxu0 %v18057_v18  ;;  %v18116_v18 = vld [vmem:[%s25815_s1 + $0x1eec] ss:$80 sps:$4 sm:$0xff]  }
 0x3c0   :  { %7620 = vmatpush1.bf16.msra.mxu1 %v18060_v48  ;;  %7584 = vmatprep.subr.bf16.mxu0 %v18065_v6  ;;  %v25829_v6 = vunpack.i.h.bf16 %v21928_v33 }
 0x3c1   :  { %7621 = vmatprep.subr.bf16.mxu1 %v18068_v46  ;;  %v25830_v46 = vunpack.i.l.bf16 %v21928_v33 }
 0x3c3   :  { %7585 = vmatpush2.bf16.msra.mxu0 %v18063_v57 }
 0x3c4   :  { %7622 = vmatpush1.bf16.msra.mxu1 %v18066_v63  ;;  %7586 = vmatprep.subr.bf16.mxu0 %v18071_v59  ;;  %v18111_v63 = vld [vmem:[%s25815_s1 + $0x19e8] ss:$80 sps:$4 sm:$0xff]  }
 0x3c5   :  { %7623 = vmatprep.subr.bf16.mxu1 %v18074_v61  ;;  %v18114_v59 = vld [vmem:[%s25815_s1 + $0x1ee8] ss:$80 sps:$4 sm:$0xff]   ;;  %v22518_v61 = vpop.permute.xlu0 %7752 }
 0x3c7   :  { %7587 = vmatpush2.bf16.msra.mxu0 %v18069_v0  ;;  %v22830_v43 = vpop.permute.xlu1 %8490 }
 0x3c8   :  { %7624 = vmatpush1.bf16.msra.mxu1 %v18072_v1  ;;  %7588 = vmatprep.subr.bf16.mxu0 %v18077_v11  ;;  %v18122_v1 = vld [vmem:[%s25815_s1 + $0x1e4c] ss:$80 sps:$4 sm:$0xff]   ;;  %25927 = vst [vmem:[#allocation22_spill] sm:$0xff] %v22830_v43 }
 0x3c9   :  { %7625 = vmatprep.subr.bf16.mxu1 %v18080_v5 }
 0x3cb   :  { %7589 = vmatpush2.bf16.msra.mxu0 %v18075_v24 }
 0x3cc   :  { %7626 = vmatpush2.bf16.msra.mxu1 %v18078_v2  ;;  %7590 = vmatprep.subr.bf16.mxu0 %v18083_v7  ;;  %v7758_v2 = vsel %vm7756_vm2, %v25830_v46, %v25829_v6  ;;  %v7760_v7 = vsel %vm7756_vm2, %v22518_v61, %v21942_v39  ;;  %v22798_v6 = vpop.permute.xlu0 %16574  ;;  %v22804_v46 = vld [vmem:[%s25817_s2 + $0x1d4] ss:$8 sps:$4 sm:$0xff]  }
 0x3cd   :  { %7627 = vmatprep.subr.bf16.mxu1 %v18086_v55  ;;  %25922 = vst [vmem:[#allocation17_spill] sm:$0xff] %v22804_v46 }
 0x3cf   :  { %7591 = vmatpush2.bf16.msra.mxu0 %v18081_v31 }
 0x3d0   :  { %7628 = vmatpush2.bf16.msra.mxu1 %v18084_v32  ;;  %7592 = vmatprep.subr.bf16.mxu0 %v18089_v3  ;;  %v22545_v3 = vld [vmem:[%s25817_s2 + $0x74] ss:$8 sps:$4 sm:$0xff]   ;;  %v22832_v51 = vpop.permute.xlu0 %16579 }
 0x3d1   :  { %7629 = vmatprep.subr.bf16.mxu1 %v18092_v52  ;;  %v22550_v52 = vld [vmem:[%s25817_s2 + $0x174] ss:$8 sps:$4 sm:$0xff]  }
 0x3d3   :  { %7593 = vmatpush2.bf16.msra.mxu0 %v18087_v26 }
 0x3d4   :  { %7630 = vmatpush2.bf16.msra.mxu1 %v18090_v25  ;;  %7594 = vmatprep.subr.bf16.mxu0 %v18095_v23  ;;  %v7767_v23 = vmax.f32 %v20912_v53, %v7758_v2  ;;  %v22570_v53 = vld [vmem:[%s25817_s2 + $0x170] ss:$8 sps:$4 sm:$0xff]   ;;  %v22688_v2 = vld [vmem:[%s25817_s2 + $0x20] ss:$8 sps:$4 sm:$0xff]  }
 0x3d5   :  { %7631 = vmatprep.subr.bf16.mxu1 %v18098_v60  ;;  %v7769_v60 = vmax.f32 %v21633_v12, %v7760_v7  ;;  %v22695_v7 = vld [vmem:[%s25817_s2 + $0x120] ss:$8 sps:$4 sm:$0xff]  }
 0x3d7   :  { %7595 = vmatpush2.bf16.msra.mxu0 %v18093_v8 }
 0x3d8   :  { %7632 = vmatpush2.bf16.msra.mxu1 %v18096_v49  ;;  %7596 = vmatprep.subr.bf16.mxu0 %v18101_v4 }
 0x3d9   :  { %7633 = vmatprep.subr.bf16.mxu1 %v18104_v62 }
 0x3da   :  { %v7274_v44 = vpop.f32.mrf.mxu0 }
 0x3db   :  { %7597 = vmatpush2.bf16.msra.mxu0 %v18099_v41  ;;  %v7275_v11 = vadd.f32 %v7274_v44, %v22316_v10  ;;  %v18117_v10 = vld [vmem:[%s25815_s1 + $0x1948] ss:$80 sps:$4 sm:$0xff]   ;;  %v22583_v44 = vld [vmem:[%s25817_s2 + $0x164] ss:$8 sps:$4 sm:$0xff]  }
 0x3dc   :  { %7634 = vmatpush2.bf16.msra.mxu1 %v18102_v37  ;;  %v7276_v38 = vpop.f32.mrf.mxu0  ;;  %7598 = vmatprep.subr.bf16.mxu0 %v18107_v28  ;;  %v22563_v41 = vld [vmem:[%s25817_s2 + $0x70] ss:$8 sps:$4 sm:$0xff]   ;;  %v7772_v28 = vpack.c.bf16 %v7767_v23, %v7767_v23  ;;  %v22736_v23 = vld [vmem:[%s25817_s2] ss:$8 sps:$4 sm:$0xff]  }
 0x3dd   :  { %7635 = vmatprep.subr.bf16.mxu1 %v18110_v15  ;;  %v7277_v48 = vadd.f32 %v7276_v38, %v22335_v20  ;;  %v18119_v20 = vld [vmem:[%s25815_s1 + $0x194c] ss:$80 sps:$4 sm:$0xff]   ;;  %v22598_v38 = vld [vmem:[%s25817_s2 + $0x160] ss:$8 sps:$4 sm:$0xff]  }
 0x3de   :  { %v7278_v57 = vpop.f32.mrf.mxu0  ;;  %v22578_v15 = vld [vmem:[%s25817_s2 + $0x64] ss:$8 sps:$4 sm:$0xff]  }
 0x3df   :  { %7599 = vmatpush2.bf16.msra.mxu0 %v18105_v58  ;;  %v7774_v58 = vpack.c.bf16 %v7769_v60, %v7769_v60  ;;  %v22634_v57 = vld [vmem:[%s25817_s2 + $0x144] ss:$8 sps:$4 sm:$0xff]   ;;  %v22743_v60 = vld [vmem:[%s25817_s2 + $0x100] ss:$8 sps:$4 sm:$0xff]  }
 0x3e0   :  { %7636 = vmatpush2.bf16.msra.mxu1 %v18108_v14  ;;  %v7279_v0 = vpop.f32.mrf.mxu0  ;;  %7662 = vmatprep.subr.bf16.mxu0 %v18116_v18  ;;  %v22592_v14 = vld [vmem:[%s25817_s2 + $0x60] ss:$8 sps:$4 sm:$0xff]   ;;  %v22623_v18 = vld [vmem:[%s25817_s2 + $0x150] ss:$8 sps:$4 sm:$0xff]   ;;  %25915 = vst [vmem:[#allocation10_spill] sm:$0xff] %v22743_v60 }
 0x3e1   :  { %7637 = vmatprep.subr.bf16.mxu1 %v18113_v45  ;;  %v22616_v45 = vld [vmem:[%s25817_s2 + $0x50] ss:$8 sps:$4 sm:$0xff]   ;;  %v22652_v0 = vld [vmem:[%s25817_s2 + $0x34] ss:$8 sps:$4 sm:$0xff]  }
 0x3e2   :  { %v7356_v24 = vpop.f32.mrf.mxu0  ;;  %7601 = vmatmul.mubr.bf16.vlgmr.msra.gmra.mxu0 %v19364_v9  ;;  %v18120_v9 = vld [vmem:[%s25815_s1 + $0x1e48] ss:$80 sps:$4 sm:$0xff]  }
 0x3e3   :  { %v7315_v5 = vpop.f32.mrf.mxu1  ;;  %7663 = vmatpush1.bf16.msra.mxu0 %v18114_v59  ;;  %7682 = vmatprep.mubr.bf16.mxu0 %v25827_v19  ;;  %v22647_v59 = vld [vmem:[%s25817_s2 + $0x140] ss:$8 sps:$4 sm:$0xff]   ;;  %v22796_v19 = vld [vmem:[%s25817_s2 + $0xd4] ss:$8 sps:$4 sm:$0xff]  }
 0x3e4   :  { %v7316_v55 = vadd.f32 %v7315_v5, %v7275_v11  ;;  %7638 = vmatpush2.bf16.msra.mxu1 %v18111_v63  ;;  %v7358_v32 = vpop.f32.mrf.mxu0  ;;  %7664 = vmatprep.subr.bf16.mxu0 %v18122_v1  ;;  %v22640_v63 = vld [vmem:[%s25817_s2 + $0x40] ss:$8 sps:$4 sm:$0xff]   ;;  %v22664_v1 = vld [vmem:[%s25817_s2 + $0x30] ss:$8 sps:$4 sm:$0xff]   ;;  %v22676_v5 = vld [vmem:[%s25817_s2 + $0x24] ss:$8 sps:$4 sm:$0xff]  }
 0x3e5   :  { %v7317_v31 = vpop.f32.mrf.mxu1  ;;  %7639 = vmatprep.subr.bf16.mxu1 %v18119_v20  ;;  %v22658_v20 = vld [vmem:[%s25817_s2 + $0x134] ss:$8 sps:$4 sm:$0xff]   ;;  %v22671_v11 = vld [vmem:[%s25817_s2 + $0x130] ss:$8 sps:$4 sm:$0xff]   ;;  %25921 = vst [vmem:[#allocation16_spill] sm:$0xff] %v22796_v19 }
 0x3e6   :  { %v22552_v26 = vadd.f32 %v7356_v24, %v7316_v55  ;;  %v7318_v25 = vadd.f32 %v7317_v31, %v7277_v48  ;;  %v7360_v8 = vpop.f32.mrf.mxu0  ;;  %v22628_v48 = vld [vmem:[%s25817_s2 + $0x44] ss:$8 sps:$4 sm:$0xff]   ;;  %v22700_v55 = vld [vmem:[%s25817_s2 + $0x14] ss:$8 sps:$4 sm:$0xff]   ;;  %v22719_v31 = vld [vmem:[%s25817_s2 + $0x110] ss:$8 sps:$4 sm:$0xff]  }
 0x3e7   :  { %v7319_v49 = vpop.f32.mrf.mxu1  ;;  %7665 = vmatpush1.bf16.msra.mxu0 %v18120_v9  ;;  %v22682_v24 = vld [vmem:[%s25817_s2 + $0x124] ss:$8 sps:$4 sm:$0xff]   ;;  %v22712_v9 = vld [vmem:[%s25817_s2 + $0x10] ss:$8 sps:$4 sm:$0xff]   ;;  %25913 = vst [vmem:[#allocation8_spill] sm:$0xff] %v22719_v31 }
 0x3e8   :  { %25911 = vst [vmem:[#allocation6_spill] sm:$0xff] %v22552_v26  ;;  %v25826_v4 = vmax.f32 %v22552_v26, 0.0  ;;  %v22558_v62 = vadd.f32 %v7358_v32, %v7318_v25  ;;  %7640 = vmatpush2.bf16.msra.mxu1 %v18117_v10  ;;  %v7361_v37 = vpop.f32.mrf.mxu0  ;;  %8201 = vmatprep.subr.bf16.mxu0 %v22545_v3  ;;  %v22706_v10 = vld [vmem:[%s25817_s2 + $0x114] ss:$8 sps:$4 sm:$0xff]   ;;  %v22724_v32 = vld [vmem:[%s25817_s2 + $0x4] ss:$8 sps:$4 sm:$0xff]  }
 0x3e9   :  { %8242 = vmatprep.subr.bf16.mxu1 %v22550_v52  ;;  %v7320_v12 = vpop.f32.mrf.mxu1  ;;  %v22730_v25 = vld [vmem:[%s25817_s2 + $0x104] ss:$8 sps:$4 sm:$0xff]   ;;  %v22748_v8 = vld [vmem:[%s25817_s2 + $0xf4] ss:$8 sps:$4 sm:$0xff]   ;;  %v22760_v37 = vld [vmem:[%s25817_s2 + $0xf0] ss:$8 sps:$4 sm:$0xff]  }
 0x3ea   :  { %25912 = vst [vmem:[#allocation7_spill] sm:$0xff] %v22558_v62  ;;  %10550 = vrot.lane.b32.xlu1 %v25826_v4, %s19092_s17  ;;  %15301 = vmatmul.mubr.msk.bf16.vlgmr.msra.gmra.mxu0 %vm6047_vm0, %v19399_v21  ;;  %v22603_v21 = vld [vmem:[%s25817_s2 + $0x54] ss:$8 sps:$4 sm:$0xff]   ;;  %25914 = vst [vmem:[#allocation9_spill] sm:$0xff] %v22730_v25  ;;  %v22767_v12 = vld [vmem:[%s25817_s2 + $0x1f0] ss:$8 sps:$4 sm:$0xff]  }
 0x3eb   :  { %7642 = vmatmul.mubr.bf16.vlgmr.msra.gmra.mxu1 %v19578_v22  ;;  %8202 = vmatpush1.bf16.msra.mxu0 %v22563_v41  ;;  %v22610_v22 = vld [vmem:[%s25817_s2 + $0x154] ss:$8 sps:$4 sm:$0xff]   ;;  %25917 = vst [vmem:[#allocation12_spill] sm:$0xff] %v22767_v12  ;;  %v22791_v4 = vld [vmem:[%s25817_s2 + $0x1e0] ss:$8 sps:$4 sm:$0xff]  }
 0x3ec   :  { %8233 = vmatprep.mubr.bf16.mxu0 %v7772_v28  ;;  %8243 = vmatpush1.bf16.msra.mxu1 %v22570_v53  ;;  %v22754_v49 = vld [vmem:[%s25817_s2 + $0x1f4] ss:$8 sps:$4 sm:$0xff]   ;;  %v22772_v28 = vld [vmem:[%s25817_s2 + $0xe4] ss:$8 sps:$4 sm:$0xff]   ;;  %25920 = vst [vmem:[#allocation15_spill] sm:$0xff] %v22791_v4 }
 0x3ed   :  { %8274 = vmatprep.mubr.bf16.mxu1 %v7774_v58  ;;  %8203 = vmatprep.subr.bf16.mxu0 %v22578_v15  ;;  %25916 = vst [vmem:[#allocation11_spill] sm:$0xff] %v22754_v49  ;;  %v22778_v58 = vld [vmem:[%s25817_s2 + $0x1e4] ss:$8 sps:$4 sm:$0xff]   ;;  %v22856_v26 = vld [vmem:[%s25817_s2 + $0x1b4] ss:$8 sps:$4 sm:$0xff]  }
 0x3ee   :  { %8244 = vmatprep.subr.bf16.mxu1 %v22583_v44  ;;  %25918 = vst [vmem:[#allocation13_spill] sm:$0xff] %v22778_v58  ;;  %v22828_v62 = vld [vmem:[%s25817_s2 + $0x1c4] ss:$8 sps:$4 sm:$0xff]   ;;  %25931 = vst [vmem:[#allocation26_spill] sm:$0xff] %v22856_v26 }
 0x3ef   :  { %8204 = vmatpush1.bf16.msra.mxu0 %v22592_v14  ;;  %25926 = vst [vmem:[#allocation21_spill] sm:$0xff] %v22828_v62 }
 0x3f0   :  { %8245 = vmatpush1.bf16.msra.mxu1 %v22598_v38  ;;  %8205 = vmatprep.subr.bf16.mxu0 %v22603_v21 }
 0x3f1   :  { %8246 = vmatprep.subr.bf16.mxu1 %v22610_v22 }
 0x3f3   :  { %8206 = vmatpush1.bf16.msra.mxu0 %v22616_v45 }
 0x3f4   :  { %8247 = vmatpush1.bf16.msra.mxu1 %v22623_v18  ;;  %8207 = vmatprep.subr.bf16.mxu0 %v22628_v48 }
 0x3f5   :  { %8248 = vmatprep.subr.bf16.mxu1 %v22634_v57 }
 0x3f7   :  { %8208 = vmatpush1.bf16.msra.mxu0 %v22640_v63 }
 0x3f8   :  { %8249 = vmatpush1.bf16.msra.mxu1 %v22647_v59  ;;  %8209 = vmatprep.subr.bf16.mxu0 %v22652_v0 }
 0x3f9   :  { %8250 = vmatprep.subr.bf16.mxu1 %v22658_v20 }
 0x3fb   :  { %8210 = vmatpush1.bf16.msra.mxu0 %v22664_v1 }
 0x3fc   :  { %8251 = vmatpush1.bf16.msra.mxu1 %v22671_v11  ;;  %8211 = vmatprep.subr.bf16.mxu0 %v22676_v5 }
 0x3fd   :  { %8252 = vmatprep.subr.bf16.mxu1 %v22682_v24 }
 0x3ff   :  { %8212 = vmatpush1.bf16.msra.mxu0 %v22688_v2 }
 0x400   :  { %8253 = vmatpush1.bf16.msra.mxu1 %v22695_v7  ;;  %8213 = vmatprep.subr.bf16.mxu0 %v22700_v55 }
 0x401   :  { %8254 = vmatprep.subr.bf16.mxu1 %v22706_v10 }
 0x403   :  { %8214 = vmatpush1.bf16.msra.mxu0 %v22712_v9 }
 0x404   :  { %8255 = vmatpush1.bf16.msra.mxu1 %v22719_v31  ;;  %8215 = vmatprep.subr.bf16.mxu0 %v22724_v32 }
 0x405   :  { %8256 = vmatprep.subr.bf16.mxu1 %v22730_v25 }
 0x407   :  { %8216 = vmatpush1.bf16.msra.mxu0 %v22736_v23 }
 0x408   :  { %8257 = vmatpush1.bf16.msra.mxu1 %v22743_v60  ;;  %8217 = vmatprep.subr.bf16.mxu0 %v22748_v8 }
 0x409   :  { %8258 = vmatprep.subr.bf16.mxu1 %v22754_v49  ;;  %v22885_v49 = vld [vmem:[%s25817_s2 + $0x1a4] ss:$8 sps:$4 sm:$0xff]  }
 0x40a   :  { %25933 = vst [vmem:[#allocation28_spill] sm:$0xff] %v22885_v49 }
 0x40b   :  { %8218 = vmatpush2.bf16.msra.mxu0 %v22760_v37 }
 0x40c   :  { %8259 = vmatpush2.bf16.msra.mxu1 %v22767_v12  ;;  %8219 = vmatprep.subr.bf16.mxu0 %v22772_v28 }
 0x40d   :  { %8260 = vmatprep.subr.bf16.mxu1 %v22778_v58 }
 0x40f   :  { %8220 = vmatpush2.bf16.msra.mxu0 %v22784_v30  ;;  %v25937_v30 = vmax.f32 %v21837_v47, 0.0 }
 0x410   :  { %8261 = vmatpush2.bf16.msra.mxu1 %v22791_v4  ;;  %8221 = vmatprep.subr.bf16.mxu0 %v22796_v19  ;;  %v25935_v19 = vmax.f32 %v21834_v42, 0.0  ;;  %v22919_v42 = vld [vmem:[%s25817_s2 + $0x94] ss:$8 sps:$4 sm:$0xff]  }
 0x411   :  { %8262 = vmatprep.subr.bf16.mxu1 %v22804_v46  ;;  %v22850_v46 = vld [vmem:[%s25817_s2 + $0xb4] ss:$8 sps:$4 sm:$0xff]  }
 0x412   :  { %25930 = vst [vmem:[#allocation25_spill] sm:$0xff] %v22850_v46 }
 0x413   :  { %8222 = vmatpush2.bf16.msra.mxu0 %v22810_v54 }
 0x414   :  { %8263 = vmatpush2.bf16.msra.mxu1 %v22817_v50  ;;  %8223 = vmatprep.subr.bf16.mxu0 %v22822_v17  ;;  %v22864_v17 = vld [vmem:[%s25817_s2 + $0xb0] ss:$8 sps:$4 sm:$0xff]  }
 0x415   :  { %8264 = vmatprep.subr.bf16.mxu1 %v22828_v62  ;;  %v16585_v50 = vpop.permute.xlu1 %16584 }
 0x416   :  { %v16587_v4 = vunpack.i.h.bf16 %v16585_v50  ;;  %v16586_v58 = vunpack.i.l.bf16 %v16585_v50  ;;  %v22873_v50 = vld [vmem:[%s25817_s2 + $0x1b0] ss:$8 sps:$4 sm:$0xff]  }
 0x417   :  { %8224 = vmatpush2.bf16.msra.mxu0 %v22838_v13  ;;  %v22859_v12 = vpop.permute.xlu0 %16589  ;;  %v22878_v13 = vld [vmem:[%s25817_s2 + $0xa4] ss:$8 sps:$4 sm:$0xff]  }
 0x418   :  { %25932 = vst [vmem:[#allocation27_spill] sm:$0xff] %v22859_v12  ;;  %8265 = vmatpush2.bf16.msra.mxu1 %v22845_v29  ;;  %v16592_v62 = vunpack.i.h.bf16 %v22859_v12  ;;  %8225 = vmatprep.subr.bf16.mxu0 %v22850_v46  ;;  %v10553_v54 = vsel %vm7726_vm1, %v16586_v58, %v16587_v4  ;;  %v25934_v29 = vunpack.i.l.bf16 %v22859_v12  ;;  %v25939_v12 = vmax.f32 %v22290_v27, 0.0  ;;  %v22929_v27 = vld [vmem:[%s25817_s2 + $0x194] ss:$8 sps:$4 sm:$0xff]  }
 0x419   :  { %8266 = vmatprep.subr.bf16.mxu1 %v22856_v26  ;;  %v22899_v26 = vld [vmem:[%s25817_s2 + $0xa0] ss:$8 sps:$4 sm:$0xff]   ;;  %v22903_v31 = vmax.f32 %v25937_v30, %v10553_v54  ;;  %25942 = vst [vmem:[#allocation33_spill] sm:$0xff] %v22929_v27  ;;  %v22937_v30 = vld [vmem:[%s25817_s2 + $0x90] ss:$8 sps:$4 sm:$0xff]  }
 0x41a   :  { %v10554_v46 = vsel %vm7726_vm1, %v16587_v4, %v25934_v29  ;;  %v10552_v60 = vsel %vm7726_vm1, %v16592_v62, %v16586_v58  ;;  %v22949_v4 = vld [vmem:[%s25817_s2 + $0x84] ss:$8 sps:$4 sm:$0xff]   ;;  %v25944_v62 = vunpack.i.l.bf16 %v21928_v33 }
 0x41b   :  { %8226 = vmatpush2.bf16.msra.mxu0 %v22864_v17  ;;  %v22894_v25 = vmax.f32 %v25935_v19, %v10552_v60  ;;  %25938 = vst [vmem:[#allocation30_spill] sm:$0xff] %v22903_v31  ;;  %v22907_v29 = vmax.f32 %v25939_v12, %v10554_v46  ;;  %v22914_v19 = vld [vmem:[%s25817_s2 + $0x1a0] ss:$8 sps:$4 sm:$0xff]   ;;  %v22944_v46 = vld [vmem:[%s25817_s2 + $0x190] ss:$8 sps:$4 sm:$0xff]  }
 0x41c   :  { %8267 = vmatpush2.bf16.msra.mxu1 %v22873_v50  ;;  %8227 = vmatprep.subr.bf16.mxu0 %v22878_v13  ;;  %25941 = vst [vmem:[#allocation32_spill] sm:$0xff] %v22914_v19  ;;  %25943 = vst [vmem:[#allocation34_spill] sm:$0xff] %v22944_v46  ;;  %v7757_v60 = vsel %vm7756_vm2, %v21980_v56, %v25944_v62  ;;  %v22959_v12 = vld [vmem:[%s25817_s2 + $0x184] ss:$8 sps:$4 sm:$0xff]   ;;  %v22974_v56 = vld [vmem:[%s25817_s2 + $0x80] ss:$8 sps:$4 sm:$0xff]   ;;  %v25946_v62 = vunpack.i.l.bf16 %v22832_v51 }
 0x41d   :  { %25936 = vst [vmem:[#allocation29_spill] sm:$0xff] %v22894_v25  ;;  %25940 = vst [vmem:[#allocation31_spill] sm:$0xff] %v22907_v29  ;;  %10571 = vrot.lane.b32.xlu1 %v22894_v25, %s19093_s15  ;;  %8268 = vmatprep.subr.bf16.mxu1 %v22885_v49  ;;  %v16593_v47 = vpack.i.bf16 %v22907_v29, %v22903_v31  ;;  %v7844_v58 = vld [vmem:[%s25817_s2 + $0x220] sm:$0xff] }
 0x41f   :  { %8228 = vmatpush2.bf16.msra.mxu0 %v22899_v26  ;;  %16594 = vrot.lane.b32.xlu0 %v16593_v47, %s19093_s15  ;;  %v25945_v47 = vunpack.i.h.bf16 %v21928_v33  ;;  %v7766_v33 = vmax.f32 %v20889_v36, %v7757_v60 }
 0x420   :  { %8269 = vmatpush2.bf16.msra.mxu1 %v22914_v19  ;;  %8229 = vmatprep.subr.bf16.mxu0 %v22919_v42  ;;  %v15370_v19 = vcombine.low %v7844_v58, %v7844_v58 }
 0x421   :  { %8270 = vmatprep.subr.bf16.mxu1 %v22929_v27  ;;  %v7759_v54 = vsel %vm7756_vm2, %v25945_v47, %v22518_v61  ;;  %v8497_v27 = vsel %vm7756_vm2, %v25946_v62, %v22830_v43  ;;  %v22992_v47 = vcombine.high %v7844_v58, %v7844_v58  ;;  %v7771_v49 = vpack.c.bf16 %v7766_v33, %v7766_v33 }
 0x422   :  { %v7397_v29 = vpop.f32.mrf.mxu0  ;;  %v7768_v62 = vmax.f32 %v20903_v16, %v7759_v54  ;;  %v8506_v60 = vmax.f32 %v22044_v34, %v8497_v27  ;;  %v23002_v58 = vsel %vm8194_vm3, %v15370_v19, 0  ;;  %v23008_v34 = vld [vmem:[%s25817_s2 + $0x214] ss:$8 sps:$4 sm:$0xff]   ;;  %v16577_v27 = vunpack.i.h.bf16 %v22798_v6  ;;  %v23024_v19 = vld [vmem:[%s25817_s2 + $0x204] ss:$8 sps:$4 sm:$0xff]  }
 0x423   :  { %v7438_v25 = vpop.f32.mrf.mxu1  ;;  %8230 = vmatpush2.bf16.msra.mxu0 %v22937_v30  ;;  %25947 = vst [vmem:[#allocation35_spill] sm:$0xff] %v22992_v47  ;;  %25948 = vst [vmem:[#allocation36_spill] sm:$0xff] %v23002_v58 }
 0x424   :  { %v22968_v31 = vadd.f32 %v7438_v25, %v7397_v29  ;;  %8271 = vmatpush2.bf16.msra.mxu1 %v22944_v46  ;;  %v22982_v61 = vpop.f32.mrf.mxu0  ;;  %8231 = vmatprep.subr.bf16.mxu0 %v22949_v4  ;;  %v22990_v29 = vld [vmem:[%s25817_s2 + $0x180] ss:$8 sps:$4 sm:$0xff]   ;;  %v7773_v54 = vpack.c.bf16 %v7768_v62, %v7768_v62  ;;  %v25949_v62 = vmov 0  }
 0x425   :  { %v22984_v25 = vpop.f32.mrf.mxu1  ;;  %8272 = vmatprep.subr.bf16.mxu1 %v22959_v12 }
 0x426   :  { %v7401_v36 = vpop.f32.mrf.mxu0 }
 0x427   :  { %v7442_v46 = vpop.f32.mrf.mxu1  ;;  %8232 = vmatpush2.bf16.msra.mxu0 %v22974_v56 }
 0x428   :  { %8273 = vmatpush2.bf16.msra.mxu1 %v22990_v29  ;;  %v7402_v43 = vpop.f32.mrf.mxu0  ;;  %15372 = vmatprep.subr.msk.bf16.mxu0 %vm8194_vm3, %v22992_v47  ;;  %v8511_v46 = vpack.c.bf16 %v8506_v60, %v8506_v60  ;;  %v23040_v60 = vld [vmem:[%s25817_s2 + $0x200] ss:$8 sps:$4 sm:$0xff]  }
 0x429   :  { %v7443_v16 = vpop.f32.mrf.mxu1  ;;  %8518 = vmatprep.subr.bf16.mxu1 %v22545_v3  ;;  %v16576_v43 = vunpack.i.l.bf16 %v22798_v6  ;;  %v23018_v3 = vld [vmem:[%s25817_s2 + $0x210] ss:$8 sps:$4 sm:$0xff]  }
 0x42a   :  { %8234 = vmatmul.mubr.bf16.vlgmr.msra.gmra.mxu0 %v7771_v49  ;;  %v7770_v16 = vmax.f32 %v21303_v40, %v21942_v39  ;;  %v25950_v39 = vld [vmem:[#allocation8_spill] sm:$0xff] }
 0x42b   :  { %v23012_v33 = vpop.f32.mrf.mxu1  ;;  %8275 = vmatmul.mubr.bf16.vlgmr.msra.gmra.mxu1 %v7773_v54  ;;  %8294 = vmatpush1.bf16.msra.mxu0 %v23002_v58 }
 0x42c   :  { %8519 = vmatpush1.bf16.msra.mxu1 %v22563_v41  ;;  %8550 = vmatprep.mubr.bf16.mxu1 %v8511_v46  ;;  %v8499_v41 = vsel %vm7756_vm2, %v16576_v43, %v16577_v27  ;;  %v7775_v46 = vpack.c.bf16 %v7770_v16, %v7770_v16  ;;  %v25975_v16 = vld [vmem:[#allocation4_spill] sm:$0xff] }
 0x42d   :  { %v23026_v49 = vpop.f32.mrf.mxu1  ;;  %8295 = vmatprep.subr.bf16.mxu0 %v23008_v34  ;;  %8520 = vmatprep.subr.bf16.mxu1 %v22578_v15  ;;  %v8508_v54 = vmax.f32 %v22026_v35, %v8499_v41  ;;  %v25951_v35 = vld [vmem:[#allocation14_spill] sm:$0xff]  ;;  %v25973_v41 = vld [vmem:[#allocation24_spill] sm:$0xff] }
 0x42e   :  { %8315 = vmatprep.mubr.bf16.mxu0 %v25949_v62 }
 0x42f   :  { %v7524_v36 = vpop.f32.mrf.mxu1  ;;  %8296 = vmatpush1.bf16.msra.mxu0 %v23018_v3  ;;  %v8513_v40 = vpack.c.bf16 %v8508_v54, %v8508_v54 }
 0x430   :  { %8521 = vmatpush1.bf16.msra.mxu1 %v22592_v14  ;;  %8297 = vmatprep.subr.bf16.mxu0 %v23024_v19  ;;  %v25955_v14 = vld [vmem:[#allocation18_spill] sm:$0xff] }
 0x431   :  { %v7525_v15 = vpop.f32.mrf.mxu1  ;;  %8522 = vmatprep.subr.bf16.mxu1 %v22603_v21  ;;  %v25957_v21 = vld [vmem:[#allocation20_spill] sm:$0xff]  ;;  %v25974_v36 = vld [vmem:[#allocation26_spill] sm:$0xff] }
 0x433   :  { %8298 = vmatpush1.bf16.msra.mxu0 %v23040_v60 }
 0x434   :  { %8523 = vmatpush1.bf16.msra.mxu1 %v22616_v45  ;;  %8559 = vmatprep.subr.bf16.mxu0 %v22550_v52  ;;  %v25952_v52 = vld [vmem:[#allocation9_spill] sm:$0xff]  ;;  %v25959_v45 = vld [vmem:[#allocation23_spill] sm:$0xff] }
 0x435   :  { %8524 = vmatprep.subr.bf16.mxu1 %v22628_v48  ;;  %v25961_v48 = vld [vmem:[#allocation25_spill] sm:$0xff] }
 0x436   :  { %15373 = vmatmul.mubr.msk.bf16.vlgmr.msra.gmra.mxu0 %vm8190_vm4, %v7775_v46 }
 0x437   :  { %8560 = vmatpush1.bf16.msra.mxu0 %v22570_v53  ;;  %8591 = vmatprep.mubr.bf16.mxu0 %v8513_v40  ;;  %v25953_v53 = vld [vmem:[#allocation16_spill] sm:$0xff] }
 0x438   :  { %8525 = vmatpush1.bf16.msra.mxu1 %v22640_v63  ;;  %8561 = vmatprep.subr.bf16.mxu0 %v22583_v44  ;;  %v25954_v44 = vld [vmem:[#allocation10_spill] sm:$0xff]  ;;  %v25962_v63 = vld [vmem:[#allocation15_spill] sm:$0xff] }
 0x439   :  { %8526 = vmatprep.subr.bf16.mxu1 %v22652_v0 }
 0x43b   :  { %8562 = vmatpush1.bf16.msra.mxu0 %v22598_v38  ;;  %v25956_v38 = vld [vmem:[#allocation11_spill] sm:$0xff] }
 0x43c   :  { %8527 = vmatpush1.bf16.msra.mxu1 %v22664_v1  ;;  %8563 = vmatprep.subr.bf16.mxu0 %v22610_v22  ;;  %v25958_v22 = vld [vmem:[#allocation12_spill] sm:$0xff]  ;;  %v25965_v1 = vld [vmem:[#allocation6_spill] sm:$0xff] }
 0x43d   :  { %8528 = vmatprep.subr.bf16.mxu1 %v22676_v5 }
 0x43f   :  { %8564 = vmatpush1.bf16.msra.mxu0 %v22623_v18  ;;  %v25960_v18 = vld [vmem:[#allocation13_spill] sm:$0xff] }
 0x440   :  { %8529 = vmatpush1.bf16.msra.mxu1 %v22688_v2  ;;  %8565 = vmatprep.subr.bf16.mxu0 %v22634_v57  ;;  %v25968_v2 = vld [vmem:[#allocation5_spill] sm:$0xff] }
 0x441   :  { %8530 = vmatprep.subr.bf16.mxu1 %v22700_v55 }
 0x443   :  { %8566 = vmatpush1.bf16.msra.mxu0 %v22647_v59  ;;  %v25963_v59 = vld [vmem:[#allocation27_spill] sm:$0xff] }
 0x444   :  { %8531 = vmatpush1.bf16.msra.mxu1 %v22712_v9  ;;  %8567 = vmatprep.subr.bf16.mxu0 %v22658_v20  ;;  %v25964_v0 = vunpack.i.l.bf16 %v25963_v59  ;;  %v18238_v59 = vld [vmem:[%s25818_s3 + $0x624] ss:$52 sps:$4 sm:$0xff]  }
 0x445   :  { %8532 = vmatprep.subr.bf16.mxu1 %v22724_v32  ;;  %v25970_v32 = vld [vmem:[#allocation19_spill] sm:$0xff] }
 0x447   :  { %8568 = vmatpush1.bf16.msra.mxu0 %v22671_v11  ;;  %v25966_v11 = vmax.f32 %v25965_v1, 0.0 }
 0x448   :  { %8533 = vmatpush1.bf16.msra.mxu1 %v22736_v23  ;;  %8569 = vmatprep.subr.bf16.mxu0 %v22682_v24  ;;  %v25967_v24 = vld [vmem:[#allocation17_spill] sm:$0xff] }
 0x449   :  { %8534 = vmatprep.subr.bf16.mxu1 %v22748_v8  ;;  %v25971_v23 = vld [vmem:[#allocation21_spill] sm:$0xff] }
 0x44b   :  { %8570 = vmatpush1.bf16.msra.mxu0 %v22695_v7  ;;  %v25969_v7 = vmax.f32 %v25968_v2, 0.0 }
 0x44c   :  { %8535 = vmatpush2.bf16.msra.mxu1 %v22760_v37  ;;  %8571 = vmatprep.subr.bf16.mxu0 %v22706_v10  ;;  %v16582_v10 = vunpack.i.h.bf16 %v22832_v51  ;;  %v7441_v37 = vadd.f32 %v22984_v25, %v22982_v61 }
 0x44d   :  { %8536 = vmatprep.subr.bf16.mxu1 %v22772_v28 }
 0x44f   :  { %8572 = vmatpush1.bf16.msra.mxu0 %v25950_v39  ;;  %v25977_v39 = vld [vmem:[#allocation32_spill] sm:$0xff] }
 0x450   :  { %8537 = vmatpush2.bf16.msra.mxu1 %v25951_v35  ;;  %8573 = vmatprep.subr.bf16.mxu0 %v25952_v52 }
 0x451   :  { %8538 = vmatprep.subr.bf16.mxu1 %v25953_v53  ;;  %v25980_v53 = vld [vmem:[#allocation34_spill] sm:$0xff] }
 0x453   :  { %8574 = vmatpush1.bf16.msra.mxu0 %v25954_v44  ;;  %v25981_v44 = vld [vmem:[#allocation3_spill] sm:$0xff] }
 0x454   :  { %8539 = vmatpush2.bf16.msra.mxu1 %v25955_v14  ;;  %8575 = vmatprep.subr.bf16.mxu0 %v25956_v38 }
 0x455   :  { %8540 = vmatprep.subr.bf16.mxu1 %v25957_v21 }
 0x457   :  { %8576 = vmatpush2.bf16.msra.mxu0 %v25958_v22 }
 0x458   :  { %8541 = vmatpush2.bf16.msra.mxu1 %v25959_v45  ;;  %8577 = vmatprep.subr.bf16.mxu0 %v25960_v18  ;;  %v18229_v18 = vld [vmem:[%s25818_s3 + $0x684] ss:$52 sps:$4 sm:$0xff]  }
 0x459   :  { %8542 = vmatprep.subr.bf16.mxu1 %v25961_v48  ;;  %v18235_v48 = vld [vmem:[%s25818_s3 + $0x61c] ss:$52 sps:$4 sm:$0xff]  }
 0x45b   :  { %8578 = vmatpush2.bf16.msra.mxu0 %v25962_v63 }
 0x45c   :  { %v10551_v57 = vpop.permute.xlu1 %10550  ;;  %8543 = vmatpush2.bf16.msra.mxu1 %v22864_v17  ;;  %8579 = vmatprep.subr.bf16.mxu0 %v25967_v24  ;;  %v25972_v17 = vunpack.i.l.bf16 %v22832_v51 }
 0x45d   :  { %v10555_v20 = vsel %vm7726_vm1, %v25964_v0, %v10551_v57  ;;  %v23095_v5 = vmax.f32 %v25966_v11, %v10551_v57  ;;  %8544 = vmatprep.subr.bf16.mxu1 %v22878_v13  ;;  %v18236_v57 = vld [vmem:[%s25818_s3 + $0x620] ss:$52 sps:$4 sm:$0xff]  }
 0x45e   :  { %v23101_v55 = vmax.f32 %v25969_v7, %v10555_v20  ;;  %v8496_v8 = vsel %vm7756_vm2, %v16582_v10, %v25972_v17  ;;  %v18241_v7 = vld [vmem:[%s25818_s3 + $0x5b4] ss:$52 sps:$4 sm:$0xff]   ;;  %v18244_v10 = vld [vmem:[%s25818_s3 + $0x5bc] ss:$52 sps:$4 sm:$0xff]   ;;  %v18242_v17 = vld [vmem:[%s25818_s3 + $0x5b8] ss:$52 sps:$4 sm:$0xff]  }
 0x45f   :  { %8580 = vmatpush2.bf16.msra.mxu0 %v25970_v32  ;;  %v8505_v15 = vmax.f32 %v25975_v16, %v8496_v8 }
 0x460   :  { %v16598_v9 = vpack.i.bf16 %v23095_v5, %v23101_v55  ;;  %8545 = vmatpush2.bf16.msra.mxu1 %v22899_v26  ;;  %8581 = vmatprep.subr.bf16.mxu0 %v25971_v23  ;;  %v18239_v23 = vld [vmem:[%s25818_s3 + $0x5b0] ss:$52 sps:$4 sm:$0xff]  }
 0x461   :  { %8546 = vmatprep.subr.bf16.mxu1 %v22919_v42 }
 0x462   :  { %16599 = vrot.lane.b32.xlu0 %v16598_v9, %s19093_s15  ;;  %v7479_v13 = vpop.f32.mrf.mxu0 }
 0x463   :  { %v7480_v28 = vadd.f32 %v7479_v13, %v22968_v31  ;;  %8582 = vmatpush2.bf16.msra.mxu0 %v25973_v41 }
 0x464   :  { %8547 = vmatpush2.bf16.msra.mxu1 %v22937_v30  ;;  %v7481_v26 = vpop.f32.mrf.mxu0  ;;  %8583 = vmatprep.subr.bf16.mxu0 %v25974_v36  ;;  %v25976_v30 = vld [vmem:[#allocation28_spill] sm:$0xff] }
 0x465   :  { %v23123_v42 = vadd.f32 %v23012_v33, %v7480_v28  ;;  %v7482_v51 = vadd.f32 %v7481_v26, %v7441_v37  ;;  %8548 = vmatprep.subr.bf16.mxu1 %v22949_v4  ;;  %v8510_v33 = vpack.c.bf16 %v8505_v15, %v8505_v15  ;;  %v25983_v37 = vld [vmem:[#allocation7_spill] sm:$0xff]  ;;  %v18247_v15 = vld [vmem:[%s25818_s3 + $0x54c] ss:$52 sps:$4 sm:$0xff]  }
 0x466   :  { %v7483_v54 = vpop.f32.mrf.mxu0  ;;  %v7706_v28 = vmax.f32 %v25983_v37, 0.0 }
 0x467   :  { %v23127_v61 = vadd.f32 %v23026_v49, %v7482_v51  ;;  %8584 = vmatpush2.bf16.msra.mxu0 %v22873_v50  ;;  %v7707_v25 = vmax.f32 %v23123_v42, 0.0  ;;  %v25978_v50 = vld [vmem:[#allocation33_spill] sm:$0xff]  ;;  %v25979_v49 = vld [vmem:[#allocation22_spill] sm:$0xff] }
 0x468   :  { %8549 = vmatpush2.bf16.msra.mxu1 %v22974_v56  ;;  %v7484_v31 = vpop.f32.mrf.mxu0  ;;  %8585 = vmatprep.subr.bf16.mxu0 %v25976_v30  ;;  %v8498_v35 = vsel %vm7756_vm2, %v25979_v49, %v16576_v43  ;;  %v25982_v43 = vld [vmem:[#allocation2_spill] sm:$0xff]  ;;  %v18262_v49 = vld [vmem:[%s25818_s3 + $0x484] ss:$52 sps:$4 sm:$0xff]  }
 0x469   :  { %v7708_v46 = vmax.f32 %v23127_v61, 0.0  ;;  %v8507_v14 = vmax.f32 %v25981_v44, %v8498_v35  ;;  %v18250_v51 = vld [vmem:[%s25818_s3 + $0x554] ss:$52 sps:$4 sm:$0xff]   ;;  %v18257_v35 = vld [vmem:[%s25818_s3 + $0x478] ss:$52 sps:$4 sm:$0xff]  }
 0x46a   :  { %v18245_v30 = vld [vmem:[%s25818_s3 + $0x548] ss:$52 sps:$4 sm:$0xff]  }
 0x46b   :  { %v7561_v40 = vpop.f32.mrf.mxu1  ;;  %8551 = vmatmul.mubr.bf16.vlgmr.msra.gmra.mxu1 %v8510_v33  ;;  %8586 = vmatpush2.bf16.msra.mxu0 %v25977_v39  ;;  %v16603_v4 = vpack.i.bf16 %v7708_v46, %v7707_v25  ;;  %v8512_v21 = vpack.c.bf16 %v8507_v14, %v8507_v14  ;;  %v18248_v33 = vld [vmem:[%s25818_s3 + $0x550] ss:$52 sps:$4 sm:$0xff]   ;;  %v18265_v44 = vld [vmem:[%s25818_s3 + $0x414] ss:$52 sps:$4 sm:$0xff]   ;;  %v18266_v14 = vld [vmem:[%s25818_s3 + $0x418] ss:$52 sps:$4 sm:$0xff]  }
 0x46c   :  { %8587 = vmatprep.subr.bf16.mxu0 %v25978_v50  ;;  %v18253_v39 = vld [vmem:[%s25818_s3 + $0x4e4] ss:$52 sps:$4 sm:$0xff]   ;;  %v18256_v50 = vld [vmem:[%s25818_s3 + $0x4ec] ss:$52 sps:$4 sm:$0xff]  }
 0x46d   :  { %v7563_v56 = vpop.f32.mrf.mxu1  ;;  %16604 = vrot.lane.b32.xlu1 %v16603_v4, %s19092_s17  ;;  %v18254_v4 = vld [vmem:[%s25818_s3 + $0x4e8] ss:$52 sps:$4 sm:$0xff]  }
 0x46f   :  { %v7565_v52 = vpop.f32.mrf.mxu1  ;;  %8588 = vmatpush2.bf16.msra.mxu0 %v25980_v53  ;;  %v18263_v53 = vld [vmem:[%s25818_s3 + $0x410] ss:$52 sps:$4 sm:$0xff]  }
 0x470   :  { %8589 = vmatprep.subr.bf16.mxu0 %v22959_v12  ;;  %v8509_v12 = vmax.f32 %v25982_v43, %v16577_v27  ;;  %v18230_v27 = vld [vmem:[%s25818_s3 + $0x688] ss:$52 sps:$4 sm:$0xff]   ;;  %v18260_v52 = vld [vmem:[%s25818_s3 + $0x480] ss:$52 sps:$4 sm:$0xff]  }
 0x471   :  { %v7566_v38 = vpop.f32.mrf.mxu1  ;;  %v18269_v43 = vld [vmem:[%s25818_s3 + $0x3a8] ss:$52 sps:$4 sm:$0xff]  }
 0x472   :  { %v18268_v38 = vld [vmem:[%s25818_s3 + $0x41c] ss:$52 sps:$4 sm:$0xff]  }
 0x473   :  { %8590 = vmatpush2.bf16.msra.mxu0 %v22990_v29  ;;  %v8514_v29 = vpack.c.bf16 %v8509_v12, %v8509_v12  ;;  %v18274_v12 = vld [vmem:[%s25818_s3 + $0x3b4] ss:$52 sps:$4 sm:$0xff]  }
 0x474   :  { %15374 = vmatprep.subr.msk.bf16.mxu0 %vm8194_vm3, %v22992_v47 }
 0x476   :  { %8592 = vmatmul.mubr.bf16.vlgmr.msra.gmra.mxu0 %v8512_v21  ;;  %v18271_v21 = vld [vmem:[%s25818_s3 + $0x3ac] ss:$52 sps:$4 sm:$0xff]  }
 0x477   :  { %8611 = vmatpush1.bf16.msra.mxu0 %v23002_v58  ;;  %8632 = vmatprep.mubr.bf16.mxu0 %v25949_v62 }
 0x478   :  { %8612 = vmatprep.subr.bf16.mxu0 %v23008_v34  ;;  %v18227_v34 = vld [vmem:[%s25818_s3 + $0x680] ss:$52 sps:$4 sm:$0xff]  }
 0x47b   :  { %8613 = vmatpush1.bf16.msra.mxu0 %v23018_v3  ;;  %v18232_v3 = vld [vmem:[%s25818_s3 + $0x68c] ss:$52 sps:$4 sm:$0xff]  }
 0x47c   :  { %8614 = vmatprep.subr.bf16.mxu0 %v23024_v19  ;;  %9409 = vmatprep.subr.bf16.mxu1 %v18232_v3 }
 0x47d   :  { %9410 = vmatpush1.bf16.msra.mxu1 %v18230_v27  ;;  %v18286_v27 = vld [vmem:[%s25818_s3 + $0x69c] ss:$52 sps:$4 sm:$0xff]  }
 0x47e   :  { %9411 = vmatprep.subr.bf16.mxu1 %v18238_v59 }
 0x47f   :  { %8615 = vmatpush1.bf16.msra.mxu0 %v23040_v60  ;;  %v18233_v60 = vld [vmem:[%s25818_s3 + $0x618] ss:$52 sps:$4 sm:$0xff]  }
 0x480   :  { %9368 = vmatprep.subr.bf16.mxu0 %v18229_v18  ;;  %v18275_v18 = vld [vmem:[%s25818_s3 + $0x6e8] ss:$52 sps:$4 sm:$0xff]  }
 0x481   :  { %9412 = vmatpush1.bf16.msra.mxu1 %v18236_v57 }
 0x482   :  { %15375 = vmatmul.mubr.msk.bf16.vlgmr.msra.gmra.mxu0 %vm8190_vm4, %v8514_v29  ;;  %9413 = vmatprep.subr.bf16.mxu1 %v18244_v10  ;;  %v18272_v29 = vld [vmem:[%s25818_s3 + $0x3b0] ss:$52 sps:$4 sm:$0xff]  }
 0x483   :  { %9369 = vmatpush1.bf16.msra.mxu0 %v18227_v34  ;;  %v18278_v34 = vld [vmem:[%s25818_s3 + $0x6f0] ss:$52 sps:$4 sm:$0xff]  }
 0x484   :  { %9370 = vmatprep.subr.bf16.mxu0 %v18235_v48 }
 0x485   :  { %9414 = vmatpush1.bf16.msra.mxu1 %v18242_v17 }
 0x486   :  { %9415 = vmatprep.subr.bf16.mxu1 %v18250_v51 }
 0x487   :  { %9371 = vmatpush1.bf16.msra.mxu0 %v18233_v60 }
 0x488   :  { %9372 = vmatprep.subr.bf16.mxu0 %v18241_v7 }
 0x489   :  { %9416 = vmatpush1.bf16.msra.mxu1 %v18248_v33 }
 0x48a   :  { %9417 = vmatprep.subr.bf16.mxu1 %v18256_v50 }
 0x48b   :  { %9373 = vmatpush1.bf16.msra.mxu0 %v18239_v23 }
 0x48c   :  { %9374 = vmatprep.subr.bf16.mxu0 %v18247_v15 }
 0x48d   :  { %9418 = vmatpush1.bf16.msra.mxu1 %v18254_v4 }
 0x48e   :  { %9419 = vmatprep.subr.bf16.mxu1 %v18262_v49 }
 0x48f   :  { %9375 = vmatpush1.bf16.msra.mxu0 %v18245_v30  ;;  %v23294_v23 = vpop.permute.xlu1 %10571 }
 0x490   :  { %9376 = vmatprep.subr.bf16.mxu0 %v18253_v39 }
 0x491   :  { %9420 = vmatpush1.bf16.msra.mxu1 %v18260_v52  ;;  %v23296_v17 = vpop.permute.xlu0 %16594 }
 0x492   :  { %9421 = vmatprep.subr.bf16.mxu1 %v18268_v38 }
 0x495   :  { %9422 = vmatpush1.bf16.msra.mxu1 %v18266_v14 }
 0x496   :  { %9423 = vmatprep.subr.bf16.mxu1 %v18274_v12  ;;  %v18281_v12 = vld [vmem:[%s25818_s3 + $0x690] ss:$52 sps:$4 sm:$0xff]  }
 0x499   :  { %9424 = vmatpush1.bf16.msra.mxu1 %v18272_v29  ;;  %v18284_v29 = vld [vmem:[%s25818_s3 + $0x698] ss:$52 sps:$4 sm:$0xff]  }
 0x4a2   :  { %v7602_v22 = vpop.f32.mrf.mxu0 }
 0x4a3   :  { %v7603_v63 = vadd.f32 %v7602_v22, %v7561_v40  ;;  %v18251_v40 = vld [vmem:[%s25818_s3 + $0x4e0] ss:$52 sps:$4 sm:$0xff]  }
 0x4a4   :  { %v7604_v45 = vpop.f32.mrf.mxu0  ;;  %9377 = vmatpush1.bf16.msra.mxu0 %v18251_v40  ;;  %v18277_v22 = vld [vmem:[%s25818_s3 + $0x6ec] ss:$52 sps:$4 sm:$0xff]  }
 0x4a5   :  { %v7605_v1 = vadd.f32 %v7604_v45, %v7563_v56  ;;  %v18259_v56 = vld [vmem:[%s25818_s3 + $0x47c] ss:$52 sps:$4 sm:$0xff]   ;;  %v18280_v45 = vld [vmem:[%s25818_s3 + $0x6f4] ss:$52 sps:$4 sm:$0xff]  }
 0x4a6   :  { %v7606_v6 = vpop.f32.mrf.mxu0  ;;  %9378 = vmatprep.subr.bf16.mxu0 %v18259_v56  ;;  %9439 = vmatprep.subr.bf16.mxu1 %v18280_v45 }
 0x4a7   :  { %v18283_v6 = vld [vmem:[%s25818_s3 + $0x694] ss:$52 sps:$4 sm:$0xff]   ;;  %9440 = vmatpush2.bf16.msra.mxu1 %v18278_v34 }
 0x4a8   :  { %v7607_v19 = vpop.f32.mrf.mxu0  ;;  %9379 = vmatpush1.bf16.msra.mxu0 %v18257_v35  ;;  %9491 = vmatprep.subr.bf16.mxu1 %v18286_v27  ;;  %v18292_v27 = vld [vmem:[%s25818_s3 + $0x634] ss:$52 sps:$4 sm:$0xff]  }
 0x4a9   :  { %9380 = vmatprep.subr.bf16.mxu0 %v18265_v44 }
 0x4aa   :  { %v7684_v20 = vpop.f32.mrf.mxu0 }
 0x4ab   :  { %v7643_v0 = vpop.f32.mrf.mxu1 }
 0x4ac   :  { %v7644_v11 = vadd.f32 %v7643_v0, %v7603_v63  ;;  %v7686_v2 = vpop.f32.mrf.mxu0  ;;  %9381 = vmatpush1.bf16.msra.mxu0 %v18263_v53 }
 0x4ad   :  { %v7645_v24 = vpop.f32.mrf.mxu1  ;;  %9382 = vmatprep.subr.bf16.mxu0 %v18271_v21 }
 0x4ae   :  { %v23191_v9 = vadd.f32 %v7684_v20, %v7644_v11  ;;  %v7646_v32 = vadd.f32 %v7645_v24, %v7605_v1  ;;  %v7688_v8 = vpop.f32.mrf.mxu0 }
 0x4af   :  { %v7647_v13 = vpop.f32.mrf.mxu1 }
 0x4b0   :  { %v7709_v41 = vmax.f32 %v23191_v9, 0.0  ;;  %v23201_v26 = vadd.f32 %v7686_v2, %v7646_v32  ;;  %v7689_v36 = vpop.f32.mrf.mxu0  ;;  %9383 = vmatpush1.bf16.msra.mxu0 %v18269_v43 }
 0x4b1   :  { %v7648_v16 = vpop.f32.mrf.mxu1  ;;  %9398 = vmatprep.subr.bf16.mxu0 %v18277_v22 }
 0x4b2   :  { %v16608_v54 = vpack.i.bf16 %v7706_v28, %v7709_v41  ;;  %v7710_v31 = vmax.f32 %v23201_v26, 0.0 }
 0x4b4   :  { %11764 = vrot.lane.b32.xlu1 %v7710_v31, %s19092_s17  ;;  %16609 = vrot.lane.b32.xlu0 %v16608_v54, %s19092_s17 }
 0x4b5   :  { %9399 = vmatpush2.bf16.msra.mxu0 %v18275_v18 }
 0x4b6   :  { %9450 = vmatprep.subr.bf16.mxu0 %v18283_v6  ;;  %v18289_v6 = vld [vmem:[%s25818_s3 + $0x62c] ss:$52 sps:$4 sm:$0xff]  }
 0x4d4   :  { %v23298_v13 = vpop.permute.xlu0 %16599 }
 0x4df   :  { %v16605_v8 = vpop.permute.xlu1 %16604 }
 0x4e0   :  { %v16607_v36 = vunpack.i.h.bf16 %v16605_v8  ;;  %v16606_v16 = vunpack.i.l.bf16 %v16605_v8  ;;  %v18313_v8 = vld [vmem:[%s25818_s3 + $0x48c] ss:$52 sps:$4 sm:$0xff]  }
 0x4e2   :  { %v11767_v51 = vsel %vm7726_vm1, %v16606_v16, %v16607_v36 }
 0x4e3   :  { %v23310_v56 = vmax.f32 %v7707_v25, %v11767_v51  ;;  %v18319_v51 = vld [vmem:[%s25818_s3 + $0x424] ss:$52 sps:$4 sm:$0xff]  }
 0x4ea   :  { %v8235_v3 = vpop.f32.mrf.mxu0 }
 0x4eb   :  { %v8276_v19 = vpop.f32.mrf.mxu1 }
 0x4ec   :  { %v8277_v60 = vadd.f32 %v8276_v19, %v8235_v3  ;;  %v8237_v48 = vpop.f32.mrf.mxu0  ;;  %v18287_v3 = vld [vmem:[%s25818_s3 + $0x628] ss:$52 sps:$4 sm:$0xff]   ;;  %v18290_v19 = vld [vmem:[%s25818_s3 + $0x630] ss:$52 sps:$4 sm:$0xff]  }
 0x4ed   :  { %v8278_v57 = vpop.f32.mrf.mxu1 }
 0x4ee   :  { %v8279_v63 = vadd.f32 %v8278_v57, %v8237_v48  ;;  %v8239_v59 = vpop.f32.mrf.mxu0  ;;  %v18298_v48 = vld [vmem:[%s25818_s3 + $0x5cc] ss:$52 sps:$4 sm:$0xff]  }
 0x4ef   :  { %v8280_v0 = vpop.f32.mrf.mxu1  ;;  %v18293_v57 = vld [vmem:[%s25818_s3 + $0x5c0] ss:$52 sps:$4 sm:$0xff]   ;;  %v18301_v59 = vld [vmem:[%s25818_s3 + $0x55c] ss:$52 sps:$4 sm:$0xff]  }
 0x4f0   :  { %v8240_v20 = vpop.f32.mrf.mxu0  ;;  %v18304_v0 = vld [vmem:[%s25818_s3 + $0x564] ss:$52 sps:$4 sm:$0xff]  }
 0x4f1   :  { %v8281_v1 = vpop.f32.mrf.mxu1  ;;  %v18299_v20 = vld [vmem:[%s25818_s3 + $0x558] ss:$52 sps:$4 sm:$0xff]  }
 0x4f2   :  { %v18302_v1 = vld [vmem:[%s25818_s3 + $0x560] ss:$52 sps:$4 sm:$0xff]  }
 0x4f6   :  { %v8317_v11 = vpop.f32.mrf.mxu0 }
 0x4f7   :  { %v23290_v24 = vadd.f32 %v8317_v11, %v8277_v60  ;;  %v18295_v60 = vld [vmem:[%s25818_s3 + $0x5c4] ss:$52 sps:$4 sm:$0xff]   ;;  %v18307_v11 = vld [vmem:[%s25818_s3 + $0x4f4] ss:$52 sps:$4 sm:$0xff]  }
 0x4f8   :  { %v8319_v2 = vpop.f32.mrf.mxu0 }
 0x4f9   :  { %v23292_v7 = vadd.f32 %v8319_v2, %v8279_v63  ;;  %v18296_v63 = vld [vmem:[%s25818_s3 + $0x5c8] ss:$52 sps:$4 sm:$0xff]  }
 0x4fa   :  { %v8321_v10 = vpop.f32.mrf.mxu0  ;;  %v18310_v2 = vld [vmem:[%s25818_s3 + $0x4fc] ss:$52 sps:$4 sm:$0xff]  }
 0x4fb   :  { %v18305_v10 = vld [vmem:[%s25818_s3 + $0x4f0] ss:$52 sps:$4 sm:$0xff]  }
 0x4fc   :  { %v8322_v32 = vpop.f32.mrf.mxu0 }
 0x4fd   :  { %v18308_v32 = vld [vmem:[%s25818_s3 + $0x4f8] ss:$52 sps:$4 sm:$0xff]  }
 0x526   :  { %v16610_v15 = vpop.permute.xlu0 %16609  ;;  %v11765_v33 = vpop.permute.xlu1 %11764 }
 0x527   :  { %v16612_v54 = vunpack.i.h.bf16 %v16610_v15  ;;  %v16611_v30 = vunpack.i.l.bf16 %v16610_v15  ;;  %v23326_v42 = vmax.f32 %v7710_v31, %v11765_v33  ;;  %v18314_v15 = vld [vmem:[%s25818_s3 + $0x490] ss:$52 sps:$4 sm:$0xff]  }
 0x529   :  { %v11768_v40 = vsel %vm7726_vm1, %v16607_v36, %v16611_v30  ;;  %v11769_v39 = vsel %vm7726_vm1, %v16611_v30, %v11765_v33  ;;  %v11766_v4 = vsel %vm7726_vm1, %v16612_v54, %v16606_v16  ;;  %25986 = vst [vmem:[#allocation9_spill] sm:$0xff] %v23326_v42  ;;  %v18316_v36 = vld [vmem:[%s25818_s3 + $0x494] ss:$52 sps:$4 sm:$0xff]   ;;  %v18322_v54 = vld [vmem:[%s25818_s3 + $0x42c] ss:$52 sps:$4 sm:$0xff]  }
 0x52a   :  { %v23306_v50 = vmax.f32 %v7706_v28, %v11766_v4  ;;  %v23314_v49 = vmax.f32 %v7708_v46, %v11768_v40  ;;  %v23322_v37 = vmax.f32 %v7709_v41, %v11769_v39  ;;  %v18311_v16 = vld [vmem:[%s25818_s3 + $0x488] ss:$52 sps:$4 sm:$0xff]   ;;  %v18317_v30 = vld [vmem:[%s25818_s3 + $0x420] ss:$52 sps:$4 sm:$0xff]   ;;  %v18328_v39 = vld [vmem:[%s25818_s3 + $0x3c4] ss:$52 sps:$4 sm:$0xff]  }
 0x52b   :  { %v8552_v35 = vpop.f32.mrf.mxu1  ;;  %v18320_v33 = vld [vmem:[%s25818_s3 + $0x428] ss:$52 sps:$4 sm:$0xff]   ;;  %v18323_v4 = vld [vmem:[%s25818_s3 + $0x3b8] ss:$52 sps:$4 sm:$0xff]  }
 0x52c   :  { %25984 = vst [vmem:[#allocation8_spill] sm:$0xff] %v23306_v50  ;;  %25985 = vst [vmem:[#allocation14_spill] sm:$0xff] %v23314_v49  ;;  %11785 = vrot.lane.b32.xlu1 %v23306_v50, %s19093_s15  ;;  %v16613_v52 = vpack.i.bf16 %v23314_v49, %v23310_v56  ;;  %v16618_v46 = vpack.i.bf16 %v23326_v42, %v23322_v37  ;;  %v18325_v40 = vld [vmem:[%s25818_s3 + $0x3bc] ss:$52 sps:$4 sm:$0xff]  }
 0x52d   :  { %v8554_v25 = vpop.f32.mrf.mxu1  ;;  %v24334_v49 = vld [vmem:[%s25817_s2 + $0x1b4] ss:$8 sps:$4 sm:$0xff]  }
 0x52e   :  { %16614 = vrot.lane.b32.xlu0 %v16613_v52, %s19093_s15  ;;  %v18331_v52 = vld [vmem:[%s25818_s3 + $0x6fc] ss:$52 sps:$4 sm:$0xff]   ;;  %26010 = vst [vmem:[#allocation22_spill] sm:$0xff] %v24334_v49 }
 0x52f   :  { %v8556_v61 = vpop.f32.mrf.mxu1 }
 0x530   :  { %v18329_v61 = vld [vmem:[%s25818_s3 + $0x6f8] ss:$52 sps:$4 sm:$0xff]  }
 0x531   :  { %v8557_v28 = vpop.f32.mrf.mxu1 }
 0x532   :  { %16619 = vrot.lane.b32.xlu0 %v16618_v46, %s19093_s15  ;;  %v18332_v46 = vld [vmem:[%s25818_s3 + $0x700] ss:$52 sps:$4 sm:$0xff]   ;;  %v18337_v28 = vld [vmem:[%s25818_s3 + $0x6a4] ss:$52 sps:$4 sm:$0xff]  }
 0x536   :  { %v8593_v53 = vpop.f32.mrf.mxu0 }
 0x537   :  { %v8594_v41 = vadd.f32 %v8593_v53, %v8552_v35  ;;  %v18326_v35 = vld [vmem:[%s25818_s3 + $0x3c0] ss:$52 sps:$4 sm:$0xff]  }
 0x538   :  { %v8595_v44 = vpop.f32.mrf.mxu0  ;;  %v18340_v53 = vld [vmem:[%s25818_s3 + $0x6ac] ss:$52 sps:$4 sm:$0xff]  }
 0x539   :  { %v8596_v21 = vadd.f32 %v8595_v44, %v8554_v25  ;;  %v18334_v25 = vld [vmem:[%s25818_s3 + $0x704] ss:$52 sps:$4 sm:$0xff]   ;;  %v18335_v44 = vld [vmem:[%s25818_s3 + $0x6a0] ss:$52 sps:$4 sm:$0xff]  }
 0x53a   :  { %v8597_v14 = vpop.f32.mrf.mxu0 }
 0x53b   :  { %v18338_v14 = vld [vmem:[%s25818_s3 + $0x6a8] ss:$52 sps:$4 sm:$0xff]  }
 0x53c   :  { %v8598_v9 = vpop.f32.mrf.mxu0 }
 0x53d   :  { %v18343_v9 = vld [vmem:[%s25818_s3 + $0x63c] ss:$52 sps:$4 sm:$0xff]  }
 0x542   :  { %v8634_v38 = vpop.f32.mrf.mxu0 }
 0x543   :  { %v8635_v26 = vadd.f32 %v8634_v38, %v8594_v41  ;;  %v18341_v41 = vld [vmem:[%s25818_s3 + $0x638] ss:$52 sps:$4 sm:$0xff]  }
 0x544   :  { %v8636_v31 = vpop.f32.mrf.mxu0  ;;  %v18346_v38 = vld [vmem:[%s25818_s3 + $0x644] ss:$52 sps:$4 sm:$0xff]  }
 0x545   :  { %v8637_v43 = vadd.f32 %v8636_v31, %v8596_v21  ;;  %v23340_v18 = vpack.c.bf16 %v8635_v26, %v8635_v26  ;;  %v18344_v21 = vld [vmem:[%s25818_s3 + $0x640] ss:$52 sps:$4 sm:$0xff]   ;;  %v18347_v31 = vld [vmem:[%s25818_s3 + $0x5d0] ss:$52 sps:$4 sm:$0xff]  }
 0x546   :  { %v8638_v22 = vpop.f32.mrf.mxu0  ;;  %v18349_v26 = vld [vmem:[%s25818_s3 + $0x5d4] ss:$52 sps:$4 sm:$0xff]  }
 0x547   :  { %v23338_v45 = vpack.c.bf16 %v8637_v43, %v8637_v43  ;;  %v18352_v43 = vld [vmem:[%s25818_s3 + $0x5dc] ss:$52 sps:$4 sm:$0xff]  }
 0x548   :  { %v8639_v34 = vpop.f32.mrf.mxu0  ;;  %v18353_v22 = vld [vmem:[%s25818_s3 + $0x568] ss:$52 sps:$4 sm:$0xff]  }
 0x549   :  { %15619 = vmatprep.mubr.msk.bf16.mxu0 %vm9364_vm5, %v23338_v45  ;;  %15620 = vmatprep.mubr.msk.bf16.mxu1 %vm9364_vm5, %v23338_v45  ;;  %v18358_v34 = vld [vmem:[%s25818_s3 + $0x574] ss:$52 sps:$4 sm:$0xff]  }
 0x54a   :  { %9401 = vmatmul.mubr.bf16.vlgmr.msra.gmra.mxu0 %v23340_v18  ;;  %9442 = vmatmul.mubr.bf16.vlgmr.msra.gmra.mxu1 %v23340_v18 }
 0x54b   :  { %9451 = vmatpush1.bf16.msra.mxu0 %v18281_v12  ;;  %9492 = vmatpush1.bf16.msra.mxu1 %v18284_v29  ;;  %v18350_v12 = vld [vmem:[%s25818_s3 + $0x5d8] ss:$52 sps:$4 sm:$0xff]  }
 0x54c   :  { %15621 = vmatprep.mubr.msk.bf16.mxu0 %vm9364_vm5, %v23338_v45  ;;  %15622 = vmatprep.mubr.msk.bf16.mxu1 %vm9364_vm5, %v23338_v45  ;;  %v18355_v29 = vld [vmem:[%s25818_s3 + $0x56c] ss:$52 sps:$4 sm:$0xff]  }
 0x54d   :  { %9452 = vmatprep.subr.bf16.mxu0 %v18289_v6  ;;  %9493 = vmatprep.subr.bf16.mxu1 %v18292_v27  ;;  %v18356_v6 = vld [vmem:[%s25818_s3 + $0x570] ss:$52 sps:$4 sm:$0xff]  }
 0x54e   :  { %v18361_v27 = vld [vmem:[%s25818_s3 + $0x504] ss:$52 sps:$4 sm:$0xff]  }
 0x54f   :  { %9453 = vmatpush1.bf16.msra.mxu0 %v18287_v3  ;;  %9494 = vmatpush1.bf16.msra.mxu1 %v18290_v19  ;;  %v18359_v3 = vld [vmem:[%s25818_s3 + $0x500] ss:$52 sps:$4 sm:$0xff]  }
 0x550   :  { %9454 = vmatprep.subr.bf16.mxu0 %v18295_v60  ;;  %9495 = vmatprep.subr.bf16.mxu1 %v18298_v48  ;;  %v18364_v19 = vld [vmem:[%s25818_s3 + $0x50c] ss:$52 sps:$4 sm:$0xff]   ;;  %v18362_v60 = vld [vmem:[%s25818_s3 + $0x508] ss:$52 sps:$4 sm:$0xff]  }
 0x551   :  { %v18367_v48 = vld [vmem:[%s25818_s3 + $0x49c] ss:$52 sps:$4 sm:$0xff]  }
 0x553   :  { %9455 = vmatpush1.bf16.msra.mxu0 %v18293_v57  ;;  %9496 = vmatpush1.bf16.msra.mxu1 %v18296_v63  ;;  %v18370_v57 = vld [vmem:[%s25818_s3 + $0x4a4] ss:$52 sps:$4 sm:$0xff]  }
 0x554   :  { %9456 = vmatprep.subr.bf16.mxu0 %v18301_v59  ;;  %9497 = vmatprep.subr.bf16.mxu1 %v18304_v0  ;;  %v18365_v63 = vld [vmem:[%s25818_s3 + $0x498] ss:$52 sps:$4 sm:$0xff]   ;;  %v18368_v59 = vld [vmem:[%s25818_s3 + $0x4a0] ss:$52 sps:$4 sm:$0xff]  }
 0x555   :  { %v18373_v0 = vld [vmem:[%s25818_s3 + $0x434] ss:$52 sps:$4 sm:$0xff]  }
 0x557   :  { %9457 = vmatpush1.bf16.msra.mxu0 %v18299_v20  ;;  %9498 = vmatpush1.bf16.msra.mxu1 %v18302_v1  ;;  %v18371_v20 = vld [vmem:[%s25818_s3 + $0x430] ss:$52 sps:$4 sm:$0xff]  }
 0x558   :  { %9458 = vmatprep.subr.bf16.mxu0 %v18307_v11  ;;  %9499 = vmatprep.subr.bf16.mxu1 %v18310_v2  ;;  %v18376_v1 = vld [vmem:[%s25818_s3 + $0x43c] ss:$52 sps:$4 sm:$0xff]   ;;  %v18374_v11 = vld [vmem:[%s25818_s3 + $0x438] ss:$52 sps:$4 sm:$0xff]  }
 0x559   :  { %v18379_v2 = vld [vmem:[%s25818_s3 + $0x3cc] ss:$52 sps:$4 sm:$0xff]  }
 0x55b   :  { %9459 = vmatpush1.bf16.msra.mxu0 %v18305_v10  ;;  %9500 = vmatpush1.bf16.msra.mxu1 %v18308_v32  ;;  %v18382_v10 = vld [vmem:[%s25818_s3 + $0x3d4] ss:$52 sps:$4 sm:$0xff]  }
 0x55c   :  { %9460 = vmatprep.subr.bf16.mxu0 %v18313_v8  ;;  %9501 = vmatprep.subr.bf16.mxu1 %v18316_v36  ;;  %v18377_v32 = vld [vmem:[%s25818_s3 + $0x3c8] ss:$52 sps:$4 sm:$0xff]   ;;  %v18380_v8 = vld [vmem:[%s25818_s3 + $0x3d0] ss:$52 sps:$4 sm:$0xff]   ;;  %v18385_v36 = vld [vmem:[%s25818_s3 + $0x70c] ss:$52 sps:$4 sm:$0xff]  }
 0x55f   :  { %9461 = vmatpush1.bf16.msra.mxu0 %v18311_v16  ;;  %9502 = vmatpush1.bf16.msra.mxu1 %v18314_v15  ;;  %v18388_v16 = vld [vmem:[%s25818_s3 + $0x714] ss:$52 sps:$4 sm:$0xff]  }
 0x560   :  { %9462 = vmatprep.subr.bf16.mxu0 %v18319_v51  ;;  %9503 = vmatprep.subr.bf16.mxu1 %v18322_v54  ;;  %v18383_v15 = vld [vmem:[%s25818_s3 + $0x708] ss:$52 sps:$4 sm:$0xff]   ;;  %v18386_v51 = vld [vmem:[%s25818_s3 + $0x710] ss:$52 sps:$4 sm:$0xff]  }
 0x561   :  { %v18391_v54 = vld [vmem:[%s25818_s3 + $0x2dc] ss:$52 sps:$4 sm:$0xff]  }
 0x563   :  { %9463 = vmatpush1.bf16.msra.mxu0 %v18317_v30  ;;  %9504 = vmatpush1.bf16.msra.mxu1 %v18320_v33  ;;  %v18392_v30 = vld [vmem:[%s25818_s3 + $0x6b0] ss:$52 sps:$4 sm:$0xff]   ;;  %v18389_v33 = vld [vmem:[%s25818_s3 + $0x2d8] ss:$52 sps:$4 sm:$0xff]  }
 0x564   :  { %9464 = vmatprep.subr.bf16.mxu0 %v18325_v40  ;;  %9505 = vmatprep.subr.bf16.mxu1 %v18328_v39  ;;  %v18395_v40 = vld [vmem:[%s25818_s3 + $0x274] ss:$52 sps:$4 sm:$0xff]   ;;  %v23578_v39 = vpack.c.bf16 %v23292_v7, %v23292_v7  ;;  %v18399_v7 = vld [vmem:[%s25818_s3 + $0x20c] ss:$52 sps:$4 sm:$0xff]  }
 0x567   :  { %9465 = vmatpush1.bf16.msra.mxu0 %v18323_v4  ;;  %9506 = vmatpush1.bf16.msra.mxu1 %v18326_v35  ;;  %v18396_v4 = vld [vmem:[%s25818_s3 + $0x648] ss:$52 sps:$4 sm:$0xff]   ;;  %v18393_v35 = vld [vmem:[%s25818_s3 + $0x270] ss:$52 sps:$4 sm:$0xff]  }
 0x568   :  { %9480 = vmatprep.subr.bf16.mxu0 %v18331_v52  ;;  %9521 = vmatprep.subr.bf16.mxu1 %v18334_v25  ;;  %v18397_v52 = vld [vmem:[%s25818_s3 + $0x208] ss:$52 sps:$4 sm:$0xff]   ;;  %v18403_v25 = vld [vmem:[%s25818_s3 + $0x1a4] ss:$52 sps:$4 sm:$0xff]  }
 0x56b   :  { %9481 = vmatpush2.bf16.msra.mxu0 %v18329_v61  ;;  %9522 = vmatpush2.bf16.msra.mxu1 %v18332_v46  ;;  %v18404_v61 = vld [vmem:[%s25818_s3 + $0x578] ss:$52 sps:$4 sm:$0xff]   ;;  %v18401_v46 = vld [vmem:[%s25818_s3 + $0x1a0] ss:$52 sps:$4 sm:$0xff]  }
 0x56c   :  { %9532 = vmatprep.subr.bf16.mxu0 %v18337_v28  ;;  %9573 = vmatprep.subr.bf16.mxu1 %v18340_v53  ;;  %v18407_v28 = vld [vmem:[%s25818_s3 + $0x13c] ss:$52 sps:$4 sm:$0xff]  }
 0x56e   :  { %9483 = vmatmul.mubr.bf16.vlgmr.msra.gmra.mxu0 %v23340_v18  ;;  %9524 = vmatmul.mubr.bf16.vlgmr.msra.gmra.mxu1 %v23340_v18 }
 0x56f   :  { %9533 = vmatpush1.bf16.msra.mxu0 %v18335_v44  ;;  %15623 = vmatprep.mubr.msk.bf16.mxu0 %vm9364_vm5, %v23338_v45  ;;  %v18408_v44 = vld [vmem:[%s25818_s3 + $0x510] ss:$52 sps:$4 sm:$0xff]  }
 0x570   :  { %9574 = vmatpush1.bf16.msra.mxu1 %v18338_v14  ;;  %15624 = vmatprep.mubr.msk.bf16.mxu1 %vm9364_vm5, %v23338_v45  ;;  %v18405_v14 = vld [vmem:[%s25818_s3 + $0x138] ss:$52 sps:$4 sm:$0xff]  }
 0x571   :  { %9534 = vmatprep.subr.bf16.mxu0 %v18343_v9  ;;  %9575 = vmatprep.subr.bf16.mxu1 %v18346_v38  ;;  %v18411_v9 = vld [vmem:[%s25818_s3 + $0xd4] ss:$52 sps:$4 sm:$0xff]  }
 0x572   :  { %v18412_v38 = vld [vmem:[%s25818_s3 + $0x4a8] ss:$52 sps:$4 sm:$0xff]  }
 0x573   :  { %9535 = vmatpush1.bf16.msra.mxu0 %v18341_v41 }
 0x574   :  { %9576 = vmatpush1.bf16.msra.mxu1 %v18344_v21  ;;  %9536 = vmatprep.subr.bf16.mxu0 %v18349_v26 }
 0x575   :  { %9577 = vmatprep.subr.bf16.mxu1 %v18352_v43  ;;  %v18415_v43 = vld [vmem:[%s25818_s3 + $0x6c] ss:$52 sps:$4 sm:$0xff]  }
 0x577   :  { %9537 = vmatpush1.bf16.msra.mxu0 %v18347_v31  ;;  %v18409_v31 = vld [vmem:[%s25818_s3 + $0xd0] ss:$52 sps:$4 sm:$0xff]  }
 0x578   :  { %9578 = vmatpush1.bf16.msra.mxu1 %v18350_v12  ;;  %9538 = vmatprep.subr.bf16.mxu0 %v18355_v29  ;;  %v18416_v29 = vld [vmem:[%s25818_s3 + $0x440] ss:$52 sps:$4 sm:$0xff]  }
 0x579   :  { %9579 = vmatprep.subr.bf16.mxu1 %v18358_v34  ;;  %v18419_v34 = vld [vmem:[%s25818_s3 + $0x4] ss:$52 sps:$4 sm:$0xff]  }
 0x57b   :  { %9539 = vmatpush1.bf16.msra.mxu0 %v18353_v22  ;;  %v18413_v22 = vld [vmem:[%s25818_s3 + $0x68] ss:$52 sps:$4 sm:$0xff]  }
 0x57c   :  { %9580 = vmatpush1.bf16.msra.mxu1 %v18356_v6  ;;  %9540 = vmatprep.subr.bf16.mxu0 %v18361_v27  ;;  %v18420_v6 = vld [vmem:[%s25818_s3 + $0x3d8] ss:$52 sps:$4 sm:$0xff]   ;;  %v18417_v27 = vld [vmem:[%s25818_s3] ss:$52 sps:$4 sm:$0xff]  }
 0x57d   :  { %9581 = vmatprep.subr.bf16.mxu1 %v18364_v19  ;;  %v18424_v19 = vld [vmem:[%s25818_s3 + $0x718] ss:$52 sps:$4 sm:$0xff]  }
 0x57f   :  { %9541 = vmatpush1.bf16.msra.mxu0 %v18359_v3  ;;  %v18423_v3 = vld [vmem:[%s25818_s3 + $0x344] ss:$52 sps:$4 sm:$0xff]  }
 0x580   :  { %9582 = vmatpush1.bf16.msra.mxu1 %v18362_v60  ;;  %9542 = vmatprep.subr.bf16.mxu0 %v18367_v48  ;;  %v18421_v60 = vld [vmem:[%s25818_s3 + $0x340] ss:$52 sps:$4 sm:$0xff]   ;;  %v18427_v48 = vld [vmem:[%s25818_s3 + $0x2e4] ss:$52 sps:$4 sm:$0xff]  }
 0x581   :  { %9583 = vmatprep.subr.bf16.mxu1 %v18370_v57  ;;  %v18430_v57 = vld [vmem:[%s25818_s3 + $0x2ec] ss:$52 sps:$4 sm:$0xff]  }
 0x583   :  { %9543 = vmatpush1.bf16.msra.mxu0 %v18365_v63  ;;  %v18425_v63 = vld [vmem:[%s25818_s3 + $0x2e0] ss:$52 sps:$4 sm:$0xff]  }
 0x584   :  { %9584 = vmatpush1.bf16.msra.mxu1 %v18368_v59  ;;  %9544 = vmatprep.subr.bf16.mxu0 %v18373_v0  ;;  %v18428_v59 = vld [vmem:[%s25818_s3 + $0x2e8] ss:$52 sps:$4 sm:$0xff]   ;;  %v23689_v0 = vpack.c.bf16 %v23290_v24, %v23290_v24  ;;  %v18434_v24 = vld [vmem:[%s25818_s3 + $0x280] ss:$52 sps:$4 sm:$0xff]  }
 0x585   :  { %9585 = vmatprep.subr.bf16.mxu1 %v18376_v1  ;;  %v18436_v1 = vld [vmem:[%s25818_s3 + $0x284] ss:$52 sps:$4 sm:$0xff]  }
 0x587   :  { %9545 = vmatpush1.bf16.msra.mxu0 %v18371_v20  ;;  %v18433_v20 = vld [vmem:[%s25818_s3 + $0x27c] ss:$52 sps:$4 sm:$0xff]  }
 0x588   :  { %9586 = vmatpush1.bf16.msra.mxu1 %v18374_v11  ;;  %9546 = vmatprep.subr.bf16.mxu0 %v18379_v2  ;;  %v18431_v11 = vld [vmem:[%s25818_s3 + $0x278] ss:$52 sps:$4 sm:$0xff]   ;;  %v18442_v2 = vld [vmem:[%s25818_s3 + $0x21c] ss:$52 sps:$4 sm:$0xff]  }
 0x589   :  { %9587 = vmatprep.subr.bf16.mxu1 %v18382_v10  ;;  %v18437_v10 = vld [vmem:[%s25818_s3 + $0x210] ss:$52 sps:$4 sm:$0xff]  }
 0x58b   :  { %9547 = vmatpush1.bf16.msra.mxu0 %v18377_v32  ;;  %v18440_v32 = vld [vmem:[%s25818_s3 + $0x218] ss:$52 sps:$4 sm:$0xff]  }
 0x58c   :  { %9588 = vmatpush1.bf16.msra.mxu1 %v18380_v8  ;;  %9562 = vmatprep.subr.bf16.mxu0 %v18385_v36  ;;  %v18445_v8 = vld [vmem:[%s25818_s3 + $0x1ac] ss:$52 sps:$4 sm:$0xff]   ;;  %v18448_v36 = vld [vmem:[%s25818_s3 + $0x1b4] ss:$52 sps:$4 sm:$0xff]  }
 0x58d   :  { %9603 = vmatprep.subr.bf16.mxu1 %v18388_v16  ;;  %v18443_v16 = vld [vmem:[%s25818_s3 + $0x1a8] ss:$52 sps:$4 sm:$0xff]  }
 0x58f   :  { %9563 = vmatpush2.bf16.msra.mxu0 %v18383_v15  ;;  %v18446_v15 = vld [vmem:[%s25818_s3 + $0x1b0] ss:$52 sps:$4 sm:$0xff]  }
 0x590   :  { %9604 = vmatpush2.bf16.msra.mxu1 %v18386_v51  ;;  %9614 = vmatprep.subr.bf16.mxu0 %v25949_v62  ;;  %v18451_v51 = vld [vmem:[%s25818_s3 + $0x144] ss:$52 sps:$4 sm:$0xff]  }
 0x591   :  { %10251 = vmatprep.subr.bf16.mxu1 %v18391_v54  ;;  %v18454_v54 = vld [vmem:[%s25818_s3 + $0x14c] ss:$52 sps:$4 sm:$0xff]  }
 0x592   :  { %9565 = vmatmul.mubr.bf16.vlgmr.msra.gmra.mxu0 %v23340_v18 }
 0x593   :  { %9606 = vmatmul.mubr.bf16.vlgmr.msra.gmra.mxu1 %v23340_v18  ;;  %9615 = vmatpush1.bf16.msra.mxu0 %v18392_v30  ;;  %v18449_v30 = vld [vmem:[%s25818_s3 + $0x140] ss:$52 sps:$4 sm:$0xff]  }
 0x594   :  { %15625 = vmatprep.mubr.msk.bf16.mxu0 %vm9364_vm5, %v23338_v45  ;;  %10252 = vmatpush1.bf16.msra.mxu1 %v18389_v33  ;;  %v18400_v45 = vld [vmem:[%s25818_s3 + $0x5e0] ss:$52 sps:$4 sm:$0xff]   ;;  %v18452_v33 = vld [vmem:[%s25818_s3 + $0x148] ss:$52 sps:$4 sm:$0xff]  }
 0x595   :  { %15743 = vmatprep.mubr.msk.bf16.mxu1 %vm9364_vm5, %v23578_v39  ;;  %9616 = vmatprep.subr.bf16.mxu0 %v25949_v62 }
 0x596   :  { %10253 = vmatprep.subr.bf16.mxu1 %v18395_v40  ;;  %v18457_v40 = vld [vmem:[%s25818_s3 + $0xdc] ss:$52 sps:$4 sm:$0xff]  }
 0x597   :  { %9617 = vmatpush1.bf16.msra.mxu0 %v18396_v4  ;;  %v18460_v4 = vld [vmem:[%s25818_s3 + $0xe4] ss:$52 sps:$4 sm:$0xff]  }
 0x598   :  { %10254 = vmatpush1.bf16.msra.mxu1 %v18393_v35  ;;  %9618 = vmatprep.subr.bf16.mxu0 %v25949_v62  ;;  %v18455_v35 = vld [vmem:[%s25818_s3 + $0xd8] ss:$52 sps:$4 sm:$0xff]  }
 0x599   :  { %10255 = vmatprep.subr.bf16.mxu1 %v18399_v7  ;;  %v18458_v7 = vld [vmem:[%s25818_s3 + $0xe0] ss:$52 sps:$4 sm:$0xff]  }
 0x59b   :  { %9619 = vmatpush1.bf16.msra.mxu0 %v18400_v45  ;;  %v18463_v45 = vld [vmem:[%s25818_s3 + $0x74] ss:$52 sps:$4 sm:$0xff]  }
 0x59c   :  { %10256 = vmatpush1.bf16.msra.mxu1 %v18397_v52  ;;  %9620 = vmatprep.subr.bf16.mxu0 %v25949_v62  ;;  %v18466_v52 = vld [vmem:[%s25818_s3 + $0x7c] ss:$52 sps:$4 sm:$0xff]  }
 0x59d   :  { %10257 = vmatprep.subr.bf16.mxu1 %v18403_v25  ;;  %v18461_v25 = vld [vmem:[%s25818_s3 + $0x70] ss:$52 sps:$4 sm:$0xff]  }
 0x59f   :  { %9621 = vmatpush1.bf16.msra.mxu0 %v18404_v61  ;;  %v18464_v61 = vld [vmem:[%s25818_s3 + $0x78] ss:$52 sps:$4 sm:$0xff]  }
 0x5a0   :  { %v23615_v53 = vpop.permute.xlu0 %16614  ;;  %10258 = vmatpush1.bf16.msra.mxu1 %v18401_v46  ;;  %9622 = vmatprep.subr.bf16.mxu0 %v25949_v62  ;;  %v18469_v46 = vld [vmem:[%s25818_s3 + $0xc] ss:$52 sps:$4 sm:$0xff]  }
 0x5a1   :  { %10259 = vmatprep.subr.bf16.mxu1 %v18407_v28  ;;  %v25868_v21 = vunpack.i.h.bf16 %v23615_v53  ;;  %v18472_v28 = vld [vmem:[%s25818_s3 + $0x14] ss:$52 sps:$4 sm:$0xff]  }
 0x5a3   :  { %9623 = vmatpush1.bf16.msra.mxu0 %v18408_v44  ;;  %v18467_v44 = vld [vmem:[%s25818_s3 + $0x8] ss:$52 sps:$4 sm:$0xff]  }
 0x5a4   :  { %v23627_v41 = vpop.permute.xlu0 %16619  ;;  %10260 = vmatpush1.bf16.msra.mxu1 %v18405_v14  ;;  %9624 = vmatprep.subr.bf16.mxu0 %v25949_v62  ;;  %v18470_v14 = vld [vmem:[%s25818_s3 + $0x10] ss:$52 sps:$4 sm:$0xff]  }
 0x5a5   :  { %v25867_v26 = vunpack.i.l.bf16 %v23627_v41  ;;  %10261 = vmatprep.subr.bf16.mxu1 %v18411_v9  ;;  %v18475_v9 = vld [vmem:[%s25818_s3 + $0x34c] ss:$52 sps:$4 sm:$0xff]  }
 0x5a7   :  { %v23646_v12 = vsel %vm7756_vm2, %v25868_v21, %v25867_v26  ;;  %9625 = vmatpush1.bf16.msra.mxu0 %v18412_v38  ;;  %v18478_v38 = vld [vmem:[%s25818_s3 + $0x354] ss:$52 sps:$4 sm:$0xff]   ;;  %v24250_v26 = vld [vmem:[%s25817_s2 + $0x1f0] ss:$8 sps:$4 sm:$0xff]   ;;  %v24256_v21 = vld [vmem:[%s25817_s2 + $0xe4] ss:$8 sps:$4 sm:$0xff]  }
 0x5a8   :  { %25987 = vst [vmem:[#allocation16_spill] sm:$0xff] %v23646_v12  ;;  %10262 = vmatpush1.bf16.msra.mxu1 %v18409_v31  ;;  %9626 = vmatprep.subr.bf16.mxu0 %v25949_v62  ;;  %v18473_v31 = vld [vmem:[%s25818_s3 + $0x348] ss:$52 sps:$4 sm:$0xff]   ;;  %26003 = vst [vmem:[#allocation21_spill] sm:$0xff] %v24250_v26 }
 0x5a9   :  { %10263 = vmatprep.subr.bf16.mxu1 %v18415_v43  ;;  %v18476_v43 = vld [vmem:[%s25818_s3 + $0x350] ss:$52 sps:$4 sm:$0xff]  }
 0x5ab   :  { %9627 = vmatpush1.bf16.msra.mxu0 %v18416_v29  ;;  %v18481_v29 = vld [vmem:[%s25818_s3 + $0x2f4] ss:$52 sps:$4 sm:$0xff]  }
 0x5ac   :  { %10264 = vmatpush1.bf16.msra.mxu1 %v18413_v22  ;;  %9628 = vmatprep.subr.bf16.mxu0 %v25949_v62  ;;  %v18484_v22 = vld [vmem:[%s25818_s3 + $0x2fc] ss:$52 sps:$4 sm:$0xff]  }
 0x5ad   :  { %10265 = vmatprep.subr.bf16.mxu1 %v18419_v34  ;;  %v18479_v34 = vld [vmem:[%s25818_s3 + $0x2f0] ss:$52 sps:$4 sm:$0xff]  }
 0x5af   :  { %9629 = vmatpush1.bf16.msra.mxu0 %v18420_v6  ;;  %v18482_v6 = vld [vmem:[%s25818_s3 + $0x2f8] ss:$52 sps:$4 sm:$0xff]  }
 0x5b0   :  { %10266 = vmatpush1.bf16.msra.mxu1 %v18417_v27  ;;  %9644 = vmatprep.subr.bf16.mxu0 %v25949_v62  ;;  %v18487_v27 = vld [vmem:[%s25818_s3 + $0x28c] ss:$52 sps:$4 sm:$0xff]  }
 0x5b1   :  { %10281 = vmatprep.subr.bf16.mxu1 %v18423_v3  ;;  %v18490_v3 = vld [vmem:[%s25818_s3 + $0x294] ss:$52 sps:$4 sm:$0xff]  }
 0x5b3   :  { %9645 = vmatpush2.bf16.msra.mxu0 %v18424_v19  ;;  %v18485_v19 = vld [vmem:[%s25818_s3 + $0x288] ss:$52 sps:$4 sm:$0xff]  }
 0x5b4   :  { %10282 = vmatpush2.bf16.msra.mxu1 %v18421_v60  ;;  %10292 = vmatprep.subr.bf16.mxu0 %v18427_v48  ;;  %v18488_v60 = vld [vmem:[%s25818_s3 + $0x290] ss:$52 sps:$4 sm:$0xff]  }
 0x5b5   :  { %10333 = vmatprep.subr.bf16.mxu1 %v18430_v57  ;;  %v18493_v48 = vld [vmem:[%s25818_s3 + $0x224] ss:$52 sps:$4 sm:$0xff]   ;;  %v18496_v57 = vld [vmem:[%s25818_s3 + $0x22c] ss:$52 sps:$4 sm:$0xff]  }
 0x5b6   :  { %9647 = vmatmul.mubr.bf16.vlgmr.msra.gmra.mxu0 %v23340_v18  ;;  %v18439_v18 = vld [vmem:[%s25818_s3 + $0x214] ss:$52 sps:$4 sm:$0xff]  }
 0x5b7   :  { %10284 = vmatmul.mubr.bf16.vlgmr.msra.gmra.mxu1 %v23689_v0  ;;  %10293 = vmatpush1.bf16.msra.mxu0 %v18425_v63  ;;  %v18491_v63 = vld [vmem:[%s25818_s3 + $0x220] ss:$52 sps:$4 sm:$0xff]  }
 0x5b8   :  { %15744 = vmatprep.mubr.msk.bf16.mxu0 %vm9364_vm5, %v23578_v39  ;;  %10334 = vmatpush1.bf16.msra.mxu1 %v18428_v59  ;;  %v18494_v59 = vld [vmem:[%s25818_s3 + $0x228] ss:$52 sps:$4 sm:$0xff]  }
 0x5b9   :  { %15745 = vmatprep.mubr.msk.bf16.mxu1 %vm9364_vm5, %v23578_v39  ;;  %10294 = vmatprep.subr.bf16.mxu0 %v18433_v20  ;;  %v18499_v20 = vld [vmem:[%s25818_s3 + $0x1bc] ss:$52 sps:$4 sm:$0xff]  }
 0x5ba   :  { %10335 = vmatprep.subr.bf16.mxu1 %v18436_v1  ;;  %v18502_v1 = vld [vmem:[%s25818_s3 + $0x1c4] ss:$52 sps:$4 sm:$0xff]  }
 0x5bb   :  { %10295 = vmatpush1.bf16.msra.mxu0 %v18431_v11  ;;  %v18497_v11 = vld [vmem:[%s25818_s3 + $0x1b8] ss:$52 sps:$4 sm:$0xff]  }
 0x5bc   :  { %10336 = vmatpush1.bf16.msra.mxu1 %v18434_v24  ;;  %10296 = vmatprep.subr.bf16.mxu0 %v18439_v18  ;;  %v18500_v24 = vld [vmem:[%s25818_s3 + $0x1c0] ss:$52 sps:$4 sm:$0xff]  }
 0x5bd   :  { %10337 = vmatprep.subr.bf16.mxu1 %v18442_v2  ;;  %v18505_v18 = vld [vmem:[%s25818_s3 + $0x154] ss:$52 sps:$4 sm:$0xff]   ;;  %v18508_v2 = vld [vmem:[%s25818_s3 + $0x15c] ss:$52 sps:$4 sm:$0xff]  }
 0x5bf   :  { %10297 = vmatpush1.bf16.msra.mxu0 %v18437_v10  ;;  %v18503_v10 = vld [vmem:[%s25818_s3 + $0x150] ss:$52 sps:$4 sm:$0xff]  }
 0x5c0   :  { %10338 = vmatpush1.bf16.msra.mxu1 %v18440_v32  ;;  %10298 = vmatprep.subr.bf16.mxu0 %v18445_v8  ;;  %v18506_v32 = vld [vmem:[%s25818_s3 + $0x158] ss:$52 sps:$4 sm:$0xff]  }
 0x5c1   :  { %10339 = vmatprep.subr.bf16.mxu1 %v18448_v36  ;;  %v18511_v8 = vld [vmem:[%s25818_s3 + $0xec] ss:$52 sps:$4 sm:$0xff]   ;;  %v18514_v36 = vld [vmem:[%s25818_s3 + $0xf4] ss:$52 sps:$4 sm:$0xff]  }
 0x5c3   :  { %10299 = vmatpush1.bf16.msra.mxu0 %v18443_v16  ;;  %v18509_v16 = vld [vmem:[%s25818_s3 + $0xe8] ss:$52 sps:$4 sm:$0xff]  }
 0x5c4   :  { %10340 = vmatpush1.bf16.msra.mxu1 %v18446_v15  ;;  %10300 = vmatprep.subr.bf16.mxu0 %v18451_v51  ;;  %v18512_v15 = vld [vmem:[%s25818_s3 + $0xf0] ss:$52 sps:$4 sm:$0xff]  }
 0x5c5   :  { %10341 = vmatprep.subr.bf16.mxu1 %v18454_v54  ;;  %v18517_v51 = vld [vmem:[%s25818_s3 + $0x84] ss:$52 sps:$4 sm:$0xff]   ;;  %v18520_v54 = vld [vmem:[%s25818_s3 + $0x8c] ss:$52 sps:$4 sm:$0xff]  }
 0x5c7   :  { %10301 = vmatpush1.bf16.msra.mxu0 %v18449_v30  ;;  %v18515_v30 = vld [vmem:[%s25818_s3 + $0x80] ss:$52 sps:$4 sm:$0xff]  }
 0x5c8   :  { %10342 = vmatpush1.bf16.msra.mxu1 %v18452_v33  ;;  %10302 = vmatprep.subr.bf16.mxu0 %v18457_v40  ;;  %v18518_v33 = vld [vmem:[%s25818_s3 + $0x88] ss:$52 sps:$4 sm:$0xff]  }
 0x5c9   :  { %10343 = vmatprep.subr.bf16.mxu1 %v18460_v4  ;;  %v18523_v40 = vld [vmem:[%s25818_s3 + $0x1c] ss:$52 sps:$4 sm:$0xff]   ;;  %v18526_v4 = vld [vmem:[%s25818_s3 + $0x24] ss:$52 sps:$4 sm:$0xff]  }
 0x5cb   :  { %10303 = vmatpush1.bf16.msra.mxu0 %v18455_v35  ;;  %v18521_v35 = vld [vmem:[%s25818_s3 + $0x18] ss:$52 sps:$4 sm:$0xff]  }
 0x5cc   :  { %10344 = vmatpush1.bf16.msra.mxu1 %v18458_v7  ;;  %10304 = vmatprep.subr.bf16.mxu0 %v18463_v45  ;;  %v18524_v7 = vld [vmem:[%s25818_s3 + $0x20] ss:$52 sps:$4 sm:$0xff]   ;;  %v18529_v45 = vld [vmem:[%s25818_s3 + $0x35c] ss:$52 sps:$4 sm:$0xff]  }
 0x5cd   :  { %10345 = vmatprep.subr.bf16.mxu1 %v18466_v52  ;;  %v18532_v52 = vld [vmem:[%s25818_s3 + $0x364] ss:$52 sps:$4 sm:$0xff]  }
 0x5cf   :  { %10305 = vmatpush1.bf16.msra.mxu0 %v18461_v25  ;;  %v18527_v25 = vld [vmem:[%s25818_s3 + $0x358] ss:$52 sps:$4 sm:$0xff]  }
 0x5d0   :  { %10346 = vmatpush1.bf16.msra.mxu1 %v18464_v61  ;;  %10306 = vmatprep.subr.bf16.mxu0 %v18469_v46  ;;  %v18530_v61 = vld [vmem:[%s25818_s3 + $0x360] ss:$52 sps:$4 sm:$0xff]   ;;  %v18535_v46 = vld [vmem:[%s25818_s3 + $0x304] ss:$52 sps:$4 sm:$0xff]  }
 0x5d1   :  { %10347 = vmatprep.subr.bf16.mxu1 %v18472_v28  ;;  %v18533_v28 = vld [vmem:[%s25818_s3 + $0x300] ss:$52 sps:$4 sm:$0xff]  }
 0x5d3   :  { %10307 = vmatpush1.bf16.msra.mxu0 %v18467_v44  ;;  %v18536_v44 = vld [vmem:[%s25818_s3 + $0x308] ss:$52 sps:$4 sm:$0xff]  }
 0x5d4   :  { %10348 = vmatpush1.bf16.msra.mxu1 %v18470_v14  ;;  %10322 = vmatprep.subr.bf16.mxu0 %v18475_v9  ;;  %v18539_v14 = vld [vmem:[%s25818_s3 + $0x29c] ss:$52 sps:$4 sm:$0xff]   ;;  %v18537_v9 = vld [vmem:[%s25818_s3 + $0x298] ss:$52 sps:$4 sm:$0xff]  }
 0x5d5   :  { %10363 = vmatprep.subr.bf16.mxu1 %v18478_v38  ;;  %v18540_v38 = vld [vmem:[%s25818_s3 + $0x2a0] ss:$52 sps:$4 sm:$0xff]  }
 0x5d7   :  { %10323 = vmatpush2.bf16.msra.mxu0 %v18473_v31  ;;  %v18543_v31 = vld [vmem:[%s25818_s3 + $0x234] ss:$52 sps:$4 sm:$0xff]  }
 0x5d8   :  { %10364 = vmatpush2.bf16.msra.mxu1 %v18476_v43  ;;  %10374 = vmatprep.subr.bf16.mxu0 %v18481_v29  ;;  %v18541_v43 = vld [vmem:[%s25818_s3 + $0x230] ss:$52 sps:$4 sm:$0xff]   ;;  %v18544_v29 = vld [vmem:[%s25818_s3 + $0x238] ss:$52 sps:$4 sm:$0xff]  }
 0x5d9   :  { %10415 = vmatprep.subr.bf16.mxu1 %v18484_v22  ;;  %v18547_v22 = vld [vmem:[%s25818_s3 + $0x1cc] ss:$52 sps:$4 sm:$0xff]  }
 0x5da   :  { %10325 = vmatmul.mubr.bf16.vlgmr.msra.gmra.mxu0 %v23689_v0 }
 0x5db   :  { %10366 = vmatmul.mubr.bf16.vlgmr.msra.gmra.mxu1 %v23689_v0  ;;  %10375 = vmatpush1.bf16.msra.mxu0 %v18479_v34  ;;  %v18548_v34 = vld [vmem:[%s25818_s3 + $0x1d0] ss:$52 sps:$4 sm:$0xff]  }
 0x5dc   :  { %15746 = vmatprep.mubr.msk.bf16.mxu0 %vm9364_vm5, %v23578_v39  ;;  %10416 = vmatpush1.bf16.msra.mxu1 %v18482_v6  ;;  %v18551_v6 = vld [vmem:[%s25818_s3 + $0x164] ss:$52 sps:$4 sm:$0xff]  }
 0x5dd   :  { %15747 = vmatprep.mubr.msk.bf16.mxu1 %vm9364_vm5, %v23578_v39  ;;  %10376 = vmatprep.subr.bf16.mxu0 %v18487_v27 }
 0x5de   :  { %10417 = vmatprep.subr.bf16.mxu1 %v18490_v3 }
 0x5df   :  { %10377 = vmatpush1.bf16.msra.mxu0 %v18485_v19  ;;  %v18549_v19 = vld [vmem:[%s25818_s3 + $0x160] ss:$52 sps:$4 sm:$0xff]  }
 0x5e0   :  { %10418 = vmatpush1.bf16.msra.mxu1 %v18488_v60  ;;  %10378 = vmatprep.subr.bf16.mxu0 %v18493_v48 }
 0x5e1   :  { %10419 = vmatprep.subr.bf16.mxu1 %v18496_v57  ;;  %v18552_v57 = vld [vmem:[%s25818_s3 + $0x168] ss:$52 sps:$4 sm:$0xff]  }
 0x5e3   :  { %10379 = vmatpush1.bf16.msra.mxu0 %v18491_v63  ;;  %v18555_v63 = vld [vmem:[%s25818_s3 + $0xfc] ss:$52 sps:$4 sm:$0xff]  }
 0x5e4   :  { %10420 = vmatpush1.bf16.msra.mxu1 %v18494_v59  ;;  %10380 = vmatprep.subr.bf16.mxu0 %v18499_v20 }
 0x5e5   :  { %10421 = vmatprep.subr.bf16.mxu1 %v18502_v1  ;;  %v18553_v1 = vld [vmem:[%s25818_s3 + $0xf8] ss:$52 sps:$4 sm:$0xff]  }
 0x5e7   :  { %10381 = vmatpush1.bf16.msra.mxu0 %v18497_v11 }
 0x5e8   :  { %10422 = vmatpush1.bf16.msra.mxu1 %v18500_v24  ;;  %10382 = vmatprep.subr.bf16.mxu0 %v18505_v18  ;;  %v18556_v18 = vld [vmem:[%s25818_s3 + $0x100] ss:$52 sps:$4 sm:$0xff]  }
 0x5e9   :  { %10423 = vmatprep.subr.bf16.mxu1 %v18508_v2  ;;  %v18559_v2 = vld [vmem:[%s25818_s3 + $0x94] ss:$52 sps:$4 sm:$0xff]  }
 0x5eb   :  { %10383 = vmatpush1.bf16.msra.mxu0 %v18503_v10  ;;  %v18557_v10 = vld [vmem:[%s25818_s3 + $0x90] ss:$52 sps:$4 sm:$0xff]  }
 0x5ec   :  { %10424 = vmatpush1.bf16.msra.mxu1 %v18506_v32  ;;  %10384 = vmatprep.subr.bf16.mxu0 %v18511_v8  ;;  %v18560_v32 = vld [vmem:[%s25818_s3 + $0x98] ss:$52 sps:$4 sm:$0xff]  }
 0x5ed   :  { %10425 = vmatprep.subr.bf16.mxu1 %v18514_v36  ;;  %v18563_v8 = vld [vmem:[%s25818_s3 + $0x2c] ss:$52 sps:$4 sm:$0xff]   ;;  %v25870_v36 = vunpack.i.h.bf16 %v23296_v17 }
 0x5ef   :  { %10385 = vmatpush1.bf16.msra.mxu0 %v18509_v16  ;;  %v25872_v16 = vunpack.i.l.bf16 %v23296_v17 }
 0x5f0   :  { %10426 = vmatpush1.bf16.msra.mxu1 %v18512_v15  ;;  %10386 = vmatprep.subr.bf16.mxu0 %v18517_v51  ;;  %v18561_v15 = vld [vmem:[%s25818_s3 + $0x28] ss:$52 sps:$4 sm:$0xff]   ;;  %v25869_v51 = vunpack.i.h.bf16 %v23298_v13 }
 0x5f1   :  { %10427 = vmatprep.subr.bf16.mxu1 %v18520_v54  ;;  %v25871_v54 = vunpack.i.l.bf16 %v23298_v13 }
 0x5f3   :  { %10387 = vmatpush1.bf16.msra.mxu0 %v18515_v30  ;;  %v18564_v30 = vld [vmem:[%s25818_s3 + $0x30] ss:$52 sps:$4 sm:$0xff]  }
 0x5f4   :  { %10428 = vmatpush1.bf16.msra.mxu1 %v18518_v33  ;;  %10388 = vmatprep.subr.bf16.mxu0 %v18523_v40  ;;  %v18567_v33 = vld [vmem:[%s25818_s3 + $0x36c] ss:$52 sps:$4 sm:$0xff]   ;;  %v18565_v40 = vld [vmem:[%s25818_s3 + $0x368] ss:$52 sps:$4 sm:$0xff]  }
 0x5f5   :  { %10429 = vmatprep.subr.bf16.mxu1 %v18526_v4  ;;  %v10582_v4 = vsel %vm7756_vm2, %v25872_v16, %v25870_v36  ;;  %v24268_v36 = vld [vmem:[%s25817_s2 + $0xe0] ss:$8 sps:$4 sm:$0xff]   ;;  %v24280_v16 = vld [vmem:[%s25817_s2 + $0xd4] ss:$8 sps:$4 sm:$0xff]  }
 0x5f7   :  { %10389 = vmatpush1.bf16.msra.mxu0 %v18521_v35  ;;  %v18568_v35 = vld [vmem:[%s25818_s3 + $0x370] ss:$52 sps:$4 sm:$0xff]  }
 0x5f8   :  { %10430 = vmatpush1.bf16.msra.mxu1 %v18524_v7  ;;  %10404 = vmatprep.subr.bf16.mxu0 %v18529_v45  ;;  %v10584_v7 = vsel %vm7756_vm2, %v25871_v54, %v25869_v51  ;;  %v25992_v45 = vld [vmem:[#allocation30_spill] sm:$0xff] }
 0x5f9   :  { %10445 = vmatprep.subr.bf16.mxu1 %v18532_v52  ;;  %v10591_v52 = vmax.f32 %v25992_v45, %v10582_v4  ;;  %v24178_v4 = vld [vmem:[%s25817_s2 + $0x120] ss:$8 sps:$4 sm:$0xff]   ;;  %v24196_v45 = vld [vmem:[%s25817_s2 + $0x10] ss:$8 sps:$4 sm:$0xff]   ;;  %v24262_v51 = vld [vmem:[%s25817_s2 + $0x1e4] ss:$8 sps:$4 sm:$0xff]  }
 0x5fa   :  { %25997 = vst [vmem:[#allocation15_spill] sm:$0xff] %v24178_v4  ;;  %26004 = vst [vmem:[#allocation24_spill] sm:$0xff] %v24262_v51  ;;  %v24274_v54 = vld [vmem:[%s25817_s2 + $0x1e0] ss:$8 sps:$4 sm:$0xff]  }
 0x5fb   :  { %10405 = vmatpush2.bf16.msra.mxu0 %v18527_v25  ;;  %v10593_v25 = vmax.f32 %v23101_v55, %v10584_v7  ;;  %v24044_v55 = vld [vmem:[%s25817_s2 + $0x70] ss:$8 sps:$4 sm:$0xff]   ;;  %v24190_v7 = vld [vmem:[%s25817_s2 + $0x114] ss:$8 sps:$4 sm:$0xff]   ;;  %26005 = vst [vmem:[#allocation26_spill] sm:$0xff] %v24274_v54 }
 0x5fc   :  { %10446 = vmatpush2.bf16.msra.mxu1 %v18530_v61  ;;  %10456 = vmatprep.subr.bf16.mxu0 %v18535_v46  ;;  %v24030_v61 = vld [vmem:[%s25817_s2 + $0x74] ss:$8 sps:$4 sm:$0xff]   ;;  %25998 = vst [vmem:[#allocation27_spill] sm:$0xff] %v24190_v7 }
 0x5fd   :  { %10497 = vmatprep.subr.bf16.mxu1 %v25949_v62  ;;  %v24036_v46 = vld [vmem:[%s25817_s2 + $0x174] ss:$8 sps:$4 sm:$0xff]  }
 0x5fe   :  { %10407 = vmatmul.mubr.bf16.vlgmr.msra.gmra.mxu0 %v23689_v0 }
 0x5ff   :  { %10448 = vmatmul.mubr.bf16.vlgmr.msra.gmra.mxu1 %v23689_v0  ;;  %10457 = vmatpush1.bf16.msra.mxu0 %v18533_v28  ;;  %v10596_v28 = vpack.c.bf16 %v10591_v52, %v10591_v52  ;;  %v24202_v52 = vld [vmem:[%s25817_s2 + $0x110] ss:$8 sps:$4 sm:$0xff]  }
 0x600   :  { %15748 = vmatprep.mubr.msk.bf16.mxu0 %vm9364_vm5, %v23578_v39  ;;  %10498 = vmatpush1.bf16.msra.mxu1 %v18536_v44  ;;  %v10598_v44 = vpack.c.bf16 %v10593_v25, %v10593_v25  ;;  %25999 = vst [vmem:[#allocation6_spill] sm:$0xff] %v24202_v52  ;;  %v24208_v25 = vld [vmem:[%s25817_s2 + $0x4] ss:$8 sps:$4 sm:$0xff]  }
 0x601   :  { %15749 = vmatprep.mubr.msk.bf16.mxu1 %vm9364_vm5, %v23578_v39  ;;  %10458 = vmatprep.subr.bf16.mxu0 %v18539_v14  ;;  %v18545_v39 = vld [vmem:[%s25818_s3 + $0x1c8] ss:$52 sps:$4 sm:$0xff]   ;;  %v24050_v14 = vld [vmem:[%s25817_s2 + $0x170] ss:$8 sps:$4 sm:$0xff]  }
 0x602   :  { %10499 = vmatprep.subr.bf16.mxu1 %v25949_v62 }
 0x603   :  { %10459 = vmatpush1.bf16.msra.mxu0 %v18537_v9  ;;  %v24062_v9 = vld [vmem:[%s25817_s2 + $0x164] ss:$8 sps:$4 sm:$0xff]  }
 0x604   :  { %10500 = vmatpush1.bf16.msra.mxu1 %v18540_v38  ;;  %10460 = vmatprep.subr.bf16.mxu0 %v18543_v31  ;;  %v24068_v38 = vld [vmem:[%s25817_s2 + $0x60] ss:$8 sps:$4 sm:$0xff]  }
 0x605   :  { %10501 = vmatprep.subr.bf16.mxu1 %v25949_v62  ;;  %v24074_v31 = vld [vmem:[%s25817_s2 + $0x160] ss:$8 sps:$4 sm:$0xff]  }
 0x607   :  { %10461 = vmatpush1.bf16.msra.mxu0 %v18541_v43  ;;  %v24080_v43 = vld [vmem:[%s25817_s2 + $0x54] ss:$8 sps:$4 sm:$0xff]  }
 0x608   :  { %10502 = vmatpush1.bf16.msra.mxu1 %v18544_v29  ;;  %10462 = vmatprep.subr.bf16.mxu0 %v18547_v22  ;;  %v24086_v29 = vld [vmem:[%s25817_s2 + $0x154] ss:$8 sps:$4 sm:$0xff]   ;;  %v24092_v22 = vld [vmem:[%s25817_s2 + $0x50] ss:$8 sps:$4 sm:$0xff]  }
 0x609   :  { %10503 = vmatprep.subr.bf16.mxu1 %v25949_v62 }
 0x60a   :  { %v23956_v27 = vpop.f32.mrf.mxu0  ;;  %v23958_v3 = vpop.f32.mrf.mxu1 }
 0x60b   :  { %25988 = vst [vmem:[#allocation10_spill] sm:$0xff] %v23956_v27  ;;  %25989 = vst [vmem:[#allocation18_spill] sm:$0xff] %v23958_v3  ;;  %10463 = vmatpush1.bf16.msra.mxu0 %v18545_v39  ;;  %v24098_v39 = vld [vmem:[%s25817_s2 + $0x150] ss:$8 sps:$4 sm:$0xff]   ;;  %v24322_v3 = vld [vmem:[%s25817_s2 + $0x1c0] ss:$8 sps:$4 sm:$0xff]  }
 0x60c   :  { %10504 = vmatpush1.bf16.msra.mxu1 %v18548_v34  ;;  %v23963_v60 = vpop.f32.mrf.mxu0  ;;  %v23965_v48 = vpop.f32.mrf.mxu1  ;;  %10464 = vmatprep.subr.bf16.mxu0 %v18551_v6  ;;  %v24104_v34 = vld [vmem:[%s25817_s2 + $0x44] ss:$8 sps:$4 sm:$0xff]   ;;  %26009 = vst [vmem:[#allocation33_spill] sm:$0xff] %v24322_v3  ;;  %v24328_v27 = vld [vmem:[%s25817_s2 + $0xb4] ss:$8 sps:$4 sm:$0xff]  }
 0x60d   :  { %25990 = vst [vmem:[#allocation11_spill] sm:$0xff] %v23963_v60  ;;  %25991 = vst [vmem:[#allocation20_spill] sm:$0xff] %v23965_v48  ;;  %10505 = vmatprep.subr.bf16.mxu1 %v25949_v62  ;;  %v24110_v6 = vld [vmem:[%s25817_s2 + $0x144] ss:$8 sps:$4 sm:$0xff]   ;;  %v24316_v60 = vld [vmem:[%s25817_s2 + $0xc0] ss:$8 sps:$4 sm:$0xff]  }
 0x60e   :  { %v9406_v59 = vpop.f32.mrf.mxu0  ;;  %v9447_v20 = vpop.f32.mrf.mxu1  ;;  %v24310_v48 = vld [vmem:[%s25817_s2 + $0x1c4] ss:$8 sps:$4 sm:$0xff]  }
 0x60f   :  { %10465 = vmatpush1.bf16.msra.mxu0 %v18549_v19  ;;  %v24126_v59 = vld [vmem:[%s25817_s2 + $0x140] ss:$8 sps:$4 sm:$0xff]   ;;  %26008 = vst [vmem:[#allocation32_spill] sm:$0xff] %v24310_v48 }
 0x610   :  { %10506 = vmatpush1.bf16.msra.mxu1 %v18552_v57  ;;  %v9407_v11 = vpop.f32.mrf.mxu0  ;;  %v9448_v24 = vpop.f32.mrf.mxu1  ;;  %10466 = vmatprep.subr.bf16.mxu0 %v18555_v63  ;;  %v24120_v63 = vld [vmem:[%s25817_s2 + $0x40] ss:$8 sps:$4 sm:$0xff]  }
 0x611   :  { %10507 = vmatprep.subr.bf16.mxu1 %v25949_v62  ;;  %v24136_v11 = vld [vmem:[%s25817_s2 + $0x34] ss:$8 sps:$4 sm:$0xff]  }
 0x612   :  { %v24142_v24 = vld [vmem:[%s25817_s2 + $0x134] ss:$8 sps:$4 sm:$0xff]  }
 0x613   :  { %10467 = vmatpush1.bf16.msra.mxu0 %v18553_v1 }
 0x614   :  { %10508 = vmatpush1.bf16.msra.mxu1 %v18556_v18  ;;  %10468 = vmatprep.subr.bf16.mxu0 %v18559_v2 }
 0x615   :  { %10509 = vmatprep.subr.bf16.mxu1 %v25949_v62 }
 0x617   :  { %10469 = vmatpush1.bf16.msra.mxu0 %v18557_v10  ;;  %v24148_v10 = vld [vmem:[%s25817_s2 + $0x30] ss:$8 sps:$4 sm:$0xff]  }
 0x618   :  { %10510 = vmatpush1.bf16.msra.mxu1 %v18560_v32  ;;  %10470 = vmatprep.subr.bf16.mxu0 %v18563_v8  ;;  %v24154_v32 = vld [vmem:[%s25817_s2 + $0x130] ss:$8 sps:$4 sm:$0xff]  }
 0x619   :  { %10511 = vmatprep.subr.bf16.mxu1 %v25949_v62 }
 0x61b   :  { %10471 = vmatpush1.bf16.msra.mxu0 %v18561_v15 }
 0x61c   :  { %10512 = vmatpush1.bf16.msra.mxu1 %v18564_v30  ;;  %10486 = vmatprep.subr.bf16.mxu0 %v18567_v33  ;;  %v24160_v30 = vld [vmem:[%s25817_s2 + $0x24] ss:$8 sps:$4 sm:$0xff]  }
 0x61d   :  { %10527 = vmatprep.subr.bf16.mxu1 %v25949_v62  ;;  %v24166_v33 = vld [vmem:[%s25817_s2 + $0x124] ss:$8 sps:$4 sm:$0xff]  }
 0x61f   :  { %10487 = vmatpush2.bf16.msra.mxu0 %v18565_v40  ;;  %v24172_v40 = vld [vmem:[%s25817_s2 + $0x20] ss:$8 sps:$4 sm:$0xff]  }
 0x620   :  { %10528 = vmatpush2.bf16.msra.mxu1 %v18568_v35  ;;  %10603 = vmatprep.subr.bf16.mxu0 %v24030_v61  ;;  %v24184_v35 = vld [vmem:[%s25817_s2 + $0x14] ss:$8 sps:$4 sm:$0xff]  }
 0x621   :  { %10644 = vmatprep.subr.bf16.mxu1 %v24036_v46 }
 0x622   :  { %10489 = vmatmul.mubr.bf16.vlgmr.msra.gmra.mxu0 %v23689_v0 }
 0x623   :  { %10530 = vmatmul.mubr.bf16.vlgmr.msra.gmra.mxu1 %v23689_v0  ;;  %10604 = vmatpush1.bf16.msra.mxu0 %v24044_v55  ;;  %v24056_v0 = vld [vmem:[%s25817_s2 + $0x64] ss:$8 sps:$4 sm:$0xff]  }
 0x624   :  { %10635 = vmatprep.mubr.bf16.mxu0 %v10596_v28  ;;  %10645 = vmatpush1.bf16.msra.mxu1 %v24050_v14  ;;  %v24214_v28 = vld [vmem:[%s25817_s2 + $0x104] ss:$8 sps:$4 sm:$0xff]  }
 0x625   :  { %10676 = vmatprep.mubr.bf16.mxu1 %v10598_v44  ;;  %10605 = vmatprep.subr.bf16.mxu0 %v24056_v0  ;;  %26000 = vst [vmem:[#allocation17_spill] sm:$0xff] %v24214_v28  ;;  %v24220_v44 = vld [vmem:[%s25817_s2] ss:$8 sps:$4 sm:$0xff]  }
 0x626   :  { %10646 = vmatprep.subr.bf16.mxu1 %v24062_v9 }
 0x627   :  { %10606 = vmatpush1.bf16.msra.mxu0 %v24068_v38 }
 0x628   :  { %10647 = vmatpush1.bf16.msra.mxu1 %v24074_v31  ;;  %10607 = vmatprep.subr.bf16.mxu0 %v24080_v43 }
 0x629   :  { %10648 = vmatprep.subr.bf16.mxu1 %v24086_v29 }
 0x62b   :  { %10608 = vmatpush1.bf16.msra.mxu0 %v24092_v22 }
 0x62c   :  { %10649 = vmatpush1.bf16.msra.mxu1 %v24098_v39  ;;  %10609 = vmatprep.subr.bf16.mxu0 %v24104_v34 }
 0x62d   :  { %10650 = vmatprep.subr.bf16.mxu1 %v24110_v6 }
 0x62e   :  { %v24113_v19 = vpop.f32.mrf.mxu0  ;;  %v24115_v57 = vpop.f32.mrf.mxu1 }
 0x62f   :  { %25993 = vst [vmem:[#allocation12_spill] sm:$0xff] %v24113_v19  ;;  %25994 = vst [vmem:[#allocation23_spill] sm:$0xff] %v24115_v57  ;;  %10610 = vmatpush1.bf16.msra.mxu0 %v24120_v63  ;;  %v24298_v57 = vld [vmem:[%s25817_s2 + $0x1d0] ss:$8 sps:$4 sm:$0xff]   ;;  %v24304_v19 = vld [vmem:[%s25817_s2 + $0xc4] ss:$8 sps:$4 sm:$0xff]  }
 0x630   :  { %10651 = vmatpush1.bf16.msra.mxu1 %v24126_v59  ;;  %v24129_v20 = vpop.f32.mrf.mxu0  ;;  %v24131_v1 = vpop.f32.mrf.mxu1  ;;  %10611 = vmatprep.subr.bf16.mxu0 %v24136_v11  ;;  %26007 = vst [vmem:[#allocation28_spill] sm:$0xff] %v24298_v57 }
 0x631   :  { %25995 = vst [vmem:[#allocation13_spill] sm:$0xff] %v24129_v20  ;;  %25996 = vst [vmem:[#allocation25_spill] sm:$0xff] %v24131_v1  ;;  %10652 = vmatprep.subr.bf16.mxu1 %v24142_v24  ;;  %v24286_v1 = vld [vmem:[%s25817_s2 + $0x1d4] ss:$8 sps:$4 sm:$0xff]   ;;  %v24292_v20 = vld [vmem:[%s25817_s2 + $0xd0] ss:$8 sps:$4 sm:$0xff]  }
 0x632   :  { %v9488_v18 = vpop.f32.mrf.mxu0  ;;  %v9529_v2 = vpop.f32.mrf.mxu1  ;;  %26006 = vst [vmem:[#allocation4_spill] sm:$0xff] %v24286_v1 }
 0x633   :  { %10612 = vmatpush1.bf16.msra.mxu0 %v24148_v10  ;;  %v24226_v18 = vld [vmem:[%s25817_s2 + $0x100] ss:$8 sps:$4 sm:$0xff]   ;;  %v24232_v2 = vld [vmem:[%s25817_s2 + $0xf4] ss:$8 sps:$4 sm:$0xff]  }
 0x634   :  { %10653 = vmatpush1.bf16.msra.mxu1 %v24154_v32  ;;  %v9489_v8 = vpop.f32.mrf.mxu0  ;;  %v9530_v15 = vpop.f32.mrf.mxu1  ;;  %10613 = vmatprep.subr.bf16.mxu0 %v24160_v30  ;;  %26001 = vst [vmem:[#allocation5_spill] sm:$0xff] %v24226_v18 }
 0x635   :  { %10654 = vmatprep.subr.bf16.mxu1 %v24166_v33  ;;  %v24238_v8 = vld [vmem:[%s25817_s2 + $0x1f4] ss:$8 sps:$4 sm:$0xff]   ;;  %v24244_v15 = vld [vmem:[%s25817_s2 + $0xf0] ss:$8 sps:$4 sm:$0xff]  }
 0x636   :  { %26002 = vst [vmem:[#allocation19_spill] sm:$0xff] %v24238_v8 }
 0x637   :  { %10614 = vmatpush1.bf16.msra.mxu0 %v24172_v40 }
 0x638   :  { %10655 = vmatpush1.bf16.msra.mxu1 %v24178_v4  ;;  %10615 = vmatprep.subr.bf16.mxu0 %v24184_v35 }
 0x639   :  { %10656 = vmatprep.subr.bf16.mxu1 %v24190_v7 }
 0x63b   :  { %10616 = vmatpush1.bf16.msra.mxu0 %v24196_v45 }
 0x63c   :  { %10657 = vmatpush1.bf16.msra.mxu1 %v24202_v52  ;;  %10617 = vmatprep.subr.bf16.mxu0 %v24208_v25 }
 0x63d   :  { %10658 = vmatprep.subr.bf16.mxu1 %v24214_v28 }
 0x63f   :  { %10618 = vmatpush1.bf16.msra.mxu0 %v24220_v44 }
 0x640   :  { %10659 = vmatpush1.bf16.msra.mxu1 %v24226_v18  ;;  %10619 = vmatprep.subr.bf16.mxu0 %v24232_v2  ;;  %v24405_v18 = vld [vmem:[%s25817_s2 + $0x90] ss:$8 sps:$4 sm:$0xff]  }
 0x641   :  { %10660 = vmatprep.subr.bf16.mxu1 %v24238_v8  ;;  %26023 = vst [vmem:[#allocation41_spill] sm:$0xff] %v24405_v18 }
 0x643   :  { %10620 = vmatpush2.bf16.msra.mxu0 %v24244_v15 }
 0x644   :  { %10661 = vmatpush2.bf16.msra.mxu1 %v24250_v26  ;;  %10621 = vmatprep.subr.bf16.mxu0 %v24256_v21  ;;  %v24394_v26 = vld [vmem:[%s25817_s2 + $0x194] ss:$8 sps:$4 sm:$0xff]  }
 0x645   :  { %10662 = vmatprep.subr.bf16.mxu1 %v24262_v51  ;;  %26020 = vst [vmem:[#allocation40_spill] sm:$0xff] %v24394_v26 }
 0x647   :  { %10622 = vmatpush2.bf16.msra.mxu0 %v24268_v36 }
 0x648   :  { %10663 = vmatpush2.bf16.msra.mxu1 %v24274_v54  ;;  %10623 = vmatprep.subr.bf16.mxu0 %v24280_v16 }
 0x649   :  { %10664 = vmatprep.subr.bf16.mxu1 %v24286_v1 }
 0x64b   :  { %10624 = vmatpush2.bf16.msra.mxu0 %v24292_v20 }
 0x64c   :  { %10665 = vmatpush2.bf16.msra.mxu1 %v24298_v57  ;;  %10625 = vmatprep.subr.bf16.mxu0 %v24304_v19  ;;  %v24350_v57 = vld [vmem:[%s25817_s2 + $0x1b0] ss:$8 sps:$4 sm:$0xff]  }
 0x64d   :  { %10666 = vmatprep.subr.bf16.mxu1 %v24310_v48  ;;  %26013 = vst [vmem:[#allocation2_spill] sm:$0xff] %v24350_v57 }
 0x64f   :  { %10626 = vmatpush2.bf16.msra.mxu0 %v24316_v60 }
 0x650   :  { %10667 = vmatpush2.bf16.msra.mxu1 %v24322_v3  ;;  %10627 = vmatprep.subr.bf16.mxu0 %v24328_v27  ;;  %v24344_v3 = vld [vmem:[%s25817_s2 + $0xb0] ss:$8 sps:$4 sm:$0xff]  }
 0x651   :  { %10668 = vmatprep.subr.bf16.mxu1 %v24334_v49  ;;  %v24366_v49 = vld [vmem:[%s25817_s2 + $0x1a4] ss:$8 sps:$4 sm:$0xff]  }
 0x652   :  { %v24337_v12 = vpop.f32.mrf.mxu0  ;;  %26016 = vst [vmem:[#allocation37_spill] sm:$0xff] %v24366_v49 }
 0x653   :  { %26011 = vst [vmem:[#allocation34_spill] sm:$0xff] %v24337_v12  ;;  %v24339_v48 = vpop.f32.mrf.mxu1  ;;  %10628 = vmatpush2.bf16.msra.mxu0 %v24344_v3 }
 0x654   :  { %26012 = vst [vmem:[#allocation3_spill] sm:$0xff] %v24339_v48  ;;  %10669 = vmatpush2.bf16.msra.mxu1 %v24350_v57  ;;  %v24353_v1 = vpop.f32.mrf.mxu0  ;;  %v24358_v48 = vld [vmem:[%s25817_s2 + $0xa4] ss:$8 sps:$4 sm:$0xff]  }
 0x655   :  { %26014 = vst [vmem:[#allocation7_spill] sm:$0xff] %v24353_v1  ;;  %10629 = vmatprep.subr.bf16.mxu0 %v24358_v48  ;;  %v24361_v12 = vpop.f32.mrf.mxu1  ;;  %10670 = vmatprep.subr.bf16.mxu1 %v24366_v49  ;;  %v24372_v1 = vld [vmem:[%s25817_s2 + $0xa0] ss:$8 sps:$4 sm:$0xff]  }
 0x656   :  { %26015 = vst [vmem:[#allocation30_spill] sm:$0xff] %v24361_v12  ;;  %v9570_v54 = vpop.f32.mrf.mxu0  ;;  %v24378_v12 = vld [vmem:[%s25817_s2 + $0x1a0] ss:$8 sps:$4 sm:$0xff]  }
 0x657   :  { %v9611_v57 = vpop.f32.mrf.mxu1  ;;  %10630 = vmatpush2.bf16.msra.mxu0 %v24372_v1  ;;  %26017 = vst [vmem:[#allocation38_spill] sm:$0xff] %v24378_v12  ;;  %v24384_v54 = vld [vmem:[%s25817_s2 + $0x94] ss:$8 sps:$4 sm:$0xff]  }
 0x658   :  { %10671 = vmatpush2.bf16.msra.mxu1 %v24378_v12  ;;  %v9571_v42 = vpop.f32.mrf.mxu0  ;;  %26018 = vst [vmem:[#allocation39_spill] sm:$0xff] %v24384_v54  ;;  %10631 = vmatprep.subr.bf16.mxu0 %v24384_v54  ;;  %v26019_v57 = vunpack.i.l.bf16 %v23296_v17  ;;  %v26022_v12 = vunpack.i.h.bf16 %v23296_v17  ;;  %v24418_v17 = vld [vmem:[%s25817_s2 + $0x84] ss:$8 sps:$4 sm:$0xff]  }
 0x659   :  { %v9612_v51 = vpop.f32.mrf.mxu1  ;;  %10672 = vmatprep.subr.bf16.mxu1 %v24394_v26  ;;  %v26021_v42 = vunpack.i.l.bf16 %v23298_v13  ;;  %26026 = vst [vmem:[#allocation42_spill] sm:$0xff] %v24418_v17  ;;  %v24437_v26 = vld [vmem:[%s25817_s2 + $0x180] ss:$8 sps:$4 sm:$0xff]  }
 0x65a   :  { %v10581_v49 = vsel %vm7756_vm2, %v23294_v23, %v26019_v57  ;;  %v26024_v23 = vld [vmem:[#allocation29_spill] sm:$0xff]  ;;  %v24412_v57 = vld [vmem:[%s25817_s2 + $0x190] ss:$8 sps:$4 sm:$0xff]   ;;  %26030 = vst [vmem:[#allocation44_spill] sm:$0xff] %v24437_v26 }
 0x65b   :  { %v10583_v8 = vsel %vm7756_vm2, %v26022_v12, %v26021_v42  ;;  %10632 = vmatpush2.bf16.msra.mxu0 %v24405_v18  ;;  %v10590_v51 = vmax.f32 %v26024_v23, %v10581_v49  ;;  %26025 = vst [vmem:[#allocation29_spill] sm:$0xff] %v24412_v57  ;;  %v26027_v12 = vld [vmem:[#allocation31_spill] sm:$0xff]  ;;  %v24425_v49 = vld [vmem:[%s25817_s2 + $0x184] ss:$8 sps:$4 sm:$0xff]   ;;  %v24431_v23 = vld [vmem:[%s25817_s2 + $0x80] ss:$8 sps:$4 sm:$0xff]  }
 0x65c   :  { %10673 = vmatpush2.bf16.msra.mxu1 %v24412_v57  ;;  %10633 = vmatprep.subr.bf16.mxu0 %v24418_v17  ;;  %v10592_v42 = vmax.f32 %v26027_v12, %v10583_v8  ;;  %26028 = vst [vmem:[#allocation31_spill] sm:$0xff] %v24425_v49  ;;  %26029 = vst [vmem:[#allocation43_spill] sm:$0xff] %v24431_v23  ;;  %v24446_v12 = vld [vmem:[%s25817_s2 + $0x214] ss:$8 sps:$4 sm:$0xff]  }
 0x65d   :  { %10674 = vmatprep.subr.bf16.mxu1 %v24425_v49  ;;  %v10595_v57 = vpack.c.bf16 %v10590_v51, %v10590_v51  ;;  %26031 = vst [vmem:[#allocation45_spill] sm:$0xff] %v24446_v12  ;;  %v24453_v51 = vld [vmem:[%s25817_s2 + $0x210] ss:$8 sps:$4 sm:$0xff]   ;;  %v18571_v49 = vld [vmem:[%s25818_s3 + $0xa2c] ss:$52 sps:$4 sm:$0xff]  }
 0x65e   :  { %v10597_v8 = vpack.c.bf16 %v10592_v42, %v10592_v42  ;;  %26032 = vst [vmem:[#allocation46_spill] sm:$0xff] %v24453_v51 }
 0x65f   :  { %10634 = vmatpush2.bf16.msra.mxu0 %v24431_v23 }
 0x660   :  { %10675 = vmatpush2.bf16.msra.mxu1 %v24437_v26  ;;  %15750 = vmatprep.subr.msk.bf16.mxu0 %vm8194_vm3, %v22992_v47  ;;  %v18569_v26 = vld [vmem:[%s25818_s3 + $0xa28] ss:$52 sps:$4 sm:$0xff]  }
 0x661   :  { %11452 = vmatprep.subr.bf16.mxu1 %v18571_v49  ;;  %v18583_v49 = vld [vmem:[%s25818_s3 + $0x95c] ss:$52 sps:$4 sm:$0xff]  }
 0x662   :  { %10636 = vmatmul.mubr.bf16.vlgmr.msra.gmra.mxu0 %v10595_v57  ;;  %v26033_v57 = vunpack.i.h.bf16 %v23298_v13  ;;  %v18574_v13 = vld [vmem:[%s25818_s3 + $0xa34] ss:$52 sps:$4 sm:$0xff]  }
 0x663   :  { %10677 = vmatmul.mubr.bf16.vlgmr.msra.gmra.mxu1 %v10597_v8  ;;  %10696 = vmatpush1.bf16.msra.mxu0 %v23002_v58  ;;  %v24462_v8 = vld [vmem:[%s25817_s2 + $0x204] ss:$8 sps:$4 sm:$0xff]  }
 0x664   :  { %10697 = vmatprep.subr.bf16.mxu0 %v24446_v12  ;;  %10717 = vmatprep.mubr.bf16.mxu0 %v25949_v62  ;;  %v10594_v42 = vmax.f32 %v23095_v5, %v26033_v57  ;;  %26034 = vst [vmem:[#allocation47_spill] sm:$0xff] %v24462_v8  ;;  %v18577_v5 = vld [vmem:[%s25818_s3 + $0x9c4] ss:$52 sps:$4 sm:$0xff]   ;;  %v24480_v57 = vld [vmem:[%s25817_s2 + $0x200] ss:$8 sps:$4 sm:$0xff]  }
 0x665   :  { %26035 = vst [vmem:[#allocation48_spill] sm:$0xff] %v24480_v57  ;;  %11453 = vmatpush1.bf16.msra.mxu1 %v18569_v26  ;;  %v18575_v12 = vld [vmem:[%s25818_s3 + $0x9c0] ss:$52 sps:$4 sm:$0xff]   ;;  %v18578_v26 = vld [vmem:[%s25818_s3 + $0x9c8] ss:$52 sps:$4 sm:$0xff]  }
 0x666   :  { %v18580_v58 = vld [vmem:[%s25818_s3 + $0x9cc] ss:$52 sps:$4 sm:$0xff]   ;;  %11454 = vmatprep.subr.bf16.mxu1 %v18577_v5 }
 0x667   :  { %10698 = vmatpush1.bf16.msra.mxu0 %v24453_v51  ;;  %v10599_v51 = vpack.c.bf16 %v10594_v42, %v10594_v42  ;;  %v18581_v42 = vld [vmem:[%s25818_s3 + $0x958] ss:$52 sps:$4 sm:$0xff]  }
 0x668   :  { %10699 = vmatprep.subr.bf16.mxu0 %v24462_v8  ;;  %v18572_v8 = vld [vmem:[%s25818_s3 + $0xa30] ss:$52 sps:$4 sm:$0xff]   ;;  %v18595_v5 = vld [vmem:[%s25818_s3 + $0x88c] ss:$52 sps:$4 sm:$0xff]  }
 0x669   :  { %11455 = vmatpush1.bf16.msra.mxu1 %v18575_v12  ;;  %v18592_v12 = vld [vmem:[%s25818_s3 + $0x8fc] ss:$52 sps:$4 sm:$0xff]  }
 0x66a   :  { %11456 = vmatprep.subr.bf16.mxu1 %v18583_v49 }
 0x66b   :  { %10700 = vmatpush1.bf16.msra.mxu0 %v24480_v57  ;;  %v18598_v57 = vld [vmem:[%s25818_s3 + $0x894] ss:$52 sps:$4 sm:$0xff]  }
 0x66c   :  { %11493 = vmatprep.subr.bf16.mxu0 %v18574_v13  ;;  %v18586_v13 = vld [vmem:[%s25818_s3 + $0x964] ss:$52 sps:$4 sm:$0xff]  }
 0x66d   :  { %11457 = vmatpush1.bf16.msra.mxu1 %v18581_v42  ;;  %v18590_v42 = vld [vmem:[%s25818_s3 + $0x8f8] ss:$52 sps:$4 sm:$0xff]  }
 0x66e   :  { %15751 = vmatmul.mubr.msk.bf16.vlgmr.msra.gmra.mxu0 %vm8190_vm4, %v10599_v51  ;;  %v18589_v51 = vld [vmem:[%s25818_s3 + $0x8f4] ss:$52 sps:$4 sm:$0xff]  }
 0x66f   :  { %11494 = vmatpush1.bf16.msra.mxu0 %v18572_v8  ;;  %v18584_v8 = vld [vmem:[%s25818_s3 + $0x960] ss:$52 sps:$4 sm:$0xff]   ;;  %11458 = vmatprep.subr.bf16.mxu1 %v18589_v51  ;;  %v18593_v51 = vld [vmem:[%s25818_s3 + $0x888] ss:$52 sps:$4 sm:$0xff]  }
 0x670   :  { %11495 = vmatprep.subr.bf16.mxu0 %v18580_v58  ;;  %v18587_v58 = vld [vmem:[%s25818_s3 + $0x8f0] ss:$52 sps:$4 sm:$0xff]  }
 0x671   :  { %11459 = vmatpush1.bf16.msra.mxu1 %v18587_v58 }
 0x672   :  { %11460 = vmatprep.subr.bf16.mxu1 %v18595_v5 }
 0x673   :  { %11496 = vmatpush1.bf16.msra.mxu0 %v18578_v26 }
 0x674   :  { %11497 = vmatprep.subr.bf16.mxu0 %v18586_v13 }
 0x675   :  { %11461 = vmatpush1.bf16.msra.mxu1 %v18593_v51  ;;  %v18599_v51 = vld [vmem:[%s25818_s3 + $0x820] ss:$52 sps:$4 sm:$0xff]  }
 0x676   :  { %v24520_v49 = vpop.f32.mrf.mxu0 }
 0x677   :  { %26036 = vst [vmem:[#allocation49_spill] sm:$0xff] %v24520_v49  ;;  %v24522_v26 = vpop.f32.mrf.mxu1  ;;  %11498 = vmatpush1.bf16.msra.mxu0 %v18584_v8 }
 0x678   :  { %26037 = vst [vmem:[#allocation50_spill] sm:$0xff] %v24522_v26  ;;  %v9650_v13 = vpop.f32.mrf.mxu0  ;;  %11499 = vmatprep.subr.bf16.mxu0 %v18592_v12 }
 0x679   :  { %v24533_v47 = vpop.f32.mrf.mxu1  ;;  %v18596_v13 = vld [vmem:[%s25818_s3 + $0x890] ss:$52 sps:$4 sm:$0xff]  }
 0x67a   :  { %26038 = vst [vmem:[#allocation51_spill] sm:$0xff] %v24533_v47  ;;  %v9651_v49 = vpop.f32.mrf.mxu0 }
 0x67b   :  { %v10289_v8 = vpop.f32.mrf.mxu1  ;;  %11500 = vmatpush1.bf16.msra.mxu0 %v18590_v42 }
 0x67c   :  { %v9652_v12 = vpop.f32.mrf.mxu0  ;;  %11501 = vmatprep.subr.bf16.mxu0 %v18598_v57  ;;  %v18604_v57 = vld [vmem:[%s25818_s3 + $0x82c] ss:$52 sps:$4 sm:$0xff]  }
 0x67d   :  { %v10290_v58 = vpop.f32.mrf.mxu1  ;;  %v18601_v12 = vld [vmem:[%s25818_s3 + $0x824] ss:$52 sps:$4 sm:$0xff]  }
 0x67e   :  { %11462 = vmatprep.subr.bf16.mxu1 %v18601_v12  ;;  %v18605_v58 = vld [vmem:[%s25818_s3 + $0x7b8] ss:$52 sps:$4 sm:$0xff]   ;;  %v18616_v12 = vld [vmem:[%s25818_s3 + $0x75c] ss:$52 sps:$4 sm:$0xff]  }
 0x67f   :  { %11502 = vmatpush1.bf16.msra.mxu0 %v18596_v13  ;;  %v18602_v13 = vld [vmem:[%s25818_s3 + $0x828] ss:$52 sps:$4 sm:$0xff]   ;;  %11463 = vmatpush1.bf16.msra.mxu1 %v18599_v51  ;;  %v18614_v51 = vld [vmem:[%s25818_s3 + $0x758] ss:$52 sps:$4 sm:$0xff]  }
 0x680   :  { %11503 = vmatprep.subr.bf16.mxu0 %v18604_v57  ;;  %v18611_v57 = vld [vmem:[%s25818_s3 + $0x750] ss:$52 sps:$4 sm:$0xff]  }
 0x683   :  { %11504 = vmatpush1.bf16.msra.mxu0 %v18602_v13  ;;  %v18619_v13 = vld [vmem:[%s25818_s3 + $0xa94] ss:$52 sps:$4 sm:$0xff]  }
 0x69a   :  { %v24538_v26 = vpop.f32.mrf.mxu0 }
 0x69b   :  { %26039 = vst [vmem:[#allocation52_spill] sm:$0xff] %v24538_v26  ;;  %v24540_v28 = vpop.f32.mrf.mxu1 }
 0x69c   :  { %26040 = vst [vmem:[#allocation53_spill] sm:$0xff] %v24540_v28  ;;  %v24542_v23 = vpop.f32.mrf.mxu0 }
 0x69d   :  { %26041 = vst [vmem:[#allocation54_spill] sm:$0xff] %v24542_v23  ;;  %v24544_v47 = vpop.f32.mrf.mxu1 }
 0x69e   :  { %26042 = vst [vmem:[#allocation55_spill] sm:$0xff] %v24544_v47  ;;  %v10330_v5 = vpop.f32.mrf.mxu0 }
 0x69f   :  { %v10371_v49 = vpop.f32.mrf.mxu1  ;;  %v18607_v5 = vld [vmem:[%s25818_s3 + $0x7bc] ss:$52 sps:$4 sm:$0xff]  }
 0x6a0   :  { %v10331_v42 = vpop.f32.mrf.mxu0  ;;  %v18608_v49 = vld [vmem:[%s25818_s3 + $0x7c0] ss:$52 sps:$4 sm:$0xff]   ;;  %11464 = vmatprep.subr.bf16.mxu1 %v18607_v5  ;;  %v18617_v5 = vld [vmem:[%s25818_s3 + $0xa90] ss:$52 sps:$4 sm:$0xff]  }
 0x6a1   :  { %v10372_v8 = vpop.f32.mrf.mxu1  ;;  %v18610_v42 = vld [vmem:[%s25818_s3 + $0x7c4] ss:$52 sps:$4 sm:$0xff]   ;;  %11465 = vmatpush1.bf16.msra.mxu1 %v18605_v58  ;;  %v18622_v58 = vld [vmem:[%s25818_s3 + $0xa9c] ss:$52 sps:$4 sm:$0xff]  }
 0x6a2   :  { %v18613_v8 = vld [vmem:[%s25818_s3 + $0x754] ss:$52 sps:$4 sm:$0xff]   ;;  %11505 = vmatprep.subr.bf16.mxu0 %v18610_v42  ;;  %v18625_v42 = vld [vmem:[%s25818_s3 + $0xa3c] ss:$52 sps:$4 sm:$0xff]  }
 0x6a3   :  { %11506 = vmatpush1.bf16.msra.mxu0 %v18608_v49  ;;  %11466 = vmatprep.subr.bf16.mxu1 %v18613_v8  ;;  %v18620_v49 = vld [vmem:[%s25818_s3 + $0xa98] ss:$52 sps:$4 sm:$0xff]  }
 0x6a4   :  { %11507 = vmatprep.subr.bf16.mxu0 %v18616_v12  ;;  %v18628_v8 = vld [vmem:[%s25818_s3 + $0xa44] ss:$52 sps:$4 sm:$0xff]  }
 0x6a5   :  { %11467 = vmatpush1.bf16.msra.mxu1 %v18611_v57 }
 0x6a6   :  { %11482 = vmatprep.subr.bf16.mxu1 %v18619_v13 }
 0x6a7   :  { %11508 = vmatpush1.bf16.msra.mxu0 %v18614_v51 }
 0x6a8   :  { %11523 = vmatprep.subr.bf16.mxu0 %v18622_v58 }
 0x6a9   :  { %11483 = vmatpush2.bf16.msra.mxu1 %v18617_v5 }
 0x6aa   :  { %11534 = vmatprep.subr.bf16.mxu1 %v18625_v42 }
 0x6ab   :  { %11524 = vmatpush2.bf16.msra.mxu0 %v18620_v49 }
 0x6ac   :  { %11575 = vmatprep.subr.bf16.mxu0 %v18628_v8 }
 0x6be   :  { %v24600_v12 = vpop.f32.mrf.mxu0 }
 0x6bf   :  { %26043 = vst [vmem:[#allocation56_spill] sm:$0xff] %v24600_v12  ;;  %v24602_v57 = vpop.f32.mrf.mxu1 }
 0x6c0   :  { %26044 = vst [vmem:[#allocation57_spill] sm:$0xff] %v24602_v57  ;;  %v24604_v51 = vpop.f32.mrf.mxu0 }
 0x6c1   :  { %26045 = vst [vmem:[#allocation58_spill] sm:$0xff] %v24604_v51  ;;  %v24606_v13 = vpop.f32.mrf.mxu1 }
 0x6c2   :  { %26046 = vst [vmem:[#allocation59_spill] sm:$0xff] %v24606_v13  ;;  %v10412_v58 = vpop.f32.mrf.mxu0 }
 0x6c3   :  { %v10453_v5 = vpop.f32.mrf.mxu1 }
 0x6c4   :  { %v10413_v49 = vpop.f32.mrf.mxu0 }
 0x6c5   :  { %v10454_v47 = vpop.f32.mrf.mxu1 }
 0x6e2   :  { %v24608_v28 = vpop.f32.mrf.mxu0 }
 0x6e3   :  { %26047 = vst [vmem:[#allocation60_spill] sm:$0xff] %v24608_v28  ;;  %v24610_v23 = vpop.f32.mrf.mxu1 }
 0x6e4   :  { %26048 = vst [vmem:[#allocation61_spill] sm:$0xff] %v24610_v23  ;;  %v24612_v26 = vpop.f32.mrf.mxu0 }
 0x6e5   :  { %26049 = vst [vmem:[#allocation62_spill] sm:$0xff] %v24612_v26  ;;  %v10533_v42 = vpop.f32.mrf.mxu1 }
 0x6e6   :  { %v10494_v8 = vpop.f32.mrf.mxu0 }
 0x6e7   :  { %v10534_v52 = vpop.f32.mrf.mxu1  ;;  %v18641_v8 = vld [vmem:[%s25818_s3 + $0x900] ss:$52 sps:$4 sm:$0xff]  }
 0x6e8   :  { %v10495_v12 = vpop.f32.mrf.mxu0  ;;  %v18623_v52 = vld [vmem:[%s25818_s3 + $0xa38] ss:$52 sps:$4 sm:$0xff]  }
 0x6e9   :  { %v10535_v17 = vpop.f32.mrf.mxu1 }
 0x6ea   :  { %v18626_v17 = vld [vmem:[%s25818_s3 + $0xa40] ss:$52 sps:$4 sm:$0xff]  }
 0x722   :  { %v10637_v57 = vpop.f32.mrf.mxu0 }
 0x723   :  { %v10678_v50 = vpop.f32.mrf.mxu1 }
 0x724   :  { %v10639_v51 = vpop.f32.mrf.mxu0  ;;  %v10679_v47 = vadd.f32 %v10678_v50, %v10637_v57  ;;  %v18631_v50 = vld [vmem:[%s25818_s3 + $0x9d4] ss:$52 sps:$4 sm:$0xff]   ;;  %v18643_v57 = vld [vmem:[%s25818_s3 + $0x904] ss:$52 sps:$4 sm:$0xff]  }
 0x725   :  { %v10680_v7 = vpop.f32.mrf.mxu1 }
 0x726   :  { %v10641_v13 = vpop.f32.mrf.mxu0  ;;  %v10681_v28 = vadd.f32 %v10680_v7, %v10639_v51  ;;  %v18634_v7 = vld [vmem:[%s25818_s3 + $0x9dc] ss:$52 sps:$4 sm:$0xff]   ;;  %v18646_v51 = vld [vmem:[%s25818_s3 + $0x90c] ss:$52 sps:$4 sm:$0xff]  }
 0x727   :  { %v10682_v58 = vpop.f32.mrf.mxu1 }
 0x728   :  { %v10642_v5 = vpop.f32.mrf.mxu0  ;;  %v18644_v58 = vld [vmem:[%s25818_s3 + $0x908] ss:$52 sps:$4 sm:$0xff]  }
 0x729   :  { %v10683_v49 = vpop.f32.mrf.mxu1  ;;  %v18649_v5 = vld [vmem:[%s25818_s3 + $0x89c] ss:$52 sps:$4 sm:$0xff]  }
 0x72a   :  { %v18652_v49 = vld [vmem:[%s25818_s3 + $0x8a4] ss:$52 sps:$4 sm:$0xff]  }
 0x72e   :  { %v10719_v18 = vpop.f32.mrf.mxu0 }
 0x72f   :  { %v10720_v4 = vadd.f32 %v10719_v18, %v10679_v47  ;;  %v18637_v18 = vld [vmem:[%s25818_s3 + $0x96c] ss:$52 sps:$4 sm:$0xff]  }
 0x730   :  { %v10721_v23 = vpop.f32.mrf.mxu0  ;;  %v18647_v47 = vld [vmem:[%s25818_s3 + $0x898] ss:$52 sps:$4 sm:$0xff]  }
 0x731   :  { %v10722_v54 = vadd.f32 %v10721_v23, %v10681_v28  ;;  %v24622_v12 = vpack.c.bf16 %v10720_v4, %v10720_v4  ;;  %v18629_v4 = vld [vmem:[%s25818_s3 + $0x9d0] ss:$52 sps:$4 sm:$0xff]   ;;  %v18632_v28 = vld [vmem:[%s25818_s3 + $0x9d8] ss:$52 sps:$4 sm:$0xff]   ;;  %v18635_v23 = vld [vmem:[%s25818_s3 + $0x968] ss:$52 sps:$4 sm:$0xff]  }
 0x732   :  { %v10723_v26 = vpop.f32.mrf.mxu0 }
 0x733   :  { %v24614_v42 = vpack.c.bf16 %v10722_v54, %v10722_v54  ;;  %v18640_v54 = vld [vmem:[%s25818_s3 + $0x974] ss:$52 sps:$4 sm:$0xff]   ;;  %v18638_v26 = vld [vmem:[%s25818_s3 + $0x970] ss:$52 sps:$4 sm:$0xff]  }
 0x734   :  { %v10724_v13 = vpop.f32.mrf.mxu0 }
 0x735   :  { %15995 = vmatprep.mubr.msk.bf16.mxu1 %vm9364_vm5, %v24614_v42  ;;  %15996 = vmatprep.mubr.msk.bf16.mxu0 %vm9364_vm5, %v24614_v42  ;;  %v18658_v13 = vld [vmem:[%s25818_s3 + $0x83c] ss:$52 sps:$4 sm:$0xff]  }
 0x736   :  { %11485 = vmatmul.mubr.bf16.vlgmr.msra.gmra.mxu1 %v24622_v12  ;;  %11526 = vmatmul.mubr.bf16.vlgmr.msra.gmra.mxu0 %v24622_v12 }
 0x737   :  { %11535 = vmatpush1.bf16.msra.mxu1 %v18623_v52  ;;  %11576 = vmatpush1.bf16.msra.mxu0 %v18626_v17  ;;  %v18650_v52 = vld [vmem:[%s25818_s3 + $0x8a0] ss:$52 sps:$4 sm:$0xff]  }
 0x738   :  { %15997 = vmatprep.mubr.msk.bf16.mxu1 %vm9364_vm5, %v24614_v42  ;;  %15998 = vmatprep.mubr.msk.bf16.mxu0 %vm9364_vm5, %v24614_v42  ;;  %v18655_v17 = vld [vmem:[%s25818_s3 + $0x834] ss:$52 sps:$4 sm:$0xff]  }
 0x739   :  { %11536 = vmatprep.subr.bf16.mxu1 %v18631_v50  ;;  %11577 = vmatprep.subr.bf16.mxu0 %v18634_v7  ;;  %v18653_v50 = vld [vmem:[%s25818_s3 + $0x830] ss:$52 sps:$4 sm:$0xff]   ;;  %v18656_v7 = vld [vmem:[%s25818_s3 + $0x838] ss:$52 sps:$4 sm:$0xff]  }
 0x73b   :  { %11537 = vmatpush1.bf16.msra.mxu1 %v18629_v4  ;;  %11578 = vmatpush1.bf16.msra.mxu0 %v18632_v28  ;;  %v18661_v4 = vld [vmem:[%s25818_s3 + $0x7cc] ss:$52 sps:$4 sm:$0xff]   ;;  %v18664_v28 = vld [vmem:[%s25818_s3 + $0x7d4] ss:$52 sps:$4 sm:$0xff]  }
 0x73c   :  { %11538 = vmatprep.subr.bf16.mxu1 %v18637_v18  ;;  %11579 = vmatprep.subr.bf16.mxu0 %v18640_v54  ;;  %v18659_v18 = vld [vmem:[%s25818_s3 + $0x7c8] ss:$52 sps:$4 sm:$0xff]   ;;  %v18662_v54 = vld [vmem:[%s25818_s3 + $0x7d0] ss:$52 sps:$4 sm:$0xff]  }
 0x73f   :  { %11539 = vmatpush1.bf16.msra.mxu1 %v18635_v23  ;;  %11580 = vmatpush1.bf16.msra.mxu0 %v18638_v26  ;;  %v18667_v23 = vld [vmem:[%s25818_s3 + $0x764] ss:$52 sps:$4 sm:$0xff]   ;;  %v18670_v26 = vld [vmem:[%s25818_s3 + $0x76c] ss:$52 sps:$4 sm:$0xff]  }
 0x740   :  { %11540 = vmatprep.subr.bf16.mxu1 %v18643_v57  ;;  %11581 = vmatprep.subr.bf16.mxu0 %v18646_v51  ;;  %v18665_v57 = vld [vmem:[%s25818_s3 + $0x760] ss:$52 sps:$4 sm:$0xff]   ;;  %v18668_v51 = vld [vmem:[%s25818_s3 + $0x768] ss:$52 sps:$4 sm:$0xff]  }
 0x743   :  { %11541 = vmatpush1.bf16.msra.mxu1 %v18641_v8  ;;  %11582 = vmatpush1.bf16.msra.mxu0 %v18644_v58  ;;  %v18673_v8 = vld [vmem:[%s25818_s3 + $0xaa4] ss:$52 sps:$4 sm:$0xff]   ;;  %v18676_v58 = vld [vmem:[%s25818_s3 + $0xaac] ss:$52 sps:$4 sm:$0xff]  }
 0x744   :  { %11542 = vmatprep.subr.bf16.mxu1 %v18649_v5  ;;  %11583 = vmatprep.subr.bf16.mxu0 %v18652_v49  ;;  %v18671_v5 = vld [vmem:[%s25818_s3 + $0xaa0] ss:$52 sps:$4 sm:$0xff]   ;;  %v18674_v49 = vld [vmem:[%s25818_s3 + $0xaa8] ss:$52 sps:$4 sm:$0xff]  }
 0x747   :  { %11543 = vmatpush1.bf16.msra.mxu1 %v18647_v47  ;;  %11584 = vmatpush1.bf16.msra.mxu0 %v18650_v52  ;;  %v18679_v47 = vld [vmem:[%s25818_s3 + $0xa4c] ss:$52 sps:$4 sm:$0xff]   ;;  %v18682_v52 = vld [vmem:[%s25818_s3 + $0xa54] ss:$52 sps:$4 sm:$0xff]  }
 0x748   :  { %11544 = vmatprep.subr.bf16.mxu1 %v18655_v17  ;;  %11585 = vmatprep.subr.bf16.mxu0 %v18658_v13  ;;  %v18677_v17 = vld [vmem:[%s25818_s3 + $0xa48] ss:$52 sps:$4 sm:$0xff]   ;;  %v18680_v13 = vld [vmem:[%s25818_s3 + $0xa50] ss:$52 sps:$4 sm:$0xff]  }
 0x74b   :  { %11545 = vmatpush1.bf16.msra.mxu1 %v18653_v50  ;;  %11586 = vmatpush1.bf16.msra.mxu0 %v18656_v7  ;;  %v18685_v50 = vld [vmem:[%s25818_s3 + $0x9e4] ss:$52 sps:$4 sm:$0xff]   ;;  %v18688_v7 = vld [vmem:[%s25818_s3 + $0x9ec] ss:$52 sps:$4 sm:$0xff]  }
 0x74c   :  { %11546 = vmatprep.subr.bf16.mxu1 %v18661_v4  ;;  %11587 = vmatprep.subr.bf16.mxu0 %v18664_v28  ;;  %v18683_v4 = vld [vmem:[%s25818_s3 + $0x9e0] ss:$52 sps:$4 sm:$0xff]   ;;  %v18686_v28 = vld [vmem:[%s25818_s3 + $0x9e8] ss:$52 sps:$4 sm:$0xff]  }
 0x74f   :  { %11547 = vmatpush1.bf16.msra.mxu1 %v18659_v18  ;;  %11588 = vmatpush1.bf16.msra.mxu0 %v18662_v54  ;;  %v18691_v18 = vld [vmem:[%s25818_s3 + $0x97c] ss:$52 sps:$4 sm:$0xff]   ;;  %v18694_v54 = vld [vmem:[%s25818_s3 + $0x984] ss:$52 sps:$4 sm:$0xff]  }
 0x750   :  { %11548 = vmatprep.subr.bf16.mxu1 %v18667_v23  ;;  %11589 = vmatprep.subr.bf16.mxu0 %v18670_v26  ;;  %v18689_v23 = vld [vmem:[%s25818_s3 + $0x978] ss:$52 sps:$4 sm:$0xff]   ;;  %v18692_v26 = vld [vmem:[%s25818_s3 + $0x980] ss:$52 sps:$4 sm:$0xff]  }
 0x753   :  { %11549 = vmatpush1.bf16.msra.mxu1 %v18665_v57  ;;  %11590 = vmatpush1.bf16.msra.mxu0 %v18668_v51  ;;  %v18697_v57 = vld [vmem:[%s25818_s3 + $0x914] ss:$52 sps:$4 sm:$0xff]   ;;  %v18700_v51 = vld [vmem:[%s25818_s3 + $0x91c] ss:$52 sps:$4 sm:$0xff]  }
 0x754   :  { %11564 = vmatprep.subr.bf16.mxu1 %v18673_v8  ;;  %11605 = vmatprep.subr.bf16.mxu0 %v18676_v58  ;;  %v18695_v8 = vld [vmem:[%s25818_s3 + $0x910] ss:$52 sps:$4 sm:$0xff]   ;;  %v18698_v58 = vld [vmem:[%s25818_s3 + $0x918] ss:$52 sps:$4 sm:$0xff]  }
 0x757   :  { %11565 = vmatpush2.bf16.msra.mxu1 %v18671_v5  ;;  %11606 = vmatpush2.bf16.msra.mxu0 %v18674_v49  ;;  %v18703_v5 = vld [vmem:[%s25818_s3 + $0x8ac] ss:$52 sps:$4 sm:$0xff]   ;;  %v18706_v49 = vld [vmem:[%s25818_s3 + $0x8b4] ss:$52 sps:$4 sm:$0xff]  }
 0x758   :  { %11616 = vmatprep.subr.bf16.mxu1 %v18679_v47  ;;  %11657 = vmatprep.subr.bf16.mxu0 %v18682_v52  ;;  %v18701_v47 = vld [vmem:[%s25818_s3 + $0x8a8] ss:$52 sps:$4 sm:$0xff]   ;;  %v18704_v52 = vld [vmem:[%s25818_s3 + $0x8b0] ss:$52 sps:$4 sm:$0xff]  }
 0x75a   :  { %11567 = vmatmul.mubr.bf16.vlgmr.msra.gmra.mxu1 %v24622_v12  ;;  %11608 = vmatmul.mubr.bf16.vlgmr.msra.gmra.mxu0 %v24622_v12 }
 0x75b   :  { %11617 = vmatpush1.bf16.msra.mxu1 %v18677_v17  ;;  %15999 = vmatprep.mubr.msk.bf16.mxu1 %vm9364_vm5, %v24614_v42  ;;  %v18709_v17 = vld [vmem:[%s25818_s3 + $0x844] ss:$52 sps:$4 sm:$0xff]  }
 0x75c   :  { %11658 = vmatpush1.bf16.msra.mxu0 %v18680_v13  ;;  %16000 = vmatprep.mubr.msk.bf16.mxu0 %vm9364_vm5, %v24614_v42  ;;  %v18712_v13 = vld [vmem:[%s25818_s3 + $0x84c] ss:$52 sps:$4 sm:$0xff]  }
 0x75d   :  { %11618 = vmatprep.subr.bf16.mxu1 %v18685_v50  ;;  %11659 = vmatprep.subr.bf16.mxu0 %v18688_v7  ;;  %v18707_v50 = vld [vmem:[%s25818_s3 + $0x840] ss:$52 sps:$4 sm:$0xff]   ;;  %v18710_v7 = vld [vmem:[%s25818_s3 + $0x848] ss:$52 sps:$4 sm:$0xff]  }
 0x75f   :  { %11619 = vmatpush1.bf16.msra.mxu1 %v18683_v4  ;;  %v18715_v4 = vld [vmem:[%s25818_s3 + $0x7dc] ss:$52 sps:$4 sm:$0xff]  }
 0x760   :  { %11660 = vmatpush1.bf16.msra.mxu0 %v18686_v28  ;;  %11620 = vmatprep.subr.bf16.mxu1 %v18691_v18  ;;  %v18718_v28 = vld [vmem:[%s25818_s3 + $0x7e4] ss:$52 sps:$4 sm:$0xff]  }
 0x761   :  { %11661 = vmatprep.subr.bf16.mxu0 %v18694_v54  ;;  %v18713_v18 = vld [vmem:[%s25818_s3 + $0x7d8] ss:$52 sps:$4 sm:$0xff]   ;;  %v18716_v54 = vld [vmem:[%s25818_s3 + $0x7e0] ss:$52 sps:$4 sm:$0xff]  }
 0x763   :  { %11621 = vmatpush1.bf16.msra.mxu1 %v18689_v23  ;;  %v18721_v23 = vld [vmem:[%s25818_s3 + $0x774] ss:$52 sps:$4 sm:$0xff]  }
 0x764   :  { %11662 = vmatpush1.bf16.msra.mxu0 %v18692_v26  ;;  %11622 = vmatprep.subr.bf16.mxu1 %v18697_v57  ;;  %v18724_v26 = vld [vmem:[%s25818_s3 + $0x77c] ss:$52 sps:$4 sm:$0xff]  }
 0x765   :  { %11663 = vmatprep.subr.bf16.mxu0 %v18700_v51  ;;  %v18719_v57 = vld [vmem:[%s25818_s3 + $0x770] ss:$52 sps:$4 sm:$0xff]   ;;  %v16616_v51 = vunpack.i.l.bf16 %v23615_v53 }
 0x767   :  { %11623 = vmatpush1.bf16.msra.mxu1 %v18695_v8  ;;  %v18722_v8 = vld [vmem:[%s25818_s3 + $0x778] ss:$52 sps:$4 sm:$0xff]  }
 0x768   :  { %11664 = vmatpush1.bf16.msra.mxu0 %v18698_v58  ;;  %11624 = vmatprep.subr.bf16.mxu1 %v18703_v5  ;;  %v18727_v58 = vld [vmem:[%s25818_s3 + $0xab4] ss:$52 sps:$4 sm:$0xff]   ;;  %v18730_v5 = vld [vmem:[%s25818_s3 + $0xabc] ss:$52 sps:$4 sm:$0xff]  }
 0x769   :  { %11665 = vmatprep.subr.bf16.mxu0 %v18706_v49  ;;  %v18725_v49 = vld [vmem:[%s25818_s3 + $0xab0] ss:$52 sps:$4 sm:$0xff]  }
 0x76b   :  { %11625 = vmatpush1.bf16.msra.mxu1 %v18701_v47  ;;  %v18728_v47 = vld [vmem:[%s25818_s3 + $0xab8] ss:$52 sps:$4 sm:$0xff]  }
 0x76c   :  { %11666 = vmatpush1.bf16.msra.mxu0 %v18704_v52  ;;  %11626 = vmatprep.subr.bf16.mxu1 %v18709_v17  ;;  %v26050_v52 = vunpack.i.h.bf16 %v23615_v53  ;;  %v26061_v53 = vld [vmem:[#allocation35_spill] sm:$0xff] }
 0x76d   :  { %11667 = vmatprep.subr.bf16.mxu0 %v18712_v13  ;;  %v18731_v13 = vld [vmem:[%s25818_s3 + $0xa58] ss:$52 sps:$4 sm:$0xff]  }
 0x76e   :  { %v11796_v17 = vsel %vm7756_vm2, %v16616_v51, %v26050_v52 }
 0x76f   :  { %11627 = vmatpush1.bf16.msra.mxu1 %v18707_v50  ;;  %v11805_v50 = vmax.f32 %v23310_v56, %v11796_v17  ;;  %v18733_v56 = vld [vmem:[%s25818_s3 + $0x988] ss:$52 sps:$4 sm:$0xff]  }
 0x770   :  { %11668 = vmatpush1.bf16.msra.mxu0 %v18710_v7  ;;  %11628 = vmatprep.subr.bf16.mxu1 %v18715_v4  ;;  %v18732_v4 = vld [vmem:[%s25818_s3 + $0x9f0] ss:$52 sps:$4 sm:$0xff]   ;;  %v26089_v17 = vld [vmem:[#allocation18_spill] sm:$0xff] }
 0x771   :  { %11669 = vmatprep.subr.bf16.mxu0 %v18718_v28  ;;  %v11810_v7 = vpack.c.bf16 %v11805_v50, %v11805_v50  ;;  %v26079_v28 = vld [vmem:[#allocation37_spill] sm:$0xff] }
 0x773   :  { %11629 = vmatpush1.bf16.msra.mxu1 %v18713_v18  ;;  %v26080_v18 = vld [vmem:[#allocation38_spill] sm:$0xff] }
 0x774   :  { %11670 = vmatpush1.bf16.msra.mxu0 %v18716_v54  ;;  %11630 = vmatprep.subr.bf16.mxu1 %v18721_v23  ;;  %v26081_v54 = vld [vmem:[#allocation40_spill] sm:$0xff]  ;;  %v26082_v23 = vld [vmem:[#allocation29_spill] sm:$0xff] }
 0x775   :  { %11671 = vmatprep.subr.bf16.mxu0 %v18724_v26  ;;  %v26083_v26 = vld [vmem:[#allocation16_spill] sm:$0xff] }
 0x777   :  { %11631 = vmatpush1.bf16.msra.mxu1 %v18719_v57  ;;  %v26084_v57 = vld [vmem:[#allocation14_spill] sm:$0xff] }
 0x778   :  { %11672 = vmatpush1.bf16.msra.mxu0 %v18722_v8  ;;  %11646 = vmatprep.subr.bf16.mxu1 %v18727_v58  ;;  %v26085_v8 = vld [vmem:[#allocation31_spill] sm:$0xff]  ;;  %v26086_v58 = vld [vmem:[#allocation44_spill] sm:$0xff] }
 0x779   :  { %11687 = vmatprep.subr.bf16.mxu0 %v18730_v5 }
 0x77b   :  { %11647 = vmatpush2.bf16.msra.mxu1 %v18725_v49  ;;  %v26087_v49 = vld [vmem:[#allocation10_spill] sm:$0xff] }
 0x77c   :  { %11688 = vmatpush2.bf16.msra.mxu0 %v18728_v47  ;;  %11698 = vmatprep.subr.bf16.mxu1 %v25949_v62  ;;  %v26088_v47 = vld [vmem:[#allocation50_spill] sm:$0xff] }
 0x77d   :  { %11817 = vmatprep.subr.bf16.mxu0 %v24030_v61  ;;  %v18734_v61 = vld [vmem:[%s25818_s3 + $0x920] ss:$52 sps:$4 sm:$0xff]   ;;  %v10286_v52 = vadd.f32 %v26088_v47, %v26087_v49  ;;  %v18773_v49 = vld [vmem:[%s25818_s3 + $0xbd0] ss:$52 sps:$4 sm:$0xff]  }
 0x77e   :  { %11649 = vmatmul.mubr.bf16.vlgmr.msra.gmra.mxu1 %v24622_v12  ;;  %v18778_v47 = vld [vmem:[%s25818_s3 + $0xb64] ss:$52 sps:$4 sm:$0xff]  }
 0x77f   :  { %11690 = vmatmul.mubr.bf16.vlgmr.msra.gmra.mxu0 %v24622_v12  ;;  %11699 = vmatpush1.bf16.msra.mxu1 %v18731_v13  ;;  %v26090_v13 = vld [vmem:[#allocation52_spill] sm:$0xff] }
 0x780   :  { %16001 = vmatprep.mubr.msk.bf16.mxu1 %vm9364_vm5, %v24614_v42  ;;  %11818 = vmatpush1.bf16.msra.mxu0 %v24044_v55  ;;  %v18735_v55 = vld [vmem:[%s25818_s3 + $0x8b8] ss:$52 sps:$4 sm:$0xff]   ;;  %v10327_v50 = vadd.f32 %v26090_v13, %v26089_v17 }
 0x781   :  { %11849 = vmatprep.mubr.bf16.mxu0 %v11810_v7  ;;  %11700 = vmatprep.subr.bf16.mxu1 %v25949_v62  ;;  %v26077_v42 = vld [vmem:[#allocation22_spill] sm:$0xff] }
 0x782   :  { %11819 = vmatprep.subr.bf16.mxu0 %v24056_v0  ;;  %v18736_v0 = vld [vmem:[%s25818_s3 + $0x850] ss:$52 sps:$4 sm:$0xff]   ;;  %v18781_v13 = vld [vmem:[%s25818_s3 + $0xb6c] ss:$52 sps:$4 sm:$0xff]  }
 0x783   :  { %11701 = vmatpush1.bf16.msra.mxu1 %v18732_v4 }
 0x784   :  { %11820 = vmatpush1.bf16.msra.mxu0 %v24068_v38  ;;  %11702 = vmatprep.subr.bf16.mxu1 %v25949_v62  ;;  %v18737_v38 = vld [vmem:[%s25818_s3 + $0x7e8] ss:$52 sps:$4 sm:$0xff]  }
 0x785   :  { %11821 = vmatprep.subr.bf16.mxu0 %v24080_v43  ;;  %v16622_v43 = vunpack.i.h.bf16 %v23627_v41 }
 0x787   :  { %11703 = vmatpush1.bf16.msra.mxu1 %v18733_v56  ;;  %v26091_v56 = vld [vmem:[#allocation11_spill] sm:$0xff] }
 0x788   :  { %11822 = vmatpush1.bf16.msra.mxu0 %v24092_v22  ;;  %11704 = vmatprep.subr.bf16.mxu1 %v25949_v62  ;;  %v18738_v22 = vld [vmem:[%s25818_s3 + $0x780] ss:$52 sps:$4 sm:$0xff]  }
 0x789   :  { %11823 = vmatprep.subr.bf16.mxu0 %v24104_v34  ;;  %v26051_v34 = vunpack.i.l.bf16 %v23627_v41 }
 0x78b   :  { %11705 = vmatpush1.bf16.msra.mxu1 %v18734_v61  ;;  %v26092_v61 = vld [vmem:[#allocation51_spill] sm:$0xff] }
 0x78c   :  { %11824 = vmatpush1.bf16.msra.mxu0 %v24120_v63  ;;  %11706 = vmatprep.subr.bf16.mxu1 %v25949_v62  ;;  %v11798_v63 = vsel %vm7756_vm2, %v26051_v34, %v16622_v43 }
 0x78d   :  { %11825 = vmatprep.subr.bf16.mxu0 %v24136_v11  ;;  %v18739_v11 = vld [vmem:[%s25818_s3 + $0xac0] ss:$52 sps:$4 sm:$0xff]  }
 0x78f   :  { %11707 = vmatpush1.bf16.msra.mxu1 %v18735_v55  ;;  %v10288_v55 = vadd.f32 %v26092_v61, %v26091_v56  ;;  %v18776_v61 = vld [vmem:[%s25818_s3 + $0xb60] ss:$52 sps:$4 sm:$0xff]  }
 0x790   :  { %11826 = vmatpush1.bf16.msra.mxu0 %v24148_v10  ;;  %11708 = vmatprep.subr.bf16.mxu1 %v25949_v62  ;;  %v11807_v10 = vmax.f32 %v23322_v37, %v11798_v63  ;;  %v11786_v37 = vpop.permute.xlu1 %11785 }
 0x791   :  { %11827 = vmatprep.subr.bf16.mxu0 %v24160_v30 }
 0x792   :  { %v11812_v41 = vpack.c.bf16 %v11807_v10, %v11807_v10 }
 0x793   :  { %11709 = vmatpush1.bf16.msra.mxu1 %v18736_v0  ;;  %v26093_v0 = vld [vmem:[#allocation20_spill] sm:$0xff] }
 0x794   :  { %11828 = vmatpush1.bf16.msra.mxu0 %v24172_v40  ;;  %11710 = vmatprep.subr.bf16.mxu1 %v25949_v62  ;;  %v26071_v40 = vld [vmem:[#allocation26_spill] sm:$0xff] }
 0x795   :  { %11829 = vmatprep.subr.bf16.mxu0 %v24184_v35  ;;  %v26072_v35 = vld [vmem:[#allocation48_spill] sm:$0xff] }
 0x797   :  { %11711 = vmatpush1.bf16.msra.mxu1 %v18737_v38  ;;  %v26094_v38 = vld [vmem:[#allocation54_spill] sm:$0xff] }
 0x798   :  { %11830 = vmatpush1.bf16.msra.mxu0 %v24196_v45  ;;  %11712 = vmatprep.subr.bf16.mxu1 %v25949_v62  ;;  %v26073_v45 = vld [vmem:[#allocation4_spill] sm:$0xff] }
 0x799   :  { %11831 = vmatprep.subr.bf16.mxu0 %v24208_v25 }
 0x79b   :  { %11713 = vmatpush1.bf16.msra.mxu1 %v18738_v22 }
 0x79c   :  { %11832 = vmatpush1.bf16.msra.mxu0 %v24220_v44  ;;  %11728 = vmatprep.subr.bf16.mxu1 %v25949_v62  ;;  %v26074_v44 = vld [vmem:[#allocation28_spill] sm:$0xff] }
 0x79d   :  { %11833 = vmatprep.subr.bf16.mxu0 %v24232_v2  ;;  %v26075_v2 = vld [vmem:[#allocation32_spill] sm:$0xff] }
 0x79f   :  { %11729 = vmatpush2.bf16.msra.mxu1 %v18739_v11 }
 0x7a0   :  { %11834 = vmatpush2.bf16.msra.mxu0 %v24244_v15  ;;  %11858 = vmatprep.subr.bf16.mxu1 %v24036_v46  ;;  %v26057_v46 = vld [vmem:[#allocation42_spill] sm:$0xff]  ;;  %v26076_v15 = vld [vmem:[#allocation33_spill] sm:$0xff] }
 0x7a1   :  { %11835 = vmatprep.subr.bf16.mxu0 %v24256_v21  ;;  %v26052_v21 = vld [vmem:[#allocation39_spill] sm:$0xff] }
 0x7a2   :  { %11731 = vmatmul.mubr.bf16.vlgmr.msra.gmra.mxu1 %v24622_v12  ;;  %v26078_v12 = vld [vmem:[#allocation2_spill] sm:$0xff] }
 0x7a3   :  { %11859 = vmatpush1.bf16.msra.mxu1 %v24050_v14  ;;  %11890 = vmatprep.mubr.bf16.mxu1 %v11812_v41  ;;  %v26058_v14 = vld [vmem:[#allocation6_spill] sm:$0xff] }
 0x7a4   :  { %11836 = vmatpush2.bf16.msra.mxu0 %v24268_v36  ;;  %11860 = vmatprep.subr.bf16.mxu1 %v24062_v9  ;;  %v26055_v36 = vld [vmem:[#allocation27_spill] sm:$0xff] }
 0x7a5   :  { %11837 = vmatprep.subr.bf16.mxu0 %v24280_v16  ;;  %v26059_v9 = vld [vmem:[#allocation43_spill] sm:$0xff] }
 0x7a7   :  { %11861 = vmatpush1.bf16.msra.mxu1 %v24074_v31  ;;  %v26060_v31 = vld [vmem:[#allocation17_spill] sm:$0xff] }
 0x7a8   :  { %11838 = vmatpush2.bf16.msra.mxu0 %v24292_v20  ;;  %11862 = vmatprep.subr.bf16.mxu1 %v24086_v29  ;;  %v26066_v20 = vld [vmem:[#allocation21_spill] sm:$0xff] }
 0x7a9   :  { %11839 = vmatprep.subr.bf16.mxu0 %v24304_v19  ;;  %v26064_v19 = vld [vmem:[#allocation19_spill] sm:$0xff] }
 0x7ab   :  { %11863 = vmatpush1.bf16.msra.mxu1 %v24098_v39  ;;  %v26062_v39 = vld [vmem:[#allocation5_spill] sm:$0xff] }
 0x7ac   :  { %11840 = vmatpush2.bf16.msra.mxu0 %v24316_v60  ;;  %11864 = vmatprep.subr.bf16.mxu1 %v24110_v6  ;;  %v26053_v60 = vld [vmem:[#allocation15_spill] sm:$0xff]  ;;  %v26063_v6 = vld [vmem:[#allocation36_spill] sm:$0xff] }
 0x7ad   :  { %11841 = vmatprep.subr.bf16.mxu0 %v24328_v27  ;;  %v11795_v27 = vsel %vm7756_vm2, %v11786_v37, %v16616_v51  ;;  %v11806_v51 = vmax.f32 %v26084_v57, %v26083_v26  ;;  %v18770_v26 = vld [vmem:[%s25818_s3 + $0xbc8] ss:$52 sps:$4 sm:$0xff]   ;;  %v26101_v57 = vld [vmem:[#allocation25_spill] sm:$0xff] }
 0x7af   :  { %11865 = vmatpush1.bf16.msra.mxu1 %v24126_v59  ;;  %v26065_v59 = vld [vmem:[#allocation45_spill] sm:$0xff]  ;;  %v11811_v5 = vpack.c.bf16 %v11806_v51, %v11806_v51  ;;  %v26102_v51 = vld [vmem:[#allocation58_spill] sm:$0xff] }
 0x7b0   :  { %11842 = vmatpush2.bf16.msra.mxu0 %v24344_v3  ;;  %11866 = vmatprep.subr.bf16.mxu1 %v24142_v24  ;;  %v26054_v3 = vld [vmem:[#allocation41_spill] sm:$0xff]  ;;  %v26068_v24 = vld [vmem:[#allocation24_spill] sm:$0xff] }
 0x7b1   :  { %11843 = vmatprep.subr.bf16.mxu0 %v24358_v48  ;;  %v26056_v48 = vld [vmem:[#allocation8_spill] sm:$0xff] }
 0x7b2   :  { %v11804_v16 = vmax.f32 %v26056_v48, %v11795_v27  ;;  %v18743_v48 = vld [vmem:[%s25818_s3 + $0xdd8] ss:$52 sps:$4 sm:$0xff]  }
 0x7b3   :  { %11867 = vmatpush1.bf16.msra.mxu1 %v24154_v32  ;;  %v26069_v32 = vld [vmem:[#allocation9_spill] sm:$0xff] }
 0x7b4   :  { %11844 = vmatpush2.bf16.msra.mxu0 %v24372_v1  ;;  %11868 = vmatprep.subr.bf16.mxu1 %v24166_v33  ;;  %v11809_v29 = vpack.c.bf16 %v11804_v16, %v11804_v16  ;;  %v26067_v1 = vld [vmem:[#allocation46_spill] sm:$0xff]  ;;  %v11808_v30 = vmax.f32 %v26069_v32, %v16622_v43  ;;  %v26070_v33 = vld [vmem:[#allocation47_spill] sm:$0xff]  ;;  %v10329_v43 = vadd.f32 %v26094_v38, %v26093_v0 }
 0x7b5   :  { %11845 = vmatprep.subr.bf16.mxu0 %v26052_v21  ;;  %v18745_v16 = vld [vmem:[%s25818_s3 + $0xddc] ss:$52 sps:$4 sm:$0xff]  }
 0x7b6   :  { %v11813_v25 = vpack.c.bf16 %v11808_v30, %v11808_v30  ;;  %v18769_v32 = vld [vmem:[%s25818_s3 + $0xc3c] ss:$52 sps:$4 sm:$0xff]  }
 0x7b7   :  { %11869 = vmatpush1.bf16.msra.mxu1 %v26053_v60  ;;  %v18764_v30 = vld [vmem:[%s25818_s3 + $0xc30] ss:$52 sps:$4 sm:$0xff]  }
 0x7b8   :  { %11846 = vmatpush2.bf16.msra.mxu0 %v26054_v3  ;;  %11870 = vmatprep.subr.bf16.mxu1 %v26055_v36  ;;  %v18740_v3 = vld [vmem:[%s25818_s3 + $0xdd0] ss:$52 sps:$4 sm:$0xff]   ;;  %v18742_v36 = vld [vmem:[%s25818_s3 + $0xdd4] ss:$52 sps:$4 sm:$0xff]  }
 0x7b9   :  { %11847 = vmatprep.subr.bf16.mxu0 %v26057_v46  ;;  %v18746_v46 = vld [vmem:[%s25818_s3 + $0xd68] ss:$52 sps:$4 sm:$0xff]  }
 0x7bb   :  { %11871 = vmatpush1.bf16.msra.mxu1 %v26058_v14  ;;  %v18748_v14 = vld [vmem:[%s25818_s3 + $0xd6c] ss:$52 sps:$4 sm:$0xff]  }
 0x7bc   :  { %11848 = vmatpush2.bf16.msra.mxu0 %v26059_v9  ;;  %11872 = vmatprep.subr.bf16.mxu1 %v26060_v31  ;;  %v18749_v9 = vld [vmem:[%s25818_s3 + $0xd70] ss:$52 sps:$4 sm:$0xff]   ;;  %v18751_v31 = vld [vmem:[%s25818_s3 + $0xd74] ss:$52 sps:$4 sm:$0xff]  }
 0x7bd   :  { %16002 = vmatprep.subr.msk.bf16.mxu0 %vm8194_vm3, %v26061_v53  ;;  %v18754_v53 = vld [vmem:[%s25818_s3 + $0xd04] ss:$52 sps:$4 sm:$0xff]  }
 0x7bf   :  { %11850 = vmatmul.mubr.bf16.vlgmr.msra.gmra.mxu0 %v11809_v29  ;;  %11873 = vmatpush1.bf16.msra.mxu1 %v26062_v39  ;;  %v18752_v29 = vld [vmem:[%s25818_s3 + $0xd00] ss:$52 sps:$4 sm:$0xff]   ;;  %v18755_v39 = vld [vmem:[%s25818_s3 + $0xd08] ss:$52 sps:$4 sm:$0xff]  }
 0x7c0   :  { %11910 = vmatpush1.bf16.msra.mxu0 %v26063_v6  ;;  %11874 = vmatprep.subr.bf16.mxu1 %v26064_v19  ;;  %v18757_v6 = vld [vmem:[%s25818_s3 + $0xd0c] ss:$52 sps:$4 sm:$0xff]   ;;  %v18760_v19 = vld [vmem:[%s25818_s3 + $0xc9c] ss:$52 sps:$4 sm:$0xff]  }
 0x7c1   :  { %11911 = vmatprep.subr.bf16.mxu0 %v26065_v59  ;;  %11931 = vmatprep.mubr.bf16.mxu0 %v25949_v62  ;;  %v18758_v59 = vld [vmem:[%s25818_s3 + $0xc98] ss:$52 sps:$4 sm:$0xff]  }
 0x7c3   :  { %11875 = vmatpush2.bf16.msra.mxu1 %v26066_v20  ;;  %v18763_v20 = vld [vmem:[%s25818_s3 + $0xca4] ss:$52 sps:$4 sm:$0xff]  }
 0x7c4   :  { %11912 = vmatpush1.bf16.msra.mxu0 %v26067_v1  ;;  %11876 = vmatprep.subr.bf16.mxu1 %v26068_v24  ;;  %v18761_v1 = vld [vmem:[%s25818_s3 + $0xca0] ss:$52 sps:$4 sm:$0xff]  }
 0x7c5   :  { %11913 = vmatprep.subr.bf16.mxu0 %v26070_v33  ;;  %v18766_v24 = vld [vmem:[%s25818_s3 + $0xc34] ss:$52 sps:$4 sm:$0xff]   ;;  %v18767_v33 = vld [vmem:[%s25818_s3 + $0xc38] ss:$52 sps:$4 sm:$0xff]  }
 0x7c7   :  { %11877 = vmatpush2.bf16.msra.mxu1 %v26071_v40  ;;  %v18772_v40 = vld [vmem:[%s25818_s3 + $0xbcc] ss:$52 sps:$4 sm:$0xff]  }
 0x7c8   :  { %11914 = vmatpush1.bf16.msra.mxu0 %v26072_v35  ;;  %11878 = vmatprep.subr.bf16.mxu1 %v26073_v45  ;;  %v18775_v35 = vld [vmem:[%s25818_s3 + $0xbd4] ss:$52 sps:$4 sm:$0xff]   ;;  %v26095_v45 = vld [vmem:[#allocation12_spill] sm:$0xff] }
 0x7c9   :  { %12666 = vmatprep.subr.bf16.mxu0 %v18742_v36  ;;  %v18796_v36 = vld [vmem:[%s25818_s3 + $0xde4] ss:$52 sps:$4 sm:$0xff]  }
 0x7cb   :  { %16003 = vmatmul.mubr.msk.bf16.vlgmr.msra.gmra.mxu0 %vm8190_vm4, %v11813_v25  ;;  %11879 = vmatpush2.bf16.msra.mxu1 %v26074_v44  ;;  %v26096_v25 = vld [vmem:[#allocation53_spill] sm:$0xff] }
 0x7cc   :  { %11880 = vmatprep.subr.bf16.mxu1 %v26075_v2  ;;  %12667 = vmatpush1.bf16.msra.mxu0 %v18740_v3  ;;  %v10368_v44 = vadd.f32 %v26096_v25, %v26095_v45  ;;  %v26097_v2 = vld [vmem:[#allocation23_spill] sm:$0xff] }
 0x7cd   :  { %12668 = vmatprep.subr.bf16.mxu0 %v18748_v14  ;;  %v18791_v3 = vld [vmem:[%s25818_s3 + $0xe40] ss:$52 sps:$4 sm:$0xff]  }
 0x7cf   :  { %11881 = vmatpush2.bf16.msra.mxu1 %v26076_v15  ;;  %v26098_v15 = vld [vmem:[#allocation56_spill] sm:$0xff] }
 0x7d0   :  { %11882 = vmatprep.subr.bf16.mxu1 %v26077_v42  ;;  %12669 = vmatpush1.bf16.msra.mxu0 %v18746_v46  ;;  %v10409_v42 = vadd.f32 %v26098_v15, %v26097_v2  ;;  %v26104_v46 = vld [vmem:[#allocation57_spill] sm:$0xff] }
 0x7d1   :  { %12670 = vmatprep.subr.bf16.mxu0 %v18754_v53 }
 0x7d3   :  { %11883 = vmatpush2.bf16.msra.mxu1 %v26078_v12  ;;  %v26099_v12 = vld [vmem:[#allocation13_spill] sm:$0xff] }
 0x7d4   :  { %11884 = vmatprep.subr.bf16.mxu1 %v26079_v28  ;;  %12671 = vmatpush1.bf16.msra.mxu0 %v18752_v29  ;;  %v26100_v28 = vld [vmem:[#allocation55_spill] sm:$0xff] }
 0x7d5   :  { %12672 = vmatprep.subr.bf16.mxu0 %v18760_v19 }
 0x7d7   :  { %11885 = vmatpush2.bf16.msra.mxu1 %v26080_v18  ;;  %v10370_v18 = vadd.f32 %v26100_v28, %v26099_v12  ;;  %v26112_v12 = vld [vmem:[#allocation61_spill] sm:$0xff] }
 0x7d8   :  { %11886 = vmatprep.subr.bf16.mxu1 %v26081_v54  ;;  %12673 = vmatpush1.bf16.msra.mxu0 %v18758_v59 }
 0x7d9   :  { %12674 = vmatprep.subr.bf16.mxu0 %v18766_v24  ;;  %v26110_v24 = vld [vmem:[#allocation62_spill] sm:$0xff] }
 0x7db   :  { %11887 = vmatpush2.bf16.msra.mxu1 %v26082_v23 }
 0x7dc   :  { %11888 = vmatprep.subr.bf16.mxu1 %v26085_v8  ;;  %12675 = vmatpush1.bf16.msra.mxu0 %v18764_v30  ;;  %v10411_v8 = vadd.f32 %v26102_v51, %v26101_v57 }
 0x7dd   :  { %12676 = vmatprep.subr.bf16.mxu0 %v18772_v40 }
 0x7df   :  { %11889 = vmatpush2.bf16.msra.mxu1 %v26086_v58 }
 0x7e0   :  { %12707 = vmatprep.subr.bf16.mxu1 %v18745_v16  ;;  %12677 = vmatpush1.bf16.msra.mxu0 %v18770_v26  ;;  %v26103_v16 = vld [vmem:[#allocation34_spill] sm:$0xff] }
 0x7e1   :  { %12678 = vmatprep.subr.bf16.mxu0 %v18778_v47  ;;  %v10450_v14 = vadd.f32 %v26104_v46, %v26103_v16  ;;  %v18805_v16 = vld [vmem:[%s25818_s3 + $0xd84] ss:$52 sps:$4 sm:$0xff]   ;;  %v18808_v46 = vld [vmem:[%s25818_s3 + $0xd14] ss:$52 sps:$4 sm:$0xff]  }
 0x7e2   :  { %11891 = vmatmul.mubr.bf16.vlgmr.msra.gmra.mxu1 %v11811_v5 }
 0x7e3   :  { %12708 = vmatpush1.bf16.msra.mxu1 %v18743_v48  ;;  %v18799_v48 = vld [vmem:[%s25818_s3 + $0xdec] ss:$52 sps:$4 sm:$0xff]  }
 0x7e4   :  { %12709 = vmatprep.subr.bf16.mxu1 %v18751_v31  ;;  %12679 = vmatpush1.bf16.msra.mxu0 %v18776_v61  ;;  %v26106_v31 = vld [vmem:[#allocation60_spill] sm:$0xff] }
 0x7e7   :  { %12710 = vmatpush1.bf16.msra.mxu1 %v18749_v9  ;;  %v26105_v9 = vld [vmem:[#allocation3_spill] sm:$0xff] }
 0x7e8   :  { %12711 = vmatprep.subr.bf16.mxu1 %v18757_v6  ;;  %v10491_v29 = vadd.f32 %v26106_v31, %v26105_v9  ;;  %v26108_v6 = vld [vmem:[#allocation59_spill] sm:$0xff]  ;;  %v18809_v31 = vld [vmem:[%s25818_s3 + $0xd18] ss:$52 sps:$4 sm:$0xff]  }
 0x7e9   :  { %v18806_v9 = vld [vmem:[%s25818_s3 + $0xd10] ss:$52 sps:$4 sm:$0xff]  }
 0x7eb   :  { %12712 = vmatpush1.bf16.msra.mxu1 %v18755_v39  ;;  %v26107_v39 = vld [vmem:[#allocation7_spill] sm:$0xff] }
 0x7ec   :  { %12713 = vmatprep.subr.bf16.mxu1 %v18763_v20  ;;  %v10452_v19 = vadd.f32 %v26108_v6, %v26107_v39  ;;  %v18812_v39 = vld [vmem:[%s25818_s3 + $0xca8] ss:$52 sps:$4 sm:$0xff]   ;;  %v18815_v6 = vld [vmem:[%s25818_s3 + $0xcb0] ss:$52 sps:$4 sm:$0xff]  }
 0x7ef   :  { %12714 = vmatpush1.bf16.msra.mxu1 %v18761_v1  ;;  %v26109_v1 = vld [vmem:[#allocation30_spill] sm:$0xff] }
 0x7f0   :  { %12715 = vmatprep.subr.bf16.mxu1 %v18769_v32  ;;  %v10493_v32 = vadd.f32 %v26110_v24, %v26109_v1  ;;  %v18818_v1 = vld [vmem:[%s25818_s3 + $0xc40] ss:$52 sps:$4 sm:$0xff]   ;;  %v18821_v24 = vld [vmem:[%s25818_s3 + $0xc48] ss:$52 sps:$4 sm:$0xff]  }
 0x7f3   :  { %12716 = vmatpush1.bf16.msra.mxu1 %v18767_v33 }
 0x7f4   :  { %12717 = vmatprep.subr.bf16.mxu1 %v18775_v35 }
 0x7f6   :  { %v11486_v7 = vpop.f32.mrf.mxu1  ;;  %v11527_v4 = vpop.f32.mrf.mxu0 }
 0x7f7   :  { %v24985_v22 = vadd.f32 %v11486_v7, %v10286_v52  ;;  %v24987_v34 = vadd.f32 %v11527_v4, %v10327_v50  ;;  %12718 = vmatpush1.bf16.msra.mxu1 %v18773_v49 }
 0x7f8   :  { %v11488_v63 = vpop.f32.mrf.mxu1  ;;  %v11529_v11 = vpop.f32.mrf.mxu0  ;;  %12719 = vmatprep.subr.bf16.mxu1 %v18781_v13 }
 0x7f9   :  { %v24989_v10 = vadd.f32 %v11488_v63, %v10288_v55  ;;  %v24991_v41 = vadd.f32 %v11529_v11, %v10329_v43  ;;  %v18779_v55 = vld [vmem:[%s25818_s3 + $0xb68] ss:$52 sps:$4 sm:$0xff]   ;;  %v18787_v63 = vld [vmem:[%s25818_s3 + $0xb04] ss:$52 sps:$4 sm:$0xff]  }
 0x7fa   :  { %v11490_v37 = vpop.f32.mrf.mxu1  ;;  %v11531_v21 = vpop.f32.mrf.mxu0  ;;  %v18784_v43 = vld [vmem:[%s25818_s3 + $0xafc] ss:$52 sps:$4 sm:$0xff]   ;;  %v18782_v11 = vld [vmem:[%s25818_s3 + $0xaf8] ss:$52 sps:$4 sm:$0xff]  }
 0x7fb   :  { %12720 = vmatpush1.bf16.msra.mxu1 %v18779_v55  ;;  %v18785_v37 = vld [vmem:[%s25818_s3 + $0xb00] ss:$52 sps:$4 sm:$0xff]   ;;  %12680 = vmatprep.subr.bf16.mxu0 %v18784_v43  ;;  %v18790_v21 = vld [vmem:[%s25818_s3 + $0xe3c] ss:$52 sps:$4 sm:$0xff]  }
 0x7fc   :  { %v11491_v27 = vpop.f32.mrf.mxu1  ;;  %v11532_v60 = vpop.f32.mrf.mxu0  ;;  %12721 = vmatprep.subr.bf16.mxu1 %v18787_v63  ;;  %12681 = vmatpush1.bf16.msra.mxu0 %v18782_v11 }
 0x7fd   :  { %v18793_v27 = vld [vmem:[%s25818_s3 + $0xe44] ss:$52 sps:$4 sm:$0xff]   ;;  %12696 = vmatprep.subr.bf16.mxu0 %v18790_v21 }
 0x7fe   :  { %v18788_v60 = vld [vmem:[%s25818_s3 + $0xe38] ss:$52 sps:$4 sm:$0xff]  }
 0x7ff   :  { %12722 = vmatpush1.bf16.msra.mxu1 %v18785_v37  ;;  %v18794_v37 = vld [vmem:[%s25818_s3 + $0xde0] ss:$52 sps:$4 sm:$0xff]  }
 0x800   :  { %12737 = vmatprep.subr.bf16.mxu1 %v18793_v27  ;;  %12697 = vmatpush2.bf16.msra.mxu0 %v18788_v60  ;;  %v18797_v27 = vld [vmem:[%s25818_s3 + $0xde8] ss:$52 sps:$4 sm:$0xff]  }
 0x801   :  { %12748 = vmatprep.subr.bf16.mxu0 %v18796_v36  ;;  %v18800_v36 = vld [vmem:[%s25818_s3 + $0xd78] ss:$52 sps:$4 sm:$0xff]  }
 0x803   :  { %12738 = vmatpush2.bf16.msra.mxu1 %v18791_v3  ;;  %v18802_v3 = vld [vmem:[%s25818_s3 + $0xd7c] ss:$52 sps:$4 sm:$0xff]  }
 0x804   :  { %12789 = vmatprep.subr.bf16.mxu1 %v18799_v48  ;;  %v18803_v48 = vld [vmem:[%s25818_s3 + $0xd80] ss:$52 sps:$4 sm:$0xff]  }
 0x81a   :  { %v11568_v54 = vpop.f32.mrf.mxu1  ;;  %v11609_v23 = vpop.f32.mrf.mxu0 }
 0x81b   :  { %v25070_v58 = vadd.f32 %v11568_v54, %v10368_v44  ;;  %v25072_v5 = vadd.f32 %v11609_v23, %v10409_v42  ;;  %v26111_v42 = vld [vmem:[#allocation49_spill] sm:$0xff] }
 0x81c   :  { %v11570_v52 = vpop.f32.mrf.mxu1  ;;  %v11611_v17 = vpop.f32.mrf.mxu0  ;;  %v10532_v28 = vadd.f32 %v26112_v12, %v26111_v42  ;;  %v18833_v42 = vld [vmem:[%s25818_s3 + $0xb78] ss:$52 sps:$4 sm:$0xff]  }
 0x81d   :  { %v25083_v50 = vadd.f32 %v11570_v52, %v10370_v18  ;;  %v25085_v7 = vadd.f32 %v11611_v17, %v10411_v8  ;;  %v18838_v12 = vld [vmem:[%s25818_s3 + $0xb0c] ss:$52 sps:$4 sm:$0xff]  }
 0x81e   :  { %v11572_v4 = vpop.f32.mrf.mxu1  ;;  %v11613_v56 = vpop.f32.mrf.mxu0 }
 0x820   :  { %v11573_v0 = vpop.f32.mrf.mxu1  ;;  %v11614_v38 = vpop.f32.mrf.mxu0 }
 0x83e   :  { %v11650_v53 = vpop.f32.mrf.mxu1 }
 0x83f   :  { %v25129_v59 = vadd.f32 %v11650_v53, %v10450_v14  ;;  %v11691_v20 = vpop.f32.mrf.mxu0  ;;  %v18811_v14 = vld [vmem:[%s25818_s3 + $0xd1c] ss:$52 sps:$4 sm:$0xff]   ;;  %v18817_v53 = vld [vmem:[%s25818_s3 + $0xcb4] ss:$52 sps:$4 sm:$0xff]  }
 0x840   :  { %v25133_v30 = vadd.f32 %v11691_v20, %v10491_v29  ;;  %v11652_v33 = vpop.f32.mrf.mxu1  ;;  %v18814_v29 = vld [vmem:[%s25818_s3 + $0xcac] ss:$52 sps:$4 sm:$0xff]  }
 0x841   :  { %v25135_v40 = vadd.f32 %v11652_v33, %v10452_v19  ;;  %v11693_v35 = vpop.f32.mrf.mxu0  ;;  %v18820_v19 = vld [vmem:[%s25818_s3 + $0xc44] ss:$52 sps:$4 sm:$0xff]   ;;  %v18823_v20 = vld [vmem:[%s25818_s3 + $0xc4c] ss:$52 sps:$4 sm:$0xff]  }
 0x842   :  { %v25137_v45 = vadd.f32 %v11693_v35, %v10493_v32  ;;  %v11654_v25 = vpop.f32.mrf.mxu1  ;;  %v18826_v32 = vld [vmem:[%s25818_s3 + $0xbdc] ss:$52 sps:$4 sm:$0xff]   ;;  %v18829_v33 = vld [vmem:[%s25818_s3 + $0xbe4] ss:$52 sps:$4 sm:$0xff]  }
 0x843   :  { %v11695_v44 = vpop.f32.mrf.mxu0  ;;  %v18824_v35 = vld [vmem:[%s25818_s3 + $0xbd8] ss:$52 sps:$4 sm:$0xff]   ;;  %v18827_v25 = vld [vmem:[%s25818_s3 + $0xbe0] ss:$52 sps:$4 sm:$0xff]  }
 0x844   :  { %v11655_v2 = vpop.f32.mrf.mxu1  ;;  %v18832_v44 = vld [vmem:[%s25818_s3 + $0xb74] ss:$52 sps:$4 sm:$0xff]  }
 0x845   :  { %v11696_v15 = vpop.f32.mrf.mxu0  ;;  %v18835_v2 = vld [vmem:[%s25818_s3 + $0xb7c] ss:$52 sps:$4 sm:$0xff]  }
 0x846   :  { %v18830_v15 = vld [vmem:[%s25818_s3 + $0xb70] ss:$52 sps:$4 sm:$0xff]  }
 0x862   :  { %v11732_v18 = vpop.f32.mrf.mxu1 }
 0x863   :  { %v25141_v54 = vadd.f32 %v11732_v18, %v10532_v28  ;;  %v18841_v28 = vld [vmem:[%s25818_s3 + $0xb14] ss:$52 sps:$4 sm:$0xff]  }
 0x864   :  { %v11734_v23 = vpop.f32.mrf.mxu1  ;;  %v18836_v18 = vld [vmem:[%s25818_s3 + $0xb08] ss:$52 sps:$4 sm:$0xff]  }
 0x865   :  { %v18839_v23 = vld [vmem:[%s25818_s3 + $0xb10] ss:$52 sps:$4 sm:$0xff]  }
 0x866   :  { %v11735_v26 = vpop.f32.mrf.mxu1 }
 0x867   :  { %v18844_v26 = vld [vmem:[%s25818_s3 + $0xe4c] ss:$52 sps:$4 sm:$0xff]  }
 0x868   :  { %v11736_v57 = vpop.f32.mrf.mxu1 }
 0x869   :  { %v18847_v57 = vld [vmem:[%s25818_s3 + $0xe54] ss:$52 sps:$4 sm:$0xff]  }
 0x87f   :  { %v11851_v51 = vpop.f32.mrf.mxu0 }
 0x881   :  { %v11853_v8 = vpop.f32.mrf.mxu0 }
 0x883   :  { %v11855_v49 = vpop.f32.mrf.mxu0 }
 0x884   :  { %v18850_v49 = vld [vmem:[%s25818_s3 + $0xdf4] ss:$52 sps:$4 sm:$0xff]  }
 0x885   :  { %v11856_v47 = vpop.f32.mrf.mxu0 }
 0x886   :  { %v18853_v47 = vld [vmem:[%s25818_s3 + $0xdfc] ss:$52 sps:$4 sm:$0xff]  }
 0x88b   :  { %v11933_v52 = vpop.f32.mrf.mxu0 }
 0x88d   :  { %v11935_v17 = vpop.f32.mrf.mxu0 }
 0x88f   :  { %v11937_v13 = vpop.f32.mrf.mxu0 }
 0x890   :  { %v18856_v13 = vld [vmem:[%s25818_s3 + $0xd8c] ss:$52 sps:$4 sm:$0xff]  }
 0x891   :  { %v11938_v4 = vpop.f32.mrf.mxu0 }
 0x892   :  { %v18859_v4 = vld [vmem:[%s25818_s3 + $0xd94] ss:$52 sps:$4 sm:$0xff]  }
 0x8a2   :  { %v11892_v56 = vpop.f32.mrf.mxu1 }
 0x8a3   :  { %v11893_v61 = vadd.f32 %v11892_v56, %v11851_v51  ;;  %v18842_v51 = vld [vmem:[%s25818_s3 + $0xe48] ss:$52 sps:$4 sm:$0xff]  }
 0x8a4   :  { %v11894_v55 = vpop.f32.mrf.mxu1  ;;  %v18854_v56 = vld [vmem:[%s25818_s3 + $0xd88] ss:$52 sps:$4 sm:$0xff]  }
 0x8a5   :  { %v11895_v0 = vadd.f32 %v11894_v55, %v11853_v8  ;;  %v11934_v38 = vadd.f32 %v11933_v52, %v11893_v61  ;;  %v18845_v8 = vld [vmem:[%s25818_s3 + $0xe50] ss:$52 sps:$4 sm:$0xff]  }
 0x8a6   :  { %v11896_v43 = vpop.f32.mrf.mxu1  ;;  %v18848_v52 = vld [vmem:[%s25818_s3 + $0xdf0] ss:$52 sps:$4 sm:$0xff]  }
 0x8a7   :  { %v11936_v63 = vadd.f32 %v11935_v17, %v11895_v0  ;;  %v25151_v60 = vpack.c.bf16 %v11934_v38, %v11934_v38  ;;  %v18851_v17 = vld [vmem:[%s25818_s3 + $0xdf8] ss:$52 sps:$4 sm:$0xff]   ;;  %v18857_v61 = vld [vmem:[%s25818_s3 + $0xd90] ss:$52 sps:$4 sm:$0xff]   ;;  %v18860_v38 = vld [vmem:[%s25818_s3 + $0xd20] ss:$52 sps:$4 sm:$0xff]  }
 0x8a8   :  { %v11897_v11 = vpop.f32.mrf.mxu1  ;;  %v18862_v55 = vld [vmem:[%s25818_s3 + $0xd24] ss:$52 sps:$4 sm:$0xff]   ;;  %v18865_v0 = vld [vmem:[%s25818_s3 + $0xd2c] ss:$52 sps:$4 sm:$0xff]   ;;  %v18863_v43 = vld [vmem:[%s25818_s3 + $0xd28] ss:$52 sps:$4 sm:$0xff]  }
 0x8a9   :  { %v25146_v21 = vpack.c.bf16 %v11936_v63, %v11936_v63  ;;  %v18868_v63 = vld [vmem:[%s25818_s3 + $0xcbc] ss:$52 sps:$4 sm:$0xff]   ;;  %v18871_v11 = vld [vmem:[%s25818_s3 + $0xcc4] ss:$52 sps:$4 sm:$0xff]  }
 0x8ab   :  { %16247 = vmatprep.mubr.msk.bf16.mxu0 %vm9364_vm5, %v25146_v21  ;;  %16248 = vmatprep.mubr.msk.bf16.mxu1 %vm9364_vm5, %v25146_v21 }
 0x8ac   :  { %12699 = vmatmul.mubr.bf16.vlgmr.msra.gmra.mxu0 %v25151_v60  ;;  %12740 = vmatmul.mubr.bf16.vlgmr.msra.gmra.mxu1 %v25151_v60 }
 0x8ad   :  { %12749 = vmatpush1.bf16.msra.mxu0 %v18794_v37  ;;  %12790 = vmatpush1.bf16.msra.mxu1 %v18797_v27  ;;  %v18866_v37 = vld [vmem:[%s25818_s3 + $0xcb8] ss:$52 sps:$4 sm:$0xff]   ;;  %v18869_v27 = vld [vmem:[%s25818_s3 + $0xcc0] ss:$52 sps:$4 sm:$0xff]  }
 0x8ae   :  { %16249 = vmatprep.mubr.msk.bf16.mxu0 %vm9364_vm5, %v25146_v21  ;;  %16250 = vmatprep.mubr.msk.bf16.mxu1 %vm9364_vm5, %v25146_v21 }
 0x8af   :  { %12750 = vmatprep.subr.bf16.mxu0 %v18802_v3  ;;  %12791 = vmatprep.subr.bf16.mxu1 %v18805_v16  ;;  %v18874_v3 = vld [vmem:[%s25818_s3 + $0xc54] ss:$52 sps:$4 sm:$0xff]   ;;  %v18875_v16 = vld [vmem:[%s25818_s3 + $0xc58] ss:$52 sps:$4 sm:$0xff]  }
 0x8b1   :  { %12751 = vmatpush1.bf16.msra.mxu0 %v18800_v36  ;;  %12792 = vmatpush1.bf16.msra.mxu1 %v18803_v48  ;;  %v18877_v36 = vld [vmem:[%s25818_s3 + $0xc5c] ss:$52 sps:$4 sm:$0xff]  }
 0x8b2   :  { %12752 = vmatprep.subr.bf16.mxu0 %v18808_v46  ;;  %12793 = vmatprep.subr.bf16.mxu1 %v18811_v14  ;;  %v18872_v48 = vld [vmem:[%s25818_s3 + $0xc50] ss:$52 sps:$4 sm:$0xff]   ;;  %v18880_v46 = vld [vmem:[%s25818_s3 + $0xbec] ss:$52 sps:$4 sm:$0xff]   ;;  %v18883_v14 = vld [vmem:[%s25818_s3 + $0xbf4] ss:$52 sps:$4 sm:$0xff]  }
 0x8b5   :  { %12753 = vmatpush1.bf16.msra.mxu0 %v18806_v9  ;;  %12794 = vmatpush1.bf16.msra.mxu1 %v18809_v31  ;;  %v18878_v9 = vld [vmem:[%s25818_s3 + $0xbe8] ss:$52 sps:$4 sm:$0xff]   ;;  %v18881_v31 = vld [vmem:[%s25818_s3 + $0xbf0] ss:$52 sps:$4 sm:$0xff]  }
 0x8b6   :  { %12754 = vmatprep.subr.bf16.mxu0 %v18814_v29  ;;  %12795 = vmatprep.subr.bf16.mxu1 %v18817_v53  ;;  %v18886_v29 = vld [vmem:[%s25818_s3 + $0xb84] ss:$52 sps:$4 sm:$0xff]   ;;  %v18889_v53 = vld [vmem:[%s25818_s3 + $0xb8c] ss:$52 sps:$4 sm:$0xff]  }
 0x8b9   :  { %12755 = vmatpush1.bf16.msra.mxu0 %v18812_v39  ;;  %12796 = vmatpush1.bf16.msra.mxu1 %v18815_v6  ;;  %v18884_v39 = vld [vmem:[%s25818_s3 + $0xb80] ss:$52 sps:$4 sm:$0xff]   ;;  %v18887_v6 = vld [vmem:[%s25818_s3 + $0xb88] ss:$52 sps:$4 sm:$0xff]  }
 0x8ba   :  { %12756 = vmatprep.subr.bf16.mxu0 %v18820_v19  ;;  %12797 = vmatprep.subr.bf16.mxu1 %v18823_v20  ;;  %v18892_v19 = vld [vmem:[%s25818_s3 + $0xb1c] ss:$52 sps:$4 sm:$0xff]   ;;  %v18895_v20 = vld [vmem:[%s25818_s3 + $0xb24] ss:$52 sps:$4 sm:$0xff]  }
 0x8bd   :  { %12757 = vmatpush1.bf16.msra.mxu0 %v18818_v1  ;;  %12798 = vmatpush1.bf16.msra.mxu1 %v18821_v24  ;;  %v18890_v1 = vld [vmem:[%s25818_s3 + $0xb18] ss:$52 sps:$4 sm:$0xff]   ;;  %v18893_v24 = vld [vmem:[%s25818_s3 + $0xb20] ss:$52 sps:$4 sm:$0xff]  }
 0x8be   :  { %12758 = vmatprep.subr.bf16.mxu0 %v18826_v32  ;;  %12799 = vmatprep.subr.bf16.mxu1 %v18829_v33  ;;  %v18898_v32 = vld [vmem:[%s25818_s3 + $0xe5c] ss:$52 sps:$4 sm:$0xff]   ;;  %v18901_v33 = vld [vmem:[%s25818_s3 + $0xe64] ss:$52 sps:$4 sm:$0xff]  }
 0x8c1   :  { %12759 = vmatpush1.bf16.msra.mxu0 %v18824_v35  ;;  %12800 = vmatpush1.bf16.msra.mxu1 %v18827_v25  ;;  %v18896_v35 = vld [vmem:[%s25818_s3 + $0xe58] ss:$52 sps:$4 sm:$0xff]   ;;  %v18899_v25 = vld [vmem:[%s25818_s3 + $0xe60] ss:$52 sps:$4 sm:$0xff]  }
 0x8c2   :  { %12760 = vmatprep.subr.bf16.mxu0 %v18832_v44  ;;  %12801 = vmatprep.subr.bf16.mxu1 %v18835_v2  ;;  %v18911_v44 = vld [vmem:[%s25819_s5 + $0x78] sm:$0xff]   ;;  %v18902_v2 = vld [vmem:[%s25818_s3 + $0xe00] ss:$52 sps:$4 sm:$0xff]  }
 0x8c5   :  { %12761 = vmatpush1.bf16.msra.mxu0 %v18830_v15  ;;  %12802 = vmatpush1.bf16.msra.mxu1 %v18833_v42  ;;  %v18913_v15 = vld [vmem:[%s25819_s5 + $0x38] sm:$0xff]   ;;  %v18915_v42 = vld [vmem:[%s25819_s5 + $0x70] sm:$0xff]  }
 0x8c6   :  { %12762 = vmatprep.subr.bf16.mxu0 %v18838_v12  ;;  %12803 = vmatprep.subr.bf16.mxu1 %v18841_v28  ;;  %v18903_v12 = vld [vmem:[%s25818_s3 + $0xd98] ss:$52 sps:$4 sm:$0xff]   ;;  %v18917_v28 = vld [vmem:[%s25819_s5 + $0x30] sm:$0xff]  }
 0x8c9   :  { %12763 = vmatpush1.bf16.msra.mxu0 %v18836_v18  ;;  %12804 = vmatpush1.bf16.msra.mxu1 %v18839_v23  ;;  %v18919_v18 = vld [vmem:[%s25819_s5 + $0x68] sm:$0xff]   ;;  %v18904_v23 = vld [vmem:[%s25818_s3 + $0xd30] ss:$52 sps:$4 sm:$0xff]  }
 0x8ca   :  { %12778 = vmatprep.subr.bf16.mxu0 %v18844_v26  ;;  %12819 = vmatprep.subr.bf16.mxu1 %v18847_v57  ;;  %v18923_v26 = vld [vmem:[%s25819_s5 + $0x60] sm:$0xff]   ;;  %v18905_v57 = vld [vmem:[%s25818_s3 + $0xcc8] ss:$52 sps:$4 sm:$0xff]  }
 0x8cd   :  { %12779 = vmatpush2.bf16.msra.mxu0 %v18842_v51  ;;  %12820 = vmatpush2.bf16.msra.mxu1 %v18845_v8  ;;  %v18925_v51 = vld [vmem:[%s25819_s5 + $0x20] sm:$0xff]   ;;  %v18927_v8 = vld [vmem:[%s25819_s5 + $0x58] sm:$0xff]  }
 0x8ce   :  { %12830 = vmatprep.subr.bf16.mxu0 %v18850_v49  ;;  %12871 = vmatprep.subr.bf16.mxu1 %v18853_v47  ;;  %v18906_v49 = vld [vmem:[%s25818_s3 + $0xc60] ss:$52 sps:$4 sm:$0xff]   ;;  %v18929_v47 = vld [vmem:[%s25819_s5 + $0x18] sm:$0xff]  }
 0x8d0   :  { %12781 = vmatmul.mubr.bf16.vlgmr.msra.gmra.mxu0 %v25151_v60  ;;  %12822 = vmatmul.mubr.bf16.vlgmr.msra.gmra.mxu1 %v25151_v60 }
 0x8d1   :  { %12831 = vmatpush1.bf16.msra.mxu0 %v18848_v52  ;;  %16251 = vmatprep.mubr.msk.bf16.mxu0 %vm9364_vm5, %v25146_v21  ;;  %v18931_v52 = vld [vmem:[%s25819_s5 + $0x50] sm:$0xff]  }
 0x8d2   :  { %12872 = vmatpush1.bf16.msra.mxu1 %v18851_v17  ;;  %16252 = vmatprep.mubr.msk.bf16.mxu1 %vm9364_vm5, %v25146_v21  ;;  %v18907_v17 = vld [vmem:[%s25818_s3 + $0xbf8] ss:$52 sps:$4 sm:$0xff]  }
 0x8d3   :  { %12832 = vmatprep.subr.bf16.mxu0 %v18856_v13  ;;  %12873 = vmatprep.subr.bf16.mxu1 %v18859_v4  ;;  %v18933_v13 = vld [vmem:[%s25819_s5 + $0x10] sm:$0xff]   ;;  %v18935_v4 = vld [vmem:[%s25819_s5 + $0x48] sm:$0xff]  }
 0x8d5   :  { %12833 = vmatpush1.bf16.msra.mxu0 %v18854_v56  ;;  %v18908_v56 = vld [vmem:[%s25818_s3 + $0xb90] ss:$52 sps:$4 sm:$0xff]  }
 0x8d6   :  { %12874 = vmatpush1.bf16.msra.mxu1 %v18857_v61  ;;  %12834 = vmatprep.subr.bf16.mxu0 %v18862_v55  ;;  %v18937_v61 = vld [vmem:[%s25819_s5 + $0x8] sm:$0xff]   ;;  %v18939_v55 = vld [vmem:[%s25819_s5 + $0x40] sm:$0xff]  }
 0x8d7   :  { %12875 = vmatprep.subr.bf16.mxu1 %v18865_v0  ;;  %v18909_v0 = vld [vmem:[%s25818_s3 + $0xb28] ss:$52 sps:$4 sm:$0xff]  }
 0x8d9   :  { %12835 = vmatpush1.bf16.msra.mxu0 %v18860_v38  ;;  %v18941_v38 = vld [vmem:[%s25819_s5] sm:$0xff]  }
 0x8da   :  { %12876 = vmatpush1.bf16.msra.mxu1 %v18863_v43  ;;  %12836 = vmatprep.subr.bf16.mxu0 %v18868_v63  ;;  %v18943_v43 = vld [vmem:[%s25819_s5 + $0x178] sm:$0xff]  }
 0x8db   :  { %12877 = vmatprep.subr.bf16.mxu1 %v18871_v11  ;;  %v18910_v63 = vld [vmem:[%s25818_s3 + $0xe68] ss:$52 sps:$4 sm:$0xff]  }
 0x8dc   :  { %v18912_v11 = vld [vmem:[%s25819_s5 + $0xf8] sm:$0xff]  }
 0x8dd   :  { %12837 = vmatpush1.bf16.msra.mxu0 %v18866_v37  ;;  %v18914_v37 = vld [vmem:[%s25819_s5 + $0xb8] sm:$0xff]  }
 0x8de   :  { %12878 = vmatpush1.bf16.msra.mxu1 %v18869_v27  ;;  %12838 = vmatprep.subr.bf16.mxu0 %v18874_v3  ;;  %v18916_v27 = vld [vmem:[%s25819_s5 + $0xf0] sm:$0xff]   ;;  %v18920_v3 = vld [vmem:[%s25819_s5 + $0xe8] sm:$0xff]  }
 0x8df   :  { %12879 = vmatprep.subr.bf16.mxu1 %v18877_v36  ;;  %v18922_v36 = vld [vmem:[%s25819_s5 + $0xa8] sm:$0xff]  }
 0x8e1   :  { %12839 = vmatpush1.bf16.msra.mxu0 %v18872_v48  ;;  %v18926_v48 = vld [vmem:[%s25819_s5 + $0xa0] sm:$0xff]  }
 0x8e2   :  { %12880 = vmatpush1.bf16.msra.mxu1 %v18875_v16  ;;  %12840 = vmatprep.subr.bf16.mxu0 %v18880_v46  ;;  %v18928_v16 = vld [vmem:[%s25819_s5 + $0xd8] sm:$0xff]  }
 0x8e3   :  { %12881 = vmatprep.subr.bf16.mxu1 %v18883_v14  ;;  %v18930_v46 = vld [vmem:[%s25819_s5 + $0x98] sm:$0xff]   ;;  %v18932_v14 = vld [vmem:[%s25819_s5 + $0xd0] sm:$0xff]  }
 0x8e5   :  { %12841 = vmatpush1.bf16.msra.mxu0 %v18878_v9  ;;  %v18934_v9 = vld [vmem:[%s25819_s5 + $0x90] sm:$0xff]  }
 0x8e6   :  { %12882 = vmatpush1.bf16.msra.mxu1 %v18881_v31  ;;  %12842 = vmatprep.subr.bf16.mxu0 %v18886_v29  ;;  %v18936_v31 = vld [vmem:[%s25819_s5 + $0xc8] sm:$0xff]  }
 0x8e7   :  { %12883 = vmatprep.subr.bf16.mxu1 %v18889_v53  ;;  %v18938_v29 = vld [vmem:[%s25819_s5 + $0x88] sm:$0xff]   ;;  %v18940_v53 = vld [vmem:[%s25819_s5 + $0xc0] sm:$0xff]  }
 0x8e9   :  { %12843 = vmatpush1.bf16.msra.mxu0 %v18884_v39  ;;  %v18942_v39 = vld [vmem:[%s25819_s5 + $0x80] sm:$0xff]  }
 0x8ea   :  { %12884 = vmatpush1.bf16.msra.mxu1 %v18887_v6  ;;  %12844 = vmatprep.subr.bf16.mxu0 %v18892_v19  ;;  %v18944_v6 = vld [vmem:[%s25819_s5 + $0x1f8] sm:$0xff]   ;;  %v12969_v19 = vlaneseq }
 0x8eb   :  { %12885 = vmatprep.subr.bf16.mxu1 %v18895_v20 }
 0x8ec   :  { %v25516_v20 = vshrl.u32 %v12969_v19, 7  ;;  %v18965_v19 = vld [vmem:[%s25819_s5 + $0x110] sm:$0xff]  }
 0x8ed   :  { %12845 = vmatpush1.bf16.msra.mxu0 %v18890_v1 }
 0x8ee   :  { %12886 = vmatpush1.bf16.msra.mxu1 %v18893_v24  ;;  %12860 = vmatprep.subr.bf16.mxu0 %v18898_v32  ;;  %v12971_v1 = vsub.s32 0, %v25516_v20  ;;  %v12979_v24 = vsub.s32 2, %v25516_v20  ;;  %v25523_v32 = vld [vmem:[%s25820_s4] sm:$0xff] }
 0x8ef   :  { %12901 = vmatprep.subr.bf16.mxu1 %v18901_v33  ;;  %v12975_v33 = vsub.s32 1, %v25516_v20 }
 0x8f1   :  { %12861 = vmatpush2.bf16.msra.mxu0 %v18896_v35  ;;  %v12983_v35 = vsub.s32 3, %v25516_v20 }
 0x8f2   :  { %12902 = vmatpush2.bf16.msra.mxu1 %v18899_v25  ;;  %12912 = vmatprep.subr.bf16.mxu0 %v25949_v62  ;;  %v12972_v25 = vrot.slane %v25523_v32, %v12971_v1 }
 0x8f3   :  { %16365 = vmatprep.subr.bf16.mxu1 %v18911_v44  ;;  %v12980_v44 = vrot.slane %v25523_v32, %v12979_v24 }
 0x8f4   :  { %12863 = vmatmul.mubr.bf16.vlgmr.msra.gmra.mxu0 %v25151_v60 }
 0x8f5   :  { %12904 = vmatmul.mubr.bf16.vlgmr.msra.gmra.mxu1 %v25151_v60  ;;  %12913 = vmatpush1.bf16.msra.mxu0 %v18902_v2 }
 0x8f6   :  { %16253 = vmatprep.mubr.msk.bf16.mxu0 %vm9364_vm5, %v25146_v21  ;;  %12914 = vmatprep.subr.bf16.mxu0 %v25949_v62  ;;  %v18921_v21 = vld [vmem:[%s25819_s5 + $0x28] sm:$0xff]  }
 0x8f7   :  { %16366 = vmatpush3.bf16.msra.mxu1 %v18913_v15 }
 0x8f8   :  { %16367 = vmatprep.subr.bf16.mxu1 %v18915_v42 }
 0x8f9   :  { %12915 = vmatpush1.bf16.msra.mxu0 %v18903_v12 }
 0x8fa   :  { %12916 = vmatprep.subr.bf16.mxu0 %v25949_v62 }
 0x8fb   :  { %16368 = vmatpush3.bf16.msra.mxu1 %v18917_v28  ;;  %v12976_v28 = vrot.slane %v25523_v32, %v12975_v33 }
 0x8fc   :  { %16369 = vmatprep.subr.bf16.mxu1 %v18919_v18  ;;  %v12984_v18 = vrot.slane %v25523_v32, %v12983_v35 }
 0x8fd   :  { %12917 = vmatpush1.bf16.msra.mxu0 %v18904_v23 }
 0x8fe   :  { %12918 = vmatprep.subr.bf16.mxu0 %v25949_v62 }
 0x8ff   :  { %16370 = vmatpush3.bf16.msra.mxu1 %v18921_v21 }
 0x900   :  { %16371 = vmatprep.subr.bf16.mxu1 %v18923_v26 }
 0x901   :  { %12919 = vmatpush1.bf16.msra.mxu0 %v18905_v57 }
 0x902   :  { %12920 = vmatprep.subr.bf16.mxu0 %v25949_v62 }
 0x903   :  { %16372 = vmatpush3.bf16.msra.mxu1 %v18925_v51 }
 0x904   :  { %16373 = vmatprep.subr.bf16.mxu1 %v18927_v8 }
 0x905   :  { %12921 = vmatpush1.bf16.msra.mxu0 %v18906_v49 }
 0x906   :  { %12922 = vmatprep.subr.bf16.mxu0 %v25949_v62 }
 0x907   :  { %16374 = vmatpush3.bf16.msra.mxu1 %v18929_v47 }
 0x908   :  { %16375 = vmatprep.subr.bf16.mxu1 %v18931_v52 }
 0x909   :  { %12923 = vmatpush1.bf16.msra.mxu0 %v18907_v17 }
 0x90a   :  { %12924 = vmatprep.subr.bf16.mxu0 %v25949_v62 }
 0x90b   :  { %16376 = vmatpush3.bf16.msra.mxu1 %v18933_v13 }
 0x90c   :  { %16377 = vmatprep.subr.bf16.mxu1 %v18935_v4 }
 0x90d   :  { %12925 = vmatpush1.bf16.msra.mxu0 %v18908_v56 }
 0x90e   :  { %12926 = vmatprep.subr.bf16.mxu0 %v25949_v62 }
 0x90f   :  { %16378 = vmatpush3.bf16.msra.mxu1 %v18937_v61 }
 0x910   :  { %16379 = vmatprep.subr.bf16.mxu1 %v18939_v55 }
 0x911   :  { %12927 = vmatpush1.bf16.msra.mxu0 %v18909_v0 }
 0x912   :  { %12942 = vmatprep.subr.bf16.mxu0 %v25949_v62  ;;  %v18918_v62 = vld [vmem:[%s25819_s5 + $0xb0] sm:$0xff]  }
 0x913   :  { %16380 = vmatpush3.bf16.msra.mxu1 %v18941_v38  ;;  %v18945_v38 = vld [vmem:[%s25819_s5 + $0x138] sm:$0xff]  }
 0x914   :  { %16409 = vmatprep.subr.bf16.mxu1 %v18943_v43 }
 0x915   :  { %12943 = vmatpush2.bf16.msra.mxu0 %v18910_v63  ;;  %v18947_v63 = vld [vmem:[%s25819_s5 + $0x170] sm:$0xff]  }
 0x916   :  { %16387 = vmatprep.subr.bf16.mxu0 %v18912_v11  ;;  %v18948_v11 = vld [vmem:[%s25819_s5 + $0x1f0] sm:$0xff]  }
 0x918   :  { %12945 = vmatmul.mubr.bf16.vlgmr.msra.gmra.mxu0 %v25151_v60  ;;  %v18924_v60 = vld [vmem:[%s25819_s5 + $0xe0] sm:$0xff]  }
 0x919   :  { %16388 = vmatpush3.bf16.msra.mxu0 %v18914_v37  ;;  %v18949_v37 = vld [vmem:[%s25819_s5 + $0x130] sm:$0xff]  }
 0x91a   :  { %16389 = vmatprep.subr.bf16.mxu0 %v18916_v27  ;;  %v18950_v27 = vld [vmem:[%s25819_s5 + $0x1b0] sm:$0xff]  }
 0x91d   :  { %16390 = vmatpush3.bf16.msra.mxu0 %v18918_v62  ;;  %v18951_v62 = vld [vmem:[%s25819_s5 + $0x168] sm:$0xff]  }
 0x91e   :  { %16391 = vmatprep.subr.bf16.mxu0 %v18920_v3  ;;  %v18952_v3 = vld [vmem:[%s25819_s5 + $0x1e8] sm:$0xff]  }
 0x921   :  { %16392 = vmatpush3.bf16.msra.mxu0 %v18922_v36  ;;  %v18953_v36 = vld [vmem:[%s25819_s5 + $0x128] sm:$0xff]  }
 0x922   :  { %16393 = vmatprep.subr.bf16.mxu0 %v18924_v60  ;;  %v18954_v60 = vld [vmem:[%s25819_s5 + $0x1a8] sm:$0xff]  }
 0x925   :  { %16394 = vmatpush3.bf16.msra.mxu0 %v18926_v48  ;;  %v18955_v48 = vld [vmem:[%s25819_s5 + $0x160] sm:$0xff]  }
 0x926   :  { %16395 = vmatprep.subr.bf16.mxu0 %v18928_v16  ;;  %v18956_v16 = vld [vmem:[%s25819_s5 + $0x1e0] sm:$0xff]  }
 0x929   :  { %16396 = vmatpush3.bf16.msra.mxu0 %v18930_v46  ;;  %v18957_v46 = vld [vmem:[%s25819_s5 + $0x120] sm:$0xff]  }
 0x92a   :  { %16397 = vmatprep.subr.bf16.mxu0 %v18932_v14  ;;  %v18958_v14 = vld [vmem:[%s25819_s5 + $0x1a0] sm:$0xff]  }
 0x92d   :  { %16398 = vmatpush3.bf16.msra.mxu0 %v18934_v9  ;;  %v18959_v9 = vld [vmem:[%s25819_s5 + $0x158] sm:$0xff]  }
 0x92e   :  { %16399 = vmatprep.subr.bf16.mxu0 %v18936_v31  ;;  %v18960_v31 = vld [vmem:[%s25819_s5 + $0x1d8] sm:$0xff]  }
 0x931   :  { %16400 = vmatpush3.bf16.msra.mxu0 %v18938_v29  ;;  %v18961_v29 = vld [vmem:[%s25819_s5 + $0x118] sm:$0xff]  }
 0x932   :  { %16401 = vmatprep.subr.bf16.mxu0 %v18940_v53  ;;  %v18962_v53 = vld [vmem:[%s25819_s5 + $0x198] sm:$0xff]  }
 0x935   :  { %16402 = vmatpush3.bf16.msra.mxu0 %v18942_v39  ;;  %v18963_v39 = vld [vmem:[%s25819_s5 + $0x150] sm:$0xff]  }
 0x936   :  { %16431 = vmatprep.subr.bf16.mxu0 %v18944_v6  ;;  %v18964_v6 = vld [vmem:[%s25819_s5 + $0x1d0] sm:$0xff]  }
 0x96c   :  { %v12700_v2 = vpop.f32.mrf.mxu0  ;;  %v12741_v15 = vpop.f32.mrf.mxu1 }
 0x96d   :  { %v12952_v42 = vadd.f32 %v12700_v2, %v24985_v22  ;;  %v12954_v12 = vadd.f32 %v12741_v15, %v24987_v34  ;;  %v18968_v2 = vld [vmem:[%s25819_s5 + $0x1c8] sm:$0xff]   ;;  %v12987_v15 = vsub.s32 4, %v25516_v20 }
 0x96e   :  { %v12702_v23 = vpop.f32.mrf.mxu0  ;;  %v12743_v21 = vpop.f32.mrf.mxu1 }
 0x96f   :  { %v13034_v26 = vadd.f32 %v12972_v25, %v12952_v42  ;;  %v13036_v57 = vadd.f32 %v12980_v44, %v12954_v12  ;;  %v12953_v51 = vadd.f32 %v12702_v23, %v24989_v10  ;;  %v12955_v8 = vadd.f32 %v12743_v21, %v24991_v41  ;;  %v18946_v10 = vld [vmem:[%s25819_s5 + $0x1b8] sm:$0xff]   ;;  %v18966_v25 = vld [vmem:[%s25819_s5 + $0x190] sm:$0xff]   ;;  %v18967_v44 = vld [vmem:[%s25819_s5 + $0x148] sm:$0xff]  }
 0x970   :  { %v12704_v49 = vpop.f32.mrf.mxu0  ;;  %v12745_v22 = vpop.f32.mrf.mxu1  ;;  %v12995_v42 = vsub.s32 6, %v25516_v20  ;;  %v12991_v12 = vsub.s32 5, %v25516_v20  ;;  %v18970_v23 = vld [vmem:[%s25819_s5 + $0x188] sm:$0xff]   ;;  %v18971_v21 = vld [vmem:[%s25819_s5 + $0x140] sm:$0xff]  }
 0x971   :  { %v13035_v47 = vadd.f32 %v12976_v28, %v12953_v51  ;;  %v13037_v34 = vadd.f32 %v12984_v18, %v12955_v8  ;;  %v13047_v52 = vmax.f32 %v13034_v26, 0.0  ;;  %v13049_v17 = vmax.f32 %v13036_v57, 0.0  ;;  %v18969_v18 = vld [vmem:[%s25819_s5 + $0x108] sm:$0xff]   ;;  %v18972_v26 = vld [vmem:[%s25819_s5 + $0x1c0] sm:$0xff]  }
 0x972   :  { %v12705_v13 = vpop.f32.mrf.mxu0  ;;  %v12746_v4 = vpop.f32.mrf.mxu1  ;;  %v12999_v28 = vsub.s32 7, %v25516_v20  ;;  %v12988_v57 = vrot.slane %v25523_v32, %v12987_v15  ;;  %v12996_v51 = vrot.slane %v25523_v32, %v12995_v42  ;;  %v12992_v22 = vrot.slane %v25523_v32, %v12991_v12  ;;  %v18991_v42 = vld [vmem:[%s25819_s5 + $0x258] sm:$0xff]   ;;  %v19012_v20 = vld [vmem:[%s25821_s7 + $0x30] sm:$0xff]  }
 0x973   :  { %v13048_v56 = vmax.f32 %v13035_v47, 0.0  ;;  %v13050_v61 = vmax.f32 %v13037_v34, 0.0  ;;  %v13060_v41 = vpack.c.bf16 %v13047_v52, %v13047_v52  ;;  %v13062_v43 = vpack.c.bf16 %v13049_v17, %v13049_v17  ;;  %v18973_v17 = vld [vmem:[%s25819_s5 + $0x100] sm:$0xff]   ;;  %v18992_v12 = vld [vmem:[%s25819_s5 + $0x2d8] sm:$0xff]  }
 0x974   :  { %v13000_v52 = vrot.slane %v25523_v32, %v12999_v28  ;;  %v18974_v13 = vld [vmem:[%s25819_s5 + $0x180] sm:$0xff]   ;;  %v18993_v28 = vld [vmem:[%s25819_s5 + $0x218] sm:$0xff]  }
 0x975   :  { %v13061_v55 = vpack.c.bf16 %v13048_v56, %v13048_v56  ;;  %v13063_v0 = vpack.c.bf16 %v13050_v61, %v13050_v61 }
 0x977   :  { %13916 = vmatprep.mubr.bf16.mxu1 %v13061_v55  ;;  %13956 = vmatprep.mubr.bf16.mxu0 %v13063_v0 }
 0x978   :  { %13917 = vmatmul.mubr.bf16.vlgmr.msra.gmra.mxu1 %v13060_v41  ;;  %13957 = vmatmul.mubr.bf16.vlgmr.msra.gmra.mxu0 %v13062_v43 }
 0x979   :  { %16410 = vmatpush3.bf16.msra.mxu1 %v18945_v38  ;;  %16432 = vmatpush3.bf16.msra.mxu0 %v18946_v10 }
 0x97a   :  { %16411 = vmatprep.subr.bf16.mxu1 %v18947_v63  ;;  %16433 = vmatprep.subr.bf16.mxu0 %v18948_v11 }
 0x97d   :  { %16412 = vmatpush3.bf16.msra.mxu1 %v18949_v37  ;;  %16434 = vmatpush3.bf16.msra.mxu0 %v18950_v27 }
 0x97e   :  { %16413 = vmatprep.subr.bf16.mxu1 %v18951_v62  ;;  %16435 = vmatprep.subr.bf16.mxu0 %v18952_v3 }
 0x981   :  { %16414 = vmatpush3.bf16.msra.mxu1 %v18953_v36  ;;  %16436 = vmatpush3.bf16.msra.mxu0 %v18954_v60 }
 0x982   :  { %16415 = vmatprep.subr.bf16.mxu1 %v18955_v48  ;;  %16437 = vmatprep.subr.bf16.mxu0 %v18956_v16 }
 0x985   :  { %16416 = vmatpush3.bf16.msra.mxu1 %v18957_v46  ;;  %16438 = vmatpush3.bf16.msra.mxu0 %v18958_v14  ;;  %v18979_v46 = vld [vmem:[%s25819_s5 + $0x270] sm:$0xff]  }
 0x986   :  { %16417 = vmatprep.subr.bf16.mxu1 %v18959_v9  ;;  %16439 = vmatprep.subr.bf16.mxu0 %v18960_v31  ;;  %v18980_v14 = vld [vmem:[%s25819_s5 + $0x2f0] sm:$0xff]  }
 0x987   :  { %v18981_v9 = vld [vmem:[%s25819_s5 + $0x230] sm:$0xff]  }
 0x988   :  { %v18982_v31 = vld [vmem:[%s25819_s5 + $0x2b0] sm:$0xff]  }
 0x989   :  { %16418 = vmatpush3.bf16.msra.mxu1 %v18961_v29  ;;  %16440 = vmatpush3.bf16.msra.mxu0 %v18962_v53  ;;  %v18983_v29 = vld [vmem:[%s25819_s5 + $0x268] sm:$0xff]  }
 0x98a   :  { %16419 = vmatprep.subr.bf16.mxu1 %v18963_v39  ;;  %16441 = vmatprep.subr.bf16.mxu0 %v18964_v6  ;;  %v18984_v53 = vld [vmem:[%s25819_s5 + $0x2e8] sm:$0xff]  }
 0x98b   :  { %v18985_v39 = vld [vmem:[%s25819_s5 + $0x228] sm:$0xff]  }
 0x98c   :  { %v18986_v6 = vld [vmem:[%s25819_s5 + $0x2a8] sm:$0xff]  }
 0x98d   :  { %16420 = vmatpush3.bf16.msra.mxu1 %v18965_v19  ;;  %16442 = vmatpush3.bf16.msra.mxu0 %v18966_v25  ;;  %v18987_v19 = vld [vmem:[%s25819_s5 + $0x260] sm:$0xff]  }
 0x98e   :  { %16421 = vmatprep.subr.bf16.mxu1 %v18967_v44  ;;  %16443 = vmatprep.subr.bf16.mxu0 %v18968_v2  ;;  %v18988_v25 = vld [vmem:[%s25819_s5 + $0x2e0] sm:$0xff]  }
 0x98f   :  { %v18989_v44 = vld [vmem:[%s25819_s5 + $0x220] sm:$0xff]  }
 0x990   :  { %v12782_v8 = vpop.f32.mrf.mxu0  ;;  %v12823_v49 = vpop.f32.mrf.mxu1  ;;  %v18990_v2 = vld [vmem:[%s25819_s5 + $0x2a0] sm:$0xff]  }
 0x991   :  { %v12956_v47 = vadd.f32 %v12782_v8, %v25070_v58  ;;  %v12958_v34 = vadd.f32 %v12823_v49, %v25072_v5  ;;  %16422 = vmatpush3.bf16.msra.mxu1 %v18969_v18  ;;  %16444 = vmatpush3.bf16.msra.mxu0 %v18970_v23  ;;  %v18975_v58 = vld [vmem:[%s25819_s5 + $0x278] sm:$0xff]   ;;  %v18995_v23 = vld [vmem:[%s25819_s5 + $0x250] sm:$0xff]   ;;  %v19000_v8 = vld [vmem:[%s25819_s5 + $0x2c8] sm:$0xff]  }
 0x992   :  { %v12784_v4 = vpop.f32.mrf.mxu0  ;;  %v12825_v56 = vpop.f32.mrf.mxu1  ;;  %16423 = vmatprep.subr.bf16.mxu1 %v18971_v21  ;;  %16445 = vmatprep.subr.bf16.mxu0 %v18972_v26  ;;  %v18976_v5 = vld [vmem:[%s25819_s5 + $0x2f8] sm:$0xff]   ;;  %v18996_v21 = vld [vmem:[%s25819_s5 + $0x2d0] sm:$0xff]   ;;  %v25728_v49 = vld [vmem:[%s25820_s4 + $0x8] sm:$0x1f] }
 0x993   :  { %v13038_v32 = vadd.f32 %v12988_v57, %v12956_v47  ;;  %v13040_v61 = vadd.f32 %v12996_v51, %v12958_v34  ;;  %v12957_v55 = vadd.f32 %v12784_v4, %v25083_v50  ;;  %v12959_v0 = vadd.f32 %v12825_v56, %v25085_v7  ;;  %v18977_v50 = vld [vmem:[%s25819_s5 + $0x238] sm:$0xff]   ;;  %v18997_v26 = vld [vmem:[%s25819_s5 + $0x210] sm:$0xff]   ;;  %v18999_v51 = vld [vmem:[%s25819_s5 + $0x248] sm:$0xff]  }
 0x994   :  { %v12786_v38 = vpop.f32.mrf.mxu0  ;;  %v12827_v10 = vpop.f32.mrf.mxu1  ;;  %v18978_v7 = vld [vmem:[%s25819_s5 + $0x2b8] sm:$0xff]   ;;  %v18998_v57 = vld [vmem:[%s25819_s5 + $0x290] sm:$0xff]   ;;  %v19002_v47 = vld [vmem:[%s25819_s5 + $0x288] sm:$0xff]   ;;  %v13012_v4 = vrot.slane %v25728_v49, %v12979_v24 }
 0x995   :  { %v13039_v41 = vadd.f32 %v12992_v22, %v12957_v55  ;;  %v13041_v43 = vadd.f32 %v13000_v52, %v12959_v0  ;;  %16424 = vmatpush3.bf16.msra.mxu1 %v18973_v17  ;;  %16446 = vmatpush3.bf16.msra.mxu0 %v18974_v13  ;;  %v13051_v63 = vmax.f32 %v13038_v32, 0.0  ;;  %v13053_v11 = vmax.f32 %v13040_v61, 0.0  ;;  %v18994_v18 = vld [vmem:[%s25819_s5 + $0x298] sm:$0xff]   ;;  %v19001_v22 = vld [vmem:[%s25819_s5 + $0x208] sm:$0xff]   ;;  %v19003_v34 = vld [vmem:[%s25819_s5 + $0x240] sm:$0xff]  }
 0x996   :  { %v12787_v37 = vpop.f32.mrf.mxu0  ;;  %v12828_v27 = vpop.f32.mrf.mxu1  ;;  %16453 = vmatprep.subr.bf16.mxu1 %v18975_v58  ;;  %16475 = vmatprep.subr.bf16.mxu0 %v18976_v5  ;;  %v19004_v52 = vld [vmem:[%s25819_s5 + $0x2c0] sm:$0xff]   ;;  %v13004_v17 = vrot.slane %v25728_v49, %v12971_v1  ;;  %v13008_v5 = vrot.slane %v25728_v49, %v12975_v33 }
 0x997   :  { %v13052_v62 = vmax.f32 %v13039_v41, 0.0  ;;  %v13054_v3 = vmax.f32 %v13041_v43, 0.0  ;;  %v13064_v48 = vpack.c.bf16 %v13051_v63, %v13051_v63  ;;  %v13066_v16 = vpack.c.bf16 %v13053_v11, %v13053_v11  ;;  %v19005_v32 = vld [vmem:[%s25819_s5 + $0x200] sm:$0xff]  }
 0x998   :  { %v19006_v1 = vld [vmem:[%s25819_s5 + $0x280] sm:$0xff]   ;;  %v19094_v27 = vmov 0.0  }
 0x999   :  { %v13065_v36 = vpack.c.bf16 %v13052_v62, %v13052_v62  ;;  %v13067_v60 = vpack.c.bf16 %v13054_v3, %v13054_v3 }
 0x99b   :  { %13996 = vmatprep.mubr.bf16.mxu1 %v13065_v36  ;;  %14036 = vmatprep.mubr.bf16.mxu0 %v13067_v60 }
 0x99c   :  { %13997 = vmatmul.mubr.bf16.vlgmr.msra.gmra.mxu1 %v13064_v48  ;;  %14037 = vmatmul.mubr.bf16.vlgmr.msra.gmra.mxu0 %v13066_v16  ;;  %v19008_v48 = vld [vmem:[%s25819_s5 + $0x310] sm:$0xff]   ;;  %v19009_v16 = vld [vmem:[%s25819_s5 + $0x308] sm:$0xff]  }
 0x99d   :  { %16454 = vmatpush3.bf16.msra.mxu1 %v18977_v50  ;;  %16476 = vmatpush3.bf16.msra.mxu0 %v18978_v7 }
 0x99e   :  { %16455 = vmatprep.subr.bf16.mxu1 %v18979_v46  ;;  %16477 = vmatprep.subr.bf16.mxu0 %v18980_v14  ;;  %v19010_v46 = vld [vmem:[%s25819_s5 + $0x300] sm:$0xff]   ;;  %v13020_v14 = vrot.slane %v25728_v49, %v12987_v15 }
 0x99f   :  { %v19014_v15 = vld [vmem:[%s25821_s7 + $0x20] sm:$0xff]  }
 0x9a1   :  { %16456 = vmatpush3.bf16.msra.mxu1 %v18981_v9  ;;  %16478 = vmatpush3.bf16.msra.mxu0 %v18982_v31 }
 0x9a2   :  { %16457 = vmatprep.subr.bf16.mxu1 %v18983_v29  ;;  %16479 = vmatprep.subr.bf16.mxu0 %v18984_v53 }
 0x9a5   :  { %16458 = vmatpush3.bf16.msra.mxu1 %v18985_v39  ;;  %16480 = vmatpush3.bf16.msra.mxu0 %v18986_v6 }
 0x9a6   :  { %16459 = vmatprep.subr.bf16.mxu1 %v18987_v19  ;;  %16481 = vmatprep.subr.bf16.mxu0 %v18988_v25 }
 0x9a9   :  { %16460 = vmatpush3.bf16.msra.mxu1 %v18989_v44  ;;  %16482 = vmatpush3.bf16.msra.mxu0 %v18990_v2  ;;  %v19011_v44 = vld [vmem:[%s25821_s7 + $0x38] sm:$0xff]  }
 0x9aa   :  { %16461 = vmatprep.subr.bf16.mxu1 %v18991_v42  ;;  %16483 = vmatprep.subr.bf16.mxu0 %v18992_v12  ;;  %v19015_v2 = vld [vmem:[%s25821_s7 + $0x18] sm:$0xff]   ;;  %v19016_v42 = vld [vmem:[%s25821_s7 + $0x10] sm:$0xff]   ;;  %v19017_v12 = vld [vmem:[%s25821_s7 + $0x8] sm:$0xff]  }
 0x9ad   :  { %16462 = vmatpush3.bf16.msra.mxu1 %v18993_v28  ;;  %16484 = vmatpush3.bf16.msra.mxu0 %v18994_v18  ;;  %v19018_v28 = vld [vmem:[%s25821_s7] sm:$0xff]  }
 0x9ae   :  { %16463 = vmatprep.subr.bf16.mxu1 %v18995_v23  ;;  %16485 = vmatprep.subr.bf16.mxu0 %v18996_v21  ;;  %v16254_v21 = vld [vmem:[%s25822_s6] ss:$0 sm:$0xff] }
 0x9b1   :  { %16464 = vmatpush3.bf16.msra.mxu1 %v18997_v26  ;;  %16486 = vmatpush3.bf16.msra.mxu0 %v18998_v57 }
 0x9b2   :  { %16465 = vmatprep.subr.bf16.mxu1 %v18999_v51  ;;  %16487 = vmatprep.subr.bf16.mxu0 %v19000_v8 }
 0x9b4   :  { %v12864_v13 = vpop.f32.mrf.mxu0 }
 0x9b5   :  { %v12960_v56 = vadd.f32 %v12864_v13, %v25129_v59  ;;  %v12905_v58 = vpop.f32.mrf.mxu1  ;;  %16466 = vmatpush3.bf16.msra.mxu1 %v19001_v22  ;;  %16488 = vmatpush3.bf16.msra.mxu0 %v19002_v47  ;;  %v13016_v59 = vrot.slane %v25728_v49, %v12983_v35 }
 0x9b6   :  { %v12962_v61 = vadd.f32 %v12905_v58, %v25133_v30  ;;  %v12866_v24 = vpop.f32.mrf.mxu0  ;;  %16467 = vmatprep.subr.bf16.mxu1 %v19003_v34  ;;  %16489 = vmatprep.subr.bf16.mxu0 %v19004_v52 }
 0x9b7   :  { %v13042_v33 = vadd.f32 %v13004_v17, %v12960_v56  ;;  %v12961_v55 = vadd.f32 %v12866_v24, %v25135_v40  ;;  %v12907_v0 = vpop.f32.mrf.mxu1  ;;  %v19007_v40 = vld [vmem:[%s25819_s5 + $0x318] sm:$0xff]  }
 0x9b8   :  { %v13044_v38 = vadd.f32 %v13012_v4, %v12962_v61  ;;  %v12963_v10 = vadd.f32 %v12907_v0, %v25137_v45  ;;  %v12868_v41 = vpop.f32.mrf.mxu0 }
 0x9b9   :  { %v13043_v43 = vadd.f32 %v13008_v5, %v12961_v55  ;;  %v12909_v63 = vpop.f32.mrf.mxu1  ;;  %16468 = vmatpush3.bf16.msra.mxu1 %v19005_v32  ;;  %16490 = vmatpush3.bf16.msra.mxu0 %v19006_v1  ;;  %v13055_v30 = vmax.f32 %v13042_v33, 0.0 }
 0x9ba   :  { %v13045_v11 = vadd.f32 %v13016_v59, %v12963_v10  ;;  %v12869_v37 = vpop.f32.mrf.mxu0  ;;  %16511 = vmatprep.subr.bf16.mxu1 %v19094_v27  ;;  %v13057_v35 = vmax.f32 %v13044_v38, 0.0 }
 0x9bb   :  { %v13056_v62 = vmax.f32 %v13043_v43, 0.0  ;;  %v12910_v3 = vpop.f32.mrf.mxu1  ;;  %v13068_v45 = vpack.c.bf16 %v13055_v30, %v13055_v30 }
 0x9bc   :  { %v13058_v36 = vmax.f32 %v13045_v11, 0.0  ;;  %v13070_v7 = vpack.c.bf16 %v13057_v35, %v13057_v35 }
 0x9bd   :  { %v13069_v60 = vpack.c.bf16 %v13056_v62, %v13056_v62 }
 0x9be   :  { %v13071_v50 = vpack.c.bf16 %v13058_v36, %v13058_v36 }
 0x9bf   :  { %14076 = vmatprep.mubr.bf16.mxu1 %v13069_v60 }
 0x9c0   :  { %14116 = vmatprep.mubr.bf16.mxu0 %v13071_v50  ;;  %14077 = vmatmul.mubr.bf16.vlgmr.msra.gmra.mxu1 %v13068_v45 }
 0x9c1   :  { %14117 = vmatmul.mubr.bf16.vlgmr.msra.gmra.mxu0 %v13070_v7  ;;  %16512 = vmatpush3.bf16.msra.mxu1 %v19007_v40 }
 0x9c2   :  { %16513 = vmatprep.subr.bf16.mxu1 %v19094_v27  ;;  %16519 = vmatprep.mubr.msk.bf16.mxu1 %vm19095_vm6, %v19094_v27 }
 0x9c5   :  { %16514 = vmatpush3.bf16.msra.mxu1 %v19008_v48  ;;  %v16356_v48 = vld [vmem:[%s25823_s8] ss:$0 sm:$0xff] }
 0x9c6   :  { %16515 = vmatprep.subr.bf16.mxu1 %v19094_v27 }
 0x9c9   :  { %16516 = vmatpush3.bf16.msra.mxu1 %v19009_v16 }
 0x9ca   :  { %16517 = vmatprep.subr.bf16.mxu1 %v19094_v27 }
 0x9cd   :  { %16518 = vmatpush3.bf16.msra.mxu1 %v19010_v46 }
 0x9ce   :  { %16523 = vmatprep.subr.bf16.mxu1 %v19094_v27 }
 0x9d8   :  { %v12946_v9 = vpop.f32.mrf.mxu0 }
 0x9d9   :  { %v12964_v31 = vadd.f32 %v12946_v9, %v25141_v54  ;;  %v19013_v54 = vld [vmem:[%s25821_s7 + $0x28] sm:$0xff]  }
 0x9da   :  { %v12948_v29 = vpop.f32.mrf.mxu0 }
 0x9db   :  { %v13046_v53 = vadd.f32 %v13020_v14, %v12964_v31 }
 0x9dc   :  { %v12949_v39 = vpop.f32.mrf.mxu0 }
 0x9dd   :  { %v13059_v6 = vmax.f32 %v13046_v53, 0.0 }
 0x9de   :  { %v12950_v19 = vpop.f32.mrf.mxu0 }
 0x9df   :  { %v13072_v25 = vpack.c.bf16 %v13059_v6, %v13059_v6 }
 0x9e1   :  { %16520 = vmatmul.mubr.msk.bf16.vlgmr.msra.gmra.mxu1 %vm13880_vm7, %v13072_v25 }
 0x9e2   :  { %16539 = vmatprep.mubr.msk.bf16.mxu1 %vm19095_vm6, %v19094_v27  ;;  %16524 = vmatpush3.bf16.msra.mxu1 %v19011_v44 }
 0x9e3   :  { %16525 = vmatprep.subr.bf16.mxu1 %v19094_v27 }
 0x9e6   :  { %16526 = vmatpush3.bf16.msra.mxu1 %v19012_v20 }
 0x9e7   :  { %16527 = vmatprep.subr.bf16.mxu1 %v19094_v27 }
 0x9ea   :  { %16528 = vmatpush3.bf16.msra.mxu1 %v19013_v54 }
 0x9eb   :  { %16529 = vmatprep.subr.bf16.mxu1 %v19094_v27 }
 0x9ee   :  { %16530 = vmatpush3.bf16.msra.mxu1 %v19014_v15 }
 0x9ef   :  { %16531 = vmatprep.subr.bf16.mxu1 %v19094_v27 }
 0x9f2   :  { %16532 = vmatpush3.bf16.msra.mxu1 %v19015_v2 }
 0x9f3   :  { %16533 = vmatprep.subr.bf16.mxu1 %v19094_v27 }
 0x9f6   :  { %16534 = vmatpush3.bf16.msra.mxu1 %v19016_v42 }
 0x9f7   :  { %16535 = vmatprep.subr.bf16.mxu1 %v19094_v27 }
 0x9fa   :  { %16536 = vmatpush3.bf16.msra.mxu1 %v19017_v12 }
 0x9fb   :  { %16537 = vmatprep.subr.bf16.mxu1 %v19094_v27 }
 0x9fe   :  { %16538 = vmatpush3.bf16.msra.mxu1 %v19018_v28 }
 0xa38   :  { %v16381_v18 = vpop.f32.mrf.mxu1  ;;  %v16403_v23 = vpop.f32.mrf.mxu0 }
 0xa3a   :  { %v16382_v26 = vpop.f32.mrf.mxu1  ;;  %v16404_v57 = vpop.f32.mrf.mxu0 }
 0xa3b   :  { %v16383_v51 = vadd.f32 %v16382_v26, %v16381_v18  ;;  %v16405_v8 = vadd.f32 %v16404_v57, %v16403_v23 }
 0xa3c   :  { %v16384_v49 = vpop.f32.mrf.mxu1  ;;  %v16406_v22 = vpop.f32.mrf.mxu0 }
 0xa3d   :  { %v13919_v47 = vadd.f32 %v16383_v51, %v16254_v21 }
 0xa3e   :  { %v16385_v34 = vpop.f32.mrf.mxu1  ;;  %v16407_v52 = vpop.f32.mrf.mxu0 }
 0xa3f   :  { %v13959_v17 = vadd.f32 %v16405_v8, %v13919_v47 }
 0xa5c   :  { %v16425_v13 = vpop.f32.mrf.mxu1  ;;  %v16447_v4 = vpop.f32.mrf.mxu0 }
 0xa5e   :  { %v16426_v56 = vpop.f32.mrf.mxu1  ;;  %v16448_v58 = vpop.f32.mrf.mxu0 }
 0xa5f   :  { %v16427_v43 = vadd.f32 %v16426_v56, %v16425_v13  ;;  %v16449_v30 = vadd.f32 %v16448_v58, %v16447_v4 }
 0xa60   :  { %v16428_v5 = vpop.f32.mrf.mxu1  ;;  %v16450_v32 = vpop.f32.mrf.mxu0 }
 0xa61   :  { %v13999_v63 = vadd.f32 %v16427_v43, %v13959_v17 }
 0xa62   :  { %v16429_v1 = vpop.f32.mrf.mxu1  ;;  %v16451_v61 = vpop.f32.mrf.mxu0 }
 0xa63   :  { %v14039_v37 = vadd.f32 %v16449_v30, %v13999_v63 }
 0xa80   :  { %v16469_v24 = vpop.f32.mrf.mxu1 }
 0xa81   :  { %v16491_v59 = vpop.f32.mrf.mxu0 }
 0xa82   :  { %v16470_v33 = vpop.f32.mrf.mxu1 }
 0xa83   :  { %v16492_v55 = vpop.f32.mrf.mxu0  ;;  %v16471_v11 = vadd.f32 %v16470_v33, %v16469_v24 }
 0xa84   :  { %v16472_v0 = vpop.f32.mrf.mxu1  ;;  %v16493_v35 = vadd.f32 %v16492_v55, %v16491_v59 }
 0xa85   :  { %v16494_v38 = vpop.f32.mrf.mxu0  ;;  %v14079_v27 = vadd.f32 %v16471_v11, %v14039_v37 }
 0xa86   :  { %v16473_v10 = vpop.f32.mrf.mxu1 }
 0xa87   :  { %v16495_v41 = vpop.f32.mrf.mxu0  ;;  %v14119_v62 = vadd.f32 %v16493_v35, %v14079_v27 }
 0xaa1   :  { %v14158_v3 = vpop.f32.mrf.mxu1 }
 0xaa2   :  { %v14159_v36 = vadd.f32 %v14158_v3, %v14119_v62 }
 0xaa3   :  { %v16521_v60 = vpop.f32.mrf.mxu1 }
 0xaa4   :  { %v14164_v40 = vmax.f32 %v14159_v36, 0.0 }
 0xaa5   :  { %v14161_v45 = vpop.f32.mrf.mxu1 }
 0xaa6   :  { %v14165_v50 = vpack.c.bf16 %v14164_v40, %v14164_v40 }
 0xaa7   :  { %v16522_v7 = vpop.f32.mrf.mxu1 }
 0xaa8   :  { %16540 = vmatmul.mubr.bf16.vlgmr.msra.gmra.mxu1 %v14165_v50 }
 0xb68   :  { %v14271_v16 = vpop.f32.mrf.mxu1 }
 0xb69   :  { %v14272_v46 = vadd.f32 %v16356_v48, %v14271_v16 }
 0xb6a   :  { %v16541_v14 = vpop.f32.mrf.mxu1 }
 0xb6b   :  { %14277 = vmax.xlane.f32.xlu1 %v14272_v46 }
 0xb6c   :  { %v14274_v9 = vpop.f32.mrf.mxu1 }
 0xb6e   :  { %v16542_v31 = vpop.f32.mrf.mxu1 }
 0xbf4   :  { %v14278_v29 = vpop.xlane.xlu1 %14277 }
 0xbf5   :  { %v14279_v53 = vsub.f32 %v14272_v46, %v14278_v29 }
 0xbf7   :  { %v14280_v39 = vmul.f32 1.442695, %v14279_v53 }
 0xbf9   :  { %19019 = vpow2.f32 %v14280_v39 }
 0xc06   :  { %v19020_v6 = vpop.eup %19019 }
 0xc07   :  { %14282 = vadd.xlane.f32.xlu0 %v19020_v6 }
 0xc90   :  { %v14283_v19 = vpop.xlane.xlu0 %14282 }
 0xc91   :  { %19021 = vlog2.f32 %v14283_v19 }
 0xc9e   :  { %v19022_v25 = vpop.eup %19021 }
 0xc9f   :  { %v14285_v44 = vmul.f32 0.6931472, %v19022_v25 }
 0xca1   :  { %v14286_v20 = vsub.f32 %v14279_v53, %v14285_v44 }
 0xca3   :  { %14287 = vst [vmem:[%s25824_s9] sm:$0xff] %v14286_v20 }

</bundles_post_ra>
